<compile_context>
chip_gen: v6e
topology: v6e:2x2x1
jax: 0.10.0
libtpu: 0.0.40
codegen_flags: <defaults>
</compile_context>

<pallas_src>
import functools

import jax
import jax.numpy as jnp
from jax.experimental import pallas as pl
from jax.experimental.pallas import tpu as pltpu

BN_EPS = 1e-5
LANE = 128


def _round_up(x, m):
    return (x + m - 1) // m * m


# ------------------------------ fused kernel ------------------------------- #

def _identity_block_kernel(x_ref, w1_ref, g1_ref, b1_ref,
                           w2_ref, g2_ref, b2_ref, w3_ref,
                           gset_ref, bset_ref,
                           o_ref, xp_ref,
                           *, eps, channels_reset, mid_p, h, w):
    # x_ref:   (M, Cin_p)              bf16 lane-padded NHWC-flattened input
    # w1_ref:  (Cin_p, mid_p[+Cout_p]) bf16 fused conv1 (+ set_conv) 1x1 weight
    # w2_ref:  (9*mid_p, mid_p)        bf16 tap-major 3x3 conv2 weight
    # w3_ref:  (mid_p, Cout_p)         bf16 conv3 1x1 weight (no BN / no act)
    # g*/b*:   (1, C) f32 BN affine (padded lanes: gamma=1, beta=0)
    # o_ref:   (M, Cout_p) f32
    # xp_ref:  VMEM scratch (N, H+2, Wp, mid_p) f32 zero-halo padded conv1 out
    n = xp_ref.shape[0]
    wpad = xp_ref.shape[2]
    cm = mid_p
    m = n * h * w
    inv_m = 1.0 / m

    # MXU reduction helper: column sums via ones @ y (row 0 of the result).
    ones_rows = jnp.ones((8, m), jnp.float32)

    def bn(y, g_ref_, b_ref_):
        # Train-mode BN over M = N*H*W (biased variance), centered two-pass
        # form for numerical stability; reductions run on the MXU.
        mean = jnp.dot(ones_rows, y,
                       preferred_element_type=jnp.float32)[0:1] * inv_m
        c = y - mean
        var = jnp.dot(ones_rows, c * c,
                      preferred_element_type=jnp.float32)[0:1] * inv_m
        return c * jax.lax.rsqrt(var + eps) * g_ref_[...] + b_ref_[...]

    # ---- conv1 (1x1) [+ set_conv 1x1] as one fused GEMM --------------------
    y1r = jnp.dot(x_ref[...], w1_ref[...], preferred_element_type=jnp.float32)
    y1 = jnp.maximum(bn(y1r[:, :cm], g1_ref, b1_ref), 0.0)      # (M, mid_p) f32

    # ---- conv2: 3x3 (pad=1) + BN + ReLU via 9 accumulating tap GEMMs -------
    # Zero only the halo; the interior is overwritten by the store below.
    zrow = jnp.zeros((n, 1, wpad, cm), xp_ref.dtype)
    xp_ref[:, 0:1, :, :] = zrow
    xp_ref[:, h + 1:h + 2, :, :] = zrow
    zcol = jnp.zeros((n, h, 1, cm), xp_ref.dtype)
    xp_ref[:, 1:h + 1, 0:1, :] = zcol
    xp_ref[:, 1:h + 1, w + 1:w + 2, :] = zcol
    xp_ref[:, 1:h + 1, 1:w + 1, :] = y1.reshape(n, h, w, cm)

    xpv = xp_ref[...]
    acc = None
    for t in range(9):                                  # static 3x3 taps
        dy, dx = divmod(t, 3)
        tap = xpv[:, dy:dy + h, dx:dx + w, :].reshape(m, cm).astype(jnp.bfloat16)
        p = jnp.dot(tap, w2_ref[t * cm:(t + 1) * cm, :],
                    preferred_element_type=jnp.float32)
        acc = p if acc is None else acc + p
    y2 = jnp.maximum(bn(acc, g2_ref, b2_ref), 0.0)              # (M, mid_p) f32

    # ---- conv3: 1x1, no BN / no act ----------------------------------------
    y3 = jnp.dot(y2.astype(jnp.bfloat16), w3_ref[...],
                 preferred_element_type=jnp.float32)            # (M, Cout_p)

    # ---- residual branch ----------------------------------------------------
    if channels_reset:
        r = bn(y1r[:, cm:], gset_ref, bset_ref)   # set_conv: 1x1 + BN, no act
    else:
        r = x_ref[...].astype(jnp.float32)        # Cin == Cout (re-read here)

    # ---- add + final ReLU ----------------------------------------------------
    o_ref[...] = jnp.maximum(y3 + r, 0.0).astype(o_ref.dtype)


# ------------------------------ wrapper ------------------------------------ #

def identity_block(x_nchw, params, *, eps=BN_EPS):
    """Forward pass of IdentityBlock. Input/output are NCHW float32."""
    N, Cin, H, W = x_nchw.shape
    mid = Cin
    Cout = params["w3"].shape[1]
    channels_reset = Cin != Cout

    cin_p = _round_up(Cin, LANE)
    mid_p = _round_up(mid, LANE)
    cout_p = _round_up(Cout, LANE)
    M = N * H * W
    Wp = _round_up(W + 2, 8)          # sublane-aligned padded width

    # NCHW -> NHWC -> (M, Cin), lane-pad, cast bf16 for the MXU.
    # TODO(synk): accept NHWC directly at realistic shapes; these XLA
    # transpose/pad/slice passes are full HBM round trips outside the kernel.
    x2d = jnp.transpose(x_nchw, (0, 2, 3, 1)).reshape(M, Cin)
    x_p = jnp.pad(x2d.astype(jnp.float32),
                  ((0, 0), (0, cin_p - Cin))).astype(jnp.bfloat16)

    def pad_mat(wm, r, c):
        return jnp.pad(wm.astype(jnp.float32),
                       ((0, r - wm.shape[0]), (0, c - wm.shape[1])))

    def pad_gamma(v, c):
        return jnp.pad(v.astype(jnp.float32), (0, c - v.shape[0]),
                       constant_values=1.0).reshape(1, c)

    def pad_beta(v, c):
        return jnp.pad(v.astype(jnp.float32), (0, c - v.shape[0])).reshape(1, c)

    # conv1 (1x1), fused with set_conv along the output dim when Cin != Cout
    # so both GEMMs sharing x become one N = mid_p + cout_p matmul.
    w1 = pad_mat(params["w1"], cin_p, mid_p)
    if channels_reset:
        wset = pad_mat(params["w_set"], cin_p, cout_p)
        w1cat = jnp.concatenate([w1, wset], axis=1)
        gset = pad_gamma(params["g_set"], cout_p)
        bset = pad_beta(params["b_set"], cout_p)
    else:
        w1cat = w1
        gset = jnp.ones((1, cout_p), jnp.float32)
        bset = jnp.zeros((1, cout_p), jnp.float32)
    w1cat = w1cat.astype(jnp.bfloat16)
    g1 = pad_gamma(params["g1"], mid_p)
    b1 = pad_beta(params["b1"], mid_p)

    # conv2 (3x3), tap-major (9, Cin, Cout) -> (9*mid_p, mid_p).
    # (A real PyTorch Conv2d weight (Cout,Cin,3,3) maps here via
    #  permute(2,3,1,0).reshape(9, Cin, Cout).)
    w2 = jnp.pad(params["w2"].astype(jnp.float32),
                 ((0, 0), (0, mid_p - mid), (0, mid_p - mid)))
    w2 = w2.reshape(9 * mid_p, mid_p).astype(jnp.bfloat16)
    g2 = pad_gamma(params["g2"], mid_p)
    b2 = pad_beta(params["b2"], mid_p)

    # conv3 (1x1, no BN/act)
    w3 = pad_mat(params["w3"], mid_p, cout_p).astype(jnp.bfloat16)

    n1 = w1cat.shape[1]

    kernel = functools.partial(_identity_block_kernel, eps=eps,
                               channels_reset=channels_reset,
                               mid_p=mid_p, h=H, w=W)

    flops = 2 * M * (cin_p * n1 + 9 * mid_p * mid_p + mid_p * cout_p)
    bytes_acc = (2 * (M * cin_p + w1cat.size + w2.size + w3.size)
                 + 4 * (M * cout_p + 4 * mid_p + 2 * cout_p))

    def full(shape):
        return pl.BlockSpec(shape, lambda i, _s=shape: (0,) * len(_s))

    out_p = pl.pallas_call(
        kernel,
        out_shape=jax.ShapeDtypeStruct((M, cout_p), jnp.float32),
        grid=(1,),
        in_specs=[
            full((M, cin_p)),
            full((cin_p, n1)), full((1, mid_p)), full((1, mid_p)),
            full((9 * mid_p, mid_p)), full((1, mid_p)), full((1, mid_p)),
            full((mid_p, cout_p)),
            full((1, cout_p)), full((1, cout_p)),
        ],
        out_specs=full((M, cout_p)),
        scratch_shapes=[
            pltpu.VMEM((N, H + 2, Wp, mid_p), jnp.float32),   # zero-halo padded act
        ],
        compiler_params=pltpu.CompilerParams(
            vmem_limit_bytes=32 * 1024 * 1024),
        cost_estimate=pl.CostEstimate(flops=flops,
                                      transcendentals=3 * max(mid_p, cout_p),
                                      bytes_accessed=bytes_acc),
    )(x_p, w1cat, g1, b1, w2, g2, b2, w3, gset, bset)

    out = out_p[:, :Cout].reshape(N, H, W, Cout)
    return jnp.transpose(out, (0, 3, 1, 2)).astype(x_nchw.dtype)   # back NCHW


# ------------------------------ params ------------------------------------- #

def init_params(key, in_channels, out_channels):
    mid = in_channels
    ks = jax.random.split(key, 12)
    return {
        # set_conv (only used when in != out): weight (Cin, Cout), BN affine
        "w_set": jax.random.normal(ks[0], (in_channels, out_channels), jnp.float32) * 0.1,
        "g_set": jax.random.uniform(ks[1], (out_channels,), jnp.float32, 0.5, 1.5),
        "b_set": jax.random.normal(ks[2], (out_channels,), jnp.float32) * 0.1,
        # conv1: 1x1 (Cin -> mid)
        "w1": jax.random.normal(ks[3], (in_channels, mid), jnp.float32) * 0.1,
        "g1": jax.random.uniform(ks[4], (mid,), jnp.float32, 0.5, 1.5),
        "b1": jax.random.normal(ks[5], (mid,), jnp.float32) * 0.1,
        # conv2: 3x3 (mid -> mid), stored (9, Cin, Cout) tap-major
        "w2": jax.random.normal(ks[6], (9, mid, mid), jnp.float32) * 0.1,
        "g2": jax.random.uniform(ks[7], (mid,), jnp.float32, 0.5, 1.5),
        "b2": jax.random.normal(ks[8], (mid,), jnp.float32) * 0.1,
        # conv3: 1x1 (mid -> Cout), no BN / no act
        "w3": jax.random.normal(ks[9], (mid, out_channels), jnp.float32) * 0.1,
    }


if __name__ == "__main__":
    key = jax.random.PRNGKey(0)
    k_x, k_p = jax.random.split(key)

    N, IN_C, OUT_C, H, W = 2, 4, 8, 16, 16   # channels differ -> exercises set_conv
    x = jax.random.normal(k_x, (N, IN_C, H, W), jnp.float32)
    params = init_params(k_p, IN_C, OUT_C)

    fwd = jax.jit(identity_block)
    out = fwd(x, params)
    jax.block_until_ready(out)
    assert out.shape == (N, OUT_C, H, W)
    assert bool(jnp.all(out >= 0.0))         # final ReLU
    print("KERNEL_OK")
</pallas_src>

<mosaic_0001>
module attributes {stable_mosaic.version = 11 : i64} {
  func.func @_identity_block_kernel(%arg0: i32, %arg1: memref<512x128xbf16, #tpu.memory_space<vmem>>, %arg2: memref<128x256xbf16, #tpu.memory_space<vmem>>, %arg3: memref<1x128xf32, #tpu.memory_space<vmem>>, %arg4: memref<1x128xf32, #tpu.memory_space<vmem>>, %arg5: memref<1152x128xbf16, #tpu.memory_space<vmem>>, %arg6: memref<1x128xf32, #tpu.memory_space<vmem>>, %arg7: memref<1x128xf32, #tpu.memory_space<vmem>>, %arg8: memref<128x128xbf16, #tpu.memory_space<vmem>>, %arg9: memref<1x128xf32, #tpu.memory_space<vmem>>, %arg10: memref<1x128xf32, #tpu.memory_space<vmem>>, %arg11: memref<512x128xf32, #tpu.memory_space<vmem>>, %arg12: memref<2x18x24x128xf32, #tpu.memory_space<vmem>>) attributes {dimension_semantics = [#tpu.dimension_semantics<arbitrary>], iteration_bounds = array<i64: 1>, scalar_prefetch = 0 : i64, scratch_operands = 1 : i64, tpu.core_type = #tpu.core_type<tc>, window_params = [{pipeline_mode = #tpu.pipeline_mode<synchronous>, transform_indices = @transform_0, window_bounds = array<i64: 512, 128>}, {pipeline_mode = #tpu.pipeline_mode<synchronous>, transform_indices = @transform_1, window_bounds = array<i64: 128, 256>}, {pipeline_mode = #tpu.pipeline_mode<synchronous>, transform_indices = @transform_2, window_bounds = array<i64: 1, 128>}, {pipeline_mode = #tpu.pipeline_mode<synchronous>, transform_indices = @transform_3, window_bounds = array<i64: 1, 128>}, {pipeline_mode = #tpu.pipeline_mode<synchronous>, transform_indices = @transform_4, window_bounds = array<i64: 1152, 128>}, {pipeline_mode = #tpu.pipeline_mode<synchronous>, transform_indices = @transform_5, window_bounds = array<i64: 1, 128>}, {pipeline_mode = #tpu.pipeline_mode<synchronous>, transform_indices = @transform_6, window_bounds = array<i64: 1, 128>}, {pipeline_mode = #tpu.pipeline_mode<synchronous>, transform_indices = @transform_7, window_bounds = array<i64: 128, 128>}, {pipeline_mode = #tpu.pipeline_mode<synchronous>, transform_indices = @transform_8, window_bounds = array<i64: 1, 128>}, {pipeline_mode = #tpu.pipeline_mode<synchronous>, transform_indices = @transform_9, window_bounds = array<i64: 1, 128>}, {pipeline_mode = #tpu.pipeline_mode<synchronous>, transform_indices = @transform_10, window_bounds = array<i64: 512, 128>}]} {
    %cst = arith.constant 1.000000e+00 : f32
    %0 = vector.broadcast %cst : f32 to vector<8x512xf32>
    %c0 = arith.constant 0 : index
    %c0_0 = arith.constant 0 : index
    %1 = vector.load %arg1[%c0, %c0_0] : memref<512x128xbf16, #tpu.memory_space<vmem>>, vector<512x128xbf16>
    %c0_1 = arith.constant 0 : index
    %c0_2 = arith.constant 0 : index
    %2 = vector.load %arg2[%c0_1, %c0_2] : memref<128x256xbf16, #tpu.memory_space<vmem>>, vector<128x256xbf16>
    %cst_3 = arith.constant dense<0.000000e+00> : vector<512x256xf32>
    %3 = tpu.matmul %1, %2, %cst_3 {dimension_numbers = #tpu.dot_dimension_numbers<[1], [0], [0], [1], [0, 0, 1, 1], [], []>} : vector<512x128xbf16>, vector<128x256xbf16>, vector<512x256xf32> -> vector<512x256xf32>
    %4 = vector.extract_strided_slice %3 {offsets = [0, 0], sizes = [512, 128], strides = [1, 1]} : vector<512x256xf32> to vector<512x128xf32>
    %cst_4 = arith.constant dense<0.000000e+00> : vector<8x128xf32>
    %5 = tpu.matmul %0, %4, %cst_4 {dimension_numbers = #tpu.dot_dimension_numbers<[1], [0], [0], [1], [0, 0, 1, 1], [], []>} : vector<8x512xf32>, vector<512x128xf32>, vector<8x128xf32> -> vector<8x128xf32>
    %6 = vector.extract_strided_slice %5 {offsets = [0, 0], sizes = [1, 128], strides = [1, 1]} : vector<8x128xf32> to vector<1x128xf32>
    %cst_5 = arith.constant 0.001953125 : f32
    %7 = vector.broadcast %cst_5 : f32 to vector<1x128xf32>
    %8 = arith.mulf %6, %7 : vector<1x128xf32>
    %9 = vector.broadcast %8 : vector<1x128xf32> to vector<512x128xf32>
    %10 = arith.subf %4, %9 : vector<512x128xf32>
    %11 = arith.mulf %10, %10 : vector<512x128xf32>
    %cst_6 = arith.constant dense<0.000000e+00> : vector<8x128xf32>
    %12 = tpu.matmul %0, %11, %cst_6 {dimension_numbers = #tpu.dot_dimension_numbers<[1], [0], [0], [1], [0, 0, 1, 1], [], []>} : vector<8x512xf32>, vector<512x128xf32>, vector<8x128xf32> -> vector<8x128xf32>
    %13 = vector.extract_strided_slice %12 {offsets = [0, 0], sizes = [1, 128], strides = [1, 1]} : vector<8x128xf32> to vector<1x128xf32>
    %cst_7 = arith.constant 0.001953125 : f32
    %14 = vector.broadcast %cst_7 : f32 to vector<1x128xf32>
    %15 = arith.mulf %13, %14 : vector<1x128xf32>
    %cst_8 = arith.constant 9.99999974E-6 : f32
    %16 = vector.broadcast %cst_8 : f32 to vector<1x128xf32>
    %17 = arith.addf %15, %16 : vector<1x128xf32>
    %18 = math.rsqrt %17 : vector<1x128xf32>
    %19 = vector.broadcast %18 : vector<1x128xf32> to vector<512x128xf32>
    %20 = arith.mulf %10, %19 : vector<512x128xf32>
    %c0_9 = arith.constant 0 : index
    %c0_10 = arith.constant 0 : index
    %21 = vector.load %arg3[%c0_9, %c0_10] : memref<1x128xf32, #tpu.memory_space<vmem>>, vector<1x128xf32>
    %22 = vector.broadcast %21 : vector<1x128xf32> to vector<512x128xf32>
    %23 = arith.mulf %20, %22 : vector<512x128xf32>
    %c0_11 = arith.constant 0 : index
    %c0_12 = arith.constant 0 : index
    %24 = vector.load %arg4[%c0_11, %c0_12] : memref<1x128xf32, #tpu.memory_space<vmem>>, vector<1x128xf32>
    %25 = vector.broadcast %24 : vector<1x128xf32> to vector<512x128xf32>
    %26 = arith.addf %23, %25 : vector<512x128xf32>
    %cst_13 = arith.constant 0.000000e+00 : f32
    %27 = vector.broadcast %cst_13 : f32 to vector<512x128xf32>
    %28 = arith.maximumf %26, %27 : vector<512x128xf32>
    %cst_14 = arith.constant 0.000000e+00 : f32
    %29 = vector.broadcast %cst_14 : f32 to vector<2x1x24x128xf32>
    %c0_15 = arith.constant 0 : index
    %c0_16 = arith.constant 0 : index
    %c0_17 = arith.constant 0 : index
    %c0_18 = arith.constant 0 : index
    %30 = vector.load %arg12[%c0_15, %c0_16, %c0_17, %c0_18] : memref<2x18x24x128xf32, #tpu.memory_space<vmem>>, vector<2x1x24x128xf32>
    tpu.vector_store %arg12[%c0_15, %c0_16, %c0_17, %c0_18], %29 {strides = array<i32>} : memref<2x18x24x128xf32, #tpu.memory_space<vmem>>, vector<2x1x24x128xf32>,
    %c0_19 = arith.constant 0 : index
    %c17 = arith.constant 17 : index
    %c0_20 = arith.constant 0 : index
    %c0_21 = arith.constant 0 : index
    %31 = vector.load %arg12[%c0_19, %c17, %c0_20, %c0_21] : memref<2x18x24x128xf32, #tpu.memory_space<vmem>>, vector<2x1x24x128xf32>
    tpu.vector_store %arg12[%c0_19, %c17, %c0_20, %c0_21], %29 {strides = array<i32>} : memref<2x18x24x128xf32, #tpu.memory_space<vmem>>, vector<2x1x24x128xf32>,
    %cst_22 = arith.constant 0.000000e+00 : f32
    %32 = vector.broadcast %cst_22 : f32 to vector<2x16x1x128xf32>
    %c0_23 = arith.constant 0 : index
    %c1 = arith.constant 1 : index
    %c0_24 = arith.constant 0 : index
    %c0_25 = arith.constant 0 : index
    %33 = vector.load %arg12[%c0_23, %c1, %c0_24, %c0_25] : memref<2x18x24x128xf32, #tpu.memory_space<vmem>>, vector<2x16x1x128xf32>
    tpu.vector_store %arg12[%c0_23, %c1, %c0_24, %c0_25], %32 {strides = array<i32>} : memref<2x18x24x128xf32, #tpu.memory_space<vmem>>, vector<2x16x1x128xf32>,
    %c0_26 = arith.constant 0 : index
    %c1_27 = arith.constant 1 : index
    %c17_28 = arith.constant 17 : index
    %c0_29 = arith.constant 0 : index
    %34 = vector.load %arg12[%c0_26, %c1_27, %c17_28, %c0_29] : memref<2x18x24x128xf32, #tpu.memory_space<vmem>>, vector<2x16x1x128xf32>
    tpu.vector_store %arg12[%c0_26, %c1_27, %c17_28, %c0_29], %32 {strides = array<i32>} : memref<2x18x24x128xf32, #tpu.memory_space<vmem>>, vector<2x16x1x128xf32>,
    %35 = vector.shape_cast %28 : vector<512x128xf32> to vector<2x16x16x128xf32>
    %c0_30 = arith.constant 0 : index
    %c1_31 = arith.constant 1 : index
    %c1_32 = arith.constant 1 : index
    %c0_33 = arith.constant 0 : index
    %36 = vector.load %arg12[%c0_30, %c1_31, %c1_32, %c0_33] : memref<2x18x24x128xf32, #tpu.memory_space<vmem>>, vector<2x16x16x128xf32>
    tpu.vector_store %arg12[%c0_30, %c1_31, %c1_32, %c0_33], %35 {strides = array<i32>} : memref<2x18x24x128xf32, #tpu.memory_space<vmem>>, vector<2x16x16x128xf32>,
    %c0_34 = arith.constant 0 : index
    %c0_35 = arith.constant 0 : index
    %c0_36 = arith.constant 0 : index
    %c0_37 = arith.constant 0 : index
    %37 = vector.load %arg12[%c0_34, %c0_35, %c0_36, %c0_37] : memref<2x18x24x128xf32, #tpu.memory_space<vmem>>, vector<2x18x24x128xf32>
    %38 = vector.extract_strided_slice %37 {offsets = [0, 0, 0, 0], sizes = [2, 16, 16, 128], strides = [1, 1, 1, 1]} : vector<2x18x24x128xf32> to vector<2x16x16x128xf32>
    %39 = vector.shape_cast %38 : vector<2x16x16x128xf32> to vector<512x128xf32>
    %40 = arith.truncf %39 : vector<512x128xf32> to vector<512x128xbf16>
    %c0_38 = arith.constant 0 : index
    %c0_39 = arith.constant 0 : index
    %41 = vector.load %arg5[%c0_38, %c0_39] : memref<1152x128xbf16, #tpu.memory_space<vmem>>, vector<128x128xbf16>
    %cst_40 = arith.constant dense<0.000000e+00> : vector<512x128xf32>
    %42 = tpu.matmul %40, %41, %cst_40 {dimension_numbers = #tpu.dot_dimension_numbers<[1], [0], [0], [1], [0, 0, 1, 1], [], []>} : vector<512x128xbf16>, vector<128x128xbf16>, vector<512x128xf32> -> vector<512x128xf32>
    %43 = vector.extract_strided_slice %37 {offsets = [0, 0, 1, 0], sizes = [2, 16, 16, 128], strides = [1, 1, 1, 1]} : vector<2x18x24x128xf32> to vector<2x16x16x128xf32>
    %44 = vector.shape_cast %43 : vector<2x16x16x128xf32> to vector<512x128xf32>
    %45 = arith.truncf %44 : vector<512x128xf32> to vector<512x128xbf16>
    %c128 = arith.constant 128 : index
    %c0_41 = arith.constant 0 : index
    %46 = vector.load %arg5[%c128, %c0_41] : memref<1152x128xbf16, #tpu.memory_space<vmem>>, vector<128x128xbf16>
    %cst_42 = arith.constant dense<0.000000e+00> : vector<512x128xf32>
    %47 = tpu.matmul %45, %46, %cst_42 {dimension_numbers = #tpu.dot_dimension_numbers<[1], [0], [0], [1], [0, 0, 1, 1], [], []>} : vector<512x128xbf16>, vector<128x128xbf16>, vector<512x128xf32> -> vector<512x128xf32>
    %48 = arith.addf %42, %47 : vector<512x128xf32>
    %49 = vector.extract_strided_slice %37 {offsets = [0, 0, 2, 0], sizes = [2, 16, 16, 128], strides = [1, 1, 1, 1]} : vector<2x18x24x128xf32> to vector<2x16x16x128xf32>
    %50 = vector.shape_cast %49 : vector<2x16x16x128xf32> to vector<512x128xf32>
    %51 = arith.truncf %50 : vector<512x128xf32> to vector<512x128xbf16>
    %c256 = arith.constant 256 : index
    %c0_43 = arith.constant 0 : index
    %52 = vector.load %arg5[%c256, %c0_43] : memref<1152x128xbf16, #tpu.memory_space<vmem>>, vector<128x128xbf16>
    %cst_44 = arith.constant dense<0.000000e+00> : vector<512x128xf32>
    %53 = tpu.matmul %51, %52, %cst_44 {dimension_numbers = #tpu.dot_dimension_numbers<[1], [0], [0], [1], [0, 0, 1, 1], [], []>} : vector<512x128xbf16>, vector<128x128xbf16>, vector<512x128xf32> -> vector<512x128xf32>
    %54 = arith.addf %48, %53 : vector<512x128xf32>
    %55 = vector.extract_strided_slice %37 {offsets = [0, 1, 0, 0], sizes = [2, 16, 16, 128], strides = [1, 1, 1, 1]} : vector<2x18x24x128xf32> to vector<2x16x16x128xf32>
    %56 = vector.shape_cast %55 : vector<2x16x16x128xf32> to vector<512x128xf32>
    %57 = arith.truncf %56 : vector<512x128xf32> to vector<512x128xbf16>
    %c384 = arith.constant 384 : index
    %c0_45 = arith.constant 0 : index
    %58 = vector.load %arg5[%c384, %c0_45] : memref<1152x128xbf16, #tpu.memory_space<vmem>>, vector<128x128xbf16>
    %cst_46 = arith.constant dense<0.000000e+00> : vector<512x128xf32>
    %59 = tpu.matmul %57, %58, %cst_46 {dimension_numbers = #tpu.dot_dimension_numbers<[1], [0], [0], [1], [0, 0, 1, 1], [], []>} : vector<512x128xbf16>, vector<128x128xbf16>, vector<512x128xf32> -> vector<512x128xf32>
    %60 = arith.addf %54, %59 : vector<512x128xf32>
    %61 = vector.extract_strided_slice %37 {offsets = [0, 1, 1, 0], sizes = [2, 16, 16, 128], strides = [1, 1, 1, 1]} : vector<2x18x24x128xf32> to vector<2x16x16x128xf32>
    %62 = vector.shape_cast %61 : vector<2x16x16x128xf32> to vector<512x128xf32>
    %63 = arith.truncf %62 : vector<512x128xf32> to vector<512x128xbf16>
    %c512 = arith.constant 512 : index
    %c0_47 = arith.constant 0 : index
    %64 = vector.load %arg5[%c512, %c0_47] : memref<1152x128xbf16, #tpu.memory_space<vmem>>, vector<128x128xbf16>
    %cst_48 = arith.constant dense<0.000000e+00> : vector<512x128xf32>
    %65 = tpu.matmul %63, %64, %cst_48 {dimension_numbers = #tpu.dot_dimension_numbers<[1], [0], [0], [1], [0, 0, 1, 1], [], []>} : vector<512x128xbf16>, vector<128x128xbf16>, vector<512x128xf32> -> vector<512x128xf32>
    %66 = arith.addf %60, %65 : vector<512x128xf32>
    %67 = vector.extract_strided_slice %37 {offsets = [0, 1, 2, 0], sizes = [2, 16, 16, 128], strides = [1, 1, 1, 1]} : vector<2x18x24x128xf32> to vector<2x16x16x128xf32>
    %68 = vector.shape_cast %67 : vector<2x16x16x128xf32> to vector<512x128xf32>
    %69 = arith.truncf %68 : vector<512x128xf32> to vector<512x128xbf16>
    %c640 = arith.constant 640 : index
    %c0_49 = arith.constant 0 : index
    %70 = vector.load %arg5[%c640, %c0_49] : memref<1152x128xbf16, #tpu.memory_space<vmem>>, vector<128x128xbf16>
    %cst_50 = arith.constant dense<0.000000e+00> : vector<512x128xf32>
    %71 = tpu.matmul %69, %70, %cst_50 {dimension_numbers = #tpu.dot_dimension_numbers<[1], [0], [0], [1], [0, 0, 1, 1], [], []>} : vector<512x128xbf16>, vector<128x128xbf16>, vector<512x128xf32> -> vector<512x128xf32>
    %72 = arith.addf %66, %71 : vector<512x128xf32>
    %73 = vector.extract_strided_slice %37 {offsets = [0, 2, 0, 0], sizes = [2, 16, 16, 128], strides = [1, 1, 1, 1]} : vector<2x18x24x128xf32> to vector<2x16x16x128xf32>
    %74 = vector.shape_cast %73 : vector<2x16x16x128xf32> to vector<512x128xf32>
    %75 = arith.truncf %74 : vector<512x128xf32> to vector<512x128xbf16>
    %c768 = arith.constant 768 : index
    %c0_51 = arith.constant 0 : index
    %76 = vector.load %arg5[%c768, %c0_51] : memref<1152x128xbf16, #tpu.memory_space<vmem>>, vector<128x128xbf16>
    %cst_52 = arith.constant dense<0.000000e+00> : vector<512x128xf32>
    %77 = tpu.matmul %75, %76, %cst_52 {dimension_numbers = #tpu.dot_dimension_numbers<[1], [0], [0], [1], [0, 0, 1, 1], [], []>} : vector<512x128xbf16>, vector<128x128xbf16>, vector<512x128xf32> -> vector<512x128xf32>
    %78 = arith.addf %72, %77 : vector<512x128xf32>
    %79 = vector.extract_strided_slice %37 {offsets = [0, 2, 1, 0], sizes = [2, 16, 16, 128], strides = [1, 1, 1, 1]} : vector<2x18x24x128xf32> to vector<2x16x16x128xf32>
    %80 = vector.shape_cast %79 : vector<2x16x16x128xf32> to vector<512x128xf32>
    %81 = arith.truncf %80 : vector<512x128xf32> to vector<512x128xbf16>
    %c896 = arith.constant 896 : index
    %c0_53 = arith.constant 0 : index
    %82 = vector.load %arg5[%c896, %c0_53] : memref<1152x128xbf16, #tpu.memory_space<vmem>>, vector<128x128xbf16>
    %cst_54 = arith.constant dense<0.000000e+00> : vector<512x128xf32>
    %83 = tpu.matmul %81, %82, %cst_54 {dimension_numbers = #tpu.dot_dimension_numbers<[1], [0], [0], [1], [0, 0, 1, 1], [], []>} : vector<512x128xbf16>, vector<128x128xbf16>, vector<512x128xf32> -> vector<512x128xf32>
    %84 = arith.addf %78, %83 : vector<512x128xf32>
    %85 = vector.extract_strided_slice %37 {offsets = [0, 2, 2, 0], sizes = [2, 16, 16, 128], strides = [1, 1, 1, 1]} : vector<2x18x24x128xf32> to vector<2x16x16x128xf32>
    %86 = vector.shape_cast %85 : vector<2x16x16x128xf32> to vector<512x128xf32>
    %87 = arith.truncf %86 : vector<512x128xf32> to vector<512x128xbf16>
    %c1024 = arith.constant 1024 : index
    %c0_55 = arith.constant 0 : index
    %88 = vector.load %arg5[%c1024, %c0_55] : memref<1152x128xbf16, #tpu.memory_space<vmem>>, vector<128x128xbf16>
    %cst_56 = arith.constant dense<0.000000e+00> : vector<512x128xf32>
    %89 = tpu.matmul %87, %88, %cst_56 {dimension_numbers = #tpu.dot_dimension_numbers<[1], [0], [0], [1], [0, 0, 1, 1], [], []>} : vector<512x128xbf16>, vector<128x128xbf16>, vector<512x128xf32> -> vector<512x128xf32>
    %90 = arith.addf %84, %89 : vector<512x128xf32>
    %cst_57 = arith.constant dense<0.000000e+00> : vector<8x128xf32>
    %91 = tpu.matmul %0, %90, %cst_57 {dimension_numbers = #tpu.dot_dimension_numbers<[1], [0], [0], [1], [0, 0, 1, 1], [], []>} : vector<8x512xf32>, vector<512x128xf32>, vector<8x128xf32> -> vector<8x128xf32>
    %92 = vector.extract_strided_slice %91 {offsets = [0, 0], sizes = [1, 128], strides = [1, 1]} : vector<8x128xf32> to vector<1x128xf32>
    %cst_58 = arith.constant 0.001953125 : f32
    %93 = vector.broadcast %cst_58 : f32 to vector<1x128xf32>
    %94 = arith.mulf %92, %93 : vector<1x128xf32>
    %95 = vector.broadcast %94 : vector<1x128xf32> to vector<512x128xf32>
    %96 = arith.subf %90, %95 : vector<512x128xf32>
    %97 = arith.mulf %96, %96 : vector<512x128xf32>
    %cst_59 = arith.constant dense<0.000000e+00> : vector<8x128xf32>
    %98 = tpu.matmul %0, %97, %cst_59 {dimension_numbers = #tpu.dot_dimension_numbers<[1], [0], [0], [1], [0, 0, 1, 1], [], []>} : vector<8x512xf32>, vector<512x128xf32>, vector<8x128xf32> -> vector<8x128xf32>
    %99 = vector.extract_strided_slice %98 {offsets = [0, 0], sizes = [1, 128], strides = [1, 1]} : vector<8x128xf32> to vector<1x128xf32>
    %cst_60 = arith.constant 0.001953125 : f32
    %100 = vector.broadcast %cst_60 : f32 to vector<1x128xf32>
    %101 = arith.mulf %99, %100 : vector<1x128xf32>
    %cst_61 = arith.constant 9.99999974E-6 : f32
    %102 = vector.broadcast %cst_61 : f32 to vector<1x128xf32>
    %103 = arith.addf %101, %102 : vector<1x128xf32>
    %104 = math.rsqrt %103 : vector<1x128xf32>
    %105 = vector.broadcast %104 : vector<1x128xf32> to vector<512x128xf32>
    %106 = arith.mulf %96, %105 : vector<512x128xf32>
    %c0_62 = arith.constant 0 : index
    %c0_63 = arith.constant 0 : index
    %107 = vector.load %arg6[%c0_62, %c0_63] : memref<1x128xf32, #tpu.memory_space<vmem>>, vector<1x128xf32>
    %108 = vector.broadcast %107 : vector<1x128xf32> to vector<512x128xf32>
    %109 = arith.mulf %106, %108 : vector<512x128xf32>
    %c0_64 = arith.constant 0 : index
    %c0_65 = arith.constant 0 : index
    %110 = vector.load %arg7[%c0_64, %c0_65] : memref<1x128xf32, #tpu.memory_space<vmem>>, vector<1x128xf32>
    %111 = vector.broadcast %110 : vector<1x128xf32> to vector<512x128xf32>
    %112 = arith.addf %109, %111 : vector<512x128xf32>
    %cst_66 = arith.constant 0.000000e+00 : f32
    %113 = vector.broadcast %cst_66 : f32 to vector<512x128xf32>
    %114 = arith.maximumf %112, %113 : vector<512x128xf32>
    %115 = arith.truncf %114 : vector<512x128xf32> to vector<512x128xbf16>
    %c0_67 = arith.constant 0 : index
    %c0_68 = arith.constant 0 : index
    %116 = vector.load %arg8[%c0_67, %c0_68] : memref<128x128xbf16, #tpu.memory_space<vmem>>, vector<128x128xbf16>
    %cst_69 = arith.constant dense<0.000000e+00> : vector<512x128xf32>
    %117 = tpu.matmul %115, %116, %cst_69 {dimension_numbers = #tpu.dot_dimension_numbers<[1], [0], [0], [1], [0, 0, 1, 1], [], []>} : vector<512x128xbf16>, vector<128x128xbf16>, vector<512x128xf32> -> vector<512x128xf32>
    %118 = vector.extract_strided_slice %3 {offsets = [0, 128], sizes = [512, 128], strides = [1, 1]} : vector<512x256xf32> to vector<512x128xf32>
    %cst_70 = arith.constant dense<0.000000e+00> : vector<8x128xf32>
    %119 = tpu.matmul %0, %118, %cst_70 {dimension_numbers = #tpu.dot_dimension_numbers<[1], [0], [0], [1], [0, 0, 1, 1], [], []>} : vector<8x512xf32>, vector<512x128xf32>, vector<8x128xf32> -> vector<8x128xf32>
    %120 = vector.extract_strided_slice %119 {offsets = [0, 0], sizes = [1, 128], strides = [1, 1]} : vector<8x128xf32> to vector<1x128xf32>
    %cst_71 = arith.constant 0.001953125 : f32
    %121 = vector.broadcast %cst_71 : f32 to vector<1x128xf32>
    %122 = arith.mulf %120, %121 : vector<1x128xf32>
    %123 = vector.broadcast %122 : vector<1x128xf32> to vector<512x128xf32>
    %124 = arith.subf %118, %123 : vector<512x128xf32>
    %125 = arith.mulf %124, %124 : vector<512x128xf32>
    %cst_72 = arith.constant dense<0.000000e+00> : vector<8x128xf32>
    %126 = tpu.matmul %0, %125, %cst_72 {dimension_numbers = #tpu.dot_dimension_numbers<[1], [0], [0], [1], [0, 0, 1, 1], [], []>} : vector<8x512xf32>, vector<512x128xf32>, vector<8x128xf32> -> vector<8x128xf32>
    %127 = vector.extract_strided_slice %126 {offsets = [0, 0], sizes = [1, 128], strides = [1, 1]} : vector<8x128xf32> to vector<1x128xf32>
    %cst_73 = arith.constant 0.001953125 : f32
    %128 = vector.broadcast %cst_73 : f32 to vector<1x128xf32>
    %129 = arith.mulf %127, %128 : vector<1x128xf32>
    %cst_74 = arith.constant 9.99999974E-6 : f32
    %130 = vector.broadcast %cst_74 : f32 to vector<1x128xf32>
    %131 = arith.addf %129, %130 : vector<1x128xf32>
    %132 = math.rsqrt %131 : vector<1x128xf32>
    %133 = vector.broadcast %132 : vector<1x128xf32> to vector<512x128xf32>
    %134 = arith.mulf %124, %133 : vector<512x128xf32>
    %c0_75 = arith.constant 0 : index
    %c0_76 = arith.constant 0 : index
    %135 = vector.load %arg9[%c0_75, %c0_76] : memref<1x128xf32, #tpu.memory_space<vmem>>, vector<1x128xf32>
    %136 = vector.broadcast %135 : vector<1x128xf32> to vector<512x128xf32>
    %137 = arith.mulf %134, %136 : vector<512x128xf32>
    %c0_77 = arith.constant 0 : index
    %c0_78 = arith.constant 0 : index
    %138 = vector.load %arg10[%c0_77, %c0_78] : memref<1x128xf32, #tpu.memory_space<vmem>>, vector<1x128xf32>
    %139 = vector.broadcast %138 : vector<1x128xf32> to vector<512x128xf32>
    %140 = arith.addf %137, %139 : vector<512x128xf32>
    %141 = arith.addf %117, %140 : vector<512x128xf32>
    %cst_79 = arith.constant 0.000000e+00 : f32
    %142 = vector.broadcast %cst_79 : f32 to vector<512x128xf32>
    %143 = arith.maximumf %141, %142 : vector<512x128xf32>
    %c0_80 = arith.constant 0 : index
    %c0_81 = arith.constant 0 : index
    %144 = vector.load %arg11[%c0_80, %c0_81] : memref<512x128xf32, #tpu.memory_space<vmem>>, vector<512x128xf32>
    tpu.vector_store %arg11[%c0_80, %c0_81], %143 {strides = array<i32>} : memref<512x128xf32, #tpu.memory_space<vmem>>, vector<512x128xf32>,
    return
  }
  func.func @transform_0(%arg0: i32) -> (i32, i32) {
    %c0_i32 = arith.constant 0 : i32
    %c0_i32_0 = arith.constant 0 : i32
    %c0_i32_1 = arith.constant 0 : i32
    return %c0_i32, %c0_i32_0 : i32, i32
  }
  func.func @transform_1(%arg0: i32) -> (i32, i32) {
    %c0_i32 = arith.constant 0 : i32
    %c0_i32_0 = arith.constant 0 : i32
    %c0_i32_1 = arith.constant 0 : i32
    return %c0_i32, %c0_i32_0 : i32, i32
  }
  func.func @transform_2(%arg0: i32) -> (i32, i32) {
    %c0_i32 = arith.constant 0 : i32
    %c0_i32_0 = arith.constant 0 : i32
    %c0_i32_1 = arith.constant 0 : i32
    return %c0_i32, %c0_i32_0 : i32, i32
  }
  func.func @transform_3(%arg0: i32) -> (i32, i32) {
    %c0_i32 = arith.constant 0 : i32
    %c0_i32_0 = arith.constant 0 : i32
    %c0_i32_1 = arith.constant 0 : i32
    return %c0_i32, %c0_i32_0 : i32, i32
  }
  func.func @transform_4(%arg0: i32) -> (i32, i32) {
    %c0_i32 = arith.constant 0 : i32
    %c0_i32_0 = arith.constant 0 : i32
    %c0_i32_1 = arith.constant 0 : i32
    return %c0_i32, %c0_i32_0 : i32, i32
  }
  func.func @transform_5(%arg0: i32) -> (i32, i32) {
    %c0_i32 = arith.constant 0 : i32
    %c0_i32_0 = arith.constant 0 : i32
    %c0_i32_1 = arith.constant 0 : i32
    return %c0_i32, %c0_i32_0 : i32, i32
  }
  func.func @transform_6(%arg0: i32) -> (i32, i32) {
    %c0_i32 = arith.constant 0 : i32
    %c0_i32_0 = arith.constant 0 : i32
    %c0_i32_1 = arith.constant 0 : i32
    return %c0_i32, %c0_i32_0 : i32, i32
  }
  func.func @transform_7(%arg0: i32) -> (i32, i32) {
    %c0_i32 = arith.constant 0 : i32
    %c0_i32_0 = arith.constant 0 : i32
    %c0_i32_1 = arith.constant 0 : i32
    return %c0_i32, %c0_i32_0 : i32, i32
  }
  func.func @transform_8(%arg0: i32) -> (i32, i32) {
    %c0_i32 = arith.constant 0 : i32
    %c0_i32_0 = arith.constant 0 : i32
    %c0_i32_1 = arith.constant 0 : i32
    return %c0_i32, %c0_i32_0 : i32, i32
  }
  func.func @transform_9(%arg0: i32) -> (i32, i32) {
    %c0_i32 = arith.constant 0 : i32
    %c0_i32_0 = arith.constant 0 : i32
    %c0_i32_1 = arith.constant 0 : i32
    return %c0_i32, %c0_i32_0 : i32, i32
  }
  func.func @transform_10(%arg0: i32) -> (i32, i32) {
    %c0_i32 = arith.constant 0 : i32
    %c0_i32_0 = arith.constant 0 : i32
    %c0_i32_1 = arith.constant 0 : i32
    return %c0_i32, %c0_i32_0 : i32, i32
  }
}

</mosaic_0001>

<bundles_post_ra>
// kernel: identity_block.1
= control target key start
LH: loop header
LB: loop body
LE: loop exit
PB: predicated region body
PF: predicated region fallthrough
CT: control target
= control target key end

     0   :  { %v9778_v1 = vmov 0   ;;  %vm1825_vm0 = vcmask 1046528   ;;  %vm2772_vm1 = vcmask 1045504   ;;  %s16456_s1 = inlined_call_operand.vmem [shape: bf16[128,256], index: 1, kind: input, shape index: {}]   ;;  %s16457_s0 = inlined_call_operand.vmem [shape: bf16[512,128], index: 0, kind: input, shape index: {}]   ;;  %s16458_s4 = inlined_call_operand.vmem [shape: bf16[1152,128], index: 4, kind: input, shape index: {}]   ;;  %s16459_s2 = inlined_call_operand.vmem [shape: f32[1,128], index: 2, kind: input, shape index: {}]   ;;  %s16460_s3 = inlined_call_operand.vmem [shape: f32[1,128], index: 3, kind: input, shape index: {}]   ;;  %s16461_s7 = inlined_call_operand.vmem [shape: bf16[128,128], index: 7, kind: input, shape index: {}]   ;;  %s16462_s5 = inlined_call_operand.vmem [shape: f32[1,128], index: 5, kind: input, shape index: {}]   ;;  %s16463_s6 = inlined_call_operand.vmem [shape: f32[1,128], index: 6, kind: input, shape index: {}]   ;;  %s16464_s8 = inlined_call_operand.vmem [shape: f32[1,128], index: 8, kind: input, shape index: {}]   ;;  %s16465_s9 = inlined_call_operand.vmem [shape: f32[1,128], index: 9, kind: input, shape index: {}]   ;;  %s16466_s10 = inlined_call_operand.vmem [shape: f32[512,128], index: 10, kind: output, shape index: {}]  }
   0x1   :  { %v9634_v0 = vld [vmem:[%s16456_s1 + $0x74] ss:$8 sps:$4 sm:$0xff]   ;;  %420 = vmatprep.mubr.bf16.mxu0 %v9778_v1  ;;  %650 = vmatprep.mubr.bf16.mxu1 %v9778_v1  ;;  %v9636_v2 = vld [vmem:[%s16456_s1 + $0x70] ss:$8 sps:$4 sm:$0xff]   ;;  %v9637_v3 = vld [vmem:[%s16456_s1 + $0x64] ss:$8 sps:$4 sm:$0xff]  }
   0x2   :  { %388 = vmatprep.subr.bf16.mxu0 %v9634_v0  ;;  %9615 = vmatprep.subr.bf16.mxu1 %v9634_v0  ;;  %v9639_v4 = vld [vmem:[%s16456_s1 + $0x60] ss:$8 sps:$4 sm:$0xff]   ;;  %v9640_v5 = vld [vmem:[%s16456_s1 + $0x54] ss:$8 sps:$4 sm:$0xff]   ;;  %v9642_v6 = vld [vmem:[%s16456_s1 + $0x50] ss:$8 sps:$4 sm:$0xff]  }
   0x3   :  { %389 = vmatpush1.bf16.msra.mxu0 %v9636_v2  ;;  %9623 = vmatpush1.bf16.msra.mxu1 %v9636_v2  ;;  %v9643_v7 = vld [vmem:[%s16456_s1 + $0x44] ss:$8 sps:$4 sm:$0xff]   ;;  %v9645_v8 = vld [vmem:[%s16456_s1 + $0x40] ss:$8 sps:$4 sm:$0xff]   ;;  %v9646_v9 = vld [vmem:[%s16456_s1 + $0x34] ss:$8 sps:$4 sm:$0xff]  }
   0x4   :  { %390 = vmatprep.subr.bf16.mxu0 %v9637_v3  ;;  %9616 = vmatprep.subr.bf16.mxu1 %v9637_v3  ;;  %v9648_v10 = vld [vmem:[%s16456_s1 + $0x30] ss:$8 sps:$4 sm:$0xff]   ;;  %v9649_v11 = vld [vmem:[%s16456_s1 + $0x24] ss:$8 sps:$4 sm:$0xff]   ;;  %v9651_v12 = vld [vmem:[%s16456_s1 + $0x20] ss:$8 sps:$4 sm:$0xff]  }
   0x5   :  { %v9652_v13 = vld [vmem:[%s16456_s1 + $0x14] ss:$8 sps:$4 sm:$0xff]   ;;  %v9654_v14 = vld [vmem:[%s16456_s1 + $0x10] ss:$8 sps:$4 sm:$0xff]   ;;  %v9655_v15 = vld [vmem:[%s16456_s1 + $0x4] ss:$8 sps:$4 sm:$0xff]  }
   0x6   :  { %v9657_v16 = vld [vmem:[%s16456_s1] ss:$8 sps:$4 sm:$0xff]   ;;  %v9670_v18 = vld [vmem:[%s16457_s0 + $0xb8] sm:$0xff]   ;;  %v9660_v21 = vld [vmem:[%s16457_s0 + $0x10] sm:$0xff]   ;;  %v16467_v3 = vmov 1.0  }
   0x7   :  { %391 = vmatpush1.bf16.msra.mxu0 %v9639_v4  ;;  %9624 = vmatpush1.bf16.msra.mxu1 %v9639_v4  ;;  %v9658_v17 = vld [vmem:[%s16457_s0] sm:$0xff]   ;;  %v9659_v19 = vld [vmem:[%s16457_s0 + $0x8] sm:$0xff]   ;;  %v9661_v23 = vld [vmem:[%s16457_s0 + $0x18] sm:$0xff]  }
   0x8   :  { %392 = vmatprep.subr.bf16.mxu0 %v9640_v5  ;;  %9617 = vmatprep.subr.bf16.mxu1 %v9640_v5  ;;  %v9672_v20 = vld [vmem:[%s16457_s0 + $0xc0] sm:$0xff]   ;;  %v9674_v22 = vld [vmem:[%s16457_s0 + $0xc8] sm:$0xff]   ;;  %v9676_v24 = vld [vmem:[%s16457_s0 + $0xd0] sm:$0xff]  }
   0x9   :  { %v9662_v25 = vld [vmem:[%s16457_s0 + $0x20] sm:$0xff]   ;;  %v9678_v26 = vld [vmem:[%s16457_s0 + $0xd8] sm:$0xff]   ;;  %v9663_v27 = vld [vmem:[%s16457_s0 + $0x28] sm:$0xff]  }
   0xa   :  { %v9680_v28 = vld [vmem:[%s16457_s0 + $0xe0] sm:$0xff]   ;;  %v9664_v29 = vld [vmem:[%s16457_s0 + $0x30] sm:$0xff]   ;;  %v9682_v30 = vld [vmem:[%s16457_s0 + $0xe8] sm:$0xff]  }
   0xb   :  { %393 = vmatpush1.bf16.msra.mxu0 %v9642_v6  ;;  %9625 = vmatpush1.bf16.msra.mxu1 %v9642_v6  ;;  %v9665_v31 = vld [vmem:[%s16457_s0 + $0x38] sm:$0xff]   ;;  %v9684_v32 = vld [vmem:[%s16457_s0 + $0xf0] sm:$0xff]   ;;  %v9666_v33 = vld [vmem:[%s16457_s0 + $0x40] sm:$0xff]  }
   0xc   :  { %394 = vmatprep.subr.bf16.mxu0 %v9643_v7  ;;  %9618 = vmatprep.subr.bf16.mxu1 %v9643_v7  ;;  %v9686_v34 = vld [vmem:[%s16457_s0 + $0xf8] sm:$0xff]   ;;  %v9667_v35 = vld [vmem:[%s16457_s0 + $0x48] sm:$0xff]   ;;  %v9668_v36 = vld [vmem:[%s16457_s0 + $0x50] sm:$0xff]  }
   0xd   :  { %v9669_v37 = vld [vmem:[%s16457_s0 + $0x58] sm:$0xff]   ;;  %v9671_v38 = vld [vmem:[%s16457_s0 + $0x60] sm:$0xff]   ;;  %v9673_v39 = vld [vmem:[%s16457_s0 + $0x68] sm:$0xff]  }
   0xe   :  { %v9675_v40 = vld [vmem:[%s16457_s0 + $0x70] sm:$0xff]   ;;  %v9677_v41 = vld [vmem:[%s16457_s0 + $0x78] sm:$0xff]   ;;  %v9679_v42 = vld [vmem:[%s16457_s0 + $0x80] sm:$0xff]  }
   0xf   :  { %395 = vmatpush1.bf16.msra.mxu0 %v9645_v8  ;;  %9626 = vmatpush1.bf16.msra.mxu1 %v9645_v8  ;;  %v9681_v43 = vld [vmem:[%s16457_s0 + $0x88] sm:$0xff]   ;;  %v9683_v44 = vld [vmem:[%s16457_s0 + $0x90] sm:$0xff]   ;;  %v9685_v45 = vld [vmem:[%s16457_s0 + $0x98] sm:$0xff]  }
  0x10   :  { %396 = vmatprep.subr.bf16.mxu0 %v9646_v9  ;;  %9619 = vmatprep.subr.bf16.mxu1 %v9646_v9  ;;  %v9687_v46 = vld [vmem:[%s16457_s0 + $0xa0] sm:$0xff]   ;;  %v9688_v47 = vld [vmem:[%s16457_s0 + $0xa8] sm:$0xff]   ;;  %v9689_v48 = vld [vmem:[%s16457_s0 + $0xb0] sm:$0xff]  }
  0x13   :  { %397 = vmatpush1.bf16.msra.mxu0 %v9648_v10  ;;  %9627 = vmatpush1.bf16.msra.mxu1 %v9648_v10 }
  0x14   :  { %398 = vmatprep.subr.bf16.mxu0 %v9649_v11  ;;  %9620 = vmatprep.subr.bf16.mxu1 %v9649_v11 }
  0x17   :  { %399 = vmatpush1.bf16.msra.mxu0 %v9651_v12  ;;  %9628 = vmatpush1.bf16.msra.mxu1 %v9651_v12 }
  0x18   :  { %400 = vmatprep.subr.bf16.mxu0 %v9652_v13  ;;  %9621 = vmatprep.subr.bf16.mxu1 %v9652_v13 }
  0x1b   :  { %401 = vmatpush1.bf16.msra.mxu0 %v9654_v14  ;;  %9629 = vmatpush1.bf16.msra.mxu1 %v9654_v14 }
  0x1c   :  { %402 = vmatprep.subr.bf16.mxu0 %v9655_v15  ;;  %9622 = vmatprep.subr.bf16.mxu1 %v9655_v15 }
  0x1f   :  { %403 = vmatpush1.bf16.msra.mxu0 %v9657_v16  ;;  %9630 = vmatpush1.bf16.msra.mxu1 %v9657_v16 }
  0x22   :  { %421 = vmatmul.mubr.bf16.vlgmr.msra.gmra.mxu0 %v9658_v17  ;;  %651 = vmatmul.mubr.bf16.vlgmr.msra.gmra.mxu1 %v9670_v18 }
  0x23   :  { %430 = vmatprep.mubr.bf16.mxu0 %v9778_v1  ;;  %660 = vmatprep.mubr.bf16.mxu1 %v9778_v1 }
  0x2a   :  { %431 = vmatmul.mubr.bf16.gmra.mxu0 %v9659_v19  ;;  %661 = vmatmul.mubr.bf16.gmra.mxu1 %v9672_v20 }
  0x2b   :  { %440 = vmatprep.mubr.bf16.mxu0 %v9778_v1  ;;  %670 = vmatprep.mubr.bf16.mxu1 %v9778_v1 }
  0x32   :  { %441 = vmatmul.mubr.bf16.gmra.mxu0 %v9660_v21  ;;  %671 = vmatmul.mubr.bf16.gmra.mxu1 %v9674_v22 }
  0x33   :  { %450 = vmatprep.mubr.bf16.mxu0 %v9778_v1  ;;  %680 = vmatprep.mubr.bf16.mxu1 %v9778_v1 }
  0x3a   :  { %451 = vmatmul.mubr.bf16.gmra.mxu0 %v9661_v23  ;;  %681 = vmatmul.mubr.bf16.gmra.mxu1 %v9676_v24 }
  0x3b   :  { %460 = vmatprep.mubr.bf16.mxu0 %v9778_v1  ;;  %690 = vmatprep.mubr.bf16.mxu1 %v9778_v1 }
  0x42   :  { %461 = vmatmul.mubr.bf16.gmra.mxu0 %v9662_v25  ;;  %691 = vmatmul.mubr.bf16.gmra.mxu1 %v9678_v26 }
  0x43   :  { %470 = vmatprep.mubr.bf16.mxu0 %v9778_v1  ;;  %700 = vmatprep.mubr.bf16.mxu1 %v9778_v1 }
  0x4a   :  { %471 = vmatmul.mubr.bf16.gmra.mxu0 %v9663_v27  ;;  %701 = vmatmul.mubr.bf16.gmra.mxu1 %v9680_v28 }
  0x4b   :  { %480 = vmatprep.mubr.bf16.mxu0 %v9778_v1  ;;  %710 = vmatprep.mubr.bf16.mxu1 %v9778_v1 }
  0x52   :  { %481 = vmatmul.mubr.bf16.gmra.mxu0 %v9664_v29  ;;  %711 = vmatmul.mubr.bf16.gmra.mxu1 %v9682_v30 }
  0x53   :  { %490 = vmatprep.mubr.bf16.mxu0 %v9778_v1  ;;  %720 = vmatprep.mubr.bf16.mxu1 %v9778_v1 }
  0x5a   :  { %491 = vmatmul.mubr.bf16.gmra.mxu0 %v9665_v31  ;;  %721 = vmatmul.mubr.bf16.gmra.mxu1 %v9684_v32 }
  0x5b   :  { %500 = vmatprep.mubr.bf16.mxu0 %v9778_v1  ;;  %730 = vmatprep.mubr.bf16.mxu1 %v9778_v1 }
  0x62   :  { %501 = vmatmul.mubr.bf16.gmra.mxu0 %v9666_v33  ;;  %731 = vmatmul.mubr.bf16.gmra.mxu1 %v9686_v34 }
  0x63   :  { %510 = vmatprep.mubr.bf16.mxu0 %v9778_v1  ;;  %805 = vmatprep.mubr.f32.mxu1 %v16467_v3 }
  0x6a   :  { %511 = vmatmul.mubr.bf16.gmra.mxu0 %v9667_v35 }
  0x6b   :  { %520 = vmatprep.mubr.bf16.mxu0 %v9778_v1 }
  0x72   :  { %521 = vmatmul.mubr.bf16.gmra.mxu0 %v9668_v36 }
  0x73   :  { %530 = vmatprep.mubr.bf16.mxu0 %v9778_v1 }
  0x7a   :  { %531 = vmatmul.mubr.bf16.gmra.mxu0 %v9669_v37 }
  0x7b   :  { %540 = vmatprep.mubr.bf16.mxu0 %v9778_v1 }
  0x82   :  { %541 = vmatmul.mubr.bf16.gmra.mxu0 %v9671_v38 }
  0x83   :  { %550 = vmatprep.mubr.bf16.mxu0 %v9778_v1 }
  0x8a   :  { %551 = vmatmul.mubr.bf16.gmra.mxu0 %v9673_v39 }
  0x8b   :  { %560 = vmatprep.mubr.bf16.mxu0 %v9778_v1 }
  0x92   :  { %561 = vmatmul.mubr.bf16.gmra.mxu0 %v9675_v40 }
  0x93   :  { %570 = vmatprep.mubr.bf16.mxu0 %v9778_v1 }
  0x9a   :  { %571 = vmatmul.mubr.bf16.gmra.mxu0 %v9677_v41 }
  0x9b   :  { %580 = vmatprep.mubr.bf16.mxu0 %v9778_v1 }
  0xa2   :  { %581 = vmatmul.mubr.bf16.gmra.mxu0 %v9679_v42 }
  0xa3   :  { %590 = vmatprep.mubr.bf16.mxu0 %v9778_v1 }
  0xaa   :  { %591 = vmatmul.mubr.bf16.gmra.mxu0 %v9681_v43 }
  0xab   :  { %600 = vmatprep.mubr.bf16.mxu0 %v9778_v1 }
  0xb2   :  { %601 = vmatmul.mubr.bf16.gmra.mxu0 %v9683_v44 }
  0xb3   :  { %610 = vmatprep.mubr.bf16.mxu0 %v9778_v1 }
  0xba   :  { %611 = vmatmul.mubr.bf16.gmra.mxu0 %v9685_v45 }
  0xbb   :  { %620 = vmatprep.mubr.bf16.mxu0 %v9778_v1 }
  0xc2   :  { %621 = vmatmul.mubr.bf16.gmra.mxu0 %v9687_v46 }
  0xc3   :  { %630 = vmatprep.mubr.bf16.mxu0 %v9778_v1 }
  0xca   :  { %631 = vmatmul.mubr.bf16.gmra.mxu0 %v9688_v47 }
  0xcb   :  { %640 = vmatprep.mubr.bf16.mxu0 %v9778_v1 }
  0xd2   :  { %641 = vmatmul.mubr.bf16.gmra.mxu0 %v9689_v48 }
  0xe2   :  { %v10013_v49 = vpop.f32.mrf.mxu0  ;;  %v10033_v59 = vpop.f32.mrf.mxu1 }
  0xe3   :  { %16908 = vst [vmem:[#allocation3_spill] sm:$0xff] %v10013_v49  ;;  %16914 = vst [vmem:[#allocation9_spill] sm:$0xff] %v10033_v59 }
  0xe4   :  { %v10015_v50 = vpop.f32.mrf.mxu0  ;;  %v10039_v62 = vpop.f32.mrf.mxu1 }
  0xe5   :  { %16909 = vst [vmem:[#allocation4_spill] sm:$0xff] %v10015_v50  ;;  %16916 = vst [vmem:[#allocation11_spill] sm:$0xff] %v10039_v62 }
  0xe6   :  { %v10017_v51 = vpop.f32.mrf.mxu0  ;;  %v10045_v1 = vpop.f32.mrf.mxu1 }
  0xe7   :  { %16918 = vst [vmem:[#allocation13_spill] sm:$0xff] %v10045_v1 }
  0xe8   :  { %v10019_v52 = vpop.f32.mrf.mxu0  ;;  %v10052_v5 = vpop.f32.mrf.mxu1 }
  0xe9   :  { %16910 = vst [vmem:[#allocation5_spill] sm:$0xff] %v10019_v52  ;;  %16920 = vst [vmem:[#allocation15_spill] sm:$0xff] %v10052_v5 }
  0xea   :  { %v10021_v53 = vpop.f32.mrf.mxu0  ;;  %v10058_v8 = vpop.f32.mrf.mxu1 }
  0xeb   :  { %16922 = vst [vmem:[#allocation17_spill] sm:$0xff] %v10058_v8 }
  0xec   :  { %v10023_v54 = vpop.f32.mrf.mxu0  ;;  %v10064_v11 = vpop.f32.mrf.mxu1 }
  0xed   :  { %16911 = vst [vmem:[#allocation6_spill] sm:$0xff] %v10023_v54  ;;  %16924 = vst [vmem:[#allocation19_spill] sm:$0xff] %v10064_v11 }
  0xee   :  { %v10025_v55 = vpop.f32.mrf.mxu0  ;;  %v10070_v14 = vpop.f32.mrf.mxu1 }
  0xef   :  { %16926 = vst [vmem:[#allocation21_spill] sm:$0xff] %v10070_v14 }
  0xf0   :  { %v10027_v56 = vpop.f32.mrf.mxu0  ;;  %v10076_v17 = vpop.f32.mrf.mxu1 }
  0xf1   :  { %16912 = vst [vmem:[#allocation7_spill] sm:$0xff] %v10027_v56  ;;  %16928 = vst [vmem:[#allocation23_spill] sm:$0xff] %v10076_v17 }
  0xf2   :  { %v10029_v57 = vpop.f32.mrf.mxu0  ;;  %v10082_v20 = vpop.f32.mrf.mxu1 }
  0xf3   :  { %16930 = vst [vmem:[#allocation25_spill] sm:$0xff] %v10082_v20 }
  0xf4   :  { %v10031_v58 = vpop.f32.mrf.mxu0  ;;  %v10088_v23 = vpop.f32.mrf.mxu1 }
  0xf5   :  { %16913 = vst [vmem:[#allocation8_spill] sm:$0xff] %v10031_v58  ;;  %16932 = vst [vmem:[#allocation27_spill] sm:$0xff] %v10088_v23 }
  0xf6   :  { %v10035_v60 = vpop.f32.mrf.mxu0  ;;  %v10094_v26 = vpop.f32.mrf.mxu1 }
  0xf7   :  { %16934 = vst [vmem:[#allocation29_spill] sm:$0xff] %v10094_v26 }
  0xf8   :  { %v10037_v61 = vpop.f32.mrf.mxu0  ;;  %v10100_v29 = vpop.f32.mrf.mxu1 }
  0xf9   :  { %16915 = vst [vmem:[#allocation10_spill] sm:$0xff] %v10037_v61  ;;  %16936 = vst [vmem:[#allocation31_spill] sm:$0xff] %v10100_v29 }
  0xfa   :  { %v10041_v63 = vpop.f32.mrf.mxu0  ;;  %v10106_v32 = vpop.f32.mrf.mxu1 }
  0xfc   :  { %v10043_v0 = vpop.f32.mrf.mxu0  ;;  %v10112_v35 = vpop.f32.mrf.mxu1 }
  0xfd   :  { %16917 = vst [vmem:[#allocation12_spill] sm:$0xff] %v10043_v0  ;;  %16940 = vst [vmem:[#allocation35_spill] sm:$0xff] %v10112_v35 }
  0xfe   :  { %v10047_v2 = vpop.f32.mrf.mxu0  ;;  %v10118_v38 = vpop.f32.mrf.mxu1 }
 0x100   :  { %v10050_v4 = vpop.f32.mrf.mxu0  ;;  %v10124_v41 = vpop.f32.mrf.mxu1 }
 0x101   :  { %16919 = vst [vmem:[#allocation14_spill] sm:$0xff] %v10050_v4  ;;  %16943 = vst [vmem:[#allocation38_spill] sm:$0xff] %v10124_v41 }
 0x102   :  { %v10054_v6 = vpop.f32.mrf.mxu0  ;;  %v10130_v44 = vpop.f32.mrf.mxu1 }
 0x104   :  { %v10056_v7 = vpop.f32.mrf.mxu0  ;;  %v10136_v47 = vpop.f32.mrf.mxu1 }
 0x105   :  { %16921 = vst [vmem:[#allocation16_spill] sm:$0xff] %v10056_v7  ;;  %16946 = vst [vmem:[#allocation41_spill] sm:$0xff] %v10136_v47 }
 0x106   :  { %v10060_v9 = vpop.f32.mrf.mxu0  ;;  %v10142_v50 = vpop.f32.mrf.mxu1 }
 0x108   :  { %v10062_v10 = vpop.f32.mrf.mxu0  ;;  %v10148_v52 = vpop.f32.mrf.mxu1 }
 0x109   :  { %16923 = vst [vmem:[#allocation18_spill] sm:$0xff] %v10062_v10  ;;  %16949 = vst [vmem:[#allocation44_spill] sm:$0xff] %v10148_v52 }
 0x10a   :  { %v10066_v12 = vpop.f32.mrf.mxu0  ;;  %v10154_v54 = vpop.f32.mrf.mxu1 }
 0x10c   :  { %v10068_v13 = vpop.f32.mrf.mxu0  ;;  %v10160_v56 = vpop.f32.mrf.mxu1 }
 0x10d   :  { %16925 = vst [vmem:[#allocation20_spill] sm:$0xff] %v10068_v13  ;;  %16952 = vst [vmem:[#allocation47_spill] sm:$0xff] %v10160_v56 }
 0x10e   :  { %v10072_v15 = vpop.f32.mrf.mxu0  ;;  %v10166_v58 = vpop.f32.mrf.mxu1 }
 0x110   :  { %v10074_v16 = vpop.f32.mrf.mxu0  ;;  %v10172_v61 = vpop.f32.mrf.mxu1 }
 0x111   :  { %16927 = vst [vmem:[#allocation22_spill] sm:$0xff] %v10074_v16  ;;  %16955 = vst [vmem:[#allocation50_spill] sm:$0xff] %v10172_v61 }
 0x112   :  { %v10078_v18 = vpop.f32.mrf.mxu0  ;;  %v10178_v0 = vpop.f32.mrf.mxu1 }
 0x114   :  { %v10080_v19 = vpop.f32.mrf.mxu0  ;;  %v10184_v4 = vpop.f32.mrf.mxu1 }
 0x115   :  { %16929 = vst [vmem:[#allocation24_spill] sm:$0xff] %v10080_v19  ;;  %16958 = vst [vmem:[#allocation53_spill] sm:$0xff] %v10184_v4 }
 0x116   :  { %v10084_v21 = vpop.f32.mrf.mxu0  ;;  %v10190_v7 = vpop.f32.mrf.mxu1 }
 0x118   :  { %v10086_v22 = vpop.f32.mrf.mxu0  ;;  %v10198_v10 = vpop.f32.mrf.mxu1 }
 0x119   :  { %16931 = vst [vmem:[#allocation26_spill] sm:$0xff] %v10086_v22  ;;  %16961 = vst [vmem:[#allocation56_spill] sm:$0xff] %v10198_v10 }
 0x11a   :  { %v10090_v24 = vpop.f32.mrf.mxu0  ;;  %v10208_v13 = vpop.f32.mrf.mxu1 }
 0x11c   :  { %v10092_v25 = vpop.f32.mrf.mxu0  ;;  %v10218_v16 = vpop.f32.mrf.mxu1 }
 0x11d   :  { %16933 = vst [vmem:[#allocation28_spill] sm:$0xff] %v10092_v25  ;;  %16966 = vst [vmem:[#allocation61_spill] sm:$0xff] %v10218_v16 }
 0x11e   :  { %v10096_v27 = vpop.f32.mrf.mxu0 }
 0x120   :  { %v10098_v28 = vpop.f32.mrf.mxu0 }
 0x121   :  { %16935 = vst [vmem:[#allocation30_spill] sm:$0xff] %v10098_v28 }
 0x122   :  { %v10102_v30 = vpop.f32.mrf.mxu0 }
 0x123   :  { %16937 = vst [vmem:[#allocation32_spill] sm:$0xff] %v10102_v30 }
 0x124   :  { %v10104_v31 = vpop.f32.mrf.mxu0 }
 0x125   :  { %16938 = vst [vmem:[#allocation33_spill] sm:$0xff] %v10104_v31 }
 0x126   :  { %v10108_v33 = vpop.f32.mrf.mxu0 }
 0x128   :  { %v10110_v34 = vpop.f32.mrf.mxu0 }
 0x129   :  { %16939 = vst [vmem:[#allocation34_spill] sm:$0xff] %v10110_v34 }
 0x12a   :  { %v10114_v36 = vpop.f32.mrf.mxu0 }
 0x12c   :  { %v10116_v37 = vpop.f32.mrf.mxu0 }
 0x12d   :  { %16941 = vst [vmem:[#allocation36_spill] sm:$0xff] %v10116_v37 }
 0x12e   :  { %v10120_v39 = vpop.f32.mrf.mxu0 }
 0x130   :  { %v10122_v40 = vpop.f32.mrf.mxu0 }
 0x131   :  { %16942 = vst [vmem:[#allocation37_spill] sm:$0xff] %v10122_v40 }
 0x132   :  { %v10126_v42 = vpop.f32.mrf.mxu0 }
 0x134   :  { %v10128_v43 = vpop.f32.mrf.mxu0 }
 0x135   :  { %16944 = vst [vmem:[#allocation39_spill] sm:$0xff] %v10128_v43 }
 0x136   :  { %v10132_v45 = vpop.f32.mrf.mxu0 }
 0x138   :  { %v10134_v46 = vpop.f32.mrf.mxu0 }
 0x139   :  { %16945 = vst [vmem:[#allocation40_spill] sm:$0xff] %v10134_v46 }
 0x13a   :  { %v10138_v48 = vpop.f32.mrf.mxu0 }
 0x13c   :  { %v10140_v3 = vpop.f32.mrf.mxu0 }
 0x13d   :  { %16947 = vst [vmem:[#allocation42_spill] sm:$0xff] %v10140_v3 }
 0x13e   :  { %v10144_v11 = vpop.f32.mrf.mxu0 }
 0x140   :  { %v10146_v31 = vpop.f32.mrf.mxu0 }
 0x141   :  { %16948 = vst [vmem:[#allocation43_spill] sm:$0xff] %v10146_v31 }
 0x142   :  { %v10150_v17 = vpop.f32.mrf.mxu0 }
 0x144   :  { %v10152_v34 = vpop.f32.mrf.mxu0 }
 0x145   :  { %16950 = vst [vmem:[#allocation45_spill] sm:$0xff] %v10152_v34 }
 0x146   :  { %v10156_v23 = vpop.f32.mrf.mxu0 }
 0x148   :  { %v10158_v37 = vpop.f32.mrf.mxu0 }
 0x149   :  { %16951 = vst [vmem:[#allocation46_spill] sm:$0xff] %v10158_v37 }
 0x14a   :  { %v10162_v29 = vpop.f32.mrf.mxu0 }
 0x14c   :  { %v10164_v40 = vpop.f32.mrf.mxu0 }
 0x14d   :  { %16953 = vst [vmem:[#allocation48_spill] sm:$0xff] %v10164_v40 }
 0x14e   :  { %v10168_v35 = vpop.f32.mrf.mxu0 }
 0x150   :  { %v10170_v43 = vpop.f32.mrf.mxu0 }
 0x151   :  { %16954 = vst [vmem:[#allocation49_spill] sm:$0xff] %v10170_v43  ;;  %v10228_v43 = vpop.f32.mrf.mxu1 }
 0x152   :  { %v10174_v41 = vpop.f32.mrf.mxu0 }
 0x153   :  { %v10238_v16 = vpop.f32.mrf.mxu1 }
 0x154   :  { %v10176_v46 = vpop.f32.mrf.mxu0  ;;  %16971 = vst [vmem:[#allocation66_spill] sm:$0xff] %v10238_v16 }
 0x155   :  { %16956 = vst [vmem:[#allocation51_spill] sm:$0xff] %v10176_v46  ;;  %v10248_v22 = vpop.f32.mrf.mxu1 }
 0x156   :  { %v10180_v47 = vpop.f32.mrf.mxu0  ;;  %16974 = vst [vmem:[#allocation69_spill] sm:$0xff] %v10248_v22 }
 0x158   :  { %v10182_v3 = vpop.f32.mrf.mxu0 }
 0x159   :  { %16957 = vst [vmem:[#allocation52_spill] sm:$0xff] %v10182_v3  ;;  %v10258_v3 = vpop.f32.mrf.mxu1 }
 0x15a   :  { %v10186_v52 = vpop.f32.mrf.mxu0  ;;  %16976 = vst [vmem:[#allocation71_spill] sm:$0xff] %v10258_v3  ;;  %v16979_v3 = vmov 1.0  }
 0x15b   :  { %v10268_v25 = vpop.f32.mrf.mxu1 }
 0x15c   :  { %v10188_v31 = vpop.f32.mrf.mxu0  ;;  %16978 = vst [vmem:[#allocation73_spill] sm:$0xff] %v10268_v25 }
 0x15d   :  { %16959 = vst [vmem:[#allocation54_spill] sm:$0xff] %v10188_v31 }
 0x15e   :  { %v10192_v56 = vpop.f32.mrf.mxu0 }
 0x15f   :  { %7995 = vmatprep.subr.mxu1 %v10192_v56 }
 0x160   :  { %v10195_v34 = vpop.f32.mrf.mxu0  ;;  %7996 = vmatpush3.msra.mxu1 %v10096_v27 }
 0x161   :  { %16960 = vst [vmem:[#allocation55_spill] sm:$0xff] %v10195_v34  ;;  %7997 = vmatprep.subr.mxu1 %v10186_v52 }
 0x162   :  { %v10201_v61 = vpop.f32.mrf.mxu0  ;;  %7998 = vmatpush3.msra.mxu1 %v10090_v24 }
 0x163   :  { %16962 = vst [vmem:[#allocation57_spill] sm:$0xff] %v10201_v61  ;;  %7999 = vmatprep.subr.mxu1 %v10180_v47 }
 0x164   :  { %v10205_v37 = vpop.f32.mrf.mxu0  ;;  %8000 = vmatpush3.msra.mxu1 %v10084_v21 }
 0x165   :  { %16963 = vst [vmem:[#allocation58_spill] sm:$0xff] %v10205_v37  ;;  %8001 = vmatprep.subr.mxu1 %v10174_v41 }
 0x166   :  { %v10211_v4 = vpop.f32.mrf.mxu0  ;;  %8002 = vmatpush3.msra.mxu1 %v10078_v18 }
 0x167   :  { %16964 = vst [vmem:[#allocation59_spill] sm:$0xff] %v10211_v4  ;;  %8003 = vmatprep.subr.mxu1 %v10168_v35 }
 0x168   :  { %v10215_v40 = vpop.f32.mrf.mxu0  ;;  %8004 = vmatpush3.msra.mxu1 %v10072_v15 }
 0x169   :  { %16965 = vst [vmem:[#allocation60_spill] sm:$0xff] %v10215_v40  ;;  %8005 = vmatprep.subr.mxu1 %v10162_v29 }
 0x16a   :  { %v10221_v37 = vpop.f32.mrf.mxu0  ;;  %8006 = vmatpush3.msra.mxu1 %v10066_v12 }
 0x16b   :  { %16967 = vst [vmem:[#allocation62_spill] sm:$0xff] %v10221_v37  ;;  %8007 = vmatprep.subr.mxu1 %v10156_v23 }
 0x16c   :  { %v10225_v10 = vpop.f32.mrf.mxu0  ;;  %8008 = vmatpush3.msra.mxu1 %v10060_v9 }
 0x16d   :  { %16968 = vst [vmem:[#allocation63_spill] sm:$0xff] %v10225_v10  ;;  %8009 = vmatprep.subr.mxu1 %v10150_v17 }
 0x16e   :  { %v10231_v40 = vpop.f32.mrf.mxu0  ;;  %8010 = vmatpush3.msra.mxu1 %v10054_v6 }
 0x16f   :  { %16969 = vst [vmem:[#allocation64_spill] sm:$0xff] %v10231_v40  ;;  %8011 = vmatprep.subr.mxu1 %v10144_v11 }
 0x170   :  { %v10235_v19 = vpop.f32.mrf.mxu0  ;;  %8012 = vmatpush3.msra.mxu1 %v10047_v2 }
 0x171   :  { %16970 = vst [vmem:[#allocation65_spill] sm:$0xff] %v10235_v19  ;;  %8013 = vmatprep.subr.mxu1 %v10138_v48 }
 0x172   :  { %v10241_v10 = vpop.f32.mrf.mxu0  ;;  %8014 = vmatpush3.msra.mxu1 %v10041_v63 }
 0x173   :  { %16972 = vst [vmem:[#allocation67_spill] sm:$0xff] %v10241_v10  ;;  %8015 = vmatprep.subr.mxu1 %v10132_v45 }
 0x174   :  { %v10245_v46 = vpop.f32.mrf.mxu0  ;;  %8016 = vmatpush3.msra.mxu1 %v10035_v60 }
 0x175   :  { %16973 = vst [vmem:[#allocation68_spill] sm:$0xff] %v10245_v46  ;;  %8017 = vmatprep.subr.mxu1 %v10126_v42 }
 0x176   :  { %v10251_v19 = vpop.f32.mrf.mxu0  ;;  %8018 = vmatpush3.msra.mxu1 %v10029_v57 }
 0x177   :  { %8019 = vmatprep.subr.mxu1 %v10120_v39 }
 0x178   :  { %v10255_v16 = vpop.f32.mrf.mxu0  ;;  %8020 = vmatpush3.msra.mxu1 %v10025_v55 }
 0x179   :  { %16975 = vst [vmem:[#allocation70_spill] sm:$0xff] %v10255_v16  ;;  %8021 = vmatprep.subr.mxu1 %v10114_v36 }
 0x17a   :  { %v10261_v46 = vpop.f32.mrf.mxu0  ;;  %8022 = vmatpush3.msra.mxu1 %v10021_v53 }
 0x17b   :  { %8023 = vmatprep.subr.mxu1 %v10108_v33 }
 0x17c   :  { %v10265_v62 = vpop.f32.mrf.mxu0  ;;  %8024 = vmatpush3.msra.mxu1 %v10017_v51 }
 0x17d   :  { %16977 = vst [vmem:[#allocation72_spill] sm:$0xff] %v10265_v62  ;;  %8025 = vmatprep.subr.mxu1 %v10102_v30 }
 0x17e   :  { %v10271_v16 = vpop.f32.mrf.mxu0  ;;  %8026 = vmatpush3.msra.mxu1 %v10013_v49 }
 0x17f   :  { %8030 = vmatprep.subr.mxu1 %v10268_v25  ;;  %806 = vmatmul.mubr.f32.vlgmr.msra.gmra.mxu1 %v16979_v3 }
 0x180   :  { %v10276_v31 = vpop.f32.mrf.mxu0  ;;  %8031 = vmatpush3.msra.mxu1 %v10045_v1  ;;  %875 = vmatprep.mubr.f32.mxu1 %v16979_v3 }
 0x181   :  { %16980 = vst [vmem:[#allocation74_spill] sm:$0xff] %v10276_v31  ;;  %8032 = vmatprep.subr.mxu1 %v10248_v22 }
 0x182   :  { %v10281_v62 = vpop.f32.mrf.mxu0  ;;  %8033 = vmatpush3.msra.mxu1 %v10033_v59 }
 0x183   :  { %8034 = vmatprep.subr.mxu1 %v10228_v43 }
 0x184   :  { %v10285_v5 = vpop.f32.mrf.mxu0 }
 0x185   :  { %16981 = vst [vmem:[#allocation75_spill] sm:$0xff] %v10285_v5  ;;  %v10334_v5 = vpop.f32.mrf.mxu1 }
 0x186   :  { %v10287_v28 = vpop.f32.mrf.mxu0  ;;  %16986 = vst [vmem:[#allocation80_spill] sm:$0xff] %v10334_v5 }
 0x188   :  { %v10289_v34 = vpop.f32.mrf.mxu0 }
 0x189   :  { %16982 = vst [vmem:[#allocation76_spill] sm:$0xff] %v10289_v34 }
 0x18a   :  { %v10291_v25 = vpop.f32.mrf.mxu0 }
 0x18c   :  { %v10293_v31 = vpop.f32.mrf.mxu0 }
 0x18d   :  { %16983 = vst [vmem:[#allocation77_spill] sm:$0xff] %v10293_v31 }
 0x18e   :  { %v10295_v1 = vpop.f32.mrf.mxu0 }
 0x190   :  { %v10297_v49 = vpop.f32.mrf.mxu0 }
 0x191   :  { %16984 = vst [vmem:[#allocation78_spill] sm:$0xff] %v10297_v49 }
 0x192   :  { %v10299_v22 = vpop.f32.mrf.mxu0 }
 0x194   :  { %v10301_v30 = vpop.f32.mrf.mxu0 }
 0x195   :  { %16985 = vst [vmem:[#allocation79_spill] sm:$0xff] %v10301_v30 }
 0x196   :  { %v10303_v59 = vpop.f32.mrf.mxu0 }
 0x197   :  { %8035 = vmatpush3.msra.mxu1 %v10303_v59 }
 0x198   :  { %8036 = vmatprep.subr.mxu1 %v10208_v13 }
 0x199   :  { %8037 = vmatpush3.msra.mxu1 %v10299_v22 }
 0x19a   :  { %8038 = vmatprep.subr.mxu1 %v10190_v7 }
 0x19b   :  { %8039 = vmatpush3.msra.mxu1 %v10295_v1 }
 0x19c   :  { %8040 = vmatprep.subr.mxu1 %v10178_v0 }
 0x19d   :  { %8041 = vmatpush3.msra.mxu1 %v10291_v25 }
 0x19e   :  { %8042 = vmatprep.subr.mxu1 %v10166_v58 }
 0x19f   :  { %8043 = vmatpush3.msra.mxu1 %v10287_v28 }
 0x1a0   :  { %8044 = vmatprep.subr.mxu1 %v10154_v54 }
 0x1a1   :  { %8045 = vmatpush3.msra.mxu1 %v10281_v62 }
 0x1a2   :  { %8046 = vmatprep.subr.mxu1 %v10142_v50 }
 0x1a3   :  { %8047 = vmatpush3.msra.mxu1 %v10271_v16 }
 0x1a4   :  { %8048 = vmatprep.subr.mxu1 %v10130_v44 }
 0x1a5   :  { %8049 = vmatpush3.msra.mxu1 %v10261_v46 }
 0x1a6   :  { %8050 = vmatprep.subr.mxu1 %v10118_v38 }
 0x1a7   :  { %8051 = vmatpush3.msra.mxu1 %v10251_v19 }
 0x1a8   :  { %8052 = vmatprep.subr.mxu1 %v10106_v32 }
 0x1a9   :  { %8053 = vmatpush3.msra.mxu1 %v10241_v10 }
 0x1aa   :  { %8054 = vmatprep.subr.mxu1 %v10094_v26 }
 0x1ab   :  { %8055 = vmatpush3.msra.mxu1 %v10231_v40 }
 0x1ac   :  { %8056 = vmatprep.subr.mxu1 %v10082_v20 }
 0x1ad   :  { %8057 = vmatpush3.msra.mxu1 %v10221_v37  ;;  %v882_v37 = vlaneseq }
 0x1ae   :  { %8058 = vmatprep.subr.mxu1 %v10070_v14 }
 0x1af   :  { %8059 = vmatpush3.msra.mxu1 %v10211_v4  ;;  %v883_v26 = vshrl.u32 %v882_v37, 7 }
 0x1b0   :  { %8060 = vmatprep.subr.mxu1 %v10058_v8 }
 0x1b1   :  { %8061 = vmatpush3.msra.mxu1 %v10201_v61  ;;  %v10336_v10 = vsub.s32 0, %v883_v26 }
 0x1b2   :  { %876 = vmatmul.mubr.f32.vlgmr.msra.gmra.mxu1 %v16979_v3 }
 0x1b3   :  { %1078 = vmatprep.mubr.f32.mxu1 %v16979_v3  ;;  %16987 = vst [vmem:[#allocation81_spill] sm:$0xff] %v10336_v10 }
 0x23f   :  { %v8027_v34 = vpop.f32.mrf.mxu1 }
 0x241   :  { %v8028_v31 = vpop.f32.mrf.mxu1 }
 0x242   :  { %v8029_v40 = vadd.f32 %v8028_v31, %v8027_v34 }
 0x272   :  { %v8062_v49 = vpop.f32.mrf.mxu1 }
 0x274   :  { %v8063_v30 = vpop.f32.mrf.mxu1 }
 0x275   :  { %v8064_v20 = vadd.f32 %v8063_v30, %v8062_v49 }
 0x277   :  { %v878_v14 = vadd.f32 %v8064_v20, %v8029_v40 }
 0x279   :  { %v881_v4 = vmul.f32 0.001953125, %v878_v14 }
 0x27b   :  { %v10339_v61 = vrot.slane %v881_v4, %v10336_v10 }
 0x27d   :  { %v10343_v8 = vsub.f32 %v10096_v27, %v10339_v61  ;;  %v10347_v5 = vsub.f32 %v10192_v56, %v10339_v61  ;;  %v10351_v49 = vsub.f32 %v10186_v52, %v10339_v61  ;;  %v10355_v14 = vsub.f32 %v10090_v24, %v10339_v61 }
 0x27e   :  { %v10361_v20 = vsub.f32 %v10180_v47, %v10339_v61  ;;  %v10367_v56 = vsub.f32 %v10084_v21, %v10339_v61  ;;  %v10371_v52 = vsub.f32 %v10174_v41, %v10339_v61  ;;  %v10377_v27 = vsub.f32 %v10078_v18, %v10339_v61 }
 0x27f   :  { %16988 = vst [vmem:[#allocation82_spill] sm:$0xff] %v10347_v5  ;;  %16989 = vst [vmem:[#allocation83_spill] sm:$0xff] %v10351_v49  ;;  %v965_v4 = vmul.f32 %v10343_v8, %v10343_v8  ;;  %v981_v26 = vmul.f32 %v10347_v5, %v10347_v5  ;;  %v980_v24 = vmul.f32 %v10351_v49, %v10351_v49 }
 0x280   :  { %v964_v30 = vmul.f32 %v10355_v14, %v10355_v14  ;;  %v10383_v21 = vsub.f32 %v10168_v35, %v10339_v61  ;;  %v979_v31 = vmul.f32 %v10361_v20, %v10361_v20  ;;  %v10389_v34 = vsub.f32 %v10072_v15, %v10339_v61 }
 0x281   :  { %8065 = vmatprep.subr.mxu1 %v981_v26  ;;  %v963_v18 = vmul.f32 %v10367_v56, %v10367_v56  ;;  %v10395_v37 = vsub.f32 %v10162_v29, %v10339_v61  ;;  %v978_v35 = vmul.f32 %v10371_v52, %v10371_v52  ;;  %v10401_v40 = vsub.f32 %v10066_v12, %v10339_v61 }
 0x282   :  { %8066 = vmatpush3.msra.mxu1 %v965_v4  ;;  %v962_v15 = vmul.f32 %v10377_v27, %v10377_v27  ;;  %v10407_v41 = vsub.f32 %v10156_v23, %v10339_v61  ;;  %v977_v29 = vmul.f32 %v10383_v21, %v10383_v21  ;;  %v10413_v47 = vsub.f32 %v10060_v9, %v10339_v61 }
 0x283   :  { %8067 = vmatprep.subr.mxu1 %v980_v24  ;;  %v961_v12 = vmul.f32 %v10389_v34, %v10389_v34  ;;  %v10419_v4 = vsub.f32 %v10150_v17, %v10339_v61  ;;  %v976_v23 = vmul.f32 %v10395_v37, %v10395_v37  ;;  %v10425_v26 = vsub.f32 %v10054_v6, %v10339_v61 }
 0x284   :  { %8068 = vmatpush3.msra.mxu1 %v964_v30  ;;  %v960_v9 = vmul.f32 %v10401_v40, %v10401_v40  ;;  %v10431_v24 = vsub.f32 %v10144_v11, %v10339_v61  ;;  %v975_v17 = vmul.f32 %v10407_v41, %v10407_v41  ;;  %v10437_v30 = vsub.f32 %v10047_v2, %v10339_v61 }
 0x285   :  { %8069 = vmatprep.subr.mxu1 %v979_v31  ;;  %v959_v6 = vmul.f32 %v10413_v47, %v10413_v47  ;;  %v10443_v31 = vsub.f32 %v10138_v48, %v10339_v61  ;;  %v974_v11 = vmul.f32 %v10419_v4, %v10419_v4  ;;  %v958_v2 = vmul.f32 %v10425_v26, %v10425_v26 }
 0x286   :  { %8070 = vmatpush3.msra.mxu1 %v963_v18  ;;  %v10449_v18 = vsub.f32 %v10041_v63, %v10339_v61  ;;  %v973_v48 = vmul.f32 %v10431_v24, %v10431_v24  ;;  %v957_v63 = vmul.f32 %v10437_v30, %v10437_v30 }
 0x287   :  { %8071 = vmatprep.subr.mxu1 %v978_v35  ;;  %v10455_v35 = vsub.f32 %v10132_v45, %v10339_v61  ;;  %v972_v45 = vmul.f32 %v10443_v31, %v10443_v31 }
 0x288   :  { %8072 = vmatpush3.msra.mxu1 %v962_v15  ;;  %v10461_v15 = vsub.f32 %v10035_v60, %v10339_v61  ;;  %v956_v60 = vmul.f32 %v10449_v18, %v10449_v18 }
 0x289   :  { %8073 = vmatprep.subr.mxu1 %v977_v29  ;;  %v10467_v29 = vsub.f32 %v10126_v42, %v10339_v61  ;;  %v971_v42 = vmul.f32 %v10455_v35, %v10455_v35 }
 0x28a   :  { %8074 = vmatpush3.msra.mxu1 %v961_v12  ;;  %v10473_v12 = vsub.f32 %v10029_v57, %v10339_v61  ;;  %v955_v57 = vmul.f32 %v10461_v15, %v10461_v15 }
 0x28b   :  { %8075 = vmatprep.subr.mxu1 %v976_v23  ;;  %v10479_v23 = vsub.f32 %v10120_v39, %v10339_v61  ;;  %v970_v39 = vmul.f32 %v10467_v29, %v10467_v29 }
 0x28c   :  { %8076 = vmatpush3.msra.mxu1 %v960_v9  ;;  %v10485_v9 = vsub.f32 %v10025_v55, %v10339_v61  ;;  %v954_v55 = vmul.f32 %v10473_v12, %v10473_v12 }
 0x28d   :  { %8077 = vmatprep.subr.mxu1 %v975_v17  ;;  %v10491_v17 = vsub.f32 %v10114_v36, %v10339_v61  ;;  %v969_v36 = vmul.f32 %v10479_v23, %v10479_v23 }
 0x28e   :  { %8078 = vmatpush3.msra.mxu1 %v959_v6  ;;  %v10497_v6 = vsub.f32 %v10021_v53, %v10339_v61  ;;  %v953_v53 = vmul.f32 %v10485_v9, %v10485_v9 }
 0x28f   :  { %8079 = vmatprep.subr.mxu1 %v974_v11  ;;  %v10503_v11 = vsub.f32 %v10108_v33, %v10339_v61  ;;  %v968_v33 = vmul.f32 %v10491_v17, %v10491_v17 }
 0x290   :  { %8080 = vmatpush3.msra.mxu1 %v958_v2  ;;  %v10509_v2 = vsub.f32 %v10017_v51, %v10339_v61  ;;  %v952_v51 = vmul.f32 %v10497_v6, %v10497_v6 }
 0x291   :  { %8081 = vmatprep.subr.mxu1 %v973_v48  ;;  %v16990_v48 = vld [vmem:[#allocation32_spill] sm:$0xff] }
 0x292   :  { %8082 = vmatpush3.msra.mxu1 %v957_v63  ;;  %v10515_v63 = vsub.f32 %v16990_v48, %v10339_v61 }
 0x293   :  { %8083 = vmatprep.subr.mxu1 %v972_v45  ;;  %v16991_v45 = vld [vmem:[#allocation3_spill] sm:$0xff] }
 0x294   :  { %8084 = vmatpush3.msra.mxu1 %v956_v60  ;;  %v10521_v60 = vsub.f32 %v16991_v45, %v10339_v61  ;;  %v16995_v45 = vld [vmem:[#allocation69_spill] sm:$0xff] }
 0x295   :  { %8085 = vmatprep.subr.mxu1 %v971_v42  ;;  %v16992_v42 = vld [vmem:[#allocation73_spill] sm:$0xff]  ;;  %v10539_v5 = vsub.f32 %v16995_v45, %v10339_v61  ;;  %v10557_v45 = vsub.f32 %v10303_v59, %v10339_v61 }
 0x296   :  { %8086 = vmatpush3.msra.mxu1 %v955_v57  ;;  %v10527_v57 = vsub.f32 %v16992_v42, %v10339_v61  ;;  %v16997_v42 = vld [vmem:[#allocation9_spill] sm:$0xff] }
 0x297   :  { %8087 = vmatprep.subr.mxu1 %v970_v39  ;;  %v967_v39 = vmul.f32 %v10503_v11, %v10503_v11  ;;  %16996 = vst [vmem:[#allocation3_spill] sm:$0xff] %v10539_v5  ;;  %v10545_v49 = vsub.f32 %v16997_v42, %v10339_v61  ;;  %v10563_v42 = vsub.f32 %v10208_v13, %v10339_v61 }
 0x298   :  { %8088 = vmatpush3.msra.mxu1 %v954_v55  ;;  %16993 = vst [vmem:[#allocation32_spill] sm:$0xff] %v10527_v57  ;;  %v16994_v55 = vld [vmem:[#allocation13_spill] sm:$0xff]  ;;  %v10577_v13 = vsub.f32 %v10190_v7, %v10339_v61 }
 0x299   :  { %8089 = vmatprep.subr.mxu1 %v969_v36  ;;  %v10533_v48 = vsub.f32 %v16994_v55, %v10339_v61  ;;  %v951_v36 = vmul.f32 %v10509_v2, %v10509_v2  ;;  %v10551_v55 = vsub.f32 %v10228_v43, %v10339_v61  ;;  %16999 = vst [vmem:[#allocation13_spill] sm:$0xff] %v10563_v42 }
 0x29a   :  { %8090 = vmatpush3.msra.mxu1 %v953_v53  ;;  %v966_v53 = vmul.f32 %v10515_v63, %v10515_v63  ;;  %v1012_v43 = vmul.f32 %v10539_v5, %v10539_v5  ;;  %v996_v59 = vmul.f32 %v10545_v49, %v10545_v49  ;;  %17000 = vst [vmem:[#allocation69_spill] sm:$0xff] %v10577_v13 }
 0x29b   :  { %8091 = vmatprep.subr.mxu1 %v968_v33  ;;  %v950_v33 = vmul.f32 %v10521_v60, %v10521_v60  ;;  %16998 = vst [vmem:[#allocation73_spill] sm:$0xff] %v10551_v55  ;;  %v1010_v7 = vmul.f32 %v10563_v42, %v10563_v42 }
 0x29c   :  { %8092 = vmatpush3.msra.mxu1 %v952_v51  ;;  %v1013_v51 = vmul.f32 %v10527_v57, %v10527_v57 }
 0x29d   :  { %8093 = vmatprep.subr.mxu1 %v967_v39  ;;  %v997_v39 = vmul.f32 %v10533_v48, %v10533_v48 }
 0x29e   :  { %8094 = vmatpush3.msra.mxu1 %v951_v36  ;;  %v10570_v36 = vsub.f32 %v10299_v22, %v10339_v61  ;;  %v995_v22 = vmul.f32 %v10557_v45, %v10557_v45 }
 0x29f   :  { %8095 = vmatprep.subr.mxu1 %v966_v53  ;;  %v1011_v53 = vmul.f32 %v10551_v55, %v10551_v55 }
 0x2a0   :  { %8096 = vmatpush3.msra.mxu1 %v950_v33  ;;  %v10583_v33 = vsub.f32 %v10295_v1, %v10339_v61  ;;  %v994_v1 = vmul.f32 %v10570_v36, %v10570_v36 }
 0x2a1   :  { %1079 = vmatmul.mubr.f32.vlgmr.msra.gmra.mxu1 %v16979_v3  ;;  %8100 = vmatprep.subr.mxu1 %v1013_v51  ;;  %v10589_v51 = vsub.f32 %v10178_v0, %v10339_v61  ;;  %v1009_v0 = vmul.f32 %v10577_v13, %v10577_v13 }
 0x2a2   :  { %8101 = vmatpush3.msra.mxu1 %v997_v39  ;;  %1148 = vmatprep.mubr.f32.mxu1 %v16979_v3  ;;  %v10595_v39 = vsub.f32 %v10291_v25, %v10339_v61  ;;  %v993_v25 = vmul.f32 %v10583_v33, %v10583_v33 }
 0x2a3   :  { %8102 = vmatprep.subr.mxu1 %v1012_v43  ;;  %17001 = vst [vmem:[#allocation9_spill] sm:$0xff] %v10589_v51  ;;  %v10601_v43 = vsub.f32 %v10166_v58, %v10339_v61  ;;  %v1008_v58 = vmul.f32 %v10589_v51, %v10589_v51 }
 0x2a4   :  { %8103 = vmatpush3.msra.mxu1 %v996_v59  ;;  %v10607_v59 = vsub.f32 %v10287_v28, %v10339_v61  ;;  %v992_v28 = vmul.f32 %v10595_v39, %v10595_v39 }
 0x2a5   :  { %8104 = vmatprep.subr.mxu1 %v1011_v53  ;;  %17002 = vst [vmem:[#allocation84_spill] sm:$0xff] %v10601_v43  ;;  %v10613_v53 = vsub.f32 %v10154_v54, %v10339_v61  ;;  %v1007_v54 = vmul.f32 %v10601_v43, %v10601_v43 }
 0x2a6   :  { %8105 = vmatpush3.msra.mxu1 %v995_v22  ;;  %v10619_v22 = vsub.f32 %v10281_v62, %v10339_v61  ;;  %v991_v62 = vmul.f32 %v10607_v59, %v10607_v59 }
 0x2a7   :  { %8106 = vmatprep.subr.mxu1 %v1010_v7  ;;  %17003 = vst [vmem:[#allocation85_spill] sm:$0xff] %v10613_v53  ;;  %v10625_v7 = vsub.f32 %v10142_v50, %v10339_v61  ;;  %v1006_v50 = vmul.f32 %v10613_v53, %v10613_v53 }
 0x2a8   :  { %8107 = vmatpush3.msra.mxu1 %v994_v1  ;;  %v10631_v1 = vsub.f32 %v10271_v16, %v10339_v61  ;;  %v990_v16 = vmul.f32 %v10619_v22, %v10619_v22 }
 0x2a9   :  { %8108 = vmatprep.subr.mxu1 %v1009_v0  ;;  %17004 = vst [vmem:[#allocation86_spill] sm:$0xff] %v10625_v7  ;;  %v10637_v0 = vsub.f32 %v10130_v44, %v10339_v61  ;;  %v1005_v44 = vmul.f32 %v10625_v7, %v10625_v7 }
 0x2aa   :  { %8109 = vmatpush3.msra.mxu1 %v993_v25  ;;  %v10643_v25 = vsub.f32 %v10261_v46, %v10339_v61  ;;  %v989_v46 = vmul.f32 %v10631_v1, %v10631_v1 }
 0x2ab   :  { %8110 = vmatprep.subr.mxu1 %v1008_v58  ;;  %17005 = vst [vmem:[#allocation87_spill] sm:$0xff] %v10637_v0  ;;  %v10649_v58 = vsub.f32 %v10118_v38, %v10339_v61  ;;  %v1004_v38 = vmul.f32 %v10637_v0, %v10637_v0 }
 0x2ac   :  { %8111 = vmatpush3.msra.mxu1 %v992_v28  ;;  %v10655_v28 = vsub.f32 %v10251_v19, %v10339_v61  ;;  %v988_v19 = vmul.f32 %v10643_v25, %v10643_v25 }
 0x2ad   :  { %8112 = vmatprep.subr.mxu1 %v1007_v54  ;;  %17006 = vst [vmem:[#allocation88_spill] sm:$0xff] %v10649_v58  ;;  %v10661_v54 = vsub.f32 %v10106_v32, %v10339_v61  ;;  %v1003_v32 = vmul.f32 %v10649_v58, %v10649_v58 }
 0x2ae   :  { %8113 = vmatpush3.msra.mxu1 %v991_v62  ;;  %v17008_v62 = vld [vmem:[#allocation67_spill] sm:$0xff] }
 0x2af   :  { %8114 = vmatprep.subr.mxu1 %v1006_v50  ;;  %17007 = vst [vmem:[#allocation89_spill] sm:$0xff] %v10661_v54  ;;  %v10667_v57 = vsub.f32 %v17008_v62, %v10339_v61  ;;  %v17009_v50 = vld [vmem:[#allocation29_spill] sm:$0xff] }
 0x2b0   :  { %8115 = vmatpush3.msra.mxu1 %v990_v16  ;;  %v10673_v5 = vsub.f32 %v17009_v50, %v10339_v61  ;;  %v17011_v16 = vld [vmem:[#allocation64_spill] sm:$0xff]  ;;  %v17012_v62 = vld [vmem:[#allocation25_spill] sm:$0xff]  ;;  %v17014_v50 = vld [vmem:[#allocation62_spill] sm:$0xff] }
 0x2b1   :  { %8116 = vmatprep.subr.mxu1 %v1005_v44  ;;  %v10679_v55 = vsub.f32 %v17011_v16, %v10339_v61  ;;  %v987_v44 = vmul.f32 %v10655_v28, %v10655_v28  ;;  %v10685_v42 = vsub.f32 %v17012_v62, %v10339_v61  ;;  %v10691_v13 = vsub.f32 %v17014_v50, %v10339_v61  ;;  %v17015_v16 = vld [vmem:[#allocation21_spill] sm:$0xff]  ;;  %v17016_v62 = vld [vmem:[#allocation59_spill] sm:$0xff] }
 0x2b2   :  { %8117 = vmatpush3.msra.mxu1 %v989_v46  ;;  %17010 = vst [vmem:[#allocation67_spill] sm:$0xff] %v10673_v5  ;;  %v1002_v46 = vmul.f32 %v10661_v54, %v10661_v54  ;;  %v10697_v51 = vsub.f32 %v17015_v16, %v10339_v61  ;;  %v10703_v43 = vsub.f32 %v17016_v62, %v10339_v61  ;;  %v17017_v50 = vld [vmem:[#allocation17_spill] sm:$0xff] }
 0x2b3   :  { %8118 = vmatprep.subr.mxu1 %v1004_v38  ;;  %17013 = vst [vmem:[#allocation29_spill] sm:$0xff] %v10685_v42  ;;  %v986_v38 = vmul.f32 %v10667_v57, %v10667_v57  ;;  %v10709_v53 = vsub.f32 %v17017_v50, %v10339_v61  ;;  %v17018_v16 = vld [vmem:[#allocation57_spill] sm:$0xff] }
 0x2b4   :  { %8119 = vmatpush3.msra.mxu1 %v988_v19  ;;  %v1001_v19 = vmul.f32 %v10673_v5, %v10673_v5  ;;  %v10715_v7 = vsub.f32 %v17018_v16, %v10339_v61  ;;  %v999_v62 = vmul.f32 %v10697_v51, %v10697_v51  ;;  %v9693_v16 = vld [vmem:[%s16458_s4 + $0x70] sm:$0xff]  }
 0x2b5   :  { %8120 = vmatprep.subr.mxu1 %v1003_v32  ;;  %v985_v32 = vmul.f32 %v10679_v55, %v10679_v55  ;;  %v998_v50 = vmul.f32 %v10709_v53, %v10709_v53 }
 0x2b6   :  { %8121 = vmatpush3.msra.mxu1 %v987_v44  ;;  %v1000_v44 = vmul.f32 %v10685_v42, %v10685_v42  ;;  %v982_v61 = vmul.f32 %v10715_v7, %v10715_v7 }
 0x2b7   :  { %8122 = vmatprep.subr.mxu1 %v1002_v46  ;;  %v984_v46 = vmul.f32 %v10691_v13, %v10691_v13 }
 0x2b8   :  { %8123 = vmatpush3.msra.mxu1 %v986_v38  ;;  %v983_v38 = vmul.f32 %v10703_v43, %v10703_v43 }
 0x2b9   :  { %8124 = vmatprep.subr.mxu1 %v1001_v19  ;;  %v9690_v19 = vld [vmem:[%s16458_s4 + $0x38] sm:$0xff]  }
 0x2ba   :  { %8125 = vmatpush3.msra.mxu1 %v985_v32  ;;  %8895 = vmatprep.subr.bf16.mxu0 %v9690_v19  ;;  %v9691_v32 = vld [vmem:[%s16458_s4 + $0x78] sm:$0xff]  }
 0x2bb   :  { %8126 = vmatprep.subr.mxu1 %v1000_v44  ;;  %8896 = vmatpush3.bf16.msra.mxu0 %v9690_v19  ;;  %v9692_v44 = vld [vmem:[%s16458_s4 + $0x30] sm:$0xff]   ;;  %v9699_v19 = vld [vmem:[%s16458_s4 + $0x58] sm:$0xff]  }
 0x2bc   :  { %8127 = vmatpush3.msra.mxu1 %v984_v46  ;;  %8897 = vmatprep.subr.bf16.mxu0 %v9692_v44  ;;  %v9694_v46 = vld [vmem:[%s16458_s4 + $0x28] sm:$0xff]  }
 0x2bd   :  { %8128 = vmatprep.subr.mxu1 %v999_v62  ;;  %v9695_v62 = vld [vmem:[%s16458_s4 + $0x68] sm:$0xff]  }
 0x2be   :  { %8129 = vmatpush3.msra.mxu1 %v983_v38  ;;  %v9696_v38 = vld [vmem:[%s16458_s4 + $0x20] sm:$0xff]  }
 0x2bf   :  { %8130 = vmatprep.subr.mxu1 %v998_v50  ;;  %8898 = vmatpush3.bf16.msra.mxu0 %v9692_v44  ;;  %v9697_v50 = vld [vmem:[%s16458_s4 + $0x60] sm:$0xff]   ;;  %v10764_v44 = vld [vmem:[%s16458_s4 + $0x50] sm:$0xff]  }
 0x2c0   :  { %8131 = vmatpush3.msra.mxu1 %v982_v61  ;;  %8899 = vmatprep.subr.bf16.mxu0 %v9694_v46  ;;  %v9698_v61 = vld [vmem:[%s16458_s4 + $0x18] sm:$0xff]  }
 0x2c1   :  { %1149 = vmatmul.mubr.f32.vlgmr.msra.gmra.mxu1 %v16979_v3  ;;  %8815 = vmatprep.subr.bf16.mxu1 %v9691_v32 }
 0x2c2   :  { %8816 = vmatpush3.bf16.msra.mxu1 %v9691_v32  ;;  %v9700_v32 = vld [vmem:[%s16458_s4 + $0x10] sm:$0xff]  }
 0x2c3   :  { %8817 = vmatprep.subr.bf16.mxu1 %v9693_v16  ;;  %8900 = vmatpush3.bf16.msra.mxu0 %v9694_v46  ;;  %v10774_v46 = vld [vmem:[%s16458_s4 + $0x48] sm:$0xff]  }
 0x2c4   :  { %8901 = vmatprep.subr.bf16.mxu0 %v9696_v38 }
 0x2c6   :  { %8818 = vmatpush3.bf16.msra.mxu1 %v9693_v16  ;;  %v10769_v16 = vld [vmem:[%s16458_s4 + $0x8] sm:$0xff]  }
 0x2c7   :  { %8819 = vmatprep.subr.bf16.mxu1 %v9695_v62  ;;  %8902 = vmatpush3.bf16.msra.mxu0 %v9696_v38  ;;  %v9780_v38 = vmov 0.0  }
 0x2c8   :  { %8903 = vmatprep.subr.bf16.mxu0 %v9698_v61  ;;  %1431 = vst [vmem:[#allocation2] sm:$0xff] %v9780_v38  ;;  %1445 = vst [vmem:[#allocation2 + $0x18] sm:$0x1] %v9780_v38 }
 0x2c9   :  { %1446 = vst [vmem:[#allocation2 + $0x30] sm:$0x1] %v9780_v38  ;;  %1447 = vst [vmem:[#allocation2 + $0x48] sm:$0x1] %v9780_v38 }
 0x2ca   :  { %8820 = vmatpush3.bf16.msra.mxu1 %v9695_v62  ;;  %v10779_v62 = vld [vmem:[%s16458_s4] sm:$0xff]   ;;  %1448 = vst [vmem:[#allocation2 + $0x60] sm:$0x1] %v9780_v38  ;;  %1449 = vst [vmem:[#allocation2 + $0x78] sm:$0x1] %v9780_v38 }
 0x2cb   :  { %8821 = vmatprep.subr.bf16.mxu1 %v9697_v50  ;;  %8904 = vmatpush3.bf16.msra.mxu0 %v9698_v61  ;;  %1450 = vst [vmem:[#allocation2 + $0x90] sm:$0x1] %v9780_v38  ;;  %1451 = vst [vmem:[#allocation2 + $0xa8] sm:$0x1] %v9780_v38  ;;  %v9705_v61 = vld [vmem:[%s16458_s4 + $0x40] sm:$0xff]  }
 0x2cc   :  { %8905 = vmatprep.subr.bf16.mxu0 %v9700_v32  ;;  %1452 = vst [vmem:[#allocation2 + $0xc0] sm:$0x1] %v9780_v38  ;;  %1453 = vst [vmem:[#allocation2 + $0xd8] sm:$0x1] %v9780_v38 }
 0x2cd   :  { %1454 = vst [vmem:[#allocation2 + $0xf0] sm:$0x1] %v9780_v38  ;;  %1455 = vst [vmem:[#allocation2 + $0x108] sm:$0x1] %v9780_v38 }
 0x2ce   :  { %8822 = vmatpush3.bf16.msra.mxu1 %v9697_v50  ;;  %v10783_v50 = vrot.slane %v9780_v38, 1  ;;  %1456 = vst [vmem:[#allocation2 + $0x120] sm:$0x1] %v9780_v38  ;;  %1457 = vst [vmem:[#allocation2 + $0x138] sm:$0x1] %v9780_v38 }
 0x2cf   :  { %8823 = vmatprep.subr.bf16.mxu1 %v9699_v19  ;;  %8906 = vmatpush3.bf16.msra.mxu0 %v9700_v32  ;;  %1458 = vst [vmem:[#allocation2 + $0x150] sm:$0x1] %v9780_v38  ;;  %1459 = vst [vmem:[#allocation2 + $0x168] sm:$0x1] %v9780_v38 }
 0x2d0   :  { %1460 = vst [vmem:[#allocation2 + $0x180] sm:$0x1] %v9780_v38  ;;  %1461 = vst [vmem:[#allocation2 + $0x1c8] sm:$0x1] %v9780_v38  ;;  %8907 = vmatprep.subr.bf16.mxu0 %v10769_v16  ;;  %v10861_v32 = vpack.c.bf16 %v10783_v50, %v10783_v50 }
 0x2d1   :  { %1462 = vst [vmem:[#allocation2 + $0x1e0] sm:$0x1] %v9780_v38  ;;  %1463 = vst [vmem:[#allocation2 + $0x1f8] sm:$0x1] %v9780_v38 }
 0x2d2   :  { %8824 = vmatpush3.bf16.msra.mxu1 %v9699_v19  ;;  %1464 = vst [vmem:[#allocation2 + $0x210] sm:$0x1] %v9780_v38  ;;  %1465 = vst [vmem:[#allocation2 + $0x228] sm:$0x1] %v9780_v38  ;;  %v16562_v19 = vmov 0.0|0.0   ;;  %8831 = vmatprep.mubr.bf16.mxu1 %v10861_v32 }
 0x2d3   :  { %1466 = vst [vmem:[#allocation2 + $0x240] sm:$0x1] %v9780_v38  ;;  %1467 = vst [vmem:[#allocation2 + $0x258] sm:$0x1] %v9780_v38  ;;  %8825 = vmatprep.subr.bf16.mxu1 %v10764_v44  ;;  %8908 = vmatpush3.bf16.msra.mxu0 %v10769_v16 }
 0x2d4   :  { %1468 = vst [vmem:[#allocation2 + $0x270] sm:$0x1] %v9780_v38  ;;  %1469 = vst [vmem:[#allocation2 + $0x288] sm:$0x1] %v9780_v38  ;;  %8909 = vmatprep.subr.bf16.mxu0 %v10779_v62  ;;  %8911 = vmatprep.mubr.bf16.mxu0 %v16562_v19 }
 0x2d5   :  { %1470 = vst [vmem:[#allocation2 + $0x2a0] sm:$0x1] %v9780_v38  ;;  %1471 = vst [vmem:[#allocation2 + $0x2b8] sm:$0x1] %v9780_v38 }
 0x2d6   :  { %1472 = vst [vmem:[#allocation2 + $0x2d0] sm:$0x1] %v9780_v38  ;;  %1473 = vst [vmem:[#allocation2 + $0x2e8] sm:$0x1] %v9780_v38  ;;  %8826 = vmatpush3.bf16.msra.mxu1 %v10764_v44 }
 0x2d7   :  { %1474 = vst [vmem:[#allocation2 + $0x300] sm:$0x1] %v9780_v38  ;;  %1475 = vst [vmem:[#allocation2 + $0x318] sm:$0x1] %v9780_v38  ;;  %8827 = vmatprep.subr.bf16.mxu1 %v10774_v46  ;;  %8910 = vmatpush3.bf16.msra.mxu0 %v10779_v62 }
 0x2d8   :  { %1476 = vst [vmem:[#allocation2 + $0x330] sm:$0x1] %v9780_v38  ;;  %1477 = vst [vmem:[#allocation2 + $0x29] sm:$0x1] %v9780_v38 }
 0x2d9   :  { %1478 = vst [vmem:[#allocation2 + $0x41] sm:$0x1] %v9780_v38  ;;  %1479 = vst [vmem:[#allocation2 + $0x59] sm:$0x1] %v9780_v38 }
 0x2da   :  { %1480 = vst [vmem:[#allocation2 + $0x71] sm:$0x1] %v9780_v38  ;;  %1481 = vst [vmem:[#allocation2 + $0x89] sm:$0x1] %v9780_v38  ;;  %8828 = vmatpush3.bf16.msra.mxu1 %v10774_v46 }
 0x2db   :  { %1482 = vst [vmem:[#allocation2 + $0xa1] sm:$0x1] %v9780_v38  ;;  %1483 = vst [vmem:[#allocation2 + $0xb9] sm:$0x1] %v9780_v38  ;;  %8829 = vmatprep.subr.bf16.mxu1 %v9705_v61 }
 0x2dc   :  { %1484 = vst [vmem:[#allocation2 + $0xd1] sm:$0x1] %v9780_v38  ;;  %1485 = vst [vmem:[#allocation2 + $0xe9] sm:$0x1] %v9780_v38 }
 0x2dd   :  { %1486 = vst [vmem:[#allocation2 + $0x101] sm:$0x1] %v9780_v38  ;;  %1487 = vst [vmem:[#allocation2 + $0x119] sm:$0x1] %v9780_v38 }
 0x2de   :  { %1488 = vst [vmem:[#allocation2 + $0x131] sm:$0x1] %v9780_v38  ;;  %1489 = vst [vmem:[#allocation2 + $0x149] sm:$0x1] %v9780_v38  ;;  %8830 = vmatpush3.bf16.msra.mxu1 %v9705_v61 }
 0x2df   :  { %1490 = vst [vmem:[#allocation2 + $0x161] sm:$0x1] %v9780_v38  ;;  %1491 = vst [vmem:[#allocation2 + $0x179] sm:$0x1] %v9780_v38 }
 0x2e0   :  { %1492 = vst [vmem:[#allocation2 + $0x191] sm:$0x1] %v9780_v38  ;;  %1493 = vst [vmem:[#allocation2 + $0x1d9] sm:$0x1] %v9780_v38 }
 0x2e1   :  { %1494 = vst [vmem:[#allocation2 + $0x1f1] sm:$0x1] %v9780_v38  ;;  %1495 = vst [vmem:[#allocation2 + $0x209] sm:$0x1] %v9780_v38 }
 0x2e2   :  { %1496 = vst [vmem:[#allocation2 + $0x221] sm:$0x1] %v9780_v38  ;;  %1497 = vst [vmem:[#allocation2 + $0x239] sm:$0x1] %v9780_v38 }
 0x2e3   :  { %1498 = vst [vmem:[#allocation2 + $0x251] sm:$0x1] %v9780_v38  ;;  %1499 = vst [vmem:[#allocation2 + $0x269] sm:$0x1] %v9780_v38 }
 0x2e4   :  { %1500 = vst [vmem:[#allocation2 + $0x281] sm:$0x1] %v9780_v38  ;;  %1501 = vst [vmem:[#allocation2 + $0x299] sm:$0x1] %v9780_v38 }
 0x2e5   :  { %1502 = vst [vmem:[#allocation2 + $0x2b1] sm:$0x1] %v9780_v38  ;;  %1503 = vst [vmem:[#allocation2 + $0x2c9] sm:$0x1] %v9780_v38 }
 0x2e6   :  { %1504 = vst [vmem:[#allocation2 + $0x2e1] sm:$0x1] %v9780_v38  ;;  %1505 = vst [vmem:[#allocation2 + $0x2f9] sm:$0x1] %v9780_v38 }
 0x2e7   :  { %1506 = vst [vmem:[#allocation2 + $0x311] sm:$0x1] %v9780_v38  ;;  %1507 = vst [vmem:[#allocation2 + $0x329] sm:$0x1] %v9780_v38 }
 0x2e8   :  { %1508 = vst [vmem:[#allocation2 + $0x341] sm:$0x1] %v9780_v38  ;;  %17019 = vst [vmem:[#allocation64_spill] sm:$0xff] %v10861_v32 }
 0x361   :  { %v8097_v44 = vpop.f32.mrf.mxu1 }
 0x363   :  { %v8098_v16 = vpop.f32.mrf.mxu1 }
 0x364   :  { %v8099_v0 = vadd.f32 %v8098_v16, %v8097_v44  ;;  %v17022_v44 = vld [vmem:[#allocation29_spill] sm:$0xff]  ;;  %v17023_v16 = vld [vmem:[#allocation67_spill] sm:$0xff] }
 0x381   :  { %v8132_v38 = vpop.f32.mrf.mxu1 }
 0x383   :  { %v8133_v3 = vpop.f32.mrf.mxu1 }
 0x384   :  { %v8134_v58 = vadd.f32 %v8133_v3, %v8132_v38  ;;  %v17025_v38 = vld [vmem:[#allocation89_spill] sm:$0xff] }
 0x386   :  { %v1151_v54 = vadd.f32 %v8134_v58, %v8099_v0  ;;  %v17020_v0 = vld [vmem:[#allocation83_spill] sm:$0xff]  ;;  %v17021_v58 = vld [vmem:[#allocation82_spill] sm:$0xff] }
 0x388   :  { %v1154_v19 = vmul.f32 0.001953125, %v1151_v54 }
 0x38a   :  { %v1155_v5 = vadd.f32 1e-05, %v1154_v19 }
 0x38c   :  { %9770 = vrsqrt.f32 %v1155_v5 }
 0x399   :  { %v9771_v50 = vpop.eup %9770 }
 0x39a   :  { %v10867_v42 = vrot.slane %v9771_v50, %v10336_v10  ;;  %v17027_v50 = vld [vmem:[#allocation88_spill] sm:$0xff]  ;;  %v17033_v10 = vld [vmem:[#allocation85_spill] sm:$0xff] }
 0x39c   :  { %v10871_v46 = vmul.f32 %v10867_v42, %v10521_v60  ;;  %v10875_v62 = vmul.f32 %v10867_v42, %v10509_v2  ;;  %v10879_v61 = vmul.f32 %v10867_v42, %v10497_v6  ;;  %v10883_v3 = vmul.f32 %v10867_v42, %v10485_v9 }
 0x39d   :  { %v10887_v5 = vmul.f32 %v10867_v42, %v10473_v12  ;;  %v10891_v60 = vmul.f32 %v10867_v42, %v10461_v15  ;;  %v10895_v2 = vmul.f32 %v10867_v42, %v10449_v18  ;;  %v10899_v6 = vmul.f32 %v10867_v42, %v10437_v30 }
 0x39e   :  { %v10903_v9 = vmul.f32 %v10867_v42, %v10425_v26  ;;  %v10907_v12 = vmul.f32 %v10867_v42, %v10413_v47  ;;  %v10911_v15 = vmul.f32 %v10867_v42, %v10401_v40  ;;  %v10915_v18 = vmul.f32 %v10867_v42, %v10389_v34 }
 0x39f   :  { %v10919_v30 = vmul.f32 %v10867_v42, %v10377_v27  ;;  %v10923_v26 = vmul.f32 %v10867_v42, %v10367_v56  ;;  %v10927_v47 = vmul.f32 %v10867_v42, %v10355_v14  ;;  %v10931_v40 = vmul.f32 %v10867_v42, %v10343_v8 }
 0x3a0   :  { %v10935_v34 = vmul.f32 %v10867_v42, %v10515_v63  ;;  %v10939_v27 = vmul.f32 %v10867_v42, %v10503_v11  ;;  %v10943_v56 = vmul.f32 %v10867_v42, %v10491_v17  ;;  %v10947_v14 = vmul.f32 %v10867_v42, %v10479_v23 }
 0x3a1   :  { %v10951_v8 = vmul.f32 %v10867_v42, %v10467_v29  ;;  %v10955_v63 = vmul.f32 %v10867_v42, %v10455_v35  ;;  %v10959_v11 = vmul.f32 %v10867_v42, %v10443_v31  ;;  %v10963_v17 = vmul.f32 %v10867_v42, %v10431_v24 }
 0x3a2   :  { %v10967_v23 = vmul.f32 %v10867_v42, %v10419_v4  ;;  %v10971_v29 = vmul.f32 %v10867_v42, %v10407_v41  ;;  %v10975_v35 = vmul.f32 %v10867_v42, %v10395_v37  ;;  %v10979_v31 = vmul.f32 %v10867_v42, %v10383_v21 }
 0x3a3   :  { %v10983_v24 = vmul.f32 %v10867_v42, %v10371_v52  ;;  %v10987_v4 = vmul.f32 %v10867_v42, %v10361_v20  ;;  %v10991_v41 = vmul.f32 %v10867_v42, %v17020_v0  ;;  %v10995_v37 = vmul.f32 %v10867_v42, %v17021_v58  ;;  %v17029_v0 = vld [vmem:[#allocation87_spill] sm:$0xff] }
 0x3a4   :  { %v10999_v21 = vmul.f32 %v10867_v42, %v10715_v7  ;;  %v11003_v52 = vmul.f32 %v10867_v42, %v10703_v43  ;;  %v11007_v20 = vmul.f32 %v10867_v42, %v10691_v13  ;;  %v11011_v54 = vmul.f32 %v10867_v42, %v10679_v55 }
 0x3a5   :  { %v11015_v19 = vmul.f32 %v10867_v42, %v10667_v57  ;;  %v11019_v7 = vmul.f32 %v10867_v42, %v10655_v28  ;;  %v11023_v43 = vmul.f32 %v10867_v42, %v10643_v25  ;;  %v11027_v13 = vmul.f32 %v10867_v42, %v10631_v1 }
 0x3a6   :  { %v11031_v55 = vmul.f32 %v10867_v42, %v10619_v22  ;;  %v11035_v57 = vmul.f32 %v10867_v42, %v10607_v59  ;;  %v11039_v28 = vmul.f32 %v10867_v42, %v10595_v39  ;;  %v11043_v25 = vmul.f32 %v10867_v42, %v10583_v33 }
 0x3a7   :  { %v11047_v1 = vmul.f32 %v10867_v42, %v10570_v36  ;;  %v11051_v22 = vmul.f32 %v10867_v42, %v10557_v45  ;;  %v11055_v59 = vmul.f32 %v10867_v42, %v10545_v49  ;;  %v11059_v39 = vmul.f32 %v10867_v42, %v10533_v48  ;;  %v11080_v48 = vld [vmem:[%s16459_s2] ss:$0 sm:$0xff] }
 0x3a8   :  { %v11063_v33 = vmul.f32 %v10867_v42, %v10709_v53  ;;  %v11067_v36 = vmul.f32 %v10867_v42, %v10697_v51  ;;  %v11071_v45 = vmul.f32 %v10867_v42, %v17022_v44  ;;  %v11075_v49 = vmul.f32 %v10867_v42, %v17023_v16  ;;  %v17031_v44 = vld [vmem:[#allocation86_spill] sm:$0xff] }
 0x3a9   :  { %v11084_v53 = vmul.f32 %v10867_v42, %v17025_v38  ;;  %v11088_v51 = vmul.f32 %v10867_v42, %v17027_v50  ;;  %v11092_v58 = vmul.f32 %v10867_v42, %v17029_v0  ;;  %v11096_v16 = vmul.f32 %v10867_v42, %v17031_v44 }
 0x3aa   :  { %17024 = vst [vmem:[#allocation25_spill] sm:$0xff] %v11075_v49  ;;  %v11100_v32 = vmul.f32 %v10867_v42, %v17033_v10  ;;  %v17035_v49 = vld [vmem:[#allocation84_spill] sm:$0xff] }
 0x3ab   :  { %17026 = vst [vmem:[#allocation62_spill] sm:$0xff] %v11084_v53  ;;  %17028 = vst [vmem:[#allocation21_spill] sm:$0xff] %v11088_v51  ;;  %v11104_v38 = vmul.f32 %v10867_v42, %v17035_v49  ;;  %v17037_v53 = vld [vmem:[#allocation9_spill] sm:$0xff] }
 0x3ac   :  { %17030 = vst [vmem:[#allocation59_spill] sm:$0xff] %v11092_v58  ;;  %17032 = vst [vmem:[#allocation17_spill] sm:$0xff] %v11096_v16  ;;  %v11108_v50 = vmul.f32 %v10867_v42, %v17037_v53  ;;  %v17038_v51 = vld [vmem:[#allocation69_spill] sm:$0xff] }
 0x3ad   :  { %17034 = vst [vmem:[#allocation57_spill] sm:$0xff] %v11100_v32  ;;  %17036 = vst [vmem:[#allocation83_spill] sm:$0xff] %v11104_v38  ;;  %v11112_v0 = vmul.f32 %v10867_v42, %v17038_v51  ;;  %v17039_v58 = vld [vmem:[#allocation13_spill] sm:$0xff]  ;;  %v17041_v32 = vld [vmem:[#allocation3_spill] sm:$0xff]  ;;  %v11132_v51 = vmul.f32 %v11080_v48, %v10871_v46  ;;  %v11152_v46 = vmul.f32 %v11080_v48, %v10891_v60 }
 0x3ae   :  { %v11116_v44 = vmul.f32 %v10867_v42, %v17039_v58  ;;  %v17040_v16 = vld [vmem:[#allocation73_spill] sm:$0xff]  ;;  %v11124_v49 = vmul.f32 %v10867_v42, %v17041_v32  ;;  %v17042_v38 = vld [vmem:[#allocation32_spill] sm:$0xff]  ;;  %v11136_v58 = vmul.f32 %v11080_v48, %v10875_v62  ;;  %v11144_v32 = vmul.f32 %v11080_v48, %v10883_v3 }
 0x3af   :  { %v11120_v10 = vmul.f32 %v10867_v42, %v17040_v16  ;;  %v11128_v53 = vmul.f32 %v10867_v42, %v17042_v38  ;;  %v11140_v16 = vmul.f32 %v11080_v48, %v10879_v61  ;;  %v11148_v42 = vmul.f32 %v11080_v48, %v10887_v5 }
 0x3b0   :  { %v11156_v62 = vmul.f32 %v11080_v48, %v10895_v2  ;;  %v11160_v61 = vmul.f32 %v11080_v48, %v10899_v6  ;;  %v11164_v3 = vmul.f32 %v11080_v48, %v10903_v9  ;;  %v11168_v5 = vmul.f32 %v11080_v48, %v10907_v12 }
 0x3b1   :  { %v11172_v60 = vmul.f32 %v11080_v48, %v10911_v15  ;;  %v11176_v2 = vmul.f32 %v11080_v48, %v10915_v18  ;;  %v11180_v6 = vmul.f32 %v11080_v48, %v10919_v30  ;;  %v11184_v9 = vmul.f32 %v11080_v48, %v10923_v26  ;;  %v17049_v38 = vld [vmem:[#allocation25_spill] sm:$0xff] }
 0x3b2   :  { %v11188_v12 = vmul.f32 %v11080_v48, %v10927_v47  ;;  %v11192_v15 = vmul.f32 %v11080_v48, %v10931_v40  ;;  %v11196_v18 = vmul.f32 %v11080_v48, %v10935_v34  ;;  %v11200_v30 = vmul.f32 %v11080_v48, %v10939_v27 }
 0x3b3   :  { %v11204_v26 = vmul.f32 %v11080_v48, %v10943_v56  ;;  %v11208_v47 = vmul.f32 %v11080_v48, %v10947_v14  ;;  %v11212_v40 = vmul.f32 %v11080_v48, %v10951_v8  ;;  %v11216_v34 = vmul.f32 %v11080_v48, %v10955_v63 }
 0x3b4   :  { %v11220_v27 = vmul.f32 %v11080_v48, %v10959_v11  ;;  %v11224_v56 = vmul.f32 %v11080_v48, %v10963_v17  ;;  %v11228_v14 = vmul.f32 %v11080_v48, %v10967_v23  ;;  %v11232_v8 = vmul.f32 %v11080_v48, %v10971_v29 }
 0x3b5   :  { %v11236_v63 = vmul.f32 %v11080_v48, %v10975_v35  ;;  %v11240_v11 = vmul.f32 %v11080_v48, %v10979_v31  ;;  %v11244_v17 = vmul.f32 %v11080_v48, %v10983_v24  ;;  %v11248_v23 = vmul.f32 %v11080_v48, %v10987_v4 }
 0x3b6   :  { %v11252_v29 = vmul.f32 %v11080_v48, %v10991_v41  ;;  %v11256_v35 = vmul.f32 %v11080_v48, %v10995_v37  ;;  %v11260_v31 = vmul.f32 %v11080_v48, %v10999_v21  ;;  %v11264_v24 = vmul.f32 %v11080_v48, %v11003_v52 }
 0x3b7   :  { %v11268_v4 = vmul.f32 %v11080_v48, %v11007_v20  ;;  %v11272_v41 = vmul.f32 %v11080_v48, %v11011_v54  ;;  %v11276_v37 = vmul.f32 %v11080_v48, %v11015_v19  ;;  %v11280_v21 = vmul.f32 %v11080_v48, %v11019_v7 }
 0x3b8   :  { %v11284_v52 = vmul.f32 %v11080_v48, %v11023_v43  ;;  %v11288_v20 = vmul.f32 %v11080_v48, %v11027_v13  ;;  %v11292_v54 = vmul.f32 %v11080_v48, %v11031_v55  ;;  %v11296_v19 = vmul.f32 %v11080_v48, %v11035_v57 }
 0x3b9   :  { %v11300_v7 = vmul.f32 %v11080_v48, %v11039_v28  ;;  %v11304_v43 = vmul.f32 %v11080_v48, %v11043_v25  ;;  %v11308_v13 = vmul.f32 %v11080_v48, %v11047_v1  ;;  %v11312_v55 = vmul.f32 %v11080_v48, %v11051_v22 }
 0x3ba   :  { %v11316_v57 = vmul.f32 %v11080_v48, %v11055_v59  ;;  %v11320_v28 = vmul.f32 %v11080_v48, %v11059_v39  ;;  %v11324_v25 = vmul.f32 %v11080_v48, %v11063_v33  ;;  %v11328_v1 = vmul.f32 %v11080_v48, %v11067_v36  ;;  %v11341_v39 = vld [vmem:[%s16460_s3] ss:$0 sm:$0xff] }
 0x3bb   :  { %17043 = vst [vmem:[#allocation82_spill] sm:$0xff] %v11312_v55  ;;  %v11332_v22 = vmul.f32 %v11080_v48, %v11071_v45  ;;  %v11336_v59 = vmul.f32 %v11080_v48, %v17049_v38  ;;  %v17056_v55 = vld [vmem:[#allocation83_spill] sm:$0xff] }
 0x3bc   :  { %17044 = vst [vmem:[#allocation29_spill] sm:$0xff] %v11316_v57  ;;  %17045 = vst [vmem:[#allocation67_spill] sm:$0xff] %v11320_v28  ;;  %v17051_v28 = vld [vmem:[#allocation62_spill] sm:$0xff] }
 0x3bd   :  { %17046 = vst [vmem:[#allocation89_spill] sm:$0xff] %v11324_v25  ;;  %17047 = vst [vmem:[#allocation88_spill] sm:$0xff] %v11328_v1  ;;  %v11345_v33 = vmul.f32 %v11080_v48, %v17051_v28  ;;  %v17052_v25 = vld [vmem:[#allocation21_spill] sm:$0xff]  ;;  %v17053_v1 = vld [vmem:[#allocation59_spill] sm:$0xff]  ;;  %v11365_v28 = vmul.f32 %v11080_v48, %v17056_v55  ;;  %v11385_v55 = vmul.f32 %v11080_v48, %v11124_v49 }
 0x3be   :  { %17048 = vst [vmem:[#allocation87_spill] sm:$0xff] %v11332_v22  ;;  %17050 = vst [vmem:[#allocation86_spill] sm:$0xff] %v11336_v59  ;;  %v11349_v36 = vmul.f32 %v11080_v48, %v17052_v25  ;;  %v11353_v45 = vmul.f32 %v11080_v48, %v17053_v1  ;;  %v17054_v22 = vld [vmem:[#allocation17_spill] sm:$0xff]  ;;  %v11369_v25 = vmul.f32 %v11080_v48, %v11108_v50 }
 0x3bf   :  { %v11357_v38 = vmul.f32 %v11080_v48, %v17054_v22  ;;  %v17055_v59 = vld [vmem:[#allocation57_spill] sm:$0xff]  ;;  %v11373_v1 = vmul.f32 %v11080_v48, %v11112_v0  ;;  %v11377_v22 = vmul.f32 %v11080_v48, %v11116_v44  ;;  %v11389_v50 = vmul.f32 %v11080_v48, %v11128_v53 }
 0x3c0   :  { %v11361_v57 = vmul.f32 %v11080_v48, %v17055_v59  ;;  %v11381_v59 = vmul.f32 %v11080_v48, %v11120_v10  ;;  %v11393_v0 = vadd.f32 %v11341_v39, %v11132_v51  ;;  %v11397_v44 = vadd.f32 %v11341_v39, %v11136_v58 }
 0x3c1   :  { %v11401_v10 = vadd.f32 %v11341_v39, %v11140_v16  ;;  %v11405_v49 = vadd.f32 %v11341_v39, %v11144_v32  ;;  %v11409_v48 = vadd.f32 %v11341_v39, %v11148_v42  ;;  %v11413_v53 = vadd.f32 %v11341_v39, %v11152_v46 }
 0x3c2   :  { %v11417_v51 = vadd.f32 %v11341_v39, %v11156_v62  ;;  %v11421_v58 = vadd.f32 %v11341_v39, %v11160_v61  ;;  %v11425_v16 = vadd.f32 %v11341_v39, %v11164_v3  ;;  %v11429_v32 = vadd.f32 %v11341_v39, %v11168_v5  ;;  %v11442_v62 = vld [vmem:[%s16458_s4 + $0xf8] sm:$0xff]  }
 0x3c3   :  { %v11433_v42 = vadd.f32 %v11341_v39, %v11172_v60  ;;  %v11437_v46 = vadd.f32 %v11341_v39, %v11176_v2  ;;  %17057 = vst [vmem:[#allocation85_spill] sm:$0xff] %v11442_v62  ;;  %v11446_v61 = vadd.f32 %v11341_v39, %v11180_v6  ;;  %v11450_v3 = vadd.f32 %v11341_v39, %v11184_v9 }
 0x3c4   :  { %v11454_v5 = vadd.f32 %v11341_v39, %v11188_v12  ;;  %v11458_v60 = vadd.f32 %v11341_v39, %v11192_v15  ;;  %v11462_v2 = vadd.f32 %v11341_v39, %v11196_v18  ;;  %v11466_v6 = vadd.f32 %v11341_v39, %v11200_v30  ;;  %9055 = vmatprep.subr.bf16.mxu0 %v11442_v62 }
 0x3c5   :  { %v11470_v9 = vadd.f32 %v11341_v39, %v11204_v26  ;;  %v11474_v12 = vadd.f32 %v11341_v39, %v11208_v47  ;;  %v11479_v15 = vadd.f32 %v11341_v39, %v11212_v40  ;;  %v11483_v18 = vadd.f32 %v11341_v39, %v11216_v34 }
 0x3c6   :  { %v11487_v30 = vadd.f32 %v11341_v39, %v11220_v27  ;;  %v11491_v26 = vadd.f32 %v11341_v39, %v11224_v56  ;;  %v11495_v47 = vadd.f32 %v11341_v39, %v11228_v14  ;;  %v11499_v40 = vadd.f32 %v11341_v39, %v11232_v8 }
 0x3c7   :  { %v11503_v34 = vadd.f32 %v11341_v39, %v11236_v63  ;;  %v11507_v27 = vadd.f32 %v11341_v39, %v11240_v11  ;;  %v11511_v56 = vadd.f32 %v11341_v39, %v11244_v17  ;;  %v11515_v14 = vadd.f32 %v11341_v39, %v11248_v23  ;;  %v11528_v11 = vld [vmem:[%s16458_s4 + $0xb8] sm:$0xff]  }
 0x3c8   :  { %v11519_v8 = vadd.f32 %v11341_v39, %v11252_v29  ;;  %v11523_v63 = vadd.f32 %v11341_v39, %v11256_v35  ;;  %17058 = vst [vmem:[#allocation84_spill] sm:$0xff] %v11528_v11  ;;  %v11532_v17 = vadd.f32 %v11341_v39, %v11260_v31  ;;  %v11536_v23 = vadd.f32 %v11341_v39, %v11264_v24 }
 0x3c9   :  { %v11540_v29 = vadd.f32 %v11341_v39, %v11268_v4  ;;  %v11544_v35 = vadd.f32 %v11341_v39, %v11272_v41  ;;  %v11548_v62 = vadd.f32 %v11341_v39, %v11276_v37  ;;  %v11552_v31 = vadd.f32 %v11341_v39, %v11280_v21  ;;  %8975 = vmatprep.subr.bf16.mxu1 %v11528_v11  ;;  %v17064_v11 = vld [vmem:[#allocation82_spill] sm:$0xff] }
 0x3ca   :  { %v11556_v24 = vadd.f32 %v11341_v39, %v11284_v52  ;;  %v11560_v4 = vadd.f32 %v11341_v39, %v11288_v20  ;;  %v11565_v41 = vadd.f32 %v11341_v39, %v11292_v54  ;;  %v11569_v37 = vadd.f32 %v11341_v39, %v11296_v19 }
 0x3cb   :  { %v11573_v21 = vadd.f32 %v11341_v39, %v11300_v7  ;;  %v11577_v52 = vadd.f32 %v11341_v39, %v11304_v43  ;;  %v11581_v20 = vadd.f32 %v11341_v39, %v11308_v13  ;;  %v11585_v54 = vadd.f32 %v11341_v39, %v17064_v11 }
 0x3cc   :  { %17059 = vst [vmem:[#allocation9_spill] sm:$0xff] %v11565_v41  ;;  %17060 = vst [vmem:[#allocation69_spill] sm:$0xff] %v11569_v37  ;;  %v17066_v41 = vld [vmem:[#allocation29_spill] sm:$0xff]  ;;  %v17067_v37 = vld [vmem:[#allocation67_spill] sm:$0xff] }
 0x3cd   :  { %17061 = vst [vmem:[#allocation13_spill] sm:$0xff] %v11573_v21  ;;  %17062 = vst [vmem:[#allocation73_spill] sm:$0xff] %v11577_v52  ;;  %v11589_v19 = vadd.f32 %v11341_v39, %v17066_v41  ;;  %v11593_v7 = vadd.f32 %v11341_v39, %v17067_v37  ;;  %v17068_v21 = vld [vmem:[#allocation89_spill] sm:$0xff]  ;;  %v17069_v52 = vld [vmem:[#allocation88_spill] sm:$0xff]  ;;  %v11613_v37 = vadd.f32 %v11341_v39, %v11345_v33 }
 0x3ce   :  { %17063 = vst [vmem:[#allocation3_spill] sm:$0xff] %v11581_v20  ;;  %17065 = vst [vmem:[#allocation32_spill] sm:$0xff] %v11585_v54  ;;  %v11597_v43 = vadd.f32 %v11341_v39, %v17068_v21  ;;  %v11601_v13 = vadd.f32 %v11341_v39, %v17069_v52  ;;  %v17070_v20 = vld [vmem:[#allocation87_spill] sm:$0xff]  ;;  %v17071_v54 = vld [vmem:[#allocation86_spill] sm:$0xff]  ;;  %v11617_v21 = vadd.f32 %v11341_v39, %v11349_v36 }
 0x3cf   :  { %v11605_v11 = vadd.f32 %v11341_v39, %v17070_v20  ;;  %v11609_v41 = vadd.f32 %v11341_v39, %v17071_v54  ;;  %v11621_v52 = vadd.f32 %v11341_v39, %v11353_v45  ;;  %v11625_v20 = vadd.f32 %v11341_v39, %v11357_v38 }
 0x3d0   :  { %v11629_v54 = vadd.f32 %v11341_v39, %v11361_v57  ;;  %v11633_v33 = vadd.f32 %v11341_v39, %v11365_v28  ;;  %v11637_v36 = vadd.f32 %v11341_v39, %v11369_v25  ;;  %v11641_v45 = vadd.f32 %v11341_v39, %v11373_v1 }
 0x3d1   :  { %v11645_v38 = vadd.f32 %v11341_v39, %v11377_v22  ;;  %v11649_v57 = vadd.f32 %v11341_v39, %v11381_v59  ;;  %v11653_v28 = vadd.f32 %v11341_v39, %v11385_v55  ;;  %v11657_v25 = vadd.f32 %v11341_v39, %v11389_v50 }
 0x3d2   :  { %17072 = vst [vmem:[#allocation25_spill] sm:$0xff] %v11637_v36  ;;  %17073 = vst [vmem:[#allocation62_spill] sm:$0xff] %v11641_v45  ;;  %v1367_v36 = vmax.f32 %v11393_v0, 0.0  ;;  %v1368_v1 = vmax.f32 %v11397_v44, 0.0  ;;  %v1369_v45 = vmax.f32 %v11401_v10, 0.0  ;;  %v1370_v22 = vmax.f32 %v11405_v49, 0.0 }
 0x3d3   :  { %17074 = vst [vmem:[#allocation21_spill] sm:$0xff] %v11645_v38  ;;  %17075 = vst [vmem:[#allocation59_spill] sm:$0xff] %v11649_v57  ;;  %v1371_v38 = vmax.f32 %v11409_v48, 0.0  ;;  %v1372_v59 = vmax.f32 %v11413_v53, 0.0  ;;  %v1373_v57 = vmax.f32 %v11417_v51, 0.0  ;;  %v1374_v55 = vmax.f32 %v11421_v58, 0.0 }
 0x3d4   :  { %17076 = vst [vmem:[#allocation17_spill] sm:$0xff] %v11653_v28  ;;  %v1375_v28 = vmax.f32 %v11425_v16, 0.0  ;;  %v1376_v39 = vmax.f32 %v11429_v32, 0.0  ;;  %v1377_v50 = vmax.f32 %v11433_v42, 0.0  ;;  %v1378_v0 = vmax.f32 %v11437_v46, 0.0  ;;  %1509 = vst [vmem:[#allocation2 + $0x19] sm:$0xff] %v1367_v36 }
 0x3d5   :  { %1510 = vst [vmem:[#allocation2 + $0x21] sm:$0xff] %v1368_v1  ;;  %1511 = vst [vmem:[#allocation2 + $0x31] sm:$0xff] %v1369_v45  ;;  %v1379_v44 = vmax.f32 %v11446_v61, 0.0  ;;  %v1380_v10 = vmax.f32 %v11450_v3, 0.0  ;;  %v1381_v49 = vmax.f32 %v11454_v5, 0.0  ;;  %v1382_v48 = vmax.f32 %v11458_v60, 0.0 }
 0x3d6   :  { %1512 = vst [vmem:[#allocation2 + $0x39] sm:$0xff] %v1370_v22  ;;  %1513 = vst [vmem:[#allocation2 + $0x49] sm:$0xff] %v1371_v38  ;;  %v1383_v53 = vmax.f32 %v11462_v2, 0.0  ;;  %v1384_v51 = vmax.f32 %v11466_v6, 0.0  ;;  %v1385_v58 = vmax.f32 %v11470_v9, 0.0  ;;  %v1386_v16 = vmax.f32 %v11474_v12, 0.0 }
 0x3d7   :  { %1514 = vst [vmem:[#allocation2 + $0x51] sm:$0xff] %v1372_v59  ;;  %1515 = vst [vmem:[#allocation2 + $0x61] sm:$0xff] %v1373_v57  ;;  %v1387_v32 = vmax.f32 %v11479_v15, 0.0  ;;  %v1388_v42 = vmax.f32 %v11483_v18, 0.0  ;;  %v1389_v46 = vmax.f32 %v11487_v30, 0.0  ;;  %v1390_v61 = vmax.f32 %v11491_v26, 0.0 }
 0x3d8   :  { %1516 = vst [vmem:[#allocation2 + $0x69] sm:$0xff] %v1374_v55  ;;  %1517 = vst [vmem:[#allocation2 + $0x79] sm:$0xff] %v1375_v28  ;;  %v1391_v3 = vmax.f32 %v11495_v47, 0.0  ;;  %v1392_v5 = vmax.f32 %v11499_v40, 0.0  ;;  %v1393_v60 = vmax.f32 %v11503_v34, 0.0  ;;  %v1394_v2 = vmax.f32 %v11507_v27, 0.0 }
 0x3d9   :  { %1518 = vst [vmem:[#allocation2 + $0x81] sm:$0xff] %v1376_v39  ;;  %1519 = vst [vmem:[#allocation2 + $0x91] sm:$0xff] %v1377_v50  ;;  %v1395_v6 = vmax.f32 %v11511_v56, 0.0  ;;  %v1396_v9 = vmax.f32 %v11515_v14, 0.0  ;;  %v1397_v12 = vmax.f32 %v11519_v8, 0.0  ;;  %v1398_v15 = vmax.f32 %v11523_v63, 0.0 }
 0x3da   :  { %1520 = vst [vmem:[#allocation2 + $0x99] sm:$0xff] %v1378_v0  ;;  %1521 = vst [vmem:[#allocation2 + $0xa9] sm:$0xff] %v1379_v44  ;;  %v1399_v18 = vmax.f32 %v11532_v17, 0.0  ;;  %v1400_v30 = vmax.f32 %v11536_v23, 0.0  ;;  %v1401_v26 = vmax.f32 %v11540_v29, 0.0  ;;  %v1402_v47 = vmax.f32 %v11544_v35, 0.0 }
 0x3db   :  { %1522 = vst [vmem:[#allocation2 + $0xb1] sm:$0xff] %v1380_v10  ;;  %1523 = vst [vmem:[#allocation2 + $0xc1] sm:$0xff] %v1381_v49  ;;  %v1403_v40 = vmax.f32 %v11548_v62, 0.0  ;;  %v1404_v34 = vmax.f32 %v11552_v31, 0.0  ;;  %v1405_v27 = vmax.f32 %v11556_v24, 0.0  ;;  %v1406_v56 = vmax.f32 %v11560_v4, 0.0 }
 0x3dc   :  { %1524 = vst [vmem:[#allocation2 + $0xc9] sm:$0xff] %v1382_v48  ;;  %1525 = vst [vmem:[#allocation2 + $0xd9] sm:$0xff] %v1383_v53  ;;  %v17077_v14 = vld [vmem:[#allocation9_spill] sm:$0xff]  ;;  %v17081_v62 = vld [vmem:[#allocation3_spill] sm:$0xff]  ;;  %v1413_v45 = vmax.f32 %v11589_v19, 0.0  ;;  %v1414_v38 = vmax.f32 %v11593_v7, 0.0 }
 0x3dd   :  { %1526 = vst [vmem:[#allocation2 + $0xe1] sm:$0xff] %v1384_v51  ;;  %1527 = vst [vmem:[#allocation2 + $0xf1] sm:$0xff] %v1385_v58  ;;  %v1407_v8 = vmax.f32 %v17077_v14, 0.0  ;;  %v17078_v63 = vld [vmem:[#allocation69_spill] sm:$0xff]  ;;  %v1411_v31 = vmax.f32 %v17081_v62, 0.0  ;;  %v17082_v24 = vld [vmem:[#allocation32_spill] sm:$0xff] }
 0x3de   :  { %1528 = vst [vmem:[#allocation2 + $0xf9] sm:$0xff] %v1386_v16  ;;  %1529 = vst [vmem:[#allocation2 + $0x109] sm:$0xff] %v1387_v32  ;;  %v1408_v17 = vmax.f32 %v17078_v63, 0.0  ;;  %v17079_v23 = vld [vmem:[#allocation13_spill] sm:$0xff]  ;;  %v1412_v4 = vmax.f32 %v17082_v24, 0.0  ;;  %v1415_v57 = vmax.f32 %v11597_v43, 0.0 }
 0x3df   :  { %1530 = vst [vmem:[#allocation2 + $0x111] sm:$0xff] %v1388_v42  ;;  %1531 = vst [vmem:[#allocation2 + $0x121] sm:$0xff] %v1389_v46  ;;  %v1409_v29 = vmax.f32 %v17079_v23, 0.0  ;;  %v17080_v35 = vld [vmem:[#allocation73_spill] sm:$0xff]  ;;  %v1416_v28 = vmax.f32 %v11601_v13, 0.0  ;;  %v1417_v1 = vmax.f32 %v11605_v11, 0.0 }
 0x3e0   :  { %1532 = vst [vmem:[#allocation2 + $0x129] sm:$0xff] %v1390_v61  ;;  %1533 = vst [vmem:[#allocation2 + $0x139] sm:$0xff] %v1391_v3  ;;  %v1410_v36 = vmax.f32 %v17080_v35, 0.0  ;;  %v1418_v22 = vmax.f32 %v11609_v41, 0.0  ;;  %v11711_v59 = vld [vmem:[#allocation2 + $0x18] sm:$0xff]  ;;  %v11713_v19 = vld [vmem:[#allocation2 + $0x20] sm:$0xff] }
 0x3e1   :  { %1534 = vst [vmem:[#allocation2 + $0x141] sm:$0xff] %v1392_v5  ;;  %1535 = vst [vmem:[#allocation2 + $0x151] sm:$0xff] %v1393_v60  ;;  %v1419_v7 = vmax.f32 %v11613_v37, 0.0  ;;  %v1420_v55 = vmax.f32 %v11617_v21, 0.0  ;;  %v1421_v43 = vmax.f32 %v11621_v52, 0.0  ;;  %v1422_v13 = vmax.f32 %v11625_v20, 0.0 }
 0x3e2   :  { %1536 = vst [vmem:[#allocation2 + $0x159] sm:$0xff] %v1394_v2  ;;  %1537 = vst [vmem:[#allocation2 + $0x169] sm:$0xff] %v1395_v6  ;;  %v11719_v11 = vld [vmem:[#allocation2 + $0x30] sm:$0xff]  ;;  %v11721_v41 = vld [vmem:[#allocation2 + $0x38] sm:$0xff]  ;;  %v1423_v39 = vmax.f32 %v11629_v54, 0.0  ;;  %v1424_v50 = vmax.f32 %v11633_v33, 0.0  ;;  %v11735_v33 = vpack.c.bf16 %v11713_v19, %v11711_v59 }
 0x3e3   :  { %1538 = vst [vmem:[#allocation2 + $0x171] sm:$0xff] %v1396_v9  ;;  %1539 = vst [vmem:[#allocation2 + $0x181] sm:$0xff] %v1397_v12  ;;  %v17083_v0 = vld [vmem:[#allocation25_spill] sm:$0xff]  ;;  %v17084_v44 = vld [vmem:[#allocation62_spill] sm:$0xff]  ;;  %v1430_v51 = vmax.f32 %v11657_v25, 0.0  ;;  %v11739_v58 = vpack.c.bf16 %v11721_v41, %v11719_v11  ;;  %v1836_v32 = vrot.slane %v11719_v11, 1 }
 0x3e4   :  { %1540 = vst [vmem:[#allocation2 + $0x189] sm:$0xff] %v1398_v15  ;;  %1541 = vst [vmem:[#allocation2 + $0x1c9] sm:$0xff] %v1399_v18  ;;  %v1425_v37 = vmax.f32 %v17083_v0, 0.0  ;;  %v1426_v21 = vmax.f32 %v17084_v44, 0.0  ;;  %v17085_v52 = vld [vmem:[#allocation21_spill] sm:$0xff]  ;;  %v17086_v10 = vld [vmem:[#allocation59_spill] sm:$0xff]  ;;  %8912 = vmatmul.mubr.bf16.vlgmr.msra.gmra.mxu0 %v11735_v33 }
 0x3e5   :  { %1542 = vst [vmem:[#allocation2 + $0x1d1] sm:$0xff] %v1400_v30  ;;  %1543 = vst [vmem:[#allocation2 + $0x1e1] sm:$0xff] %v1401_v26  ;;  %v1427_v20 = vmax.f32 %v17085_v52, 0.0  ;;  %v1428_v49 = vmax.f32 %v17086_v10, 0.0  ;;  %v17087_v48 = vld [vmem:[#allocation17_spill] sm:$0xff]  ;;  %v11731_v54 = vld [vmem:[#allocation2 + $0x28] sm:$0xff]  ;;  %8915 = vmatprep.mubr.bf16.mxu0 %v11739_v58 }
 0x3e6   :  { %1544 = vst [vmem:[#allocation2 + $0x1e9] sm:$0xff] %v1402_v47  ;;  %1545 = vst [vmem:[#allocation2 + $0x1f9] sm:$0xff] %v1403_v40  ;;  %v1429_v53 = vmax.f32 %v17087_v48, 0.0  ;;  %v11741_v16 = vld [vmem:[#allocation2 + $0x40] sm:$0xff]  ;;  %v9708_v25 = vld [vmem:[%s16458_s4 + $0xf0] sm:$0xff]   ;;  %v1837_v42 = vrot.slane %v11721_v41, 1 }
 0x3e7   :  { %1546 = vst [vmem:[#allocation2 + $0x201] sm:$0xff] %v1404_v34  ;;  %1547 = vst [vmem:[#allocation2 + $0x211] sm:$0xff] %v1405_v27  ;;  %v1831_v46 = vrot.slane %v11711_v59, 1  ;;  %v1832_v61 = vrot.slane %v11713_v19, 1  ;;  %v1834_v3 = vrot.slane %v11731_v54, 1  ;;  %v1839_v60 = vrot.slane %v11741_v16, 1 }
 0x3e8   :  { %1548 = vst [vmem:[#allocation2 + $0x219] sm:$0xff] %v1406_v56  ;;  %1549 = vst [vmem:[#allocation2 + $0x229] sm:$0xff] %v1407_v8  ;;  %v1838_v5 = vsel %vm1825_vm0, %v1836_v32, %v1837_v42  ;;  %v11755_v2 = vld [vmem:[#allocation2 + $0x48] sm:$0xff]  ;;  %v11757_v6 = vld [vmem:[#allocation2 + $0x50] sm:$0xff] }
 0x3e9   :  { %1550 = vst [vmem:[#allocation2 + $0x231] sm:$0xff] %v1408_v17  ;;  %1551 = vst [vmem:[#allocation2 + $0x241] sm:$0xff] %v1409_v29  ;;  %v17090_v9 = vld [vmem:[#allocation85_spill] sm:$0xff]  ;;  %v1833_v12 = vsel %vm1825_vm0, %v1831_v46, %v1832_v61  ;;  %v1835_v15 = vsel %vm1825_vm0, %v1832_v61, %v1834_v3  ;;  %v11762_v18 = vld [vmem:[#allocation2 + $0x60] sm:$0xff]  ;;  %v1840_v40 = vsel %vm1825_vm0, %v1837_v42, %v1839_v60  ;;  %v1841_v8 = vrot.slane %v11755_v2, 1 }
 0x3ea   :  { %1552 = vst [vmem:[#allocation2 + $0x249] sm:$0xff] %v1410_v36  ;;  %1553 = vst [vmem:[#allocation2 + $0x259] sm:$0xff] %v1411_v31  ;;  %9056 = vmatpush3.bf16.msra.mxu0 %v17090_v9  ;;  %v11764_v30 = vld [vmem:[#allocation2 + $0x68] sm:$0xff]  ;;  %v11766_v26 = vld [vmem:[#allocation2 + $0x58] sm:$0xff]  ;;  %v11768_v47 = vpack.c.bf16 %v1835_v15, %v1833_v12  ;;  %v11779_v14 = vpack.c.bf16 %v1840_v40, %v1838_v5  ;;  %v1842_v63 = vrot.slane %v11757_v6, 1  ;;  %v1846_v17 = vrot.slane %v11762_v18, 1 }
 0x3eb   :  { %1554 = vst [vmem:[#allocation2 + $0x261] sm:$0xff] %v1412_v4  ;;  %1555 = vst [vmem:[#allocation2 + $0x271] sm:$0xff] %v1413_v45  ;;  %9057 = vmatprep.subr.bf16.mxu0 %v9708_v25  ;;  %v11771_v34 = vld [vmem:[#allocation2 + $0x70] sm:$0xff]  ;;  %v9710_v56 = vld [vmem:[%s16458_s4 + $0xe8] sm:$0xff]   ;;  %v1847_v23 = vrot.slane %v11764_v30, 1  ;;  %v1844_v29 = vrot.slane %v11766_v26, 1  ;;  %v11790_v35 = vpack.c.bf16 %v11757_v6, %v11755_v2  ;;  %v11799_v24 = vpack.c.bf16 %v11764_v30, %v11762_v18 }
 0x3ec   :  { %1556 = vst [vmem:[#allocation2 + $0x279] sm:$0xff] %v1414_v38  ;;  %1557 = vst [vmem:[#allocation2 + $0x289] sm:$0xff] %v1415_v57  ;;  %v9709_v27 = vld [vmem:[%s16458_s4 + $0xb0] sm:$0xff]   ;;  %8832 = vmatmul.mubr.bf16.vlgmr.msra.gmra.mxu1 %v11768_v47  ;;  %v1849_v36 = vrot.slane %v11771_v34, 1  ;;  %v17094_v62 = vld [vmem:[#allocation84_spill] sm:$0xff]  ;;  %v1843_v45 = vsel %vm1825_vm0, %v1841_v8, %v1842_v63 }
 0x3ed   :  { %1558 = vst [vmem:[#allocation2 + $0x291] sm:$0xff] %v1416_v28  ;;  %1559 = vst [vmem:[#allocation2 + $0x2a1] sm:$0xff] %v1417_v1  ;;  %8835 = vmatprep.mubr.bf16.mxu1 %v11779_v14  ;;  %8976 = vmatpush3.bf16.msra.mxu1 %v17094_v62  ;;  %v9712_v31 = vld [vmem:[%s16458_s4 + $0xe0] sm:$0xff]   ;;  %v9711_v4 = vld [vmem:[%s16458_s4 + $0xa8] sm:$0xff]   ;;  %v1845_v38 = vsel %vm1825_vm0, %v1842_v63, %v1844_v29  ;;  %v1848_v57 = vsel %vm1825_vm0, %v1846_v17, %v1847_v23 }
 0x3ee   :  { %1560 = vst [vmem:[#allocation2 + $0x2a9] sm:$0xff] %v1418_v22  ;;  %1561 = vst [vmem:[#allocation2 + $0x2b9] sm:$0xff] %v1419_v7  ;;  %9058 = vmatpush3.bf16.msra.mxu0 %v9708_v25  ;;  %8977 = vmatprep.subr.bf16.mxu1 %v9709_v27  ;;  %v1850_v28 = vsel %vm1825_vm0, %v1847_v23, %v1849_v36  ;;  %v11810_v1 = vld [vmem:[#allocation2 + $0x78] sm:$0xff]  ;;  %v11812_v22 = vld [vmem:[#allocation2 + $0x80] sm:$0xff] }
 0x3ef   :  { %1562 = vst [vmem:[#allocation2 + $0x2c1] sm:$0xff] %v1420_v55  ;;  %1563 = vst [vmem:[#allocation2 + $0x2d1] sm:$0xff] %v1421_v43  ;;  %9059 = vmatprep.subr.bf16.mxu0 %v9710_v56  ;;  %8916 = vmatmul.mubr.bf16.gmra.mxu0 %v11790_v35  ;;  %v11814_v7 = vld [vmem:[#allocation2 + $0x88] sm:$0xff]  ;;  %v11816_v55 = vld [vmem:[#allocation2 + $0x90] sm:$0xff]  ;;  %v1851_v44 = vrot.slane %v11810_v1, 1  ;;  %v11842_v48 = vpack.c.bf16 %v11812_v22, %v11810_v1 }
 0x3f0   :  { %1564 = vst [vmem:[#allocation2 + $0x2d9] sm:$0xff] %v1422_v13  ;;  %1565 = vst [vmem:[#allocation2 + $0x2e9] sm:$0xff] %v1423_v39  ;;  %8919 = vmatprep.mubr.bf16.mxu0 %v11799_v24  ;;  %v11818_v43 = vld [vmem:[#allocation2 + $0x98] sm:$0xff]  ;;  %v11820_v13 = vld [vmem:[#allocation2 + $0xa0] sm:$0xff]  ;;  %v11822_v39 = vpack.c.bf16 %v1845_v38, %v1843_v45  ;;  %v1854_v52 = vrot.slane %v11814_v7, 1 }
 0x3f1   :  { %1566 = vst [vmem:[#allocation2 + $0x2f1] sm:$0xff] %v1424_v50  ;;  %1567 = vst [vmem:[#allocation2 + $0x301] sm:$0xff] %v1425_v37  ;;  %8978 = vmatpush3.bf16.msra.mxu1 %v9709_v27  ;;  %v9713_v50 = vld [vmem:[%s16458_s4 + $0xa0] sm:$0xff]   ;;  %v9714_v0 = vld [vmem:[%s16458_s4 + $0xd8] sm:$0xff]   ;;  %v11830_v37 = vpack.c.bf16 %v1850_v28, %v1848_v57  ;;  %v1857_v10 = vrot.slane %v11818_v43, 1 }
 0x3f2   :  { %1568 = vst [vmem:[#allocation2 + $0x309] sm:$0xff] %v1426_v21  ;;  %17088 = vst [vmem:[#allocation57_spill] sm:$0xff] %v11735_v33  ;;  %9060 = vmatpush3.bf16.msra.mxu0 %v9710_v56  ;;  %8979 = vmatprep.subr.bf16.mxu1 %v9711_v4  ;;  %v1852_v21 = vrot.slane %v11812_v22, 1  ;;  %v11851_v25 = vld [vmem:[#allocation2 + $0xa8] sm:$0xff]  ;;  %v9715_v32 = vld [vmem:[%s16458_s4 + $0x98] sm:$0xff]  }
 0x3f3   :  { %17089 = vst [vmem:[#allocation83_spill] sm:$0xff] %v11739_v58  ;;  %1569 = vst [vmem:[#allocation2 + $0x319] sm:$0xff] %v1427_v20  ;;  %9061 = vmatprep.subr.bf16.mxu0 %v9712_v31  ;;  %v1856_v20 = vrot.slane %v11816_v55, 1  ;;  %v11860_v3 = vld [vmem:[#allocation2 + $0xb0] sm:$0xff]  ;;  %v11862_v5 = vld [vmem:[#allocation2 + $0xc0] sm:$0xff]  ;;  %v1861_v23 = vrot.slane %v11851_v25, 1 }
 0x3f4   :  { %1570 = vst [vmem:[#allocation2 + $0x321] sm:$0xff] %v1428_v49  ;;  %1571 = vst [vmem:[#allocation2 + $0x331] sm:$0xff] %v1429_v53  ;;  %8836 = vmatmul.mubr.bf16.gmra.mxu1 %v11822_v39  ;;  %v1859_v49 = vrot.slane %v11820_v13, 1  ;;  %v9716_v53 = vld [vmem:[%s16458_s4 + $0xd0] sm:$0xff]   ;;  %v1853_v46 = vsel %vm1825_vm0, %v1851_v44, %v1852_v21  ;;  %v1855_v61 = vsel %vm1825_vm0, %v1852_v21, %v1854_v52  ;;  %v11864_v60 = vld [vmem:[#allocation2 + $0xc8] sm:$0xff]  ;;  %v1862_v36 = vrot.slane %v11860_v3, 1 }
 0x3f5   :  { %1572 = vst [vmem:[#allocation2 + $0x339] sm:$0xff] %v1430_v51  ;;  %17091 = vst [vmem:[#allocation82_spill] sm:$0xff] %v11768_v47  ;;  %8839 = vmatprep.mubr.bf16.mxu1 %v11830_v37  ;;  %8980 = vmatpush3.bf16.msra.mxu1 %v9711_v4  ;;  %v11849_v51 = vpack.c.bf16 %v11818_v43, %v11816_v55  ;;  %v1858_v15 = vsel %vm1825_vm0, %v1856_v20, %v1857_v10  ;;  %v11871_v27 = vld [vmem:[#allocation2 + $0xb8] sm:$0xff]  ;;  %v11873_v56 = vld [vmem:[#allocation2 + $0xd0] sm:$0xff]  ;;  %v1866_v62 = vrot.slane %v11862_v5, 1 }
 0x3f6   :  { %17092 = vst [vmem:[#allocation29_spill] sm:$0xff] %v11779_v14  ;;  %17093 = vst [vmem:[#allocation67_spill] sm:$0xff] %v11790_v35  ;;  %9062 = vmatpush3.bf16.msra.mxu0 %v9712_v31  ;;  %8981 = vmatprep.subr.bf16.mxu1 %v9713_v50  ;;  %v1860_v40 = vsel %vm1825_vm0, %v1857_v10, %v1859_v49  ;;  %v11879_v29 = vpack.c.bf16 %v1855_v61, %v1853_v46  ;;  %v1867_v31 = vrot.slane %v11864_v60, 1  ;;  %v9717_v4 = vld [vmem:[%s16458_s4 + $0x90] sm:$0xff]   ;;  %v11899_v20 = vld [vmem:[#allocation2 + $0xe0] sm:$0xff] }
 0x3f7   :  { %17095 = vst [vmem:[#allocation89_spill] sm:$0xff] %v11799_v24  ;;  %17096 = vst [vmem:[#allocation88_spill] sm:$0xff] %v11822_v39  ;;  %9063 = vmatprep.subr.bf16.mxu0 %v9714_v0  ;;  %8920 = vmatmul.mubr.bf16.gmra.mxu0 %v11842_v48  ;;  %v11888_v38 = vpack.c.bf16 %v1860_v40, %v1858_v15  ;;  %v1864_v57 = vrot.slane %v11871_v27, 1  ;;  %v1869_v28 = vrot.slane %v11873_v56, 1  ;;  %v11901_v10 = vld [vmem:[#allocation2 + $0xf0] sm:$0xff]  ;;  %v11911_v40 = vld [vmem:[#allocation2 + $0xf8] sm:$0xff] }
 0x3f8   :  { %17097 = vst [vmem:[#allocation87_spill] sm:$0xff] %v11830_v37  ;;  %17098 = vst [vmem:[#allocation86_spill] sm:$0xff] %v11842_v48  ;;  %8923 = vmatprep.mubr.bf16.mxu0 %v11849_v51  ;;  %v11909_v15 = vpack.c.bf16 %v11860_v3, %v11851_v25  ;;  %v11913_v52 = vld [vmem:[#allocation2 + $0xe8] sm:$0xff]  ;;  %v11920_v46 = vpack.c.bf16 %v11864_v60, %v11862_v5  ;;  %v1863_v61 = vsel %vm1825_vm0, %v1861_v23, %v1862_v36  ;;  %v11949_v9 = vld [vmem:[#allocation2 + $0x110] sm:$0xff] }
 0x3f9   :  { %17099 = vst [vmem:[#allocation9_spill] sm:$0xff] %v11849_v51  ;;  %8982 = vmatpush3.bf16.msra.mxu1 %v9713_v50  ;;  %17100 = vst [vmem:[#allocation69_spill] sm:$0xff] %v11879_v29  ;;  %v11892_v50 = vld [vmem:[#allocation2 + $0xd8] sm:$0xff]  ;;  %v1868_v49 = vsel %vm1825_vm0, %v1866_v62, %v1867_v31  ;;  %v9718_v44 = vld [vmem:[%s16458_s4 + $0xc8] sm:$0xff]   ;;  %v1865_v21 = vsel %vm1825_vm0, %v1862_v36, %v1864_v57  ;;  %v1872_v17 = vrot.slane %v11899_v20, 1  ;;  %v1876_v45 = vrot.slane %v11901_v10, 1 }
 0x3fa   :  { %9064 = vmatpush3.bf16.msra.mxu0 %v9714_v0  ;;  %8983 = vmatprep.subr.bf16.mxu1 %v9715_v32  ;;  %17101 = vst [vmem:[#allocation13_spill] sm:$0xff] %v11888_v38  ;;  %17102 = vst [vmem:[#allocation73_spill] sm:$0xff] %v11892_v50  ;;  %v11915_v0 = vld [vmem:[#allocation2 + $0x100] sm:$0xff]  ;;  %v9719_v23 = vld [vmem:[%s16458_s4 + $0x88] sm:$0xff]   ;;  %v1877_v36 = vrot.slane %v11911_v40, 1  ;;  %v11958_v39 = vpack.c.bf16 %v11899_v20, %v11892_v50 }
 0x3fb   :  { %9065 = vmatprep.subr.bf16.mxu0 %v9716_v53  ;;  %17103 = vst [vmem:[#allocation3_spill] sm:$0xff] %v11901_v10  ;;  %17104 = vst [vmem:[#allocation32_spill] sm:$0xff] %v11909_v15  ;;  %v9720_v62 = vld [vmem:[%s16458_s4 + $0xc0] sm:$0xff]   ;;  %v1879_v57 = vrot.slane %v11915_v0, 1  ;;  %v11961_v8 = vld [vmem:[#allocation2 + $0x128] sm:$0xff] }
 0x3fc   :  { %8840 = vmatmul.mubr.bf16.gmra.mxu1 %v11879_v29  ;;  %17105 = vst [vmem:[#allocation25_spill] sm:$0xff] %v11911_v40  ;;  %17106 = vst [vmem:[#allocation62_spill] sm:$0xff] %v11913_v52  ;;  %v11953_v29 = vpack.c.bf16 %v1865_v21, %v1863_v61  ;;  %v11963_v63 = vld [vmem:[#allocation2 + $0x118] sm:$0xff]  ;;  %v11973_v61 = vpack.c.bf16 %v11911_v40, %v11901_v10  ;;  %v1878_v37 = vsel %vm1825_vm0, %v1876_v45, %v1877_v36  ;;  %v12020_v48 = vld [vmem:[#allocation2 + $0x160] sm:$0xff] }
 0x3fd   :  { %8843 = vmatprep.mubr.bf16.mxu1 %v11888_v38  ;;  %17107 = vst [vmem:[#allocation21_spill] sm:$0xff] %v11915_v0  ;;  %8984 = vmatpush3.bf16.msra.mxu1 %v9715_v32  ;;  %17108 = vst [vmem:[#allocation59_spill] sm:$0xff] %v11920_v46  ;;  %v1870_v32 = vsel %vm1825_vm0, %v1867_v31, %v1869_v28  ;;  %v1874_v31 = vrot.slane %v11913_v52, 1  ;;  %v11943_v28 = vld [vmem:[#allocation2 + $0x108] sm:$0xff]  ;;  %v11951_v38 = vld [vmem:[#allocation2 + $0x120] sm:$0xff]  ;;  %v1880_v14 = vsel %vm1825_vm0, %v1877_v36, %v1879_v57 }
 0x3fe   :  { %9066 = vmatpush3.bf16.msra.mxu0 %v9716_v53  ;;  %8985 = vmatprep.subr.bf16.mxu1 %v9717_v4  ;;  %v1871_v53 = vrot.slane %v11892_v50, 1  ;;  %17109 = vst [vmem:[#allocation17_spill] sm:$0xff] %v11943_v28  ;;  %17110 = vst [vmem:[#allocation85_spill] sm:$0xff] %v11949_v9  ;;  %v1886_v47 = vrot.slane %v11951_v38, 1  ;;  %v1881_v21 = vrot.slane %v11943_v28, 1  ;;  %v12003_v45 = vld [vmem:[#allocation2 + $0x138] sm:$0xff] }
 0x3ff   :  { %8924 = vmatmul.mubr.bf16.gmra.mxu0 %v11909_v15  ;;  %9067 = vmatprep.subr.bf16.mxu0 %v9718_v44  ;;  %17111 = vst [vmem:[#allocation84_spill] sm:$0xff] %v11951_v38  ;;  %17112 = vst [vmem:[#allocation90_spill] sm:$0xff] %v11953_v29  ;;  %v1875_v42 = vsel %vm1825_vm0, %v1872_v17, %v1874_v31  ;;  %v11993_v31 = vpack.c.bf16 %v11949_v9, %v11943_v28  ;;  %v12005_v36 = vld [vmem:[#allocation2 + $0x140] sm:$0xff]  ;;  %v12016_v15 = vld [vmem:[#allocation2 + $0x150] sm:$0xff] }
 0x400   :  { %8927 = vmatprep.mubr.bf16.mxu0 %v11920_v46  ;;  %17113 = vst [vmem:[#allocation91_spill] sm:$0xff] %v11958_v39  ;;  %17114 = vst [vmem:[#allocation92_spill] sm:$0xff] %v11961_v8  ;;  %v1873_v12 = vsel %vm1825_vm0, %v1871_v53, %v1872_v17  ;;  %v1882_v53 = vrot.slane %v11949_v9, 1  ;;  %v12007_v46 = vld [vmem:[#allocation2 + $0x148] sm:$0xff]  ;;  %v12018_v51 = vld [vmem:[#allocation2 + $0x158] sm:$0xff] }
 0x401   :  { %8986 = vmatpush3.bf16.msra.mxu1 %v9717_v4  ;;  %17115 = vst [vmem:[#allocation93_spill] sm:$0xff] %v11963_v63  ;;  %v9721_v4 = vld [vmem:[%s16458_s4 + $0x80] sm:$0xff]   ;;  %17117 = vst [vmem:[#allocation95_spill] sm:$0xff] %v11973_v61  ;;  %v1894_v57 = vrot.slane %v12007_v46, 1  ;;  %v12061_v33 = vld [vmem:[#allocation2 + $0x1d8] sm:$0xff] }
 0x402   :  { %9068 = vmatpush3.bf16.msra.mxu0 %v9718_v44  ;;  %8987 = vmatprep.subr.bf16.mxu1 %v9719_v23  ;;  %v11968_v44 = vpack.c.bf16 %v1870_v32, %v1868_v49  ;;  %v11981_v49 = vld [vmem:[#allocation2 + $0x130] sm:$0xff]  ;;  %v1887_v32 = vrot.slane %v11961_v8, 1  ;;  %17119 = vst [vmem:[#allocation97_spill] sm:$0xff] %v11993_v31  ;;  %17121 = vst [vmem:[#allocation99_spill] sm:$0xff] %v12003_v45  ;;  %v1883_v24 = vsel %vm1825_vm0, %v1881_v21, %v1882_v53  ;;  %v12099_v28 = vld [vmem:[#allocation2 + $0x200] sm:$0xff] }
 0x403   :  { %9069 = vmatprep.subr.bf16.mxu0 %v9720_v62  ;;  %17118 = vst [vmem:[#allocation96_spill] sm:$0xff] %v11981_v49  ;;  %v1889_v17 = vrot.slane %v11981_v49, 1  ;;  %17122 = vst [vmem:[#allocation100_spill] sm:$0xff] %v12005_v36  ;;  %v12035_v21 = vld [vmem:[#allocation2 + $0x170] sm:$0xff]  ;;  %v12142_v0 = vld [vmem:[#allocation2 + $0x240] sm:$0xff] }
 0x404   :  { %17116 = vst [vmem:[#allocation94_spill] sm:$0xff] %v11968_v44  ;;  %8844 = vmatmul.mubr.bf16.gmra.mxu1 %v11953_v29  ;;  %v1884_v29 = vrot.slane %v11963_v63, 1  ;;  %17123 = vst [vmem:[#allocation101_spill] sm:$0xff] %v12007_v46 }
 0x405   :  { %8847 = vmatprep.mubr.bf16.mxu1 %v11968_v44  ;;  %8988 = vmatpush3.bf16.msra.mxu1 %v9719_v23  ;;  %v12000_v23 = vpack.c.bf16 %v11961_v8, %v11951_v38  ;;  %17126 = vst [vmem:[#allocation104_spill] sm:$0xff] %v12016_v15  ;;  %17127 = vst [vmem:[#allocation105_spill] sm:$0xff] %v12018_v51  ;;  %v12033_v44 = vld [vmem:[#allocation2 + $0x168] sm:$0xff]  ;;  %v12050_v38 = vpack.c.bf16 %v12018_v51, %v12016_v15 }
 0x406   :  { %9070 = vmatpush3.bf16.msra.mxu0 %v9720_v62  ;;  %8989 = vmatprep.subr.bf16.mxu1 %v9721_v4  ;;  %v12010_v62 = vpack.c.bf16 %v1875_v42, %v1873_v12  ;;  %17128 = vst [vmem:[#allocation106_spill] sm:$0xff] %v12020_v48  ;;  %v1885_v35 = vsel %vm1825_vm0, %v1882_v53, %v1884_v29  ;;  %v1892_v12 = vrot.slane %v12005_v36, 1  ;;  %17130 = vst [vmem:[#allocation108_spill] sm:$0xff] %v12033_v44  ;;  %v12037_v29 = vld [vmem:[#allocation2 + $0x178] sm:$0xff]  ;;  %v12052_v8 = vld [vmem:[#allocation2 + $0x1c8] sm:$0xff] }
 0x407   :  { %8928 = vmatmul.mubr.bf16.gmra.mxu0 %v11958_v39  ;;  %17120 = vst [vmem:[#allocation98_spill] sm:$0xff] %v12000_v23  ;;  %v12012_v39 = vpack.c.bf16 %v1880_v14, %v1878_v37  ;;  %v1888_v42 = vsel %vm1825_vm0, %v1886_v47, %v1887_v32  ;;  %v12028_v14 = vpack.c.bf16 %v12005_v36, %v12003_v45  ;;  %v1891_v37 = vrot.slane %v12003_v45, 1 }
 0x408   :  { %8931 = vmatprep.mubr.bf16.mxu0 %v11973_v61  ;;  %17124 = vst [vmem:[#allocation102_spill] sm:$0xff] %v12010_v62  ;;  %17131 = vst [vmem:[#allocation109_spill] sm:$0xff] %v12035_v21  ;;  %v1890_v53 = vsel %vm1825_vm0, %v1887_v32, %v1889_v17  ;;  %v1896_v47 = vrot.slane %v12016_v15, 1  ;;  %v1899_v61 = vrot.slane %v12020_v48, 1  ;;  %v12044_v58 = vpack.c.bf16 %v1885_v35, %v1883_v24  ;;  %v12059_v24 = vld [vmem:[#allocation2 + $0x1d0] sm:$0xff] }
 0x409   :  { %17125 = vst [vmem:[#allocation103_spill] sm:$0xff] %v12012_v39  ;;  %8990 = vmatpush3.bf16.msra.mxu1 %v9721_v4  ;;  %17129 = vst [vmem:[#allocation107_spill] sm:$0xff] %v12028_v14  ;;  %v1897_v4 = vrot.slane %v12018_v51, 1  ;;  %v1901_v17 = vrot.slane %v12033_v44, 1  ;;  %v1904_v35 = vrot.slane %v12037_v29, 1  ;;  %v12063_v49 = vpack.c.bf16 %v1890_v53, %v1888_v42  ;;  %v12076_v42 = vld [vmem:[#allocation2 + $0x1e0] sm:$0xff] }
 0x40a   :  { %17132 = vst [vmem:[#allocation110_spill] sm:$0xff] %v12037_v29  ;;  %17133 = vst [vmem:[#allocation111_spill] sm:$0xff] %v12044_v58  ;;  %v1893_v45 = vsel %vm1825_vm0, %v1891_v37, %v1892_v12  ;;  %v12074_v63 = vpack.c.bf16 %v12035_v21, %v12033_v44  ;;  %v12078_v53 = vld [vmem:[#allocation2 + $0x1e8] sm:$0xff]  ;;  %v12080_v48 = vld [vmem:[#allocation2 + $0x1f0] sm:$0xff]  ;;  %v1911_v37 = vrot.slane %v12052_v8, 1 }
 0x40b   :  { %17134 = vst [vmem:[#allocation112_spill] sm:$0xff] %v12050_v38  ;;  %17135 = vst [vmem:[#allocation113_spill] sm:$0xff] %v12052_v8  ;;  %v1898_v15 = vsel %vm1825_vm0, %v1896_v47, %v1897_v4  ;;  %v1900_v36 = vsel %vm1825_vm0, %v1897_v4, %v1899_v61  ;;  %v1914_v61 = vrot.slane %v12061_v33, 1  ;;  %v12092_v51 = vld [vmem:[#allocation2 + $0x1f8] sm:$0xff]  ;;  %v1919_v44 = vrot.slane %v12080_v48, 1  ;;  %v12114_v4 = vld [vmem:[#allocation2 + $0x220] sm:$0xff] }
 0x40c   :  { %8848 = vmatmul.mubr.bf16.gmra.mxu1 %v12010_v62  ;;  %v1902_v62 = vrot.slane %v12035_v21, 1  ;;  %17136 = vst [vmem:[#allocation114_spill] sm:$0xff] %v12059_v24  ;;  %17137 = vst [vmem:[#allocation115_spill] sm:$0xff] %v12061_v33  ;;  %v12094_v46 = vpack.c.bf16 %v1900_v36, %v1898_v15  ;;  %v12121_v21 = vpack.c.bf16 %v12078_v53, %v12076_v42 }
 0x40d   :  { %8851 = vmatprep.mubr.bf16.mxu1 %v12012_v39  ;;  %17138 = vst [vmem:[#allocation116_spill] sm:$0xff] %v12063_v49  ;;  %v1895_v39 = vsel %vm1825_vm0, %v1892_v12, %v1894_v57  ;;  %17139 = vst [vmem:[#allocation117_spill] sm:$0xff] %v12074_v63  ;;  %v1912_v12 = vrot.slane %v12059_v24, 1  ;;  %v1916_v57 = vrot.slane %v12076_v42, 1  ;;  %v12140_v9 = vpack.c.bf16 %v12099_v28, %v12092_v51 }
 0x40e   :  { %17140 = vst [vmem:[#allocation118_spill] sm:$0xff] %v12076_v42  ;;  %17141 = vst [vmem:[#allocation119_spill] sm:$0xff] %v12078_v53  ;;  %v12087_v47 = vpack.c.bf16 %v1895_v39, %v1893_v45  ;;  %v1903_v32 = vsel %vm1825_vm0, %v1901_v17, %v1902_v62  ;;  %v12101_v39 = vld [vmem:[#allocation2 + $0x210] sm:$0xff]  ;;  %v12103_v45 = vld [vmem:[#allocation2 + $0x218] sm:$0xff] }
 0x40f   :  { %8932 = vmatmul.mubr.bf16.gmra.mxu0 %v11993_v31  ;;  %17142 = vst [vmem:[#allocation120_spill] sm:$0xff] %v12080_v48  ;;  %v1905_v31 = vsel %vm1825_vm0, %v1902_v62, %v1904_v35  ;;  %17144 = vst [vmem:[#allocation122_spill] sm:$0xff] %v12092_v51  ;;  %v12108_v62 = vpack.c.bf16 %v12059_v24, %v12052_v8  ;;  %v12112_v35 = vld [vmem:[#allocation2 + $0x208] sm:$0xff]  ;;  %v1913_v17 = vsel %vm1825_vm0, %v1911_v37, %v1912_v12 }
 0x410   :  { %8935 = vmatprep.mubr.bf16.mxu0 %v12000_v23  ;;  %17143 = vst [vmem:[#allocation121_spill] sm:$0xff] %v12087_v47  ;;  %17145 = vst [vmem:[#allocation123_spill] sm:$0xff] %v12094_v46  ;;  %v1917_v23 = vrot.slane %v12078_v53, 1  ;;  %v12117_v48 = vpack.c.bf16 %v1905_v31, %v1903_v32  ;;  %v1915_v29 = vsel %vm1825_vm0, %v1912_v12, %v1914_v61  ;;  %v1926_v15 = vrot.slane %v12101_v39, 1 }
 0x411   :  { %17146 = vst [vmem:[#allocation124_spill] sm:$0xff] %v12099_v28  ;;  %17147 = vst [vmem:[#allocation125_spill] sm:$0xff] %v12101_v39  ;;  %v1927_v36 = vrot.slane %v12103_v45, 1  ;;  %v1921_v8 = vrot.slane %v12092_v51, 1  ;;  %v1924_v24 = vrot.slane %v12112_v35, 1  ;;  %v1929_v37 = vrot.slane %v12114_v4, 1 }
 0x412   :  { %17148 = vst [vmem:[#allocation126_spill] sm:$0xff] %v12103_v45  ;;  %17149 = vst [vmem:[#allocation127_spill] sm:$0xff] %v12108_v62  ;;  %v1918_v31 = vsel %vm1825_vm0, %v1916_v57, %v1917_v23  ;;  %v1920_v32 = vsel %vm1825_vm0, %v1917_v23, %v1919_v44  ;;  %v12144_v57 = vld [vmem:[#allocation2 + $0x248] sm:$0xff]  ;;  %v12147_v44 = vpack.c.bf16 %v1915_v29, %v1913_v17  ;;  %v12166_v23 = vld [vmem:[#allocation2 + $0x250] sm:$0xff] }
 0x413   :  { %17150 = vst [vmem:[#allocation128_spill] sm:$0xff] %v12112_v35  ;;  %17151 = vst [vmem:[#allocation129_spill] sm:$0xff] %v12114_v4  ;;  %v12153_v61 = vpack.c.bf16 %v12103_v45, %v12101_v39  ;;  %v12159_v4 = vld [vmem:[#allocation2 + $0x238] sm:$0xff]  ;;  %v12161_v42 = vpack.c.bf16 %v1920_v32, %v1918_v31  ;;  %v1928_v17 = vsel %vm1825_vm0, %v1926_v15, %v1927_v36  ;;  %v1937_v53 = vrot.slane %v12144_v57, 1  ;;  %v12198_v45 = vld [vmem:[#allocation2 + $0x270] sm:$0xff] }
 0x414   :  { %8852 = vmatmul.mubr.bf16.gmra.mxu1 %v12044_v58  ;;  %17152 = vst [vmem:[#allocation130_spill] sm:$0xff] %v12117_v48  ;;  %17153 = vst [vmem:[#allocation131_spill] sm:$0xff] %v12121_v21  ;;  %v1922_v58 = vrot.slane %v12099_v28, 1  ;;  %v1930_v51 = vsel %vm1825_vm0, %v1927_v36, %v1929_v37  ;;  %v1936_v28 = vrot.slane %v12142_v0, 1  ;;  %v1939_v36 = vrot.slane %v12166_v23, 1  ;;  %v12184_v37 = vld [vmem:[#allocation2 + $0x258] sm:$0xff] }
 0x415   :  { %8855 = vmatprep.mubr.bf16.mxu1 %v12063_v49  ;;  %17154 = vst [vmem:[#allocation132_spill] sm:$0xff] %v12140_v9  ;;  %17155 = vst [vmem:[#allocation133_spill] sm:$0xff] %v12142_v0  ;;  %v12155_v49 = vld [vmem:[#allocation2 + $0x228] sm:$0xff]  ;;  %v12191_v39 = vpack.c.bf16 %v1930_v51, %v1928_v17 }
 0x416   :  { %17156 = vst [vmem:[#allocation134_spill] sm:$0xff] %v12144_v57  ;;  %17157 = vst [vmem:[#allocation135_spill] sm:$0xff] %v12147_v44  ;;  %v1923_v29 = vsel %vm1825_vm0, %v1921_v8, %v1922_v58  ;;  %v1925_v12 = vsel %vm1825_vm0, %v1922_v58, %v1924_v24  ;;  %v1931_v31 = vrot.slane %v12155_v49, 1  ;;  %v1934_v8 = vrot.slane %v12159_v4, 1  ;;  %v12200_v24 = vld [vmem:[#allocation2 + $0x278] sm:$0xff]  ;;  %v12206_v51 = vld [vmem:[#allocation2 + $0x268] sm:$0xff] }
 0x417   :  { %8936 = vmatmul.mubr.bf16.gmra.mxu0 %v12028_v14  ;;  %17158 = vst [vmem:[#allocation136_spill] sm:$0xff] %v12153_v61  ;;  %17159 = vst [vmem:[#allocation137_spill] sm:$0xff] %v12155_v49  ;;  %v12157_v14 = vld [vmem:[#allocation2 + $0x230] sm:$0xff]  ;;  %v12189_v33 = vpack.c.bf16 %v1925_v12, %v1923_v29  ;;  %v1938_v12 = vsel %vm1825_vm0, %v1936_v28, %v1937_v53  ;;  %v12208_v29 = vld [vmem:[#allocation2 + $0x280] sm:$0xff] }
 0x418   :  { %8939 = vmatprep.mubr.bf16.mxu0 %v12050_v38  ;;  %17160 = vst [vmem:[#allocation138_spill] sm:$0xff] %v12157_v14  ;;  %17161 = vst [vmem:[#allocation139_spill] sm:$0xff] %v12159_v4  ;;  %v1932_v32 = vrot.slane %v12157_v14, 1  ;;  %v12180_v58 = vpack.c.bf16 %v12157_v14, %v12155_v49  ;;  %v12186_v38 = vld [vmem:[#allocation2 + $0x260] sm:$0xff]  ;;  %v12218_v49 = vld [vmem:[#allocation2 + $0x288] sm:$0xff]  ;;  %v1941_v4 = vrot.slane %v12184_v37, 1 }
 0x419   :  { %17162 = vst [vmem:[#allocation140_spill] sm:$0xff] %v12161_v42  ;;  %17163 = vst [vmem:[#allocation141_spill] sm:$0xff] %v12166_v23  ;;  %v12215_v14 = vpack.c.bf16 %v12186_v38, %v12184_v37  ;;  %v12222_v28 = vld [vmem:[#allocation2 + $0x2a8] sm:$0xff]  ;;  %v12233_v23 = vld [vmem:[#allocation2 + $0x2b0] sm:$0xff]  ;;  %v1942_v35 = vrot.slane %v12186_v38, 1 }
 0x41a   :  { %17164 = vst [vmem:[#allocation142_spill] sm:$0xff] %v12180_v58  ;;  %17165 = vst [vmem:[#allocation143_spill] sm:$0xff] %v12184_v37  ;;  %v1933_v17 = vsel %vm1825_vm0, %v1931_v31, %v1932_v32  ;;  %v1935_v15 = vsel %vm1825_vm0, %v1932_v32, %v1934_v8  ;;  %v1946_v32 = vrot.slane %v12198_v45, 1  ;;  %v1947_v8 = vrot.slane %v12200_v24, 1 }
 0x41b   :  { %17166 = vst [vmem:[#allocation144_spill] sm:$0xff] %v12186_v38  ;;  %17167 = vst [vmem:[#allocation145_spill] sm:$0xff] %v12189_v33  ;;  %v12243_v31 = vpack.c.bf16 %v12200_v24, %v12198_v45  ;;  %v1957_v58 = vrot.slane %v12222_v28, 1  ;;  %v1959_v10 = vrot.slane %v12233_v23, 1  ;;  %v1943_v40 = vsel %vm1825_vm0, %v1941_v4, %v1942_v35  ;;  %v12274_v4 = vld [vmem:[#allocation2 + $0x2c0] sm:$0xff] }
 0x41c   :  { %8856 = vmatmul.mubr.bf16.gmra.mxu1 %v12087_v47  ;;  %17168 = vst [vmem:[#allocation146_spill] sm:$0xff] %v12191_v39  ;;  %v12196_v47 = vpack.c.bf16 %v12144_v57, %v12142_v0  ;;  %17170 = vst [vmem:[#allocation148_spill] sm:$0xff] %v12208_v29  ;;  %v17172_v0 = vmov 0.0|0.0   ;;  %v12229_v57 = vld [vmem:[#allocation2 + $0x290] sm:$0xff]  ;;  %v1951_v39 = vrot.slane %v12218_v49, 1  ;;  %v1948_v50 = vsel %vm1825_vm0, %v1946_v32, %v1947_v8 }
 0x41d   :  { %8859 = vmatprep.mubr.bf16.mxu1 %v12094_v46  ;;  %17171 = vst [vmem:[#allocation149_spill] sm:$0xff] %v12215_v14  ;;  %v12220_v46 = vld [vmem:[#allocation2 + $0x2a0] sm:$0xff]  ;;  %v12231_v14 = vld [vmem:[#allocation2 + $0x298] sm:$0xff]  ;;  %17173 = vst [vmem:[#allocation150_spill] sm:$0xff] %v12233_v23  ;;  %v1952_v37 = vrot.slane %v12229_v57, 1 }
 0x41e   :  { %17169 = vst [vmem:[#allocation147_spill] sm:$0xff] %v12196_v47  ;;  %17175 = vst [vmem:[#allocation152_spill] sm:$0xff] %v12243_v31  ;;  %v1956_v47 = vrot.slane %v12220_v46, 1  ;;  %v1954_v38 = vrot.slane %v12231_v14, 1 }
 0x41f   :  { %8940 = vmatmul.mubr.bf16.gmra.mxu0 %v12074_v63  ;;  %v1940_v63 = vsel %vm1825_vm0, %v1937_v53, %v1939_v36  ;;  %v1949_v53 = vrot.slane %v12208_v29, 1  ;;  %v12239_v36 = vpack.c.bf16 %v1935_v15, %v1933_v17  ;;  %v12270_v29 = vpack.c.bf16 %v12222_v28, %v12220_v46 }
 0x420   :  { %8943 = vmatprep.mubr.bf16.mxu0 %v17172_v0  ;;  %v1944_v0 = vrot.slane %v12206_v51, 1  ;;  %v12252_v15 = vpack.c.bf16 %v1940_v63, %v1938_v12  ;;  %v12264_v63 = vpack.c.bf16 %v12229_v57, %v12218_v49  ;;  %v1953_v32 = vsel %vm1825_vm0, %v1951_v39, %v1952_v37  ;;  %v12283_v12 = vld [vmem:[#allocation2 + $0x2d8] sm:$0xff]  ;;  %v12294_v39 = vld [vmem:[#allocation2 + $0x2e8] sm:$0xff] }
 0x421   :  { %17174 = vst [vmem:[#allocation151_spill] sm:$0xff] %v12239_v36  ;;  %v17177_v36 = vld [vmem:[#allocation64_spill] sm:$0xff]  ;;  %v1950_v23 = vsel %vm1825_vm0, %v1947_v8, %v1949_v53  ;;  %17179 = vst [vmem:[#allocation154_spill] sm:$0xff] %v12270_v29  ;;  %v1955_v8 = vsel %vm1825_vm0, %v1952_v37, %v1954_v38  ;;  %v1960_v53 = vsel %vm1825_vm0, %v1957_v58, %v1959_v10  ;;  %v12315_v38 = vld [vmem:[#allocation2 + $0x2f8] sm:$0xff]  ;;  %v17184_v10 = vrot.slane %v11713_v19, 2 }
 0x422   :  { %17176 = vst [vmem:[#allocation153_spill] sm:$0xff] %v12252_v15  ;;  %v1945_v52 = vsel %vm1825_vm0, %v1942_v35, %v1944_v0  ;;  %17178 = vst [vmem:[#allocation64_spill] sm:$0xff] %v12264_v63  ;;  %v12276_v35 = vld [vmem:[#allocation2 + $0x2d0] sm:$0xff]  ;;  %v1958_v0 = vsel %vm1825_vm0, %v1956_v47, %v1957_v58  ;;  %v12288_v31 = vpack.c.bf16 %v1950_v23, %v1948_v50  ;;  %v12292_v29 = vld [vmem:[#allocation2 + $0x2c8] sm:$0xff]  ;;  %v17185_v47 = vrot.slane %v11711_v59, 2 }
 0x423   :  { %v12286_v17 = vpack.c.bf16 %v1945_v52, %v1943_v40  ;;  %v12300_v52 = vld [vmem:[#allocation2 + $0x2f0] sm:$0xff]  ;;  %v12302_v50 = vld [vmem:[#allocation2 + $0x300] sm:$0xff]  ;;  %v12304_v40 = vpack.c.bf16 %v1955_v8, %v1953_v32  ;;  %v12306_v23 = vpack.c.bf16 %v1960_v53, %v1958_v0  ;;  %v17186_v58 = vrot.slane %v11731_v54, 2 }
 0x424   :  { %8860 = vmatmul.mubr.bf16.gmra.mxu1 %v12117_v48  ;;  %17181 = vst [vmem:[#allocation156_spill] sm:$0xff] %v12288_v31  ;;  %v12323_v53 = vld [vmem:[#allocation2 + $0x320] sm:$0xff]  ;;  %v2780_v37 = vsel %vm2772_vm1, %v17185_v47, %v17184_v10  ;;  %v17187_v32 = vmov %v17184_v10  ;;  %v17188_v0 = vrot.slane %v11721_v41, 2  ;;  %v2786_v59 = vrot.slane %v11741_v16, 2 }
 0x425   :  { %8863 = vmatprep.mubr.bf16.mxu1 %v17177_v36  ;;  %v12272_v36 = vld [vmem:[#allocation2 + $0x2b8] sm:$0xff]  ;;  %17180 = vst [vmem:[#allocation155_spill] sm:$0xff] %v12286_v17  ;;  %17182 = vst [vmem:[#allocation157_spill] sm:$0xff] %v12304_v40  ;;  %v2782_v8 = vsel %vm2772_vm1, %v17187_v32, %v17186_v58  ;;  %v17190_v54 = vrot.slane %v11757_v6, 2  ;;  %v17191_v19 = vrot.slane %v11755_v2, 2  ;;  %v17193_v32 = vrot.slane %v11766_v26, 2 }
 0x426   :  { %17183 = vst [vmem:[#allocation158_spill] sm:$0xff] %v12306_v23  ;;  %v17196_v2 = vrot.slane %v11762_v18, 2  ;;  %v2796_v41 = vrot.slane %v11771_v34, 2  ;;  %v17199_v26 = vrot.slane %v11812_v22, 2  ;;  %v17200_v6 = vrot.slane %v11810_v1, 2  ;;  %v17254_v48 = vld [vmem:[#allocation147_spill] sm:$0xff] }
 0x427   :  { %8944 = vmatmul.mubr.bf16.gmra.mxu0 %v12108_v62  ;;  %v12310_v62 = vld [vmem:[#allocation2 + $0x308] sm:$0xff]  ;;  %v2790_v58 = vsel %vm2772_vm1, %v17191_v19, %v17190_v54  ;;  %v2806_v34 = vrot.slane %v11820_v13, 2  ;;  %v17206_v1 = vrot.slane %v11851_v25, 2  ;;  %v17211_v13 = vrot.slane %v11864_v60, 2 }
 0x428   :  { %8947 = vmatprep.mubr.bf16.mxu0 %v12121_v21  ;;  %v12317_v21 = vld [vmem:[#allocation2 + $0x318] sm:$0xff]  ;;  %v17202_v18 = vmov %v17199_v26 }
 0x42c   :  { %8864 = vmatmul.mubr.bf16.gmra.mxu1 %v12147_v44  ;;  %v17189_v44 = vrot.slane %v11719_v11, 2  ;;  %v12480_v11 = vld [vmem:[#allocation2 + $0x188] sm:$0xff] }
 0x42d   :  { %8867 = vmatprep.mubr.bf16.mxu1 %v12161_v42  ;;  %v12345_v42 = vpack.c.bf16 %v2782_v8, %v2780_v37  ;;  %v17195_v8 = vrot.slane %v11764_v30, 2 }
 0x42e   :  { %v2785_v23 = vsel %vm2772_vm1, %v17189_v44, %v17188_v0  ;;  %v17192_v44 = vmov %v17188_v0  ;;  %v17194_v0 = vmov %v17190_v54 }
 0x42f   :  { %8948 = vmatmul.mubr.bf16.gmra.mxu0 %v12140_v9  ;;  %v2787_v16 = vsel %vm2772_vm1, %v17192_v44, %v2786_v59  ;;  %v2792_v37 = vsel %vm2772_vm1, %v17194_v0, %v17193_v32  ;;  %v2795_v54 = vsel %vm2772_vm1, %v17196_v2, %v17195_v8  ;;  %v2800_v59 = vsel %vm2772_vm1, %v17200_v6, %v17199_v26  ;;  %v17303_v9 = vld [vmem:[#allocation137_spill] sm:$0xff] }
 0x430   :  { %8951 = vmatprep.mubr.bf16.mxu0 %v12153_v61  ;;  %v12368_v19 = vpack.c.bf16 %v2787_v16, %v2785_v23  ;;  %v12370_v47 = vpack.c.bf16 %v2792_v37, %v2790_v58  ;;  %v17201_v44 = vrot.slane %v11814_v7, 2  ;;  %v17203_v0 = vrot.slane %v11818_v43, 2 }
 0x431   :  { %v17204_v23 = vrot.slane %v11816_v55, 2  ;;  %v17205_v16 = vrot.slane %v11860_v3, 2  ;;  %v17207_v7 = vmov %v17195_v8  ;;  %v17209_v2 = vrot.slane %v11871_v27, 2 }
 0x432   :  { %17197 = vst [vmem:[#allocation159_spill] sm:$0xff] %v12368_v19  ;;  %17198 = vst [vmem:[#allocation160_spill] sm:$0xff] %v12370_v47  ;;  %v2802_v32 = vsel %vm2772_vm1, %v17202_v18, %v17201_v44  ;;  %v2797_v22 = vsel %vm2772_vm1, %v17207_v7, %v2796_v41  ;;  %v17212_v6 = vrot.slane %v11862_v5, 2  ;;  %v17214_v30 = vmov %v17203_v0 }
 0x433   :  { %v2805_v58 = vsel %vm2772_vm1, %v17204_v23, %v17203_v0  ;;  %v2810_v37 = vsel %vm2772_vm1, %v17206_v1, %v17205_v16  ;;  %v12397_v8 = vpack.c.bf16 %v2802_v32, %v2800_v59  ;;  %v17210_v55 = vmov %v17205_v16  ;;  %v17218_v32 = vld [vmem:[#allocation73_spill] sm:$0xff] }
 0x434   :  { %v2812_v26 = vsel %vm2772_vm1, %v17210_v55, %v17209_v2  ;;  %v2815_v25 = vsel %vm2772_vm1, %v17212_v6, %v17211_v13  ;;  %v12409_v44 = vpack.c.bf16 %v2797_v22, %v2795_v54  ;;  %v2807_v41 = vsel %vm2772_vm1, %v17214_v30, %v2806_v34  ;;  %8868 = vmatmul.mubr.bf16.gmra.mxu1 %v12189_v33  ;;  %v17220_v54 = vld [vmem:[#allocation62_spill] sm:$0xff]  ;;  %v17223_v16 = vld [vmem:[#allocation25_spill] sm:$0xff] }
 0x435   :  { %17208 = vst [vmem:[#allocation161_spill] sm:$0xff] %v12397_v8  ;;  %v12414_v59 = vpack.c.bf16 %v2812_v26, %v2810_v37  ;;  %v2816_v27 = vrot.slane %v11873_v56, 2  ;;  %v12418_v3 = vpack.c.bf16 %v2807_v41, %v2805_v58  ;;  %v17217_v18 = vrot.slane %v11899_v20, 2  ;;  %v17225_v37 = vld [vmem:[#allocation3_spill] sm:$0xff]  ;;  %v17227_v58 = vld [vmem:[#allocation146_spill] sm:$0xff]  ;;  %v17230_v26 = vld [vmem:[#allocation21_spill] sm:$0xff] }
 0x436   :  { %17213 = vst [vmem:[#allocation162_spill] sm:$0xff] %v12409_v44  ;;  %v17219_v5 = vrot.slane %v17218_v32, 2  ;;  %v17221_v23 = vrot.slane %v17220_v54, 2  ;;  %v17224_v1 = vrot.slane %v17223_v16, 2  ;;  %v17226_v56 = vrot.slane %v17225_v37, 2  ;;  %8871 = vmatprep.mubr.bf16.mxu1 %v17227_v58  ;;  %v17231_v6 = vld [vmem:[#allocation85_spill] sm:$0xff] }
 0x437   :  { %17215 = vst [vmem:[#allocation163_spill] sm:$0xff] %v12414_v59  ;;  %17216 = vst [vmem:[#allocation164_spill] sm:$0xff] %v12418_v3  ;;  %v17222_v43 = vmov %v17217_v18  ;;  %v17228_v22 = vmov %v17211_v13  ;;  %v2826_v13 = vrot.slane %v17230_v26, 2  ;;  %v17232_v20 = vrot.slane %v17231_v6, 2  ;;  %v17233_v30 = vld [vmem:[#allocation17_spill] sm:$0xff]  ;;  %v12447_v32 = vld [vmem:[#allocation2 + $0x328] sm:$0xff] }
 0x438   :  { %v2820_v0 = vsel %vm2772_vm1, %v17219_v5, %v17217_v18  ;;  %v2822_v34 = vsel %vm2772_vm1, %v17222_v43, %v17221_v23  ;;  %v2825_v7 = vsel %vm2772_vm1, %v17226_v56, %v17224_v1  ;;  %v2817_v2 = vsel %vm2772_vm1, %v17228_v22, %v2816_v27  ;;  %v17236_v54 = vld [vmem:[#allocation93_spill] sm:$0xff]  ;;  %v17243_v56 = vld [vmem:[#allocation96_spill] sm:$0xff]  ;;  %v12462_v26 = vld [vmem:[#allocation2 + $0x180] sm:$0xff] }
 0x439   :  { %v12439_v55 = vpack.c.bf16 %v2822_v34, %v2820_v0  ;;  %v17234_v41 = vrot.slane %v17233_v30, 2  ;;  %v12449_v5 = vpack.c.bf16 %v2817_v2, %v2815_v25  ;;  %v17237_v23 = vrot.slane %v17236_v54, 2  ;;  %v17239_v0 = vld [vmem:[#allocation92_spill] sm:$0xff]  ;;  %v17249_v54 = vld [vmem:[#allocation99_spill] sm:$0xff]  ;;  %v17274_v58 = vld [vmem:[#allocation113_spill] sm:$0xff] }
 0x43a   :  { %v17238_v60 = vmov %v17232_v20  ;;  %v17240_v43 = vrot.slane %v17239_v0, 2  ;;  %v17241_v34 = vld [vmem:[#allocation84_spill] sm:$0xff]  ;;  %v2836_v22 = vrot.slane %v17243_v56, 2  ;;  %v17245_v25 = vrot.slane %v17223_v16, 2 }
 0x43b   :  { %17229 = vst [vmem:[#allocation73_spill] sm:$0xff] %v12439_v55  ;;  %v2830_v18 = vsel %vm2772_vm1, %v17234_v41, %v17232_v20  ;;  %17235 = vst [vmem:[#allocation62_spill] sm:$0xff] %v12449_v5  ;;  %v2832_v27 = vsel %vm2772_vm1, %v17238_v60, %v17237_v23  ;;  %v17242_v1 = vrot.slane %v17241_v34, 2  ;;  %v17244_v20 = vld [vmem:[#allocation142_spill] sm:$0xff]  ;;  %v17247_v6 = vld [vmem:[#allocation100_spill] sm:$0xff]  ;;  %v17250_v23 = vrot.slane %v17249_v54, 2 }
 0x43c   :  { %8952 = vmatmul.mubr.bf16.gmra.mxu0 %v17244_v20  ;;  %v2827_v2 = vsel %vm2772_vm1, %v17245_v25, %v2826_v13  ;;  %v12468_v30 = vpack.c.bf16 %v2832_v27, %v2830_v18  ;;  %v17248_v41 = vrot.slane %v17247_v6, 2  ;;  %v17251_v34 = vld [vmem:[#allocation101_spill] sm:$0xff]  ;;  %v17256_v13 = vrot.slane %v17239_v0, 2  ;;  %v17260_v54 = vld [vmem:[#allocation104_spill] sm:$0xff] }
 0x43d   :  { %v2835_v37 = vsel %vm2772_vm1, %v17242_v1, %v17240_v43  ;;  %v17252_v43 = vrot.slane %v17251_v34, 2  ;;  %8955 = vmatprep.mubr.bf16.mxu0 %v17254_v48  ;;  %v12483_v16 = vpack.c.bf16 %v2827_v2, %v2825_v7  ;;  %v17258_v25 = vld [vmem:[#allocation105_spill] sm:$0xff]  ;;  %v17272_v34 = vld [vmem:[#allocation114_spill] sm:$0xff]  ;;  %v17275_v2 = vrot.slane %v17274_v58, 2  ;;  %v17276_v48 = vld [vmem:[#allocation115_spill] sm:$0xff] }
 0x43e   :  { %17246 = vst [vmem:[#allocation25_spill] sm:$0xff] %v12468_v30  ;;  %v2840_v60 = vsel %vm2772_vm1, %v17250_v23, %v17248_v41  ;;  %v17253_v1 = vmov %v17248_v41  ;;  %v2837_v18 = vsel %vm2772_vm1, %v17256_v13, %v2836_v22  ;;  %v17259_v41 = vrot.slane %v17258_v25, 2  ;;  %v17266_v13 = vld [vmem:[#allocation108_spill] sm:$0xff]  ;;  %v17297_v20 = vld [vmem:[#allocation125_spill] sm:$0xff] }
 0x43f   :  { %v2842_v56 = vsel %vm2772_vm1, %v17253_v1, %v17252_v43  ;;  %17255 = vst [vmem:[#allocation3_spill] sm:$0xff] %v12483_v16  ;;  %v17261_v23 = vrot.slane %v17260_v54, 2  ;;  %v12496_v43 = vpack.c.bf16 %v2837_v18, %v2835_v37  ;;  %v17263_v1 = vld [vmem:[#allocation106_spill] sm:$0xff]  ;;  %v17267_v54 = vrot.slane %v17266_v13, 2 }
 0x440   :  { %v12488_v27 = vpack.c.bf16 %v2842_v56, %v2840_v60  ;;  %v2846_v10 = vrot.slane %v17263_v1, 2  ;;  %v17264_v60 = vld [vmem:[#allocation109_spill] sm:$0xff]  ;;  %v17269_v18 = vld [vmem:[#allocation110_spill] sm:$0xff]  ;;  %v17273_v22 = vrot.slane %v17272_v34, 2  ;;  %v17277_v13 = vrot.slane %v17276_v48, 2  ;;  %v17287_v48 = vld [vmem:[#allocation120_spill] sm:$0xff] }
 0x441   :  { %v2845_v6 = vsel %vm2772_vm1, %v17261_v23, %v17259_v41  ;;  %17262 = vst [vmem:[#allocation85_spill] sm:$0xff] %v12496_v43  ;;  %v17265_v56 = vrot.slane %v17264_v60, 2  ;;  %v17268_v23 = vrot.slane %v17258_v25, 2  ;;  %v17270_v1 = vrot.slane %v17269_v18, 2 }
 0x442   :  { %17257 = vst [vmem:[#allocation21_spill] sm:$0xff] %v12488_v27  ;;  %v2860_v33 = vsel %vm2772_vm1, %v17275_v2, %v17273_v22  ;;  %v2866_v34 = vrot.slane %v17287_v48, 2  ;;  %v17288_v2 = vld [vmem:[#allocation124_spill] sm:$0xff]  ;;  %v17300_v48 = vld [vmem:[#allocation129_spill] sm:$0xff] }
 0x443   :  { %v2850_v41 = vsel %vm2772_vm1, %v17267_v54, %v17265_v56  ;;  %v2847_v37 = vsel %vm2772_vm1, %v17268_v23, %v2846_v10  ;;  %v17271_v7 = vmov %v17265_v56  ;;  %v17278_v56 = vmov %v17273_v22  ;;  %v17279_v54 = vld [vmem:[#allocation151_spill] sm:$0xff] }
 0x444   :  { %v2852_v0 = vsel %vm2772_vm1, %v17271_v7, %v17270_v1  ;;  %v2862_v25 = vsel %vm2772_vm1, %v17278_v56, %v17277_v13  ;;  %8872 = vmatmul.mubr.bf16.gmra.mxu1 %v17279_v54  ;;  %v12527_v10 = vpack.c.bf16 %v2847_v37, %v2845_v6  ;;  %v17283_v7 = vld [vmem:[#allocation119_spill] sm:$0xff]  ;;  %v17285_v1 = vld [vmem:[#allocation118_spill] sm:$0xff]  ;;  %v17289_v13 = vrot.slane %v17288_v2, 2 }
 0x445   :  { %v12529_v23 = vpack.c.bf16 %v2852_v0, %v2850_v41  ;;  %v12531_v60 = vpack.c.bf16 %v2862_v25, %v2860_v33  ;;  %v17284_v18 = vrot.slane %v17283_v7, 2  ;;  %v17286_v58 = vrot.slane %v17285_v1, 2  ;;  %8875 = vmatprep.mubr.bf16.mxu1 %v12252_v15  ;;  %v17290_v56 = vld [vmem:[#allocation122_spill] sm:$0xff]  ;;  %v17292_v0 = vld [vmem:[#allocation128_spill] sm:$0xff] }
 0x446   :  { %17280 = vst [vmem:[#allocation17_spill] sm:$0xff] %v12527_v10  ;;  %v17291_v54 = vrot.slane %v17290_v56, 2  ;;  %v17293_v41 = vrot.slane %v17292_v0, 2  ;;  %v17294_v33 = vmov %v17289_v13  ;;  %v17295_v25 = vld [vmem:[#allocation126_spill] sm:$0xff]  ;;  %v2876_v61 = vrot.slane %v17300_v48, 2  ;;  %v17305_v0 = vld [vmem:[#allocation139_spill] sm:$0xff] }
 0x447   :  { %17281 = vst [vmem:[#allocation93_spill] sm:$0xff] %v12529_v23  ;;  %17282 = vst [vmem:[#allocation92_spill] sm:$0xff] %v12531_v60  ;;  %v2865_v22 = vsel %vm2772_vm1, %v17286_v58, %v17284_v18  ;;  %v17296_v1 = vrot.slane %v17295_v25, 2  ;;  %v17298_v18 = vrot.slane %v17297_v20, 2  ;;  %v17301_v60 = vld [vmem:[#allocation138_spill] sm:$0xff]  ;;  %v17306_v2 = vrot.slane %v17305_v0, 2 }
 0x448   :  { %v2870_v6 = vsel %vm2772_vm1, %v17291_v54, %v17289_v13  ;;  %v2872_v37 = vsel %vm2772_vm1, %v17294_v33, %v17293_v41  ;;  %v17302_v56 = vrot.slane %v17301_v60, 2  ;;  %v17304_v54 = vrot.slane %v17303_v9, 2  ;;  %v17308_v23 = vld [vmem:[#allocation149_spill] sm:$0xff] }
 0x449   :  { %v2875_v58 = vsel %vm2772_vm1, %v17298_v18, %v17296_v1  ;;  %v12555_v15 = vpack.c.bf16 %v2872_v37, %v2870_v6  ;;  %8956 = vmatmul.mubr.bf16.gmra.mxu0 %v17308_v23  ;;  %v17309_v20 = vrot.slane %v17283_v7, 2  ;;  %v17311_v1 = vld [vmem:[#allocation134_spill] sm:$0xff]  ;;  %v17313_v48 = vld [vmem:[#allocation133_spill] sm:$0xff] }
 0x44a   :  { %v2880_v13 = vsel %vm2772_vm1, %v17304_v54, %v17302_v56  ;;  %v17307_v41 = vmov %v17302_v56  ;;  %v17312_v18 = vrot.slane %v17311_v1, 2  ;;  %v17314_v9 = vrot.slane %v17313_v48, 2  ;;  %v17315_v54 = vld [vmem:[#allocation141_spill] sm:$0xff] }
 0x44b   :  { %17299 = vst [vmem:[#allocation84_spill] sm:$0xff] %v12555_v15  ;;  %v2882_v33 = vsel %vm2772_vm1, %v17307_v41, %v17306_v2  ;;  %v2867_v6 = vsel %vm2772_vm1, %v17309_v20, %v2866_v34  ;;  %v2886_v0 = vrot.slane %v17315_v54, 2  ;;  %v17316_v15 = vld [vmem:[#allocation152_spill] sm:$0xff]  ;;  %v17318_v2 = vrot.slane %v17295_v25, 2  ;;  %v12596_v54 = vld [vmem:[#allocation2 + $0x2e0] sm:$0xff] }
 0x44c   :  { %v12572_v37 = vpack.c.bf16 %v2882_v33, %v2880_v13  ;;  %v2885_v56 = vsel %vm2772_vm1, %v17314_v9, %v17312_v18  ;;  %8959 = vmatprep.mubr.bf16.mxu0 %v17316_v15  ;;  %v12581_v60 = vpack.c.bf16 %v2867_v6, %v2865_v22  ;;  %v17319_v41 = vld [vmem:[#allocation144_spill] sm:$0xff]  ;;  %v17321_v13 = vld [vmem:[#allocation143_spill] sm:$0xff]  ;;  %v17323_v48 = vrot.slane %v12206_v51, 2  ;;  %8876 = vmatmul.mubr.bf16.gmra.mxu1 %v12286_v17 }
 0x44d   :  { %v2877_v7 = vsel %vm2772_vm1, %v17318_v2, %v2876_v61  ;;  %v17320_v34 = vrot.slane %v17319_v41, 2  ;;  %v17322_v33 = vrot.slane %v17321_v13, 2  ;;  %v17326_v25 = vrot.slane %v17311_v1, 2  ;;  %v17331_v41 = vld [vmem:[#allocation148_spill] sm:$0xff]  ;;  %8879 = vmatprep.mubr.bf16.mxu1 %v12288_v31 }
 0x44e   :  { %17310 = vst [vmem:[#allocation96_spill] sm:$0xff] %v12572_v37  ;;  %17317 = vst [vmem:[#allocation100_spill] sm:$0xff] %v12581_v60  ;;  %v12598_v22 = vpack.c.bf16 %v2877_v7, %v2875_v58  ;;  %v17328_v2 = vrot.slane %v12200_v24, 2  ;;  %v17333_v58 = vrot.slane %v12218_v49, 2  ;;  %v17340_v49 = vrot.slane %v12274_v4, 2 }
 0x44f   :  { %v2890_v20 = vsel %vm2772_vm1, %v17322_v33, %v17320_v34  ;;  %v17324_v18 = vmov %v17320_v34  ;;  %v2887_v61 = vsel %vm2772_vm1, %v17326_v25, %v2886_v0  ;;  %v17329_v34 = vrot.slane %v12198_v45, 2  ;;  %v17339_v25 = vld [vmem:[#allocation150_spill] sm:$0xff] }
 0x450   :  { %v2892_v9 = vsel %vm2772_vm1, %v17324_v18, %v17323_v48  ;;  %17325 = vst [vmem:[#allocation99_spill] sm:$0xff] %v12598_v22  ;;  %v12610_v13 = vpack.c.bf16 %v2887_v61, %v2885_v56  ;;  %v2896_v33 = vrot.slane %v17331_v41, 2  ;;  %v17332_v48 = vrot.slane %v12229_v57, 2  ;;  %v12637_v57 = vld [vmem:[#allocation2 + $0x310] sm:$0xff] }
 0x451   :  { %v12603_v6 = vpack.c.bf16 %v2892_v9, %v2890_v20  ;;  %v2895_v51 = vsel %vm2772_vm1, %v17329_v34, %v17328_v2  ;;  %v17334_v0 = vrot.slane %v12231_v14, 2  ;;  %v17337_v45 = vrot.slane %v12222_v28, 2  ;;  %8960 = vmatmul.mubr.bf16.gmra.mxu0 %v12264_v63 }
 0x452   :  { %17330 = vst [vmem:[#allocation105_spill] sm:$0xff] %v12610_v13  ;;  %v2900_v1 = vsel %vm2772_vm1, %v17333_v58, %v17332_v48  ;;  %v17335_v7 = vmov %v17332_v48  ;;  %v17338_v56 = vrot.slane %v12220_v46, 2  ;;  %v2906_v61 = vrot.slane %v17339_v25, 2 }
 0x453   :  { %17327 = vst [vmem:[#allocation101_spill] sm:$0xff] %v12603_v6  ;;  %v2902_v20 = vsel %vm2772_vm1, %v17335_v7, %v17334_v0  ;;  %v17341_v2 = vrot.slane %v12272_v36, 2  ;;  %v17342_v34 = vrot.slane %v12200_v24, 2  ;;  %v17343_v46 = vrot.slane %v12292_v29, 2 }
 0x454   :  { %v12623_v18 = vpack.c.bf16 %v2902_v20, %v2900_v1  ;;  %v2905_v9 = vsel %vm2772_vm1, %v17338_v56, %v17337_v45  ;;  %v17344_v48 = vmov %v17340_v49  ;;  %v17345_v1 = vrot.slane %v12283_v12, 2  ;;  %8880 = vmatmul.mubr.bf16.gmra.mxu1 %v12304_v40 }
 0x455   :  { %v2910_v14 = vsel %vm2772_vm1, %v17341_v2, %v17340_v49  ;;  %v2897_v41 = vsel %vm2772_vm1, %v17342_v34, %v2896_v33  ;;  %v2912_v58 = vsel %vm2772_vm1, %v17344_v48, %v17343_v46  ;;  %v17346_v0 = vrot.slane %v12276_v35, 2  ;;  %v12666_v34 = vld [vmem:[#allocation2 + $0x330] sm:$0xff]  ;;  %v12668_v46 = vld [vmem:[#allocation2 + $0x338] sm:$0xff] }
 0x456   :  { %17336 = vst [vmem:[#allocation104_spill] sm:$0xff] %v12623_v18  ;;  %v2916_v20 = vrot.slane %v12596_v54, 2  ;;  %v12654_v45 = vpack.c.bf16 %v2897_v41, %v2895_v51  ;;  %v17348_v24 = vrot.slane %v12222_v28, 2  ;;  %v12659_v56 = vpack.c.bf16 %v2912_v58, %v2910_v14  ;;  %17352 = vst [vmem:[#allocation108_spill] sm:$0xff] %v12666_v34 }
 0x457   :  { %v2915_v7 = vsel %vm2772_vm1, %v17346_v0, %v17345_v1  ;;  %v17350_v25 = vrot.slane %v12300_v52, 2  ;;  %v17351_v49 = vrot.slane %v12294_v39, 2  ;;  %17353 = vst [vmem:[#allocation110_spill] sm:$0xff] %v12668_v46  ;;  %v17355_v51 = vmov %v17345_v1 }
 0x458   :  { %17347 = vst [vmem:[#allocation106_spill] sm:$0xff] %v12654_v45  ;;  %v2907_v33 = vsel %vm2772_vm1, %v17348_v24, %v2906_v61  ;;  %17349 = vst [vmem:[#allocation109_spill] sm:$0xff] %v12659_v56  ;;  %v2917_v28 = vsel %vm2772_vm1, %v17355_v51, %v2916_v20  ;;  %v17356_v61 = vrot.slane %v12315_v38, 2  ;;  %v17358_v58 = vrot.slane %v12310_v62, 2 }
 0x459   :  { %v2920_v2 = vsel %vm2772_vm1, %v17351_v49, %v17350_v25  ;;  %v12670_v48 = vpack.c.bf16 %v2907_v33, %v2905_v9  ;;  %v17357_v14 = vmov %v17350_v25  ;;  %v17359_v1 = vrot.slane %v12302_v50, 2  ;;  %v1623_v25 = vld [vmem:[#allocation2 + $0x190] sm:$0xff]  ;;  %v17362_v49 = vld [vmem:[#allocation154_spill] sm:$0xff] }
 0x45a   :  { %v2922_v41 = vsel %vm2772_vm1, %v17357_v14, %v17356_v61  ;;  %v1964_v9 = vrot.slane %v12292_v29, 1  ;;  %v12687_v24 = vpack.c.bf16 %v2917_v28, %v2915_v7  ;;  %v2926_v20 = vrot.slane %v12637_v57, 2  ;;  %8963 = vmatprep.mubr.bf16.mxu0 %v17362_v49  ;;  %v12700_v29 = vld [vmem:[%s16458_s4 + $0x178] sm:$0xff]  }
 0x45b   :  { %17354 = vst [vmem:[#allocation114_spill] sm:$0xff] %v12670_v48  ;;  %v2925_v0 = vsel %vm2772_vm1, %v17359_v1, %v17358_v58  ;;  %v12689_v33 = vpack.c.bf16 %v2922_v41, %v2920_v2  ;;  %v3876_v51 = vrot.slane %v12666_v34, 1  ;;  %v3877_v61 = vrot.slane %v12668_v46, 1  ;;  %v1677_v1 = vld [vmem:[#allocation2 + $0x340] sm:$0xff]  ;;  %9215 = vmatprep.subr.bf16.mxu0 %v12700_v29 }
 0x45c   :  { %17360 = vst [vmem:[#allocation113_spill] sm:$0xff] %v12687_v24  ;;  %v4309_v14 = vrot.slane %v12666_v34, 2  ;;  %v4310_v58 = vrot.slane %v12668_v46, 2  ;;  %v17363_v7 = vrot.slane %v12310_v62, 2  ;;  %v17364_v28 = vrot.slane %v12323_v53, 2 }
 0x45d   :  { %17361 = vst [vmem:[#allocation115_spill] sm:$0xff] %v12689_v33  ;;  %v17365_v41 = vrot.slane %v12317_v21, 2  ;;  %v17366_v17 = vrot.slane %v12447_v32, 2  ;;  %v17368_v33 = vrot.slane %v12480_v11, 2  ;;  %v17369_v24 = vrot.slane %v12462_v26, 2 }
 0x45e   :  { %v2927_v2 = vsel %vm2772_vm1, %v17363_v7, %v2926_v20  ;;  %v17367_v46 = vmov %v17364_v28  ;;  %v4307_v7 = vrot.slane %v1623_v25, 2  ;;  %v17372_v18 = vrot.slane %v12480_v11, 1 }
 0x45f   :  { %v2930_v31 = vsel %vm2772_vm1, %v17365_v41, %v17364_v28  ;;  %v2932_v34 = vsel %vm2772_vm1, %v17367_v46, %v17366_v17  ;;  %v4306_v56 = vsel %vm2772_vm1, %v17369_v24, %v17368_v33  ;;  %v12720_v48 = vpack.c.bf16 %v2927_v2, %v2925_v0 }
 0x460   :  { %v12722_v20 = vpack.c.bf16 %v2932_v34, %v2930_v31  ;;  %v17373_v28 = vrot.slane %v12462_v26, 1  ;;  %v3874_v17 = vrot.slane %v1623_v25, 1  ;;  %v4311_v46 = vsel %vm2772_vm1, %v4309_v14, %v4310_v58 }
 0x461   :  { %17370 = vst [vmem:[#allocation119_spill] sm:$0xff] %v12720_v48  ;;  %v4312_v49 = vrot.slane %v1677_v1, 2  ;;  %v3878_v45 = vsel %vm1825_vm0, %v3876_v51, %v3877_v61  ;;  %v1967_v31 = vrot.slane %v12283_v12, 1  ;;  %v1969_v34 = vrot.slane %v12596_v54, 1  ;;  %v9723_v51 = vld [vmem:[%s16458_s4 + $0x138] sm:$0xff]  }
 0x462   :  { %17371 = vst [vmem:[#allocation118_spill] sm:$0xff] %v12722_v20  ;;  %v3873_v41 = vsel %vm1825_vm0, %v17373_v28, %v17372_v18  ;;  %v17374_v0 = vmov %v17368_v33  ;;  %v3879_v33 = vrot.slane %v1677_v1, 1  ;;  %v17375_v18 = vld [vmem:[#allocation158_spill] sm:$0xff]  ;;  %v12741_v25 = vpack.c.bf16 %v12274_v4, %v12272_v36  ;;  %9135 = vmatprep.subr.bf16.mxu1 %v9723_v51 }
 0x463   :  { %v4308_v24 = vsel %vm2772_vm1, %v17374_v0, %v4307_v7  ;;  %8883 = vmatprep.mubr.bf16.mxu1 %v17375_v18  ;;  %v17378_v2 = vrot.slane %v12480_v11, 1  ;;  %v4313_v28 = vsel %vm2772_vm1, %v4310_v58, %v4312_v49  ;;  %v12754_v1 = vpack.c.bf16 %v12283_v12, %v12276_v35 }
 0x464   :  { %17376 = vst [vmem:[#allocation120_spill] sm:$0xff] %v12741_v25  ;;  %v12746_v14 = vpack.c.bf16 %v4308_v24, %v4306_v56  ;;  %v12758_v0 = vpack.c.bf16 %v4313_v28, %v4311_v46  ;;  %v3880_v18 = vsel %vm1825_vm0, %v3877_v61, %v3879_v33  ;;  %8964 = vmatmul.mubr.bf16.gmra.mxu0 %v12741_v25  ;;  %v17381_v56 = vrot.slane %v12274_v4, 1 }
 0x465   :  { %v3875_v54 = vsel %vm1825_vm0, %v17378_v2, %v3874_v17  ;;  %17379 = vst [vmem:[#allocation122_spill] sm:$0xff] %v12754_v1  ;;  %v17382_v24 = vrot.slane %v12272_v36, 1  ;;  %v12770_v12 = vpack.c.bf16 %v3880_v18, %v3878_v45  ;;  %8967 = vmatprep.mubr.bf16.mxu0 %v12754_v1  ;;  %v1970_v46 = vsel %vm1825_vm0, %v1967_v31, %v1969_v34 }
 0x466   :  { %17377 = vst [vmem:[#allocation124_spill] sm:$0xff] %v12746_v14  ;;  %v12756_v7 = vpack.c.bf16 %v3875_v54, %v3873_v41  ;;  %17380 = vst [vmem:[#allocation128_spill] sm:$0xff] %v12758_v0  ;;  %v17383_v49 = vmov %v17381_v56  ;;  %v17385_v41 = vrot.slane %v12276_v35, 1  ;;  %v1971_v2 = vrot.slane %v12294_v39, 1 }
 0x467   :  { %v1963_v17 = vsel %vm1825_vm0, %v17382_v24, %v17381_v56  ;;  %v1965_v58 = vsel %vm1825_vm0, %v17383_v49, %v1964_v9  ;;  %17384 = vst [vmem:[#allocation126_spill] sm:$0xff] %v12770_v12  ;;  %v1972_v4 = vrot.slane %v12300_v52, 1  ;;  %v1974_v9 = vrot.slane %v12315_v38, 1  ;;  %v9776_v56 = vld [vmem:[#allocation2] sm:$0xff] }
 0x468   :  { %v1968_v61 = vsel %vm1825_vm0, %v17385_v41, %v1967_v31  ;;  %v12777_v33 = vpack.c.bf16 %v1965_v58, %v1963_v17  ;;  %v1976_v45 = vrot.slane %v12302_v50, 1  ;;  %v1977_v35 = vrot.slane %v12310_v62, 1 }
 0x469   :  { %v12779_v36 = vpack.c.bf16 %v1970_v46, %v1968_v61  ;;  %v1979_v18 = vrot.slane %v12637_v57, 1  ;;  %v12791_v31 = vpack.c.bf16 %v12300_v52, %v12294_v39  ;;  %v12795_v34 = vpack.c.bf16 %v12310_v62, %v12302_v50  ;;  %v17393_v46 = vld [vmem:[#allocation57_spill] sm:$0xff] }
 0x46a   :  { %17386 = vst [vmem:[#allocation125_spill] sm:$0xff] %v12777_v33  ;;  %8884 = vmatmul.mubr.bf16.gmra.mxu1 %v12777_v33  ;;  %v1973_v38 = vsel %vm1825_vm0, %v1971_v2, %v1972_v4  ;;  %v1975_v54 = vsel %vm1825_vm0, %v1972_v4, %v1974_v9  ;;  %v1978_v57 = vsel %vm1825_vm0, %v1976_v45, %v1977_v35  ;;  %v2773_v24 = vrot.slane %v9776_v56, 2  ;;  %v17396_v4 = vld [vmem:[#allocation67_spill] sm:$0xff]  ;;  %v9725_v9 = vld [vmem:[%s16458_s4 + $0x130] sm:$0xff]   ;;  %v9726_v45 = vld [vmem:[%s16458_s4 + $0x168] sm:$0xff]  }
 0x46b   :  { %17387 = vst [vmem:[#allocation129_spill] sm:$0xff] %v12779_v36  ;;  %8887 = vmatprep.mubr.bf16.mxu1 %v12779_v36  ;;  %17388 = vst [vmem:[#allocation138_spill] sm:$0xff] %v12791_v31  ;;  %v1980_v28 = vsel %vm1825_vm0, %v1977_v35, %v1979_v18  ;;  %v12803_v39 = vpack.c.bf16 %v1975_v54, %v1973_v38  ;;  %v1981_v62 = vrot.slane %v12317_v21, 1  ;;  %v1982_v50 = vrot.slane %v12323_v53, 1  ;;  %v9728_v35 = vld [vmem:[%s16458_s4 + $0x160] sm:$0xff]   ;;  %v17397_v18 = vld [vmem:[#allocation89_spill] sm:$0xff] }
 0x46c   :  { %17389 = vst [vmem:[#allocation137_spill] sm:$0xff] %v12795_v34  ;;  %8968 = vmatmul.mubr.bf16.gmra.mxu0 %v12791_v31  ;;  %v12805_v52 = vpack.c.bf16 %v1980_v28, %v1978_v57  ;;  %v1984_v17 = vrot.slane %v12447_v32, 1  ;;  %v12814_v49 = vpack.c.bf16 %v12323_v53, %v12317_v21  ;;  %v2777_v58 = vsel %vm2772_vm1, %v2773_v24, %v2773_v24  ;;  %v9724_v21 = vld [vmem:[%s16458_s4 + $0x170] sm:$0xff]   ;;  %v17395_v53 = vld [vmem:[#allocation83_spill] sm:$0xff]  ;;  %v17398_v38 = vld [vmem:[#allocation86_spill] sm:$0xff] }
 0x46d   :  { %8971 = vmatprep.mubr.bf16.mxu0 %v12795_v34  ;;  %17390 = vst [vmem:[#allocation139_spill] sm:$0xff] %v12803_v39  ;;  %v1983_v41 = vsel %vm1825_vm0, %v1981_v62, %v1982_v50  ;;  %v12821_v2 = vpack.c.bf16 %v2777_v58, %v2773_v24  ;;  %v9730_v54 = vld [vmem:[%s16458_s4 + $0x158] sm:$0xff]   ;;  %v9732_v57 = vld [vmem:[%s16458_s4 + $0x150] sm:$0xff]   ;;  %v17400_v24 = vld [vmem:[#allocation32_spill] sm:$0xff] }
 0x46e   :  { %17391 = vst [vmem:[#allocation134_spill] sm:$0xff] %v12805_v52  ;;  %17392 = vst [vmem:[#allocation133_spill] sm:$0xff] %v12814_v49  ;;  %v1985_v61 = vsel %vm1825_vm0, %v1982_v50, %v1984_v17  ;;  %v9731_v28 = vld [vmem:[%s16458_s4 + $0x118] sm:$0xff]   ;;  %v17399_v56 = vld [vmem:[#allocation9_spill] sm:$0xff] }
 0x46f   :  { %v12823_v32 = vpack.c.bf16 %v1985_v61, %v1983_v41  ;;  %v9733_v62 = vld [vmem:[%s16458_s4 + $0x110] sm:$0xff]   ;;  %v9734_v50 = vld [vmem:[%s16458_s4 + $0x148] sm:$0xff]   ;;  %v9736_v17 = vld [vmem:[%s16458_s4 + $0x140] sm:$0xff]  }
 0x470   :  { %v9735_v58 = vld [vmem:[%s16458_s4 + $0x108] sm:$0xff]   ;;  %v17401_v41 = vld [vmem:[#allocation59_spill] sm:$0xff] }
 0x471   :  { %17394 = vst [vmem:[#allocation141_spill] sm:$0xff] %v12823_v32  ;;  %v17402_v61 = vld [vmem:[#allocation91_spill] sm:$0xff] }
 0x472   :  { %8888 = vmatmul.mubr.bf16.gmra.mxu1 %v12803_v39 }
 0x473   :  { %8891 = vmatprep.mubr.bf16.mxu1 %v12805_v52 }
 0x474   :  { %8972 = vmatmul.mubr.bf16.gmra.mxu0 %v12814_v49 }
 0x475   :  { %9071 = vmatprep.mubr.bf16.mxu0 %v17393_v46  ;;  %v9737_v46 = vld [vmem:[%s16458_s4 + $0x100] sm:$0xff]  }
 0x47a   :  { %8892 = vmatmul.mubr.bf16.gmra.mxu1 %v12823_v32 }
 0x47b   :  { %8991 = vmatprep.mubr.bf16.mxu1 %v12821_v2 }
 0x47c   :  { %9072 = vmatmul.mubr.bf16.vlgmr.msra.gmra.mxu0 %v17395_v53 }
 0x47d   :  { %9075 = vmatprep.mubr.bf16.mxu0 %v17396_v4  ;;  %9216 = vmatpush3.bf16.msra.mxu0 %v12700_v29  ;;  %v9727_v29 = vld [vmem:[%s16458_s4 + $0x128] sm:$0xff]  }
 0x47e   :  { %9217 = vmatprep.subr.bf16.mxu0 %v9724_v21 }
 0x481   :  { %9218 = vmatpush3.bf16.msra.mxu0 %v9724_v21  ;;  %v17403_v21 = vld [vmem:[#allocation95_spill] sm:$0xff] }
 0x482   :  { %8992 = vmatmul.mubr.bf16.vlgmr.msra.gmra.mxu1 %v12345_v42  ;;  %9219 = vmatprep.subr.bf16.mxu0 %v9726_v45 }
 0x483   :  { %8995 = vmatprep.mubr.bf16.mxu1 %v12368_v19  ;;  %9136 = vmatpush3.bf16.msra.mxu1 %v9723_v51  ;;  %v9729_v51 = vld [vmem:[%s16458_s4 + $0x120] sm:$0xff]  }
 0x484   :  { %9137 = vmatprep.subr.bf16.mxu1 %v9725_v9  ;;  %9076 = vmatmul.mubr.bf16.gmra.mxu0 %v17397_v18 }
 0x485   :  { %9079 = vmatprep.mubr.bf16.mxu0 %v17398_v38  ;;  %9220 = vmatpush3.bf16.msra.mxu0 %v9726_v45  ;;  %v17405_v45 = vld [vmem:[#allocation98_spill] sm:$0xff] }
 0x486   :  { %9221 = vmatprep.subr.bf16.mxu0 %v9728_v35 }
 0x487   :  { %9138 = vmatpush3.bf16.msra.mxu1 %v9725_v9  ;;  %v17404_v9 = vld [vmem:[#allocation97_spill] sm:$0xff] }
 0x488   :  { %9139 = vmatprep.subr.bf16.mxu1 %v9727_v29 }
 0x489   :  { %9222 = vmatpush3.bf16.msra.mxu0 %v9728_v35  ;;  %v17406_v35 = vld [vmem:[#allocation107_spill] sm:$0xff] }
 0x48a   :  { %8996 = vmatmul.mubr.bf16.gmra.mxu1 %v12370_v47  ;;  %9223 = vmatprep.subr.bf16.mxu0 %v9730_v54 }
 0x48b   :  { %8999 = vmatprep.mubr.bf16.mxu1 %v12409_v44  ;;  %9140 = vmatpush3.bf16.msra.mxu1 %v9727_v29  ;;  %v17407_v29 = vld [vmem:[#allocation112_spill] sm:$0xff] }
 0x48c   :  { %9141 = vmatprep.subr.bf16.mxu1 %v9729_v51  ;;  %9080 = vmatmul.mubr.bf16.gmra.mxu0 %v17399_v56 }
 0x48d   :  { %9083 = vmatprep.mubr.bf16.mxu0 %v17400_v24  ;;  %9224 = vmatpush3.bf16.msra.mxu0 %v9730_v54  ;;  %v12900_v54 = vpack.c.bf16 %v12480_v11, %v12462_v26  ;;  %v17415_v11 = vld [vmem:[#allocation92_spill] sm:$0xff] }
 0x48e   :  { %9225 = vmatprep.subr.bf16.mxu0 %v9732_v57 }
 0x48f   :  { %9142 = vmatpush3.bf16.msra.mxu1 %v9729_v51  ;;  %v17408_v51 = vld [vmem:[#allocation117_spill] sm:$0xff]  ;;  %17409 = vst [vmem:[#allocation144_spill] sm:$0xff] %v12900_v54 }
 0x490   :  { %9143 = vmatprep.subr.bf16.mxu1 %v9731_v28 }
 0x491   :  { %9226 = vmatpush3.bf16.msra.mxu0 %v9732_v57  ;;  %v17410_v57 = vld [vmem:[#allocation127_spill] sm:$0xff] }
 0x492   :  { %9000 = vmatmul.mubr.bf16.gmra.mxu1 %v12397_v8  ;;  %9227 = vmatprep.subr.bf16.mxu0 %v9734_v50 }
 0x493   :  { %9003 = vmatprep.mubr.bf16.mxu1 %v12418_v3  ;;  %9144 = vmatpush3.bf16.msra.mxu1 %v9731_v28  ;;  %v17411_v28 = vld [vmem:[#allocation93_spill] sm:$0xff] }
 0x494   :  { %9145 = vmatprep.subr.bf16.mxu1 %v9733_v62  ;;  %9084 = vmatmul.mubr.bf16.gmra.mxu0 %v17401_v41  ;;  %v17418_v41 = vld [vmem:[#allocation84_spill] sm:$0xff] }
 0x495   :  { %9087 = vmatprep.mubr.bf16.mxu0 %v17402_v61  ;;  %9228 = vmatpush3.bf16.msra.mxu0 %v9734_v50 }
 0x496   :  { %9229 = vmatprep.subr.bf16.mxu0 %v9736_v17 }
 0x497   :  { %9146 = vmatpush3.bf16.msra.mxu1 %v9733_v62  ;;  %v12905_v62 = vpop.f32.mrf.mxu0 }
 0x498   :  { %9147 = vmatprep.subr.bf16.mxu1 %v9735_v58  ;;  %17412 = vst [vmem:[#allocation143_spill] sm:$0xff] %v12905_v62 }
 0x499   :  { %9230 = vmatpush3.bf16.msra.mxu0 %v9736_v17  ;;  %v17413_v17 = vld [vmem:[#allocation131_spill] sm:$0xff] }
 0x49a   :  { %9004 = vmatmul.mubr.bf16.gmra.mxu1 %v12414_v59 }
 0x49b   :  { %9007 = vmatprep.mubr.bf16.mxu1 %v12449_v5  ;;  %9148 = vmatpush3.bf16.msra.mxu1 %v9735_v58  ;;  %v17414_v58 = vld [vmem:[#allocation132_spill] sm:$0xff] }
 0x49c   :  { %9149 = vmatprep.subr.bf16.mxu1 %v9737_v46  ;;  %9088 = vmatmul.mubr.bf16.gmra.mxu0 %v17403_v21 }
 0x49d   :  { %9091 = vmatprep.mubr.bf16.mxu0 %v17404_v9 }
 0x49f   :  { %9150 = vmatpush3.bf16.msra.mxu1 %v9737_v46 }
 0x4a2   :  { %9008 = vmatmul.mubr.bf16.gmra.mxu1 %v12439_v55 }
 0x4a3   :  { %9011 = vmatprep.mubr.bf16.mxu1 %v12483_v16 }
 0x4a4   :  { %9092 = vmatmul.mubr.bf16.gmra.mxu0 %v17405_v45  ;;  %v8913_v50 = vpop.f32.mrf.mxu0 }
 0x4a5   :  { %9095 = vmatprep.mubr.bf16.mxu0 %v17406_v35 }
 0x4a6   :  { %v2517_v46 = vpop.f32.mrf.mxu0 }
 0x4aa   :  { %9012 = vmatmul.mubr.bf16.gmra.mxu1 %v12468_v30 }
 0x4ab   :  { %9015 = vmatprep.mubr.bf16.mxu1 %v12496_v43 }
 0x4ac   :  { %9096 = vmatmul.mubr.bf16.gmra.mxu0 %v17407_v29  ;;  %v8833_v29 = vpop.f32.mrf.mxu1 }
 0x4ad   :  { %9099 = vmatprep.mubr.bf16.mxu0 %v17408_v51  ;;  %v8914_v51 = vpop.f32.mrf.mxu0  ;;  %v12911_v26 = vadd.f32 %v8913_v50, %v8833_v29 }
 0x4b2   :  { %9016 = vmatmul.mubr.bf16.gmra.mxu1 %v12488_v27 }
 0x4b3   :  { %9019 = vmatprep.mubr.bf16.mxu1 %v12527_v10 }
 0x4b4   :  { %9100 = vmatmul.mubr.bf16.gmra.mxu0 %v12900_v54  ;;  %v2180_v54 = vpop.f32.mrf.mxu1 }
 0x4b5   :  { %9103 = vmatprep.mubr.bf16.mxu0 %v17410_v57  ;;  %v2520_v57 = vpop.f32.mrf.mxu0  ;;  %v12914_v35 = vadd.f32 %v2517_v46, %v2180_v54 }
 0x4b6   :  { %v8834_v45 = vpop.f32.mrf.mxu1 }
 0x4b7   :  { %v8917_v62 = vpop.f32.mrf.mxu0 }
 0x4b8   :  { %v2183_v21 = vpop.f32.mrf.mxu1 }
 0x4b9   :  { %v2533_v9 = vpop.f32.mrf.mxu0  ;;  %v12920_v61 = vadd.f32 %v2520_v57, %v2183_v21 }
 0x4ba   :  { %9020 = vmatmul.mubr.bf16.gmra.mxu1 %v17411_v28  ;;  %v8837_v50 = vpop.f32.mrf.mxu1 }
 0x4bb   :  { %9023 = vmatprep.mubr.bf16.mxu1 %v12821_v2  ;;  %v17416_v2 = vld [vmem:[#allocation136_spill] sm:$0xff]  ;;  %v8918_v29 = vpop.f32.mrf.mxu0  ;;  %v12923_v24 = vadd.f32 %v8917_v62, %v8837_v50 }
 0x4bc   :  { %9104 = vmatmul.mubr.bf16.gmra.mxu0 %v17413_v17  ;;  %v17417_v17 = vld [vmem:[#allocation142_spill] sm:$0xff]  ;;  %v2196_v46 = vpop.f32.mrf.mxu1 }
 0x4bd   :  { %9107 = vmatprep.mubr.bf16.mxu0 %v17414_v58  ;;  %v12918_v58 = vadd.f32 %v8914_v51, %v8834_v45  ;;  %v2536_v54 = vpop.f32.mrf.mxu0 }
 0x4be   :  { %v8838_v45 = vpop.f32.mrf.mxu1 }
 0x4bf   :  { %v8921_v56 = vpop.f32.mrf.mxu0  ;;  %v12930_v21 = vadd.f32 %v8918_v29, %v8838_v45 }
 0x4c0   :  { %v2199_v57 = vpop.f32.mrf.mxu1 }
 0x4c1   :  { %v2549_v51 = vpop.f32.mrf.mxu0  ;;  %v12932_v38 = vadd.f32 %v2536_v54, %v2199_v57 }
 0x4c2   :  { %9024 = vmatmul.mubr.bf16.gmra.mxu1 %v17415_v11  ;;  %v8841_v50 = vpop.f32.mrf.mxu1 }
 0x4c3   :  { %9027 = vmatprep.mubr.bf16.mxu1 %v12581_v60  ;;  %v8922_v62 = vpop.f32.mrf.mxu0  ;;  %v12935_v18 = vadd.f32 %v8921_v56, %v8841_v50 }
 0x4c4   :  { %9108 = vmatmul.mubr.bf16.gmra.mxu0 %v17416_v2  ;;  %v12926_v2 = vadd.f32 %v2533_v9, %v2196_v46  ;;  %v2212_v46 = vpop.f32.mrf.mxu1 }
 0x4c5   :  { %9111 = vmatprep.mubr.bf16.mxu0 %v17417_v17  ;;  %v17419_v17 = vld [vmem:[#allocation147_spill] sm:$0xff]  ;;  %v2552_v9 = vpop.f32.mrf.mxu0 }
 0x4c6   :  { %v8842_v29 = vpop.f32.mrf.mxu1 }
 0x4c7   :  { %v8925_v4 = vpop.f32.mrf.mxu0  ;;  %v12942_v54 = vadd.f32 %v8922_v62, %v8842_v29 }
 0x4c8   :  { %v2215_v57 = vpop.f32.mrf.mxu1 }
 0x4c9   :  { %v2565_v45 = vpop.f32.mrf.mxu0 }
 0x4ca   :  { %9028 = vmatmul.mubr.bf16.gmra.mxu1 %v17418_v41  ;;  %v8845_v50 = vpop.f32.mrf.mxu1 }
 0x4cb   :  { %9031 = vmatprep.mubr.bf16.mxu1 %v12598_v22  ;;  %v8926_v56 = vpop.f32.mrf.mxu0  ;;  %v12947_v53 = vadd.f32 %v8925_v4, %v8845_v50  ;;  %v12959_v4 = vld [vmem:[%s16458_s4 + $0x1f8] sm:$0xff]  }
 0x4cc   :  { %9112 = vmatmul.mubr.bf16.gmra.mxu0 %v17419_v17  ;;  %v12938_v17 = vadd.f32 %v2549_v51, %v2212_v46  ;;  %v17420_v51 = vld [vmem:[#allocation106_spill] sm:$0xff]  ;;  %v2228_v12 = vpop.f32.mrf.mxu1  ;;  %9375 = vmatprep.subr.bf16.mxu0 %v12959_v4 }
 0x4cd   :  { %9115 = vmatprep.mubr.bf16.mxu0 %v17308_v23  ;;  %v12944_v23 = vadd.f32 %v2552_v9, %v2215_v57  ;;  %v2568_v46 = vpop.f32.mrf.mxu0 }
 0x4ce   :  { %v8846_v62 = vpop.f32.mrf.mxu1 }
 0x4cf   :  { %v8929_v0 = vpop.f32.mrf.mxu0  ;;  %v12954_v9 = vadd.f32 %v8926_v56, %v8846_v62  ;;  %v12971_v62 = vld [vmem:[%s16458_s4 + $0x1b8] sm:$0xff]  }
 0x4d0   :  { %v2231_v57 = vpop.f32.mrf.mxu1  ;;  %9295 = vmatprep.subr.bf16.mxu1 %v12971_v62 }
 0x4d1   :  { %17423 = vst [vmem:[#allocation150_spill] sm:$0xff] %v12954_v9  ;;  %v2581_v29 = vpop.f32.mrf.mxu0  ;;  %v12961_v50 = vadd.f32 %v2568_v46, %v2231_v57  ;;  %v17430_v9 = vld [vmem:[#allocation109_spill] sm:$0xff] }
 0x4d2   :  { %9032 = vmatmul.mubr.bf16.gmra.mxu1 %v12572_v37 }
 0x4d3   :  { %9035 = vmatprep.mubr.bf16.mxu1 %v12610_v13  ;;  %17424 = vst [vmem:[#allocation57_spill] sm:$0xff] %v12961_v50  ;;  %v8930_v32 = vpop.f32.mrf.mxu0 }
 0x4d4   :  { %9116 = vmatmul.mubr.bf16.gmra.mxu0 %v17316_v15  ;;  %v12950_v15 = vadd.f32 %v2565_v45, %v2228_v12  ;;  %v8849_v12 = vpop.f32.mrf.mxu1  ;;  %v17425_v45 = vld [vmem:[#allocation104_spill] sm:$0xff] }
 0x4d5   :  { %9119 = vmatprep.mubr.bf16.mxu0 %v12264_v63  ;;  %v17422_v63 = vld [vmem:[#allocation154_spill] sm:$0xff]  ;;  %v2584_v56 = vpop.f32.mrf.mxu0 }
 0x4d6   :  { %17421 = vst [vmem:[#allocation148_spill] sm:$0xff] %v12950_v15  ;;  %v2244_v52 = vpop.f32.mrf.mxu1 }
 0x4d7   :  { %v12973_v39 = vadd.f32 %v2581_v29, %v2244_v52  ;;  %v8933_v46 = vpop.f32.mrf.mxu0  ;;  %v17432_v29 = vld [vmem:[#allocation113_spill] sm:$0xff] }
 0x4d8   :  { %v8850_v57 = vpop.f32.mrf.mxu1 }
 0x4d9   :  { %17428 = vst [vmem:[#allocation92_spill] sm:$0xff] %v12973_v39 }
 0x4da   :  { %9036 = vmatmul.mubr.bf16.gmra.mxu1 %v12603_v6  ;;  %v2247_v36 = vpop.f32.mrf.mxu1 }
 0x4db   :  { %9039 = vmatprep.mubr.bf16.mxu1 %v17420_v51  ;;  %v12980_v33 = vadd.f32 %v2584_v56, %v2247_v36 }
 0x4dc   :  { %9120 = vmatmul.mubr.bf16.gmra.mxu0 %v17422_v63  ;;  %v12965_v63 = vadd.f32 %v8929_v0, %v8849_v12  ;;  %v12978_v0 = vadd.f32 %v8930_v32, %v8850_v57  ;;  %v2597_v12 = vpop.f32.mrf.mxu0  ;;  %v8853_v50 = vpop.f32.mrf.mxu1 }
 0x4dd   :  { %9123 = vmatprep.mubr.bf16.mxu0 %v12741_v25  ;;  %v17427_v25 = vld [vmem:[#allocation114_spill] sm:$0xff]  ;;  %17429 = vst [vmem:[#allocation165_spill] sm:$0xff] %v12980_v33  ;;  %v12983_v52 = vadd.f32 %v8933_v46, %v8853_v50 }
 0x4de   :  { %17426 = vst [vmem:[#allocation127_spill] sm:$0xff] %v12965_v63  ;;  %v8934_v63 = vpop.f32.mrf.mxu0  ;;  %v2260_v39 = vpop.f32.mrf.mxu1 }
 0x4df   :  { %17431 = vst [vmem:[#allocation166_spill] sm:$0xff] %v12983_v52  ;;  %v17436_v52 = vld [vmem:[#allocation115_spill] sm:$0xff] }
 0x4e0   :  { %v8854_v32 = vpop.f32.mrf.mxu1 }
 0x4e1   :  { %v12990_v36 = vadd.f32 %v8934_v63, %v8854_v32 }
 0x4e2   :  { %9040 = vmatmul.mubr.bf16.gmra.mxu1 %v17425_v45  ;;  %v2263_v57 = vpop.f32.mrf.mxu1 }
 0x4e3   :  { %9043 = vmatprep.mubr.bf16.mxu1 %v17427_v25  ;;  %v12986_v25 = vadd.f32 %v2597_v12, %v2260_v39  ;;  %17434 = vst [vmem:[#allocation168_spill] sm:$0xff] %v12990_v36  ;;  %v17438_v12 = vld [vmem:[#allocation108_spill] sm:$0xff] }
 0x4e4   :  { %9124 = vmatmul.mubr.bf16.gmra.mxu0 %v12754_v1  ;;  %v2600_v1 = vpop.f32.mrf.mxu0  ;;  %v8857_v46 = vpop.f32.mrf.mxu1 }
 0x4e5   :  { %9127 = vmatprep.mubr.bf16.mxu0 %v12791_v31  ;;  %17433 = vst [vmem:[#allocation167_spill] sm:$0xff] %v12986_v25  ;;  %v12992_v31 = vadd.f32 %v2600_v1, %v2263_v57 }
 0x4e6   :  { %v8937_v15 = vpop.f32.mrf.mxu0 }
 0x4e7   :  { %17435 = vst [vmem:[#allocation169_spill] sm:$0xff] %v12992_v31  ;;  %v12995_v33 = vadd.f32 %v8937_v15, %v8857_v46 }
 0x4e8   :  { %v2613_v56 = vpop.f32.mrf.mxu0 }
 0x4e9   :  { %17437 = vst [vmem:[#allocation170_spill] sm:$0xff] %v12995_v33 }
 0x4ea   :  { %9044 = vmatmul.mubr.bf16.gmra.mxu1 %v17430_v9  ;;  %v8938_v50 = vpop.f32.mrf.mxu0 }
 0x4eb   :  { %9047 = vmatprep.mubr.bf16.mxu1 %v17432_v29 }
 0x4ec   :  { %9128 = vmatmul.mubr.bf16.gmra.mxu0 %v12795_v34  ;;  %v2616_v39 = vpop.f32.mrf.mxu0  ;;  %v17439_v34 = vld [vmem:[#allocation110_spill] sm:$0xff] }
 0x4ed   :  { %9131 = vmatprep.mubr.bf16.mxu0 %v12814_v49  ;;  %v13000_v25 = vpack.c.bf16 %v17439_v34, %v17438_v12  ;;  %v2276_v49 = vpop.f32.mrf.mxu1  ;;  %v9740_v12 = vld [vmem:[%s16458_s4 + $0x1f0] sm:$0xff]  }
 0x4ee   :  { %v13002_v63 = vadd.f32 %v2613_v56, %v2276_v49  ;;  %v8941_v32 = vpop.f32.mrf.mxu0  ;;  %v17441_v49 = vld [vmem:[#allocation82_spill] sm:$0xff] }
 0x4ef   :  { %17440 = vst [vmem:[#allocation108_spill] sm:$0xff] %v13000_v25  ;;  %v8858_v1 = vpop.f32.mrf.mxu1 }
 0x4f0   :  { %v13006_v57 = vadd.f32 %v8938_v50, %v8858_v1  ;;  %v2629_v15 = vpop.f32.mrf.mxu0 }
 0x4f1   :  { %v2279_v46 = vpop.f32.mrf.mxu1 }
 0x4f2   :  { %9048 = vmatmul.mubr.bf16.gmra.mxu1 %v17436_v52  ;;  %v13008_v33 = vadd.f32 %v2616_v39, %v2279_v46  ;;  %v8942_v31 = vpop.f32.mrf.mxu0 }
 0x4f3   :  { %9051 = vmatprep.mubr.bf16.mxu1 %v12720_v48  ;;  %v8861_v36 = vpop.f32.mrf.mxu1 }
 0x4f4   :  { %9132 = vmatmul.mubr.bf16.gmra.mxu0 %v13000_v25  ;;  %v13011_v34 = vadd.f32 %v8941_v32, %v8861_v36  ;;  %v2632_v56 = vpop.f32.mrf.mxu0 }
 0x4f5   :  { %9231 = vmatprep.mubr.bf16.mxu0 %v12345_v42  ;;  %v2292_v42 = vpop.f32.mrf.mxu1 }
 0x4f6   :  { %v13017_v50 = vadd.f32 %v2629_v15, %v2292_v42  ;;  %v8945_v1 = vpop.f32.mrf.mxu0  ;;  %v9742_v15 = vld [vmem:[%s16458_s4 + $0x1e8] sm:$0xff]  }
 0x4f7   :  { %v8862_v39 = vpop.f32.mrf.mxu1 }
 0x4f8   :  { %17442 = vst [vmem:[#allocation110_spill] sm:$0xff] %v13017_v50  ;;  %v13022_v36 = vadd.f32 %v8942_v31, %v8862_v39  ;;  %v2645_v32 = vpop.f32.mrf.mxu0 }
 0x4f9   :  { %v2295_v46 = vpop.f32.mrf.mxu1 }
 0x4fa   :  { %9052 = vmatmul.mubr.bf16.gmra.mxu1 %v12722_v20  ;;  %17443 = vst [vmem:[#allocation82_spill] sm:$0xff] %v13022_v36  ;;  %v13030_v42 = vadd.f32 %v2632_v56, %v2295_v46  ;;  %v9744_v36 = vld [vmem:[%s16458_s4 + $0x1e0] sm:$0xff]   ;;  %v9743_v56 = vld [vmem:[%s16458_s4 + $0x1a8] sm:$0xff]  }
 0x4fb   :  { %9151 = vmatprep.mubr.bf16.mxu1 %v17441_v49  ;;  %v9741_v49 = vld [vmem:[%s16458_s4 + $0x1b0] sm:$0xff]   ;;  %v8865_v25 = vpop.f32.mrf.mxu1 }
 0x4fc   :  { %9232 = vmatmul.mubr.bf16.vlgmr.msra.gmra.mxu0 %v12368_v19  ;;  %17444 = vst [vmem:[#allocation171_spill] sm:$0xff] %v13030_v42  ;;  %v8946_v19 = vpop.f32.mrf.mxu0  ;;  %v13033_v31 = vadd.f32 %v8945_v1, %v8865_v25  ;;  %v9745_v42 = vld [vmem:[%s16458_s4 + $0x1a0] sm:$0xff]  }
 0x4fd   :  { %9235 = vmatprep.mubr.bf16.mxu0 %v12370_v47  ;;  %9376 = vmatpush3.bf16.msra.mxu0 %v12959_v4  ;;  %v17445_v47 = vld [vmem:[#allocation29_spill] sm:$0xff]  ;;  %v17447_v4 = vld [vmem:[#allocation88_spill] sm:$0xff]  ;;  %v2308_v50 = vpop.f32.mrf.mxu1 }
 0x4fe   :  { %9377 = vmatprep.subr.bf16.mxu0 %v9740_v12  ;;  %17446 = vst [vmem:[#allocation29_spill] sm:$0xff] %v13033_v31  ;;  %v2648_v39 = vpop.f32.mrf.mxu0  ;;  %v13043_v46 = vadd.f32 %v2645_v32, %v2308_v50  ;;  %v9746_v50 = vld [vmem:[%s16458_s4 + $0x1d8] sm:$0xff]  }
 0x500   :  { %17448 = vst [vmem:[#allocation88_spill] sm:$0xff] %v13043_v46  ;;  %v8949_v25 = vpop.f32.mrf.mxu0 }
 0x501   :  { %9378 = vmatpush3.bf16.msra.mxu0 %v9740_v12  ;;  %v8866_v12 = vpop.f32.mrf.mxu1 }
 0x502   :  { %9152 = vmatmul.mubr.bf16.vlgmr.msra.gmra.mxu1 %v17445_v47  ;;  %9379 = vmatprep.subr.bf16.mxu0 %v9742_v15  ;;  %v2661_v1 = vpop.f32.mrf.mxu0 }
 0x503   :  { %9155 = vmatprep.mubr.bf16.mxu1 %v17447_v4  ;;  %9296 = vmatpush3.bf16.msra.mxu1 %v12971_v62  ;;  %v13047_v62 = vadd.f32 %v8946_v19, %v8866_v12  ;;  %v2311_v31 = vpop.f32.mrf.mxu1 }
 0x504   :  { %9297 = vmatprep.subr.bf16.mxu1 %v9741_v49  ;;  %9236 = vmatmul.mubr.bf16.gmra.mxu0 %v12409_v44  ;;  %v13055_v32 = vadd.f32 %v2648_v39, %v2311_v31  ;;  %v8950_v44 = vpop.f32.mrf.mxu0  ;;  %v9747_v31 = vld [vmem:[%s16458_s4 + $0x198] sm:$0xff]  }
 0x505   :  { %9239 = vmatprep.mubr.bf16.mxu0 %v12397_v8  ;;  %9380 = vmatpush3.bf16.msra.mxu0 %v9742_v15  ;;  %17449 = vst [vmem:[#allocation172_spill] sm:$0xff] %v13047_v62  ;;  %v8869_v8 = vpop.f32.mrf.mxu1  ;;  %v17451_v15 = vld [vmem:[#allocation87_spill] sm:$0xff]  ;;  %v9748_v62 = vld [vmem:[%s16458_s4 + $0x1d0] sm:$0xff]  }
 0x506   :  { %9381 = vmatprep.subr.bf16.mxu0 %v9744_v36  ;;  %17450 = vst [vmem:[#allocation173_spill] sm:$0xff] %v13055_v32  ;;  %v13058_v19 = vadd.f32 %v8949_v25, %v8869_v8  ;;  %v2664_v12 = vpop.f32.mrf.mxu0  ;;  %v9749_v32 = vld [vmem:[%s16458_s4 + $0x190] sm:$0xff]  }
 0x507   :  { %9298 = vmatpush3.bf16.msra.mxu1 %v9741_v49  ;;  %v17453_v49 = vld [vmem:[#allocation69_spill] sm:$0xff]  ;;  %v2324_v46 = vpop.f32.mrf.mxu1 }
 0x508   :  { %9299 = vmatprep.subr.bf16.mxu1 %v9743_v56  ;;  %17452 = vst [vmem:[#allocation87_spill] sm:$0xff] %v13058_v19  ;;  %v13067_v39 = vadd.f32 %v2661_v1, %v2324_v46  ;;  %v9750_v46 = vld [vmem:[%s16458_s4 + $0x1c8] sm:$0xff]  }
 0x509   :  { %9382 = vmatpush3.bf16.msra.mxu0 %v9744_v36  ;;  %v8953_v36 = vpop.f32.mrf.mxu0  ;;  %v8870_v8 = vpop.f32.mrf.mxu1 }
 0x50a   :  { %9156 = vmatmul.mubr.bf16.gmra.mxu1 %v17451_v15  ;;  %9383 = vmatprep.subr.bf16.mxu0 %v9746_v50  ;;  %17454 = vst [vmem:[#allocation69_spill] sm:$0xff] %v13067_v39 }
 0x50b   :  { %9159 = vmatprep.mubr.bf16.mxu1 %v17453_v49  ;;  %9300 = vmatpush3.bf16.msra.mxu1 %v9743_v56  ;;  %v13071_v56 = vadd.f32 %v8950_v44, %v8870_v8  ;;  %v2677_v25 = vpop.f32.mrf.mxu0  ;;  %v2327_v19 = vpop.f32.mrf.mxu1 }
 0x50c   :  { %9301 = vmatprep.subr.bf16.mxu1 %v9745_v42  ;;  %9240 = vmatmul.mubr.bf16.gmra.mxu0 %v12418_v3  ;;  %v13079_v1 = vadd.f32 %v2664_v12, %v2327_v19  ;;  %v9751_v19 = vld [vmem:[%s16458_s4 + $0x188] sm:$0xff]  }
 0x50d   :  { %9243 = vmatprep.mubr.bf16.mxu0 %v12414_v59  ;;  %9384 = vmatpush3.bf16.msra.mxu0 %v9746_v50  ;;  %17455 = vst [vmem:[#allocation174_spill] sm:$0xff] %v13071_v56  ;;  %v8954_v3 = vpop.f32.mrf.mxu0  ;;  %v8873_v59 = vpop.f32.mrf.mxu1  ;;  %v17457_v50 = vld [vmem:[#allocation13_spill] sm:$0xff]  ;;  %v9752_v56 = vld [vmem:[%s16458_s4 + $0x1c0] sm:$0xff]  }
 0x50e   :  { %9385 = vmatprep.subr.bf16.mxu0 %v9748_v62  ;;  %17456 = vst [vmem:[#allocation175_spill] sm:$0xff] %v13079_v1  ;;  %v13082_v44 = vadd.f32 %v8953_v36, %v8873_v59  ;;  %v9753_v1 = vld [vmem:[%s16458_s4 + $0x180] sm:$0xff]  }
 0x50f   :  { %9302 = vmatpush3.bf16.msra.mxu1 %v9745_v42  ;;  %v17459_v42 = vld [vmem:[#allocation90_spill] sm:$0xff]  ;;  %v2680_v8 = vpop.f32.mrf.mxu0  ;;  %v2340_v39 = vpop.f32.mrf.mxu1 }
 0x510   :  { %9303 = vmatprep.subr.bf16.mxu1 %v9747_v31  ;;  %17458 = vst [vmem:[#allocation13_spill] sm:$0xff] %v13082_v44  ;;  %v13091_v12 = vadd.f32 %v2677_v25, %v2340_v39 }
 0x511   :  { %9386 = vmatpush3.bf16.msra.mxu0 %v9748_v62  ;;  %v8957_v62 = vpop.f32.mrf.mxu0  ;;  %v8874_v59 = vpop.f32.mrf.mxu1 }
 0x512   :  { %9160 = vmatmul.mubr.bf16.gmra.mxu1 %v17457_v50  ;;  %9387 = vmatprep.subr.bf16.mxu0 %v9750_v46  ;;  %17460 = vst [vmem:[#allocation90_spill] sm:$0xff] %v13091_v12 }
 0x513   :  { %9163 = vmatprep.mubr.bf16.mxu1 %v17459_v42  ;;  %9304 = vmatpush3.bf16.msra.mxu1 %v9747_v31  ;;  %v13095_v31 = vadd.f32 %v8954_v3, %v8874_v59  ;;  %v2693_v36 = vpop.f32.mrf.mxu0  ;;  %v2343_v44 = vpop.f32.mrf.mxu1  ;;  %v17465_v3 = vld [vmem:[#allocation102_spill] sm:$0xff] }
 0x514   :  { %9305 = vmatprep.subr.bf16.mxu1 %v9749_v32  ;;  %9244 = vmatmul.mubr.bf16.gmra.mxu0 %v12449_v5  ;;  %v13100_v39 = vadd.f32 %v2680_v8, %v2343_v44  ;;  %v17463_v5 = vld [vmem:[#allocation94_spill] sm:$0xff] }
 0x515   :  { %9247 = vmatprep.mubr.bf16.mxu0 %v12439_v55  ;;  %9388 = vmatpush3.bf16.msra.mxu0 %v9750_v46  ;;  %17461 = vst [vmem:[#allocation176_spill] sm:$0xff] %v13095_v31  ;;  %v8958_v25 = vpop.f32.mrf.mxu0  ;;  %v8877_v12 = vpop.f32.mrf.mxu1 }
 0x516   :  { %9389 = vmatprep.subr.bf16.mxu0 %v9752_v56  ;;  %17462 = vst [vmem:[#allocation177_spill] sm:$0xff] %v13100_v39  ;;  %v13103_v55 = vadd.f32 %v8957_v62, %v8877_v12 }
 0x517   :  { %9306 = vmatpush3.bf16.msra.mxu1 %v9749_v32  ;;  %v2696_v46 = vpop.f32.mrf.mxu0  ;;  %v2356_v32 = vpop.f32.mrf.mxu1 }
 0x518   :  { %9307 = vmatprep.subr.bf16.mxu1 %v9751_v19  ;;  %17464 = vst [vmem:[#allocation94_spill] sm:$0xff] %v13103_v55  ;;  %v13106_v59 = vadd.f32 %v2693_v36, %v2356_v32  ;;  %v17471_v36 = vld [vmem:[#allocation111_spill] sm:$0xff] }
 0x519   :  { %9390 = vmatpush3.bf16.msra.mxu0 %v9752_v56  ;;  %v8961_v31 = vpop.f32.mrf.mxu0  ;;  %v8878_v44 = vpop.f32.mrf.mxu1 }
 0x51a   :  { %9164 = vmatmul.mubr.bf16.gmra.mxu1 %v17463_v5  ;;  %17466 = vst [vmem:[#allocation178_spill] sm:$0xff] %v13106_v59  ;;  %v13110_v8 = vadd.f32 %v8958_v25, %v8878_v44 }
 0x51b   :  { %9167 = vmatprep.mubr.bf16.mxu1 %v17465_v3  ;;  %9308 = vmatpush3.bf16.msra.mxu1 %v9751_v19  ;;  %v2709_v39 = vpop.f32.mrf.mxu0  ;;  %v2359_v56 = vpop.f32.mrf.mxu1  ;;  %v17469_v19 = vld [vmem:[#allocation103_spill] sm:$0xff] }
 0x51c   :  { %9309 = vmatprep.subr.bf16.mxu1 %v9753_v1  ;;  %9248 = vmatmul.mubr.bf16.gmra.mxu0 %v12483_v16  ;;  %17467 = vst [vmem:[#allocation179_spill] sm:$0xff] %v13110_v8  ;;  %v13112_v12 = vadd.f32 %v2696_v46, %v2359_v56 }
 0x51d   :  { %9251 = vmatprep.mubr.bf16.mxu0 %v12468_v30  ;;  %v8962_v62 = vpop.f32.mrf.mxu0  ;;  %v8881_v55 = vpop.f32.mrf.mxu1 }
 0x51e   :  { %17468 = vst [vmem:[#allocation180_spill] sm:$0xff] %v13112_v12  ;;  %v13115_v3 = vadd.f32 %v8961_v31, %v8881_v55 }
 0x51f   :  { %9310 = vmatpush3.bf16.msra.mxu1 %v9753_v1  ;;  %v2712_v32 = vpop.f32.mrf.mxu0  ;;  %v2372_v16 = vpop.f32.mrf.mxu1 }
 0x520   :  { %17470 = vst [vmem:[#allocation103_spill] sm:$0xff] %v13115_v3  ;;  %v13118_v59 = vadd.f32 %v2709_v39, %v2372_v16  ;;  %v17475_v3 = vld [vmem:[#allocation116_spill] sm:$0xff]  ;;  %v17477_v16 = vld [vmem:[#allocation121_spill] sm:$0xff] }
 0x521   :  { %v8882_v25 = vpop.f32.mrf.mxu1 }
 0x522   :  { %9168 = vmatmul.mubr.bf16.gmra.mxu1 %v17469_v19  ;;  %17472 = vst [vmem:[#allocation111_spill] sm:$0xff] %v13118_v59  ;;  %v13122_v1 = vadd.f32 %v8962_v62, %v8882_v25 }
 0x523   :  { %9171 = vmatprep.mubr.bf16.mxu1 %v17471_v36  ;;  %v2375_v44 = vpop.f32.mrf.mxu1 }
 0x524   :  { %v8965_v30 = vpop.f32.mrf.mxu0  ;;  %9252 = vmatmul.mubr.bf16.gmra.mxu0 %v12496_v43  ;;  %17473 = vst [vmem:[#allocation181_spill] sm:$0xff] %v13122_v1  ;;  %v13124_v56 = vadd.f32 %v2712_v32, %v2375_v44 }
 0x525   :  { %9255 = vmatprep.mubr.bf16.mxu0 %v12488_v27 }
 0x526   :  { %v2725_v46 = vpop.f32.mrf.mxu0  ;;  %17474 = vst [vmem:[#allocation182_spill] sm:$0xff] %v13124_v56 }
 0x528   :  { %v8966_v55 = vpop.f32.mrf.mxu0 }
 0x52a   :  { %v8885_v31 = vpop.f32.mrf.mxu1  ;;  %9172 = vmatmul.mubr.bf16.gmra.mxu1 %v17475_v3  ;;  %v2728_v39 = vpop.f32.mrf.mxu0 }
 0x52b   :  { %v13127_v12 = vadd.f32 %v8965_v30, %v8885_v31  ;;  %9175 = vmatprep.mubr.bf16.mxu1 %v17477_v16 }
 0x52c   :  { %v2388_v59 = vpop.f32.mrf.mxu1  ;;  %v8969_v8 = vpop.f32.mrf.mxu0  ;;  %9256 = vmatmul.mubr.bf16.gmra.mxu0 %v12527_v10 }
 0x52d   :  { %17476 = vst [vmem:[#allocation116_spill] sm:$0xff] %v13127_v12  ;;  %v13130_v43 = vadd.f32 %v2725_v46, %v2388_v59  ;;  %9259 = vmatprep.mubr.bf16.mxu0 %v17411_v28  ;;  %v17480_v12 = vld [vmem:[#allocation123_spill] sm:$0xff]  ;;  %v17482_v59 = vld [vmem:[#allocation130_spill] sm:$0xff] }
 0x52e   :  { %v8886_v62 = vpop.f32.mrf.mxu1  ;;  %v2741_v25 = vpop.f32.mrf.mxu0 }
 0x52f   :  { %17478 = vst [vmem:[#allocation121_spill] sm:$0xff] %v13130_v43  ;;  %v13134_v32 = vadd.f32 %v8966_v55, %v8886_v62 }
 0x530   :  { %v2391_v44 = vpop.f32.mrf.mxu1  ;;  %v8970_v30 = vpop.f32.mrf.mxu0 }
 0x531   :  { %v13136_v27 = vadd.f32 %v2728_v39, %v2391_v44 }
 0x532   :  { %v8889_v31 = vpop.f32.mrf.mxu1  ;;  %9176 = vmatmul.mubr.bf16.gmra.mxu1 %v17480_v12  ;;  %v2744_v46 = vpop.f32.mrf.mxu0 }
 0x533   :  { %17479 = vst [vmem:[#allocation183_spill] sm:$0xff] %v13136_v27  ;;  %v13139_v56 = vadd.f32 %v8969_v8, %v8889_v31  ;;  %9179 = vmatprep.mubr.bf16.mxu1 %v17482_v59 }
 0x534   :  { %v2404_v43 = vpop.f32.mrf.mxu1  ;;  %v8973_v1 = vpop.f32.mrf.mxu0  ;;  %9260 = vmatmul.mubr.bf16.gmra.mxu0 %v12746_v14 }
 0x535   :  { %17481 = vst [vmem:[#allocation123_spill] sm:$0xff] %v13139_v56  ;;  %v13142_v10 = vadd.f32 %v2741_v25, %v2404_v43  ;;  %9263 = vmatprep.mubr.bf16.mxu0 %v17415_v11  ;;  %v17486_v43 = vld [vmem:[#allocation135_spill] sm:$0xff] }
 0x536   :  { %v8890_v55 = vpop.f32.mrf.mxu1  ;;  %v2757_v62 = vpop.f32.mrf.mxu0 }
 0x537   :  { %17483 = vst [vmem:[#allocation130_spill] sm:$0xff] %v13142_v10  ;;  %v13146_v39 = vadd.f32 %v8970_v30, %v8890_v55 }
 0x538   :  { %v2407_v44 = vpop.f32.mrf.mxu1  ;;  %v8974_v8 = vpop.f32.mrf.mxu0 }
 0x539   :  { %v13148_v28 = vadd.f32 %v2744_v46, %v2407_v44 }
 0x53a   :  { %v8893_v31 = vpop.f32.mrf.mxu1  ;;  %9180 = vmatmul.mubr.bf16.gmra.mxu1 %v12756_v7  ;;  %v2760_v25 = vpop.f32.mrf.mxu0 }
 0x53b   :  { %17484 = vst [vmem:[#allocation184_spill] sm:$0xff] %v13148_v28  ;;  %v13151_v56 = vadd.f32 %v8973_v1, %v8893_v31  ;;  %9183 = vmatprep.mubr.bf16.mxu1 %v17486_v43 }
 0x53c   :  { %v2420_v10 = vpop.f32.mrf.mxu1  ;;  %v9073_v27 = vpop.f32.mrf.mxu0  ;;  %9264 = vmatmul.mubr.bf16.gmra.mxu0 %v12581_v60 }
 0x53d   :  { %17485 = vst [vmem:[#allocation185_spill] sm:$0xff] %v13151_v56  ;;  %v13154_v14 = vadd.f32 %v2757_v62, %v2420_v10  ;;  %9267 = vmatprep.mubr.bf16.mxu0 %v17418_v41  ;;  %v17490_v56 = vld [vmem:[#allocation140_spill] sm:$0xff]  ;;  %v17491_v10 = vld [vmem:[#allocation145_spill] sm:$0xff] }
 0x53e   :  { %v8894_v11 = vpop.f32.mrf.mxu1  ;;  %v3546_v46 = vpop.f32.mrf.mxu0 }
 0x53f   :  { %17487 = vst [vmem:[#allocation135_spill] sm:$0xff] %v13154_v14  ;;  %v13158_v30 = vadd.f32 %v8974_v8, %v8894_v11 }
 0x540   :  { %v2423_v55 = vpop.f32.mrf.mxu1  ;;  %v9074_v1 = vpop.f32.mrf.mxu0 }
 0x541   :  { %17488 = vst [vmem:[#allocation186_spill] sm:$0xff] %v13158_v30  ;;  %v13160_v44 = vadd.f32 %v2760_v25, %v2423_v55 }
 0x542   :  { %v8993_v31 = vpop.f32.mrf.mxu1  ;;  %9184 = vmatmul.mubr.bf16.gmra.mxu1 %v17490_v56  ;;  %v3549_v62 = vpop.f32.mrf.mxu0 }
 0x543   :  { %17489 = vst [vmem:[#allocation187_spill] sm:$0xff] %v13160_v44  ;;  %v3384_v43 = vadd.f32 %v8993_v31, %v12911_v26  ;;  %9187 = vmatprep.mubr.bf16.mxu1 %v17491_v10 }
 0x544   :  { %v3127_v14 = vpop.f32.mrf.mxu1  ;;  %v9077_v28 = vpop.f32.mrf.mxu0  ;;  %9268 = vmatmul.mubr.bf16.gmra.mxu0 %v12598_v22 }
 0x545   :  { %v3382_v60 = vadd.f32 %v3127_v14, %v12914_v35  ;;  %v13167_v8 = vadd.f32 %v9073_v27, %v3384_v43  ;;  %9271 = vmatprep.mubr.bf16.mxu0 %v12572_v37  ;;  %v17492_v35 = vld [vmem:[#allocation146_spill] sm:$0xff]  ;;  %v17493_v43 = vld [vmem:[#allocation151_spill] sm:$0xff] }
 0x546   :  { %v8994_v11 = vpop.f32.mrf.mxu1  ;;  %v3562_v55 = vpop.f32.mrf.mxu0 }
 0x547   :  { %v3385_v25 = vadd.f32 %v8994_v11, %v12918_v58  ;;  %v13171_v41 = vadd.f32 %v3546_v46, %v3382_v60 }
 0x548   :  { %v3130_v26 = vpop.f32.mrf.mxu1  ;;  %v9078_v44 = vpop.f32.mrf.mxu0 }
 0x549   :  { %v3383_v31 = vadd.f32 %v3130_v26, %v12920_v61  ;;  %v13174_v30 = vadd.f32 %v9074_v1, %v3385_v25 }
 0x54a   :  { %v8997_v14 = vpop.f32.mrf.mxu1  ;;  %9188 = vmatmul.mubr.bf16.gmra.mxu1 %v17492_v35  ;;  %v3565_v22 = vpop.f32.mrf.mxu0 }
 0x54b   :  { %v3388_v27 = vadd.f32 %v8997_v14, %v12923_v24  ;;  %9191 = vmatprep.mubr.bf16.mxu1 %v17493_v43  ;;  %v13179_v37 = vadd.f32 %v3549_v62, %v3383_v31 }
 0x54c   :  { %v3143_v58 = vpop.f32.mrf.mxu1  ;;  %v9081_v46 = vpop.f32.mrf.mxu0  ;;  %9272 = vmatmul.mubr.bf16.gmra.mxu0 %v12610_v13 }
 0x54d   :  { %v3386_v60 = vadd.f32 %v3143_v58, %v12926_v2  ;;  %v13183_v61 = vadd.f32 %v9077_v28, %v3388_v27  ;;  %9275 = vmatprep.mubr.bf16.mxu0 %v12603_v6  ;;  %v17494_v58 = vld [vmem:[#allocation153_spill] sm:$0xff]  ;;  %v17495_v27 = vld [vmem:[#allocation155_spill] sm:$0xff] }
 0x54e   :  { %v8998_v1 = vpop.f32.mrf.mxu1  ;;  %v3578_v25 = vpop.f32.mrf.mxu0 }
 0x54f   :  { %v3389_v11 = vadd.f32 %v8998_v1, %v12930_v21  ;;  %v13187_v24 = vadd.f32 %v3562_v55, %v3386_v60 }
 0x550   :  { %v3146_v26 = vpop.f32.mrf.mxu1  ;;  %v9082_v31 = vpop.f32.mrf.mxu0 }
 0x551   :  { %v3387_v62 = vadd.f32 %v3146_v26, %v12932_v38  ;;  %v13190_v14 = vadd.f32 %v9078_v44, %v3389_v11 }
 0x552   :  { %v9001_v2 = vpop.f32.mrf.mxu1  ;;  %9192 = vmatmul.mubr.bf16.gmra.mxu1 %v17494_v58  ;;  %v3581_v13 = vpop.f32.mrf.mxu0 }
 0x553   :  { %v3392_v28 = vadd.f32 %v9001_v2, %v12935_v18  ;;  %9195 = vmatprep.mubr.bf16.mxu1 %v17495_v27  ;;  %v13195_v6 = vadd.f32 %v3565_v22, %v3387_v62 }
 0x554   :  { %v3159_v21 = vpop.f32.mrf.mxu1  ;;  %v9085_v60 = vpop.f32.mrf.mxu0  ;;  %9276 = vmatmul.mubr.bf16.gmra.mxu0 %v17420_v51  ;;  %v17500_v51 = vld [vmem:[#allocation114_spill] sm:$0xff] }
 0x555   :  { %v3390_v55 = vadd.f32 %v3159_v21, %v12938_v17  ;;  %v13199_v38 = vadd.f32 %v9081_v46, %v3392_v28  ;;  %9279 = vmatprep.mubr.bf16.mxu0 %v17425_v45  ;;  %v17497_v21 = vld [vmem:[#allocation156_spill] sm:$0xff] }
 0x556   :  { %v9002_v44 = vpop.f32.mrf.mxu1  ;;  %v3594_v11 = vpop.f32.mrf.mxu0 }
 0x557   :  { %v3393_v1 = vadd.f32 %v9002_v44, %v12942_v54  ;;  %v13203_v18 = vadd.f32 %v3578_v25, %v3390_v55  ;;  %v17499_v44 = vld [vmem:[#allocation148_spill] sm:$0xff] }
 0x558   :  { %v3162_v26 = vpop.f32.mrf.mxu1  ;;  %v9086_v62 = vpop.f32.mrf.mxu0 }
 0x559   :  { %v3391_v22 = vadd.f32 %v3162_v26, %v12944_v23  ;;  %v13206_v2 = vadd.f32 %v9082_v31, %v3393_v1  ;;  %v17502_v1 = vld [vmem:[#allocation150_spill] sm:$0xff] }
 0x55a   :  { %v9005_v17 = vpop.f32.mrf.mxu1  ;;  %9196 = vmatmul.mubr.bf16.gmra.mxu1 %v17497_v21  ;;  %v3597_v28 = vpop.f32.mrf.mxu0 }
 0x55b   :  { %17496 = vst [vmem:[#allocation140_spill] sm:$0xff] %v13206_v2  ;;  %v3396_v46 = vadd.f32 %v9005_v17, %v12947_v53  ;;  %9199 = vmatprep.mubr.bf16.mxu1 %v12304_v40  ;;  %v13211_v45 = vadd.f32 %v3581_v13, %v3391_v22  ;;  %v17503_v40 = vld [vmem:[#allocation57_spill] sm:$0xff] }
 0x55c   :  { %v3175_v54 = vpop.f32.mrf.mxu1  ;;  %v9089_v55 = vpop.f32.mrf.mxu0  ;;  %9280 = vmatmul.mubr.bf16.gmra.mxu0 %v17500_v51  ;;  %v17506_v51 = vld [vmem:[#allocation127_spill] sm:$0xff] }
 0x55d   :  { %17498 = vst [vmem:[#allocation145_spill] sm:$0xff] %v13211_v45  ;;  %v3394_v25 = vadd.f32 %v3175_v54, %v17499_v44  ;;  %v13215_v23 = vadd.f32 %v9085_v60, %v3396_v46  ;;  %9283 = vmatprep.mubr.bf16.mxu0 %v17430_v9  ;;  %v17505_v44 = vld [vmem:[#allocation158_spill] sm:$0xff]  ;;  %v17507_v46 = vld [vmem:[#allocation125_spill] sm:$0xff] }
 0x55e   :  { %v9006_v31 = vpop.f32.mrf.mxu1  ;;  %v3610_v2 = vpop.f32.mrf.mxu0 }
 0x55f   :  { %17501 = vst [vmem:[#allocation146_spill] sm:$0xff] %v13215_v23  ;;  %v3397_v26 = vadd.f32 %v9006_v31, %v17502_v1  ;;  %v13219_v53 = vadd.f32 %v3594_v11, %v3394_v25  ;;  %v13232_v11 = vld [vmem:[%s16458_s4 + $0x238] sm:$0xff]  }
 0x560   :  { %v3178_v17 = vpop.f32.mrf.mxu1  ;;  %v9090_v22 = vpop.f32.mrf.mxu0  ;;  %9455 = vmatprep.subr.bf16.mxu1 %v13232_v11 }
 0x561   :  { %v3395_v13 = vadd.f32 %v3178_v17, %v17503_v40  ;;  %v13222_v45 = vadd.f32 %v9086_v62, %v3397_v26  ;;  %v17509_v40 = vld [vmem:[#allocation92_spill] sm:$0xff] }
 0x562   :  { %v9009_v54 = vpop.f32.mrf.mxu1  ;;  %9200 = vmatmul.mubr.bf16.gmra.mxu1 %v17505_v44  ;;  %v3613_v23 = vpop.f32.mrf.mxu0 }
 0x563   :  { %17504 = vst [vmem:[#allocation151_spill] sm:$0xff] %v13222_v45  ;;  %v3400_v60 = vadd.f32 %v9009_v54, %v17506_v51  ;;  %9203 = vmatprep.mubr.bf16.mxu1 %v17507_v46  ;;  %v13227_v9 = vadd.f32 %v3597_v28, %v3395_v13  ;;  %v17511_v54 = vld [vmem:[#allocation165_spill] sm:$0xff] }
 0x564   :  { %v3191_v25 = vpop.f32.mrf.mxu1  ;;  %v9093_v62 = vpop.f32.mrf.mxu0  ;;  %9284 = vmatmul.mubr.bf16.gmra.mxu0 %v17432_v29  ;;  %v17513_v29 = vld [vmem:[#allocation129_spill] sm:$0xff] }
 0x565   :  { %17508 = vst [vmem:[#allocation153_spill] sm:$0xff] %v13227_v9  ;;  %v3398_v31 = vadd.f32 %v3191_v25, %v17509_v40  ;;  %v13236_v1 = vadd.f32 %v9089_v55, %v3400_v60  ;;  %9287 = vmatprep.mubr.bf16.mxu0 %v17436_v52  ;;  %v17514_v55 = vld [vmem:[#allocation166_spill] sm:$0xff] }
 0x566   :  { %v9010_v51 = vpop.f32.mrf.mxu1  ;;  %v3626_v26 = vpop.f32.mrf.mxu0 }
 0x567   :  { %17510 = vst [vmem:[#allocation155_spill] sm:$0xff] %v13236_v1  ;;  %v3401_v28 = vadd.f32 %v9010_v51, %v12978_v0  ;;  %v13241_v17 = vadd.f32 %v3610_v2, %v3398_v31  ;;  %v17515_v1 = vld [vmem:[#allocation139_spill] sm:$0xff] }
 0x568   :  { %v3194_v13 = vpop.f32.mrf.mxu1  ;;  %v9094_v45 = vpop.f32.mrf.mxu0  ;;  %v17517_v51 = vld [vmem:[#allocation167_spill] sm:$0xff] }
 0x569   :  { %v3399_v9 = vadd.f32 %v3194_v13, %v17511_v54  ;;  %v13244_v25 = vadd.f32 %v9090_v22, %v3401_v28  ;;  %v17519_v28 = vld [vmem:[#allocation168_spill] sm:$0xff] }
 0x56a   :  { %v9013_v40 = vpop.f32.mrf.mxu1  ;;  %9204 = vmatmul.mubr.bf16.gmra.mxu1 %v17513_v29  ;;  %v3629_v46 = vpop.f32.mrf.mxu0 }
 0x56b   :  { %17512 = vst [vmem:[#allocation156_spill] sm:$0xff] %v13244_v25  ;;  %v3404_v60 = vadd.f32 %v9013_v40, %v17514_v55  ;;  %9207 = vmatprep.mubr.bf16.mxu1 %v17515_v1  ;;  %v13249_v52 = vadd.f32 %v3613_v23, %v3399_v9  ;;  %v17520_v1 = vld [vmem:[#allocation169_spill] sm:$0xff] }
 0x56c   :  { %v3207_v0 = vpop.f32.mrf.mxu1  ;;  %v9097_v31 = vpop.f32.mrf.mxu0  ;;  %9288 = vmatmul.mubr.bf16.gmra.mxu0 %v12720_v48  ;;  %v17522_v48 = vld [vmem:[#allocation170_spill] sm:$0xff] }
 0x56d   :  { %17516 = vst [vmem:[#allocation148_spill] sm:$0xff] %v13249_v52  ;;  %v3402_v2 = vadd.f32 %v3207_v0, %v17517_v51  ;;  %v13253_v13 = vadd.f32 %v9093_v62, %v3404_v60  ;;  %9291 = vmatprep.mubr.bf16.mxu0 %v12722_v20  ;;  %v17521_v51 = vld [vmem:[#allocation134_spill] sm:$0xff]  ;;  %v17523_v60 = vld [vmem:[#allocation141_spill] sm:$0xff] }
 0x56e   :  { %v9014_v22 = vpop.f32.mrf.mxu1  ;;  %v3642_v25 = vpop.f32.mrf.mxu0 }
 0x56f   :  { %17518 = vst [vmem:[#allocation150_spill] sm:$0xff] %v13253_v13  ;;  %v3405_v54 = vadd.f32 %v9014_v22, %v17519_v28  ;;  %v13257_v40 = vadd.f32 %v3626_v26, %v3402_v2  ;;  %v17525_v28 = vld [vmem:[#allocation128_spill] sm:$0xff] }
 0x570   :  { %v3210_v55 = vpop.f32.mrf.mxu1  ;;  %v9098_v23 = vpop.f32.mrf.mxu0 }
 0x571   :  { %v3403_v9 = vadd.f32 %v3210_v55, %v17520_v1  ;;  %v13260_v52 = vadd.f32 %v9094_v45, %v3405_v54 }
 0x572   :  { %v9017_v0 = vpop.f32.mrf.mxu1  ;;  %9208 = vmatmul.mubr.bf16.gmra.mxu1 %v17521_v51  ;;  %v3645_v13 = vpop.f32.mrf.mxu0 }
 0x573   :  { %v3408_v62 = vadd.f32 %v9017_v0, %v17522_v48  ;;  %9211 = vmatprep.mubr.bf16.mxu1 %v17523_v60  ;;  %v13265_v20 = vadd.f32 %v3629_v46, %v3403_v9 }
 0x574   :  { %v3223_v22 = vpop.f32.mrf.mxu1  ;;  %v9101_v2 = vpop.f32.mrf.mxu0  ;;  %9292 = vmatmul.mubr.bf16.gmra.mxu0 %v17525_v28 }
 0x575   :  { %17524 = vst [vmem:[#allocation57_spill] sm:$0xff] %v13265_v20  ;;  %v3406_v26 = vadd.f32 %v3223_v22, %v13002_v63  ;;  %v13269_v1 = vadd.f32 %v9097_v31, %v3408_v62  ;;  %9391 = vmatprep.mubr.bf16.mxu0 %v17445_v47  ;;  %v17527_v22 = vld [vmem:[#allocation126_spill] sm:$0xff]  ;;  %v17528_v62 = vld [vmem:[#allocation83_spill] sm:$0xff] }
 0x576   :  { %v9018_v45 = vpop.f32.mrf.mxu1  ;;  %v3658_v55 = vpop.f32.mrf.mxu0 }
 0x577   :  { %v3409_v54 = vadd.f32 %v9018_v45, %v13006_v57  ;;  %v13273_v48 = vadd.f32 %v3642_v25, %v3406_v26  ;;  %v17529_v45 = vld [vmem:[#allocation110_spill] sm:$0xff] }
 0x578   :  { %v3226_v0 = vpop.f32.mrf.mxu1  ;;  %v9102_v9 = vpop.f32.mrf.mxu0 }
 0x579   :  { %v3407_v46 = vadd.f32 %v3226_v0, %v13008_v33  ;;  %v13276_v20 = vadd.f32 %v9098_v23, %v3409_v54  ;;  %v17531_v54 = vld [vmem:[#allocation82_spill] sm:$0xff] }
 0x57a   :  { %v9021_v63 = vpop.f32.mrf.mxu1  ;;  %9212 = vmatmul.mubr.bf16.gmra.mxu1 %v17527_v22  ;;  %v3661_v28 = vpop.f32.mrf.mxu0 }
 0x57b   :  { %17526 = vst [vmem:[#allocation158_spill] sm:$0xff] %v13276_v20  ;;  %v3412_v31 = vadd.f32 %v9021_v63, %v13011_v34  ;;  %9311 = vmatprep.mubr.bf16.mxu1 %v17528_v62  ;;  %v13281_v47 = vadd.f32 %v3645_v13, %v3407_v46  ;;  %v9755_v13 = vld [vmem:[%s16458_s4 + $0x230] sm:$0xff]   ;;  %v17532_v46 = vld [vmem:[#allocation171_spill] sm:$0xff] }
 0x57c   :  { %v3239_v57 = vpop.f32.mrf.mxu1  ;;  %v9105_v26 = vpop.f32.mrf.mxu0  ;;  %9392 = vmatmul.mubr.bf16.vlgmr.msra.gmra.mxu0 %v17447_v4 }
 0x57d   :  { %v3410_v25 = vadd.f32 %v3239_v57, %v17529_v45  ;;  %v13285_v33 = vadd.f32 %v9101_v2, %v3412_v31  ;;  %9395 = vmatprep.mubr.bf16.mxu0 %v17451_v15  ;;  %v17533_v2 = vld [vmem:[#allocation67_spill] sm:$0xff]  ;;  %v17534_v31 = vld [vmem:[#allocation29_spill] sm:$0xff] }
 0x57e   :  { %v9022_v23 = vpop.f32.mrf.mxu1  ;;  %v3674_v20 = vpop.f32.mrf.mxu0 }
 0x57f   :  { %17530 = vst [vmem:[#allocation127_spill] sm:$0xff] %v13285_v33  ;;  %v3413_v0 = vadd.f32 %v9022_v23, %v17531_v54  ;;  %v13289_v34 = vadd.f32 %v3658_v55, %v3410_v25  ;;  %v17535_v33 = vld [vmem:[#allocation89_spill] sm:$0xff]  ;;  %v9756_v54 = vld [vmem:[%s16458_s4 + $0x228] sm:$0xff]  }
 0x580   :  { %v3242_v63 = vpop.f32.mrf.mxu1  ;;  %v9106_v57 = vpop.f32.mrf.mxu0 }
 0x581   :  { %v3411_v62 = vadd.f32 %v3242_v63, %v17532_v46  ;;  %v13295_v45 = vadd.f32 %v9102_v9, %v3413_v0  ;;  %v17536_v9 = vld [vmem:[#allocation88_spill] sm:$0xff] }
 0x582   :  { %v9025_v4 = vpop.f32.mrf.mxu1  ;;  %9312 = vmatmul.mubr.bf16.vlgmr.msra.gmra.mxu1 %v17533_v2  ;;  %v3677_v23 = vpop.f32.mrf.mxu0 }
 0x583   :  { %v3416_v15 = vadd.f32 %v9025_v4, %v17534_v31  ;;  %9315 = vmatprep.mubr.bf16.mxu1 %v17535_v33  ;;  %9456 = vmatpush3.bf16.msra.mxu1 %v13232_v11  ;;  %v13301_v55 = vadd.f32 %v3661_v28, %v3411_v62  ;;  %v17538_v33 = vld [vmem:[#allocation172_spill] sm:$0xff]  ;;  %v9757_v31 = vld [vmem:[%s16458_s4 + $0x220] sm:$0xff]  }
 0x584   :  { %v3255_v25 = vpop.f32.mrf.mxu1  ;;  %9457 = vmatprep.subr.bf16.mxu1 %v9755_v13  ;;  %v9109_v63 = vpop.f32.mrf.mxu0  ;;  %9396 = vmatmul.mubr.bf16.gmra.mxu0 %v17453_v49 }
 0x585   :  { %v3414_v0 = vadd.f32 %v3255_v25, %v17536_v9  ;;  %v13308_v46 = vadd.f32 %v9105_v26, %v3416_v15  ;;  %9399 = vmatprep.mubr.bf16.mxu0 %v17457_v50  ;;  %v17539_v25 = vld [vmem:[#allocation173_spill] sm:$0xff]  ;;  %v17542_v50 = vld [vmem:[#allocation87_spill] sm:$0xff] }
 0x586   :  { %v9026_v4 = vpop.f32.mrf.mxu1  ;;  %v3690_v28 = vpop.f32.mrf.mxu0 }
 0x587   :  { %17537 = vst [vmem:[#allocation92_spill] sm:$0xff] %v13308_v46  ;;  %v3417_v11 = vadd.f32 %v9026_v4, %v17538_v33  ;;  %9458 = vmatpush3.bf16.msra.mxu1 %v9755_v13  ;;  %v13312_v62 = vadd.f32 %v3674_v20, %v3414_v0  ;;  %v17541_v46 = vld [vmem:[#allocation86_spill] sm:$0xff]  ;;  %v17543_v33 = vld [vmem:[#allocation9_spill] sm:$0xff] }
 0x588   :  { %v3258_v2 = vpop.f32.mrf.mxu1  ;;  %9459 = vmatprep.subr.bf16.mxu1 %v9756_v54  ;;  %v9110_v49 = vpop.f32.mrf.mxu0 }
 0x589   :  { %v3415_v9 = vadd.f32 %v3258_v2, %v17539_v25  ;;  %v13318_v26 = vadd.f32 %v9106_v57, %v3417_v11  ;;  %v9758_v2 = vld [vmem:[%s16458_s4 + $0x218] sm:$0xff]   ;;  %v17545_v25 = vld [vmem:[#allocation69_spill] sm:$0xff] }
 0x58a   :  { %v9029_v15 = vpop.f32.mrf.mxu1  ;;  %9316 = vmatmul.mubr.bf16.gmra.mxu1 %v17541_v46  ;;  %v3693_v20 = vpop.f32.mrf.mxu0 }
 0x58b   :  { %17540 = vst [vmem:[#allocation165_spill] sm:$0xff] %v13318_v26  ;;  %v3420_v4 = vadd.f32 %v9029_v15, %v17542_v50  ;;  %9319 = vmatprep.mubr.bf16.mxu1 %v17543_v33  ;;  %9460 = vmatpush3.bf16.msra.mxu1 %v9756_v54  ;;  %v13323_v13 = vadd.f32 %v3677_v23, %v3415_v9  ;;  %v17547_v50 = vld [vmem:[#allocation174_spill] sm:$0xff] }
 0x58c   :  { %v3271_v0 = vpop.f32.mrf.mxu1  ;;  %9461 = vmatprep.subr.bf16.mxu1 %v9757_v31  ;;  %v9113_v11 = vpop.f32.mrf.mxu0  ;;  %9400 = vmatmul.mubr.bf16.gmra.mxu0 %v17459_v42 }
 0x58d   :  { %17544 = vst [vmem:[#allocation129_spill] sm:$0xff] %v13323_v13  ;;  %v3418_v57 = vadd.f32 %v3271_v0, %v17545_v25  ;;  %v13330_v46 = vadd.f32 %v9109_v63, %v3420_v4  ;;  %9403 = vmatprep.mubr.bf16.mxu0 %v17463_v5  ;;  %v9759_v0 = vld [vmem:[%s16458_s4 + $0x210] sm:$0xff]   ;;  %v17549_v25 = vld [vmem:[#allocation175_spill] sm:$0xff] }
 0x58e   :  { %v9030_v15 = vpop.f32.mrf.mxu1  ;;  %v3706_v23 = vpop.f32.mrf.mxu0  ;;  %v17552_v5 = vld [vmem:[#allocation13_spill] sm:$0xff] }
 0x58f   :  { %17546 = vst [vmem:[#allocation166_spill] sm:$0xff] %v13330_v46  ;;  %v3421_v54 = vadd.f32 %v9030_v15, %v17547_v50  ;;  %9462 = vmatpush3.bf16.msra.mxu1 %v9757_v31  ;;  %v13334_v9 = vadd.f32 %v3690_v28, %v3418_v57  ;;  %v17551_v46 = vld [vmem:[#allocation32_spill] sm:$0xff]  ;;  %v17553_v50 = vld [vmem:[#allocation59_spill] sm:$0xff] }
 0x590   :  { %v3274_v33 = vpop.f32.mrf.mxu1  ;;  %9463 = vmatprep.subr.bf16.mxu1 %v9758_v2  ;;  %v9114_v42 = vpop.f32.mrf.mxu0 }
 0x591   :  { %17548 = vst [vmem:[#allocation167_spill] sm:$0xff] %v13334_v9  ;;  %v3419_v13 = vadd.f32 %v3274_v33, %v17549_v25  ;;  %v13340_v63 = vadd.f32 %v9110_v49, %v3421_v54  ;;  %v9760_v33 = vld [vmem:[%s16458_s4 + $0x208] sm:$0xff]   ;;  %v17555_v25 = vld [vmem:[#allocation90_spill] sm:$0xff] }
 0x592   :  { %v9033_v4 = vpop.f32.mrf.mxu1  ;;  %9320 = vmatmul.mubr.bf16.gmra.mxu1 %v17551_v46  ;;  %v3709_v28 = vpop.f32.mrf.mxu0 }
 0x593   :  { %17550 = vst [vmem:[#allocation168_spill] sm:$0xff] %v13340_v63  ;;  %v3424_v15 = vadd.f32 %v9033_v4, %v17552_v5  ;;  %9323 = vmatprep.mubr.bf16.mxu1 %v17553_v50  ;;  %9464 = vmatpush3.bf16.msra.mxu1 %v9758_v2  ;;  %v13345_v31 = vadd.f32 %v3693_v20, %v3419_v13  ;;  %v17556_v63 = vld [vmem:[#allocation102_spill] sm:$0xff]  ;;  %v17558_v5 = vld [vmem:[#allocation176_spill] sm:$0xff] }
 0x594   :  { %v3287_v57 = vpop.f32.mrf.mxu1  ;;  %9465 = vmatprep.subr.bf16.mxu1 %v9759_v0  ;;  %v9117_v54 = vpop.f32.mrf.mxu0  ;;  %9404 = vmatmul.mubr.bf16.gmra.mxu0 %v17556_v63 }
 0x595   :  { %17554 = vst [vmem:[#allocation169_spill] sm:$0xff] %v13345_v31  ;;  %v3422_v49 = vadd.f32 %v3287_v57, %v17555_v25  ;;  %v13352_v46 = vadd.f32 %v9113_v11, %v3424_v15  ;;  %9407 = vmatprep.mubr.bf16.mxu0 %v17469_v19  ;;  %v9761_v57 = vld [vmem:[%s16458_s4 + $0x200] sm:$0xff]   ;;  %v17560_v25 = vld [vmem:[#allocation177_spill] sm:$0xff]  ;;  %v17562_v19 = vld [vmem:[#allocation94_spill] sm:$0xff] }
 0x596   :  { %v9034_v4 = vpop.f32.mrf.mxu1  ;;  %v3722_v20 = vpop.f32.mrf.mxu0 }
 0x597   :  { %17557 = vst [vmem:[#allocation134_spill] sm:$0xff] %v13352_v46  ;;  %v3425_v2 = vadd.f32 %v9034_v4, %v17558_v5  ;;  %9466 = vmatpush3.bf16.msra.mxu1 %v9759_v0  ;;  %v13356_v13 = vadd.f32 %v3706_v23, %v3422_v49  ;;  %v17561_v46 = vld [vmem:[#allocation91_spill] sm:$0xff] }
 0x598   :  { %v3290_v50 = vpop.f32.mrf.mxu1  ;;  %9467 = vmatprep.subr.bf16.mxu1 %v9760_v33  ;;  %v9118_v63 = vpop.f32.mrf.mxu0  ;;  %v17563_v5 = vld [vmem:[#allocation95_spill] sm:$0xff] }
 0x599   :  { %17559 = vst [vmem:[#allocation170_spill] sm:$0xff] %v13356_v13  ;;  %v3423_v31 = vadd.f32 %v3290_v50, %v17560_v25  ;;  %v13362_v11 = vadd.f32 %v9114_v42, %v3425_v2  ;;  %v17564_v13 = vld [vmem:[#allocation178_spill] sm:$0xff] }
 0x59a   :  { %v9037_v15 = vpop.f32.mrf.mxu1  ;;  %9324 = vmatmul.mubr.bf16.gmra.mxu1 %v17561_v46  ;;  %v3725_v23 = vpop.f32.mrf.mxu0  ;;  %v17566_v46 = vld [vmem:[#allocation179_spill] sm:$0xff] }
 0x59b   :  { %v3428_v4 = vadd.f32 %v9037_v15, %v17562_v19  ;;  %9327 = vmatprep.mubr.bf16.mxu1 %v17563_v5  ;;  %9468 = vmatpush3.bf16.msra.mxu1 %v9760_v33  ;;  %v13367_v0 = vadd.f32 %v3709_v28, %v3423_v31  ;;  %v17567_v31 = vld [vmem:[#allocation180_spill] sm:$0xff] }
 0x59c   :  { %v3303_v49 = vpop.f32.mrf.mxu1  ;;  %9469 = vmatprep.subr.bf16.mxu1 %v9761_v57  ;;  %v9121_v26 = vpop.f32.mrf.mxu0  ;;  %9408 = vmatmul.mubr.bf16.gmra.mxu0 %v17471_v36  ;;  %v17569_v36 = vld [vmem:[#allocation103_spill] sm:$0xff] }
 0x59d   :  { %v3426_v9 = vadd.f32 %v3303_v49, %v17564_v13  ;;  %v13371_v42 = vadd.f32 %v9117_v54, %v3428_v4  ;;  %9411 = vmatprep.mubr.bf16.mxu0 %v17475_v3  ;;  %v17568_v49 = vld [vmem:[#allocation97_spill] sm:$0xff]  ;;  %v17570_v4 = vld [vmem:[#allocation98_spill] sm:$0xff] }
 0x59e   :  { %v9038_v2 = vpop.f32.mrf.mxu1  ;;  %v3738_v25 = vpop.f32.mrf.mxu0 }
 0x59f   :  { %17565 = vst [vmem:[#allocation141_spill] sm:$0xff] %v13371_v42  ;;  %v3429_v50 = vadd.f32 %v9038_v2, %v17566_v46  ;;  %9470 = vmatpush3.bf16.msra.mxu1 %v9761_v57  ;;  %v13375_v15 = vadd.f32 %v3722_v20, %v3426_v9  ;;  %v17571_v57 = vld [vmem:[#allocation111_spill] sm:$0xff] }
 0x5a0   :  { %v3306_v28 = vpop.f32.mrf.mxu1  ;;  %v9122_v19 = vpop.f32.mrf.mxu0 }
 0x5a1   :  { %v3427_v33 = vadd.f32 %v3306_v28, %v17567_v31  ;;  %v13378_v5 = vadd.f32 %v9118_v63, %v3429_v50  ;;  %v17573_v50 = vld [vmem:[#allocation181_spill] sm:$0xff] }
 0x5a2   :  { %v9041_v13 = vpop.f32.mrf.mxu1  ;;  %9328 = vmatmul.mubr.bf16.gmra.mxu1 %v17568_v49  ;;  %v3741_v3 = vpop.f32.mrf.mxu0 }
 0x5a3   :  { %v3432_v54 = vadd.f32 %v9041_v13, %v17569_v36  ;;  %9331 = vmatprep.mubr.bf16.mxu1 %v17570_v4  ;;  %v13383_v42 = vadd.f32 %v3725_v23, %v3427_v33  ;;  %v17574_v36 = vld [vmem:[#allocation182_spill] sm:$0xff] }
 0x5a4   :  { %v3319_v2 = vpop.f32.mrf.mxu1  ;;  %v9125_v20 = vpop.f32.mrf.mxu0  ;;  %9412 = vmatmul.mubr.bf16.gmra.mxu0 %v17477_v16  ;;  %v13397_v16 = vld [vmem:[#allocation2] sm:$0xff] }
 0x5a5   :  { %v3430_v9 = vadd.f32 %v3319_v2, %v17571_v57  ;;  %v13387_v46 = vadd.f32 %v9121_v26, %v3432_v54  ;;  %9415 = vmatprep.mubr.bf16.mxu0 %v17480_v12  ;;  %v17576_v57 = vld [vmem:[#allocation107_spill] sm:$0xff]  ;;  %v5162_v26 = vrot.slane %v13397_v16, 1  ;;  %v17577_v54 = vld [vmem:[#allocation116_spill] sm:$0xff] }
 0x5a6   :  { %v9042_v63 = vpop.f32.mrf.mxu1  ;;  %v3754_v31 = vpop.f32.mrf.mxu0 }
 0x5a7   :  { %17572 = vst [vmem:[#allocation126_spill] sm:$0xff] %v13387_v46  ;;  %v3433_v28 = vadd.f32 %v9042_v63, %v17573_v50  ;;  %v13391_v13 = vadd.f32 %v3738_v25, %v3430_v9  ;;  %v17578_v46 = vld [vmem:[#allocation112_spill] sm:$0xff]  ;;  %v17580_v50 = vld [vmem:[#allocation121_spill] sm:$0xff] }
 0x5a8   :  { %v3322_v49 = vpop.f32.mrf.mxu1  ;;  %v9126_v33 = vpop.f32.mrf.mxu0 }
 0x5a9   :  { %v3431_v23 = vadd.f32 %v3322_v49, %v17574_v36  ;;  %v13394_v4 = vadd.f32 %v9122_v19, %v3433_v28 }
 0x5aa   :  { %v9045_v2 = vpop.f32.mrf.mxu1  ;;  %9332 = vmatmul.mubr.bf16.gmra.mxu1 %v17576_v57  ;;  %v3757_v63 = vpop.f32.mrf.mxu0 }
 0x5ab   :  { %17575 = vst [vmem:[#allocation83_spill] sm:$0xff] %v13394_v4  ;;  %v3436_v12 = vadd.f32 %v9045_v2, %v17577_v54  ;;  %9335 = vmatprep.mubr.bf16.mxu1 %v17578_v46  ;;  %v13402_v25 = vadd.f32 %v3741_v3, %v3431_v23  ;;  %v17583_v54 = vld [vmem:[#allocation183_spill] sm:$0xff] }
 0x5ac   :  { %v3335_v9 = vpop.f32.mrf.mxu1  ;;  %v9129_v36 = vpop.f32.mrf.mxu0  ;;  %9416 = vmatmul.mubr.bf16.gmra.mxu0 %v17482_v59  ;;  %v17584_v59 = vld [vmem:[#allocation117_spill] sm:$0xff] }
 0x5ad   :  { %17579 = vst [vmem:[#allocation110_spill] sm:$0xff] %v13402_v25  ;;  %v3434_v49 = vadd.f32 %v3335_v9, %v17580_v50  ;;  %v13406_v19 = vadd.f32 %v9125_v20, %v3436_v12  ;;  %9419 = vmatprep.mubr.bf16.mxu0 %v12756_v7  ;;  %v13413_v25 = vpack.c.bf16 %v5162_v26, %v5162_v26  ;;  %v17585_v20 = vld [vmem:[#allocation123_spill] sm:$0xff] }
 0x5ae   :  { %v9046_v28 = vpop.f32.mrf.mxu1  ;;  %v3770_v4 = vpop.f32.mrf.mxu0 }
 0x5af   :  { %17581 = vst [vmem:[#allocation82_spill] sm:$0xff] %v13406_v19  ;;  %v3437_v57 = vadd.f32 %v9046_v28, %v13134_v32  ;;  %v13410_v2 = vadd.f32 %v3754_v31, %v3434_v49  ;;  %v17586_v19 = vld [vmem:[#allocation144_spill] sm:$0xff]  ;;  %v17587_v49 = vld [vmem:[#allocation130_spill] sm:$0xff] }
 0x5b0   :  { %v3338_v46 = vpop.f32.mrf.mxu1  ;;  %v9130_v23 = vpop.f32.mrf.mxu0 }
 0x5b1   :  { %17582 = vst [vmem:[#allocation171_spill] sm:$0xff] %v13410_v2  ;;  %v3435_v3 = vadd.f32 %v3338_v46, %v17583_v54  ;;  %v13415_v9 = vadd.f32 %v9126_v33, %v3437_v57  ;;  %v13429_v57 = vpack.c.bf16 %v13397_v16, %v13397_v16 }
 0x5b2   :  { %v9049_v50 = vpop.f32.mrf.mxu1  ;;  %9336 = vmatmul.mubr.bf16.gmra.mxu1 %v17584_v59  ;;  %v3773_v7 = vpop.f32.mrf.mxu0 }
 0x5b3   :  { %v3440_v12 = vadd.f32 %v9049_v50, %v17585_v20  ;;  %9339 = vmatprep.mubr.bf16.mxu1 %v17586_v19  ;;  %v13420_v32 = vadd.f32 %v3757_v63, %v3435_v3  ;;  %v17589_v3 = vld [vmem:[#allocation184_spill] sm:$0xff] }
 0x5b4   :  { %v3351_v31 = vpop.f32.mrf.mxu1  ;;  %v9133_v2 = vpop.f32.mrf.mxu0  ;;  %9420 = vmatmul.mubr.bf16.gmra.mxu0 %v13413_v25 }
 0x5b5   :  { %v3438_v28 = vadd.f32 %v3351_v31, %v17587_v49  ;;  %v13424_v26 = vadd.f32 %v9129_v36, %v3440_v12  ;;  %9423 = vmatprep.mubr.bf16.mxu0 %v17490_v56  ;;  %v17591_v12 = vld [vmem:[#allocation185_spill] sm:$0xff]  ;;  %v17592_v31 = vld [vmem:[#allocation131_spill] sm:$0xff] }
 0x5b6   :  { %v9050_v33 = vpop.f32.mrf.mxu1  ;;  %v3786_v46 = vpop.f32.mrf.mxu0 }
 0x5b7   :  { %17588 = vst [vmem:[#allocation67_spill] sm:$0xff] %v13424_v26  ;;  %v3441_v19 = vadd.f32 %v9050_v33, %v13146_v39  ;;  %v13432_v63 = vadd.f32 %v3770_v4, %v3438_v28  ;;  %v17594_v33 = vld [vmem:[#allocation135_spill] sm:$0xff] }
 0x5b8   :  { %v3354_v54 = vpop.f32.mrf.mxu1  ;;  %v9134_v59 = vpop.f32.mrf.mxu0 }
 0x5b9   :  { %v3439_v50 = vadd.f32 %v3354_v54, %v17589_v3  ;;  %v13435_v20 = vadd.f32 %v9130_v23, %v3441_v19  ;;  %v17595_v19 = vld [vmem:[#allocation186_spill] sm:$0xff] }
 0x5ba   :  { %v9053_v36 = vpop.f32.mrf.mxu1  ;;  %9340 = vmatmul.mubr.bf16.gmra.mxu1 %v13429_v57  ;;  %v3789_v49 = vpop.f32.mrf.mxu0 }
 0x5bb   :  { %17590 = vst [vmem:[#allocation29_spill] sm:$0xff] %v13435_v20  ;;  %v3444_v56 = vadd.f32 %v9053_v36, %v17591_v12  ;;  %9343 = vmatprep.mubr.bf16.mxu1 %v17592_v31  ;;  %v13440_v26 = vadd.f32 %v3773_v7, %v3439_v50  ;;  %v17596_v31 = vld [vmem:[#allocation187_spill] sm:$0xff] }
 0x5bc   :  { %v3367_v39 = vpop.f32.mrf.mxu1  ;;  %v9233_v28 = vpop.f32.mrf.mxu0  ;;  %9424 = vmatmul.mubr.bf16.gmra.mxu0 %v17491_v10 }
 0x5bd   :  { %17593 = vst [vmem:[#allocation89_spill] sm:$0xff] %v13440_v26  ;;  %v3442_v4 = vadd.f32 %v3367_v39, %v17594_v33  ;;  %v13444_v54 = vadd.f32 %v9133_v2, %v3444_v56  ;;  %9427 = vmatprep.mubr.bf16.mxu0 %v17492_v35  ;;  %v17597_v33 = vld [vmem:[#allocation132_spill] sm:$0xff] }
 0x5be   :  { %v9054_v23 = vpop.f32.mrf.mxu1  ;;  %v4418_v20 = vpop.f32.mrf.mxu0  ;;  %v17598_v2 = vld [vmem:[#allocation136_spill] sm:$0xff] }
 0x5bf   :  { %v3445_v3 = vadd.f32 %v9054_v23, %v17595_v19  ;;  %v13448_v36 = vadd.f32 %v3786_v46, %v3442_v4 }
 0x5c0   :  { %v3370_v12 = vpop.f32.mrf.mxu1  ;;  %v9234_v50 = vpop.f32.mrf.mxu0 }
 0x5c1   :  { %v3443_v7 = vadd.f32 %v3370_v12, %v17596_v31  ;;  %v13451_v26 = vadd.f32 %v9134_v59, %v3445_v3 }
 0x5c2   :  { %v9153_v39 = vpop.f32.mrf.mxu1  ;;  %9344 = vmatmul.mubr.bf16.gmra.mxu1 %v17597_v33  ;;  %v4421_v56 = vpop.f32.mrf.mxu0  ;;  %v17599_v33 = vld [vmem:[#allocation142_spill] sm:$0xff] }
 0x5c3   :  { %v4242_v10 = vadd.f32 %v9153_v39, %v13167_v8  ;;  %9347 = vmatprep.mubr.bf16.mxu1 %v17598_v2  ;;  %v13456_v35 = vadd.f32 %v3789_v49, %v3443_v7 }
 0x5c4   :  { %v3985_v23 = vpop.f32.mrf.mxu1  ;;  %v9237_v4 = vpop.f32.mrf.mxu0  ;;  %9428 = vmatmul.mubr.bf16.gmra.mxu0 %v17493_v43 }
 0x5c5   :  { %v4240_v46 = vadd.f32 %v3985_v23, %v13171_v41  ;;  %v13460_v19 = vadd.f32 %v9233_v28, %v4242_v10  ;;  %9431 = vmatprep.mubr.bf16.mxu0 %v17494_v58  ;;  %v17600_v28 = vld [vmem:[#allocation147_spill] sm:$0xff] }
 0x5c6   :  { %v9154_v59 = vpop.f32.mrf.mxu1  ;;  %v4434_v12 = vpop.f32.mrf.mxu0 }
 0x5c7   :  { %v4243_v3 = vadd.f32 %v9154_v59, %v13174_v30  ;;  %v13464_v8 = vadd.f32 %v4418_v20, %v4240_v46 }
 0x5c8   :  { %v3988_v31 = vpop.f32.mrf.mxu1  ;;  %v9238_v7 = vpop.f32.mrf.mxu0 }
 0x5c9   :  { %v4241_v49 = vadd.f32 %v3988_v31, %v13179_v37  ;;  %v13467_v39 = vadd.f32 %v9234_v50, %v4243_v3 }
 0x5ca   :  { %v9157_v41 = vpop.f32.mrf.mxu1  ;;  %9348 = vmatmul.mubr.bf16.gmra.mxu1 %v17599_v33  ;;  %v4437_v10 = vpop.f32.mrf.mxu0 }
 0x5cb   :  { %v4246_v43 = vadd.f32 %v9157_v41, %v13183_v61  ;;  %9351 = vmatprep.mubr.bf16.mxu1 %v17600_v28  ;;  %v13472_v58 = vadd.f32 %v4421_v56, %v4241_v49  ;;  %v17601_v49 = vld [vmem:[#allocation149_spill] sm:$0xff]  ;;  %v17604_v28 = vld [vmem:[#allocation140_spill] sm:$0xff] }
 0x5cc   :  { %v4001_v30 = vpop.f32.mrf.mxu1  ;;  %v9241_v2 = vpop.f32.mrf.mxu0  ;;  %9432 = vmatmul.mubr.bf16.gmra.mxu0 %v17495_v27 }
 0x5cd   :  { %v4244_v20 = vadd.f32 %v4001_v30, %v13187_v24  ;;  %v13476_v37 = vadd.f32 %v9237_v4, %v4246_v43  ;;  %9435 = vmatprep.mubr.bf16.mxu0 %v17497_v21  ;;  %v17602_v4 = vld [vmem:[#allocation152_spill] sm:$0xff]  ;;  %v17603_v43 = vld [vmem:[#allocation157_spill] sm:$0xff] }
 0x5ce   :  { %v9158_v50 = vpop.f32.mrf.mxu1  ;;  %v4450_v46 = vpop.f32.mrf.mxu0 }
 0x5cf   :  { %v4247_v23 = vadd.f32 %v9158_v50, %v13190_v14  ;;  %v13480_v61 = vadd.f32 %v4434_v12, %v4244_v20 }
 0x5d0   :  { %v4004_v59 = vpop.f32.mrf.mxu1  ;;  %v9242_v3 = vpop.f32.mrf.mxu0 }
 0x5d1   :  { %v4245_v56 = vadd.f32 %v4004_v59, %v13195_v6  ;;  %v13483_v31 = vadd.f32 %v9238_v7, %v4247_v23  ;;  %v17605_v23 = vld [vmem:[#allocation145_spill] sm:$0xff] }
 0x5d2   :  { %v9161_v24 = vpop.f32.mrf.mxu1  ;;  %9352 = vmatmul.mubr.bf16.gmra.mxu1 %v17601_v49  ;;  %v4453_v41 = vpop.f32.mrf.mxu0  ;;  %v17607_v49 = vld [vmem:[#allocation146_spill] sm:$0xff] }
 0x5d3   :  { %v4250_v27 = vadd.f32 %v9161_v24, %v13199_v38  ;;  %9355 = vmatprep.mubr.bf16.mxu1 %v17602_v4  ;;  %v13488_v21 = vadd.f32 %v4437_v10, %v4245_v56  ;;  %v17606_v24 = vld [vmem:[#allocation64_spill] sm:$0xff] }
 0x5d4   :  { %v4017_v14 = vpop.f32.mrf.mxu1  ;;  %v9245_v33 = vpop.f32.mrf.mxu0  ;;  %9436 = vmatmul.mubr.bf16.gmra.mxu0 %v17603_v43  ;;  %v17609_v43 = vld [vmem:[#allocation125_spill] sm:$0xff] }
 0x5d5   :  { %v4248_v12 = vadd.f32 %v4017_v14, %v13203_v18  ;;  %v13492_v6 = vadd.f32 %v9241_v2, %v4250_v27  ;;  %9439 = vmatprep.mubr.bf16.mxu0 %v17505_v44  ;;  %v17608_v27 = vld [vmem:[#allocation154_spill] sm:$0xff] }
 0x5d6   :  { %v9162_v7 = vpop.f32.mrf.mxu1  ;;  %v4466_v20 = vpop.f32.mrf.mxu0 }
 0x5d7   :  { %v4251_v30 = vadd.f32 %v9162_v7, %v17604_v28  ;;  %v13496_v38 = vadd.f32 %v4450_v46, %v4248_v12  ;;  %v17610_v28 = vld [vmem:[#allocation151_spill] sm:$0xff] }
 0x5d8   :  { %v4020_v50 = vpop.f32.mrf.mxu1  ;;  %v9246_v59 = vpop.f32.mrf.mxu0 }
 0x5d9   :  { %v4249_v10 = vadd.f32 %v4020_v50, %v17605_v23  ;;  %v13499_v56 = vadd.f32 %v9242_v3, %v4251_v30 }
 0x5da   :  { %v9165_v18 = vpop.f32.mrf.mxu1  ;;  %9356 = vmatmul.mubr.bf16.gmra.mxu1 %v17606_v24  ;;  %v4469_v4 = vpop.f32.mrf.mxu0 }
 0x5db   :  { %v4254_v2 = vadd.f32 %v9165_v18, %v17607_v49  ;;  %9359 = vmatprep.mubr.bf16.mxu1 %v17608_v27  ;;  %v13504_v44 = vadd.f32 %v4453_v41, %v4249_v10  ;;  %v17612_v41 = vld [vmem:[#allocation153_spill] sm:$0xff]  ;;  %v17613_v27 = vld [vmem:[#allocation120_spill] sm:$0xff] }
 0x5dc   :  { %v4033_v14 = vpop.f32.mrf.mxu1  ;;  %v9249_v12 = vpop.f32.mrf.mxu0  ;;  %9440 = vmatmul.mubr.bf16.gmra.mxu0 %v17609_v43 }
 0x5dd   :  { %v4252_v46 = vadd.f32 %v4033_v14, %v13219_v53  ;;  %v13508_v7 = vadd.f32 %v9245_v33, %v4254_v2  ;;  %9443 = vmatprep.mubr.bf16.mxu0 %v17513_v29  ;;  %v17614_v33 = vld [vmem:[#allocation155_spill] sm:$0xff]  ;;  %v17615_v14 = vld [vmem:[#allocation122_spill] sm:$0xff] }
 0x5de   :  { %v9166_v3 = vpop.f32.mrf.mxu1  ;;  %v13512_v50 = vpop.f32.mrf.mxu0 }
 0x5df   :  { %v4255_v30 = vadd.f32 %v9166_v3, %v17610_v28  ;;  %17611 = vst [vmem:[#allocation88_spill] sm:$0xff] %v13512_v50  ;;  %v13514_v23 = vadd.f32 %v4466_v20, %v4252_v46  ;;  %v17618_v28 = vld [vmem:[#allocation139_spill] sm:$0xff] }
 0x5e0   :  { %v4036_v18 = vpop.f32.mrf.mxu1  ;;  %v9250_v24 = vpop.f32.mrf.mxu0 }
 0x5e1   :  { %v4253_v10 = vadd.f32 %v4036_v18, %v17612_v41  ;;  %v13517_v49 = vadd.f32 %v9246_v59, %v4255_v30  ;;  %v17619_v18 = vld [vmem:[#allocation156_spill] sm:$0xff] }
 0x5e2   :  { %v9169_v53 = vpop.f32.mrf.mxu1  ;;  %9360 = vmatmul.mubr.bf16.gmra.mxu1 %v17613_v27  ;;  %v13522_v29 = vpop.f32.mrf.mxu0 }
 0x5e3   :  { %v4258_v2 = vadd.f32 %v9169_v53, %v17614_v33  ;;  %9363 = vmatprep.mubr.bf16.mxu1 %v17615_v14  ;;  %17616 = vst [vmem:[#allocation172_spill] sm:$0xff] %v13522_v29  ;;  %v13524_v43 = vadd.f32 %v4469_v4, %v4253_v10  ;;  %v17621_v33 = vld [vmem:[#allocation148_spill] sm:$0xff] }
 0x5e4   :  { %v4049_v3 = vpop.f32.mrf.mxu1  ;;  %v9253_v46 = vpop.f32.mrf.mxu0  ;;  %9444 = vmatmul.mubr.bf16.gmra.mxu0 %v17618_v28  ;;  %v17624_v28 = vld [vmem:[#allocation150_spill] sm:$0xff] }
 0x5e5   :  { %v13527_v20 = vadd.f32 %v4049_v3, %v13241_v17  ;;  %v13530_v59 = vadd.f32 %v9249_v12, %v4258_v2  ;;  %9447 = vmatprep.mubr.bf16.mxu0 %v17521_v51  ;;  %v17623_v3 = vld [vmem:[#allocation138_spill] sm:$0xff]  ;;  %v17625_v2 = vld [vmem:[#allocation137_spill] sm:$0xff] }
 0x5e6   :  { %v9170_v30 = vpop.f32.mrf.mxu1  ;;  %v13534_v53 = vpop.f32.mrf.mxu0 }
 0x5e7   :  { %17617 = vst [vmem:[#allocation173_spill] sm:$0xff] %v13527_v20  ;;  %v4259_v41 = vadd.f32 %v9170_v30, %v17619_v18  ;;  %17620 = vst [vmem:[#allocation86_spill] sm:$0xff] %v13534_v53 }
 0x5e8   :  { %v4052_v27 = vpop.f32.mrf.mxu1  ;;  %v9254_v10 = vpop.f32.mrf.mxu0 }
 0x5e9   :  { %v13537_v4 = vadd.f32 %v4052_v27, %v17621_v33  ;;  %v13539_v14 = vadd.f32 %v9250_v24, %v4259_v41 }
 0x5ea   :  { %v9173_v17 = vpop.f32.mrf.mxu1  ;;  %9364 = vmatmul.mubr.bf16.gmra.mxu1 %v17623_v3  ;;  %v13544_v50 = vpop.f32.mrf.mxu0  ;;  %v17628_v3 = vld [vmem:[#allocation57_spill] sm:$0xff] }
 0x5eb   :  { %17622 = vst [vmem:[#allocation87_spill] sm:$0xff] %v13537_v4  ;;  %v4262_v12 = vadd.f32 %v9173_v17, %v17624_v28  ;;  %9367 = vmatprep.mubr.bf16.mxu1 %v17625_v2  ;;  %17626 = vst [vmem:[#allocation9_spill] sm:$0xff] %v13544_v50  ;;  %v17638_v50 = vld [vmem:[#allocation160_spill] sm:$0xff] }
 0x5ec   :  { %v4065_v51 = vpop.f32.mrf.mxu1  ;;  %v9257_v18 = vpop.f32.mrf.mxu0  ;;  %9448 = vmatmul.mubr.bf16.gmra.mxu0 %v17523_v60 }
 0x5ed   :  { %v13547_v30 = vadd.f32 %v4065_v51, %v13257_v40  ;;  %v13550_v27 = vadd.f32 %v9253_v46, %v4262_v12  ;;  %9451 = vmatprep.mubr.bf16.mxu0 %v17527_v22  ;;  %v17630_v51 = vld [vmem:[#allocation133_spill] sm:$0xff]  ;;  %v17631_v46 = vld [vmem:[#allocation108_spill] sm:$0xff] }
 0x5ee   :  { %v9174_v24 = vpop.f32.mrf.mxu1  ;;  %v4514_v33 = vpop.f32.mrf.mxu0 }
 0x5ef   :  { %17627 = vst [vmem:[#allocation69_spill] sm:$0xff] %v13547_v30  ;;  %v4263_v41 = vadd.f32 %v9174_v24, %v13260_v52 }
 0x5f0   :  { %v4068_v17 = vpop.f32.mrf.mxu1  ;;  %v9258_v2 = vpop.f32.mrf.mxu0 }
 0x5f1   :  { %v13555_v28 = vadd.f32 %v4068_v17, %v17628_v3  ;;  %v13557_v20 = vadd.f32 %v9254_v10, %v4263_v41  ;;  %v17632_v10 = vmov 1.0   ;;  %v17633_v41 = vld [vmem:[#allocation158_spill] sm:$0xff] }
 0x5f2   :  { %v9177_v40 = vpop.f32.mrf.mxu1  ;;  %9368 = vmatmul.mubr.bf16.gmra.mxu1 %v17630_v51  ;;  %v13562_v12 = vpop.f32.mrf.mxu0 }
 0x5f3   :  { %17629 = vst [vmem:[#allocation174_spill] sm:$0xff] %v13555_v28  ;;  %v4266_v60 = vadd.f32 %v9177_v40, %v13269_v1  ;;  %9371 = vmatprep.mubr.bf16.mxu1 %v17631_v46 }
 0x5f4   :  { %v4081_v22 = vpop.f32.mrf.mxu1  ;;  %v9261_v24 = vpop.f32.mrf.mxu0  ;;  %9452 = vmatmul.mubr.bf16.gmra.mxu0 %v13413_v25  ;;  %v17634_v25 = vld [vmem:[#allocation127_spill] sm:$0xff] }
 0x5f5   :  { %v4264_v52 = vadd.f32 %v4081_v22, %v13273_v48  ;;  %v13566_v17 = vadd.f32 %v9257_v18, %v4266_v60  ;;  %6092 = vmatprep.mubr.f32.mxu0 %v17632_v10  ;;  %v17635_v60 = vld [vmem:[#allocation159_spill] sm:$0xff] }
 0x5f6   :  { %v9178_v3 = vpop.f32.mrf.mxu1  ;;  %v4530_v51 = vpop.f32.mrf.mxu0 }
 0x5f7   :  { %v4267_v29 = vadd.f32 %v9178_v3, %v17633_v41  ;;  %v13570_v4 = vadd.f32 %v4514_v33, %v4264_v52 }
 0x5f8   :  { %v4084_v1 = vpop.f32.mrf.mxu1  ;;  %v9262_v46 = vpop.f32.mrf.mxu0 }
 0x5f9   :  { %v13573_v40 = vadd.f32 %v4084_v1, %v13281_v47  ;;  %v13575_v53 = vadd.f32 %v9258_v2, %v4267_v29 }
 0x5fa   :  { %v9181_v48 = vpop.f32.mrf.mxu1  ;;  %9372 = vmatmul.mubr.bf16.gmra.mxu1 %v13429_v57  ;;  %v13580_v22 = vpop.f32.mrf.mxu0 }
 0x5fb   :  { %v4270_v18 = vadd.f32 %v9181_v48, %v17634_v25  ;;  %9471 = vmatprep.mubr.bf16.mxu1 %v17635_v60  ;;  %17636 = vst [vmem:[#allocation175_spill] sm:$0xff] %v13580_v22 }
 0x5fc   :  { %v4097_v3 = vpop.f32.mrf.mxu1  ;;  %v9265_v52 = vpop.f32.mrf.mxu0 }
 0x5fd   :  { %v4268_v33 = vadd.f32 %v4097_v3, %v13289_v34  ;;  %v13583_v41 = vadd.f32 %v9261_v24, %v4270_v18  ;;  %v17639_v34 = vld [vmem:[#allocation92_spill] sm:$0xff]  ;;  %v17640_v24 = vld [vmem:[#allocation162_spill] sm:$0xff] }
 0x5fe   :  { %v9182_v47 = vpop.f32.mrf.mxu1  ;;  %v4546_v29 = vpop.f32.mrf.mxu0 }
 0x5ff   :  { %v4271_v1 = vadd.f32 %v9182_v47, %v13295_v45  ;;  %v13586_v2 = vadd.f32 %v4530_v51, %v4268_v33 }
 0x600   :  { %v4100_v30 = vpop.f32.mrf.mxu1  ;;  %v9266_v48 = vpop.f32.mrf.mxu0 }
 0x601   :  { %v13589_v57 = vadd.f32 %v4100_v30, %v13301_v55  ;;  %v13591_v25 = vadd.f32 %v9262_v46, %v4271_v1  ;;  %v17643_v30 = vld [vmem:[#allocation165_spill] sm:$0xff] }
 0x602   :  { %v9185_v60 = vpop.f32.mrf.mxu1  ;;  %9472 = vmatmul.mubr.bf16.vlgmr.msra.gmra.mxu1 %v17638_v50  ;;  %v13596_v18 = vpop.f32.mrf.mxu0  ;;  %v17645_v50 = vld [vmem:[#allocation129_spill] sm:$0xff] }
 0x603   :  { %17637 = vst [vmem:[#allocation32_spill] sm:$0xff] %v13589_v57  ;;  %v4274_v3 = vadd.f32 %v9185_v60, %v17639_v34  ;;  %9475 = vmatprep.mubr.bf16.mxu1 %v17640_v24  ;;  %17641 = vst [vmem:[#allocation13_spill] sm:$0xff] %v13596_v18  ;;  %v17648_v18 = vld [vmem:[#allocation161_spill] sm:$0xff] }
 0x604   :  { %v4113_v45 = vpop.f32.mrf.mxu1  ;;  %v9269_v33 = vpop.f32.mrf.mxu0 }
 0x605   :  { %v4272_v51 = vadd.f32 %v4113_v45, %v13312_v62  ;;  %v13599_v47 = vadd.f32 %v9265_v52, %v4274_v3  ;;  %v17649_v62 = vld [vmem:[#allocation166_spill] sm:$0xff]  ;;  %v17650_v52 = vld [vmem:[#allocation164_spill] sm:$0xff] }
 0x606   :  { %v9186_v55 = vpop.f32.mrf.mxu1  ;;  %v4562_v46 = vpop.f32.mrf.mxu0 }
 0x607   :  { %17642 = vst [vmem:[#allocation59_spill] sm:$0xff] %v13599_v47  ;;  %v4275_v28 = vadd.f32 %v9186_v55, %v17643_v30  ;;  %v13602_v1 = vadd.f32 %v4546_v29, %v4272_v51  ;;  %v17652_v30 = vld [vmem:[#allocation167_spill] sm:$0xff] }
 0x608   :  { %v4116_v22 = vpop.f32.mrf.mxu1  ;;  %v9270_v60 = vpop.f32.mrf.mxu0 }
 0x609   :  { %17644 = vst [vmem:[#allocation90_spill] sm:$0xff] %v13602_v1  ;;  %v13605_v57 = vadd.f32 %v4116_v22, %v17645_v50  ;;  %v13607_v34 = vadd.f32 %v9266_v48, %v4275_v28  ;;  %v17653_v50 = vld [vmem:[#allocation168_spill] sm:$0xff] }
 0x60a   :  { %v9189_v24 = vpop.f32.mrf.mxu1  ;;  %9476 = vmatmul.mubr.bf16.gmra.mxu1 %v17648_v18  ;;  %v13612_v3 = vpop.f32.mrf.mxu0  ;;  %v17655_v18 = vld [vmem:[#allocation169_spill] sm:$0xff] }
 0x60b   :  { %17646 = vst [vmem:[#allocation102_spill] sm:$0xff] %v13605_v57  ;;  %17647 = vst [vmem:[#allocation176_spill] sm:$0xff] %v13607_v34  ;;  %v4278_v45 = vadd.f32 %v9189_v24, %v17649_v62  ;;  %9479 = vmatprep.mubr.bf16.mxu1 %v17650_v52 }
 0x60c   :  { %17651 = vst [vmem:[#allocation177_spill] sm:$0xff] %v13612_v3  ;;  %v4129_v55 = vpop.f32.mrf.mxu1  ;;  %v9273_v51 = vpop.f32.mrf.mxu0  ;;  %v17657_v3 = vld [vmem:[#allocation163_spill] sm:$0xff] }
 0x60d   :  { %v4276_v29 = vadd.f32 %v4129_v55, %v17652_v30  ;;  %v13615_v1 = vadd.f32 %v9269_v33, %v4278_v45  ;;  %v17658_v55 = vld [vmem:[#allocation134_spill] sm:$0xff] }
 0x60e   :  { %v9190_v22 = vpop.f32.mrf.mxu1  ;;  %v4578_v28 = vpop.f32.mrf.mxu0  ;;  %v17659_v33 = vld [vmem:[#allocation62_spill] sm:$0xff] }
 0x60f   :  { %v4279_v57 = vadd.f32 %v9190_v22, %v17653_v50  ;;  %v13618_v48 = vadd.f32 %v4562_v46, %v4276_v29  ;;  %v17661_v50 = vld [vmem:[#allocation170_spill] sm:$0xff] }
 0x610   :  { %v4132_v34 = vpop.f32.mrf.mxu1  ;;  %v9274_v24 = vpop.f32.mrf.mxu0 }
 0x611   :  { %17654 = vst [vmem:[#allocation91_spill] sm:$0xff] %v13618_v48  ;;  %v13621_v47 = vadd.f32 %v4132_v34, %v17655_v18  ;;  %v13623_v62 = vadd.f32 %v9270_v60, %v4279_v57 }
 0x612   :  { %v9193_v52 = vpop.f32.mrf.mxu1  ;;  %9480 = vmatmul.mubr.bf16.gmra.mxu1 %v17657_v3  ;;  %v13628_v45 = vpop.f32.mrf.mxu0 }
 0x613   :  { %17656 = vst [vmem:[#allocation94_spill] sm:$0xff] %v13621_v47  ;;  %v4282_v30 = vadd.f32 %v9193_v52, %v17658_v55  ;;  %9483 = vmatprep.mubr.bf16.mxu1 %v17659_v33  ;;  %17660 = vst [vmem:[#allocation95_spill] sm:$0xff] %v13628_v45  ;;  %v17663_v45 = vld [vmem:[#allocation73_spill] sm:$0xff] }
 0x614   :  { %v4145_v22 = vpop.f32.mrf.mxu1  ;;  %v9277_v29 = vpop.f32.mrf.mxu0 }
 0x615   :  { %v4280_v46 = vadd.f32 %v4145_v22, %v17661_v50  ;;  %v13631_v48 = vadd.f32 %v9273_v51, %v4282_v30  ;;  %v17664_v22 = vld [vmem:[#allocation141_spill] sm:$0xff]  ;;  %v17665_v51 = vld [vmem:[#allocation3_spill] sm:$0xff] }
 0x616   :  { %v9194_v34 = vpop.f32.mrf.mxu1  ;;  %v4594_v57 = vpop.f32.mrf.mxu0 }
 0x617   :  { %v4283_v18 = vadd.f32 %v9194_v34, %v13362_v11  ;;  %v13634_v60 = vadd.f32 %v4578_v28, %v4280_v46 }
 0x618   :  { %v4148_v47 = vpop.f32.mrf.mxu1  ;;  %v9278_v52 = vpop.f32.mrf.mxu0 }
 0x619   :  { %v13637_v3 = vadd.f32 %v4148_v47, %v13367_v0  ;;  %v13639_v55 = vadd.f32 %v9274_v24, %v4283_v18 }
 0x61a   :  { %v9197_v33 = vpop.f32.mrf.mxu1  ;;  %9484 = vmatmul.mubr.bf16.gmra.mxu1 %v17663_v45  ;;  %v13644_v30 = vpop.f32.mrf.mxu0 }
 0x61b   :  { %17662 = vst [vmem:[#allocation178_spill] sm:$0xff] %v13637_v3  ;;  %v4286_v50 = vadd.f32 %v9197_v33, %v17664_v22  ;;  %9487 = vmatprep.mubr.bf16.mxu1 %v17665_v51  ;;  %17666 = vst [vmem:[#allocation179_spill] sm:$0xff] %v13644_v30  ;;  %v17670_v30 = vld [vmem:[#allocation25_spill] sm:$0xff] }
 0x61c   :  { %v4161_v11 = vpop.f32.mrf.mxu1  ;;  %v9281_v46 = vpop.f32.mrf.mxu0 }
 0x61d   :  { %v4284_v28 = vadd.f32 %v4161_v11, %v13375_v15  ;;  %v13647_v34 = vadd.f32 %v9277_v29, %v4286_v50  ;;  %v17671_v15 = vld [vmem:[#allocation126_spill] sm:$0xff]  ;;  %v17672_v29 = vld [vmem:[#allocation85_spill] sm:$0xff] }
 0x61e   :  { %v9198_v0 = vpop.f32.mrf.mxu1  ;;  %v4610_v24 = vpop.f32.mrf.mxu0 }
 0x61f   :  { %v4287_v47 = vadd.f32 %v9198_v0, %v13378_v5  ;;  %v13650_v18 = vadd.f32 %v4594_v57, %v4284_v28 }
 0x620   :  { %v4164_v3 = vpop.f32.mrf.mxu1  ;;  %v9282_v33 = vpop.f32.mrf.mxu0 }
 0x621   :  { %17667 = vst [vmem:[#allocation180_spill] sm:$0xff] %v13650_v18  ;;  %v13653_v45 = vadd.f32 %v4164_v3, %v13383_v42  ;;  %v13655_v22 = vadd.f32 %v9278_v52, %v4287_v47  ;;  %v17674_v3 = vld [vmem:[#allocation83_spill] sm:$0xff] }
 0x622   :  { %v9201_v51 = vpop.f32.mrf.mxu1  ;;  %9488 = vmatmul.mubr.bf16.gmra.mxu1 %v17670_v30  ;;  %v13660_v50 = vpop.f32.mrf.mxu0  ;;  %v17676_v30 = vld [vmem:[#allocation110_spill] sm:$0xff] }
 0x623   :  { %17668 = vst [vmem:[#allocation97_spill] sm:$0xff] %v13653_v45  ;;  %17669 = vst [vmem:[#allocation103_spill] sm:$0xff] %v13655_v22  ;;  %v4290_v11 = vadd.f32 %v9201_v51, %v17671_v15  ;;  %9491 = vmatprep.mubr.bf16.mxu1 %v17672_v29 }
 0x624   :  { %17673 = vst [vmem:[#allocation98_spill] sm:$0xff] %v13660_v50  ;;  %v4177_v5 = vpop.f32.mrf.mxu1  ;;  %v9285_v28 = vpop.f32.mrf.mxu0  ;;  %v17678_v50 = vld [vmem:[#allocation21_spill] sm:$0xff] }
 0x625   :  { %v4288_v57 = vadd.f32 %v4177_v5, %v13391_v13  ;;  %v13663_v0 = vadd.f32 %v9281_v46, %v4290_v11  ;;  %v17679_v13 = vld [vmem:[#allocation82_spill] sm:$0xff]  ;;  %v17680_v46 = vld [vmem:[#allocation17_spill] sm:$0xff] }
 0x626   :  { %v9202_v42 = vpop.f32.mrf.mxu1  ;;  %v4626_v52 = vpop.f32.mrf.mxu0 }
 0x627   :  { %v4291_v45 = vadd.f32 %v9202_v42, %v17674_v3  ;;  %v13666_v47 = vadd.f32 %v4610_v24, %v4288_v57  ;;  %v17682_v3 = vld [vmem:[#allocation171_spill] sm:$0xff] }
 0x628   :  { %v4180_v22 = vpop.f32.mrf.mxu1  ;;  %v9286_v51 = vpop.f32.mrf.mxu0 }
 0x629   :  { %17675 = vst [vmem:[#allocation111_spill] sm:$0xff] %v13666_v47  ;;  %v13669_v18 = vadd.f32 %v4180_v22, %v17676_v30  ;;  %v13671_v15 = vadd.f32 %v9282_v33, %v4291_v45  ;;  %v5600_v30 = vrot.slane %v13397_v16, 2 }
 0x62a   :  { %v9205_v29 = vpop.f32.mrf.mxu1  ;;  %9492 = vmatmul.mubr.bf16.gmra.mxu1 %v17678_v50  ;;  %v13676_v11 = vpop.f32.mrf.mxu0 }
 0x62b   :  { %17677 = vst [vmem:[#allocation181_spill] sm:$0xff] %v13669_v18  ;;  %v4294_v5 = vadd.f32 %v9205_v29, %v17679_v13  ;;  %9495 = vmatprep.mubr.bf16.mxu1 %v17680_v46  ;;  %17681 = vst [vmem:[#allocation182_spill] sm:$0xff] %v13676_v11 }
 0x62c   :  { %v4193_v42 = vpop.f32.mrf.mxu1  ;;  %v9289_v57 = vpop.f32.mrf.mxu0 }
 0x62d   :  { %v4292_v24 = vadd.f32 %v4193_v42, %v17682_v3  ;;  %v13679_v47 = vadd.f32 %v9285_v28, %v4294_v5  ;;  %v17686_v42 = vld [vmem:[#allocation93_spill] sm:$0xff]  ;;  %v17687_v28 = vld [vmem:[#allocation67_spill] sm:$0xff]  ;;  %v17688_v3 = vld [vmem:[#allocation124_spill] sm:$0xff] }
 0x62e   :  { %v9206_v22 = vpop.f32.mrf.mxu1  ;;  %v4642_v33 = vpop.f32.mrf.mxu0 }
 0x62f   :  { %v4295_v45 = vadd.f32 %v9206_v22, %v13415_v9  ;;  %v13683_v18 = vadd.f32 %v4626_v52, %v4292_v24 }
 0x630   :  { %v4196_v50 = vpop.f32.mrf.mxu1  ;;  %v9290_v13 = vpop.f32.mrf.mxu0 }
 0x631   :  { %17683 = vst [vmem:[#allocation107_spill] sm:$0xff] %v13683_v18  ;;  %v13686_v29 = vadd.f32 %v4196_v50, %v13420_v32  ;;  %v13688_v46 = vadd.f32 %v9286_v51, %v4295_v45  ;;  %v13698_v50 = vpack.c.bf16 %v5600_v30, %v5600_v30  ;;  %v17690_v51 = vld [vmem:[#allocation29_spill] sm:$0xff] }
 0x632   :  { %v9209_v11 = vpop.f32.mrf.mxu1  ;;  %9496 = vmatmul.mubr.bf16.gmra.mxu1 %v17686_v42  ;;  %v13693_v16 = vpop.f32.mrf.mxu0 }
 0x633   :  { %17684 = vst [vmem:[#allocation116_spill] sm:$0xff] %v13686_v29  ;;  %17685 = vst [vmem:[#allocation112_spill] sm:$0xff] %v13688_v46  ;;  %v4298_v5 = vadd.f32 %v9209_v11, %v17687_v28  ;;  %9499 = vmatprep.mubr.bf16.mxu1 %v17688_v3  ;;  %v17691_v11 = vld [vmem:[#allocation89_spill] sm:$0xff] }
 0x634   :  { %17689 = vst [vmem:[#allocation121_spill] sm:$0xff] %v13693_v16  ;;  %v4209_v9 = vpop.f32.mrf.mxu1  ;;  %v9293_v24 = vpop.f32.mrf.mxu0 }
 0x635   :  { %v4296_v52 = vadd.f32 %v4209_v9, %v13432_v63  ;;  %v13696_v22 = vadd.f32 %v9289_v57, %v4298_v5  ;;  %v17692_v57 = vld [vmem:[#allocation100_spill] sm:$0xff] }
 0x636   :  { %v9210_v32 = vpop.f32.mrf.mxu1  ;;  %v4658_v29 = vpop.f32.mrf.mxu0 }
 0x637   :  { %v4299_v45 = vadd.f32 %v9210_v32, %v17690_v51  ;;  %v13701_v46 = vadd.f32 %v4642_v33, %v4296_v52 }
 0x638   :  { %v4212_v42 = vpop.f32.mrf.mxu1  ;;  %v9294_v3 = vpop.f32.mrf.mxu0 }
 0x639   :  { %v13704_v28 = vadd.f32 %v4212_v42, %v17691_v11  ;;  %v13706_v16 = vadd.f32 %v9290_v13, %v4299_v45 }
 0x63a   :  { %v9213_v18 = vpop.f32.mrf.mxu1  ;;  %9500 = vmatmul.mubr.bf16.gmra.mxu1 %v13698_v50  ;;  %v13711_v30 = vpop.f32.mrf.mxu0 }
 0x63b   :  { %v4302_v63 = vadd.f32 %v9213_v18, %v13444_v54  ;;  %9503 = vmatprep.mubr.bf16.mxu1 %v17692_v57  ;;  %17693 = vst [vmem:[#allocation183_spill] sm:$0xff] %v13711_v30  ;;  %v17694_v30 = vld [vmem:[#allocation84_spill] sm:$0xff] }
 0x63c   :  { %v4225_v5 = vpop.f32.mrf.mxu1  ;;  %v9393_v9 = vpop.f32.mrf.mxu0 }
 0x63d   :  { %v4300_v33 = vadd.f32 %v4225_v5, %v13448_v36  ;;  %v13714_v52 = vadd.f32 %v9293_v24, %v4302_v63  ;;  %v17695_v24 = vld [vmem:[#allocation99_spill] sm:$0xff] }
 0x63e   :  { %v9214_v32 = vpop.f32.mrf.mxu1  ;;  %v5276_v13 = vpop.f32.mrf.mxu0 }
 0x63f   :  { %v4303_v51 = vadd.f32 %v9214_v32, %v13451_v26  ;;  %v13717_v45 = vadd.f32 %v4658_v29, %v4300_v33 }
 0x640   :  { %v4228_v42 = vpop.f32.mrf.mxu1  ;;  %v9394_v54 = vpop.f32.mrf.mxu0 }
 0x641   :  { %v13720_v11 = vadd.f32 %v4228_v42, %v13456_v35  ;;  %v13722_v18 = vadd.f32 %v9294_v3, %v4303_v51 }
 0x642   :  { %v9313_v57 = vpop.f32.mrf.mxu1  ;;  %9504 = vmatmul.mubr.bf16.gmra.mxu1 %v17694_v30  ;;  %v13727_v63 = vpop.f32.mrf.mxu0 }
 0x643   :  { %v5094_v36 = vadd.f32 %v9313_v57, %v13460_v19  ;;  %9507 = vmatprep.mubr.bf16.mxu1 %v17695_v24  ;;  %17696 = vst [vmem:[#allocation117_spill] sm:$0xff] %v13727_v63  ;;  %v17697_v63 = vld [vmem:[#allocation96_spill] sm:$0xff] }
 0x644   :  { %v4837_v26 = vpop.f32.mrf.mxu1  ;;  %v9397_v5 = vpop.f32.mrf.mxu0 }
 0x645   :  { %v5092_v29 = vadd.f32 %v4837_v26, %v13464_v8  ;;  %v13730_v33 = vadd.f32 %v9393_v9, %v5094_v36  ;;  %v17698_v9 = vld [vmem:[#allocation105_spill] sm:$0xff] }
 0x646   :  { %v9314_v35 = vpop.f32.mrf.mxu1  ;;  %v5292_v3 = vpop.f32.mrf.mxu0 }
 0x647   :  { %v5095_v32 = vadd.f32 %v9314_v35, %v13467_v39  ;;  %v13733_v51 = vadd.f32 %v5276_v13, %v5092_v29 }
 0x648   :  { %v4840_v42 = vpop.f32.mrf.mxu1  ;;  %v9398_v19 = vpop.f32.mrf.mxu0 }
 0x649   :  { %v13736_v30 = vadd.f32 %v4840_v42, %v13472_v58  ;;  %v13738_v57 = vadd.f32 %v9394_v54, %v5095_v32 }
 0x64a   :  { %v9317_v24 = vpop.f32.mrf.mxu1  ;;  %9508 = vmatmul.mubr.bf16.gmra.mxu1 %v17697_v63  ;;  %v13743_v36 = vpop.f32.mrf.mxu0 }
 0x64b   :  { %v5098_v8 = vadd.f32 %v9317_v24, %v13476_v37  ;;  %9511 = vmatprep.mubr.bf16.mxu1 %v17698_v9  ;;  %v17702_v9 = vld [vmem:[#allocation101_spill] sm:$0xff] }
 0x64c   :  { %v4853_v39 = vpop.f32.mrf.mxu1  ;;  %v13746_v26 = vpop.f32.mrf.mxu0 }
 0x64d   :  { %v5096_v13 = vadd.f32 %v4853_v39, %v13480_v61  ;;  %17699 = vst [vmem:[#allocation123_spill] sm:$0xff] %v13746_v26  ;;  %v13748_v29 = vadd.f32 %v9397_v5, %v5098_v8  ;;  %v17704_v8 = vld [vmem:[#allocation106_spill] sm:$0xff] }
 0x64e   :  { %v9318_v58 = vpop.f32.mrf.mxu1  ;;  %v13751_v35 = vpop.f32.mrf.mxu0 }
 0x64f   :  { %v5099_v54 = vadd.f32 %v9318_v58, %v13483_v31  ;;  %17700 = vst [vmem:[#allocation144_spill] sm:$0xff] %v13751_v35  ;;  %v13753_v32 = vadd.f32 %v5292_v3, %v5096_v13 }
 0x650   :  { %v4856_v63 = vpop.f32.mrf.mxu1  ;;  %v13758_v42 = vpop.f32.mrf.mxu0 }
 0x651   :  { %v13756_v37 = vadd.f32 %v4856_v63, %v13488_v21  ;;  %17701 = vst [vmem:[#allocation130_spill] sm:$0xff] %v13758_v42  ;;  %v13760_v24 = vadd.f32 %v9398_v19, %v5099_v54 }
 0x652   :  { %v9321_v61 = vpop.f32.mrf.mxu1  ;;  %9512 = vmatmul.mubr.bf16.gmra.mxu1 %v17702_v9  ;;  %v13767_v31 = vpop.f32.mrf.mxu0  ;;  %v17710_v9 = vld [vmem:[#allocation104_spill] sm:$0xff] }
 0x653   :  { %v13764_v5 = vadd.f32 %v9321_v61, %v13492_v6  ;;  %9515 = vmatprep.mubr.bf16.mxu1 %v17704_v8  ;;  %17705 = vst [vmem:[#allocation185_spill] sm:$0xff] %v13767_v31  ;;  %v17711_v8 = vld [vmem:[#allocation114_spill] sm:$0xff]  ;;  %v17716_v31 = vld [vmem:[#allocation109_spill] sm:$0xff] }
 0x654   :  { %v4869_v3 = vpop.f32.mrf.mxu1  ;;  %v13772_v21 = vpop.f32.mrf.mxu0 }
 0x655   :  { %17703 = vst [vmem:[#allocation184_spill] sm:$0xff] %v13764_v5  ;;  %v13770_v39 = vadd.f32 %v4869_v3, %v13496_v38 }
 0x656   :  { %v9322_v13 = vpop.f32.mrf.mxu1  ;;  %v13777_v58 = vpop.f32.mrf.mxu0 }
 0x657   :  { %17706 = vst [vmem:[#allocation131_spill] sm:$0xff] %v13770_v39  ;;  %v13775_v19 = vadd.f32 %v9322_v13, %v13499_v56  ;;  %17708 = vst [vmem:[#allocation186_spill] sm:$0xff] %v13777_v58 }
 0x658   :  { %v4872_v54 = vpop.f32.mrf.mxu1  ;;  %v13782_v63 = vpop.f32.mrf.mxu0 }
 0x659   :  { %17707 = vst [vmem:[#allocation135_spill] sm:$0xff] %v13775_v19  ;;  %v13780_v6 = vadd.f32 %v4872_v54, %v13504_v44  ;;  %v17748_v19 = vld [vmem:[#allocation102_spill] sm:$0xff] }
 0x65a   :  { %v9325_v61 = vpop.f32.mrf.mxu1  ;;  %9516 = vmatmul.mubr.bf16.gmra.mxu1 %v17710_v9  ;;  %v13789_v3 = vpop.f32.mrf.mxu0 }
 0x65b   :  { %17709 = vst [vmem:[#allocation187_spill] sm:$0xff] %v13780_v6  ;;  %v13786_v38 = vadd.f32 %v9325_v61, %v13508_v7  ;;  %9519 = vmatprep.mubr.bf16.mxu1 %v17711_v8 }
 0x65c   :  { %v4885_v56 = vpop.f32.mrf.mxu1  ;;  %v13794_v35 = vpop.f32.mrf.mxu0 }
 0x65d   :  { %v13792_v13 = vadd.f32 %v4885_v56, %v13514_v23  ;;  %17713 = vst [vmem:[#allocation136_spill] sm:$0xff] %v13794_v35  ;;  %v17718_v56 = vld [vmem:[#allocation113_spill] sm:$0xff] }
 0x65e   :  { %v9326_v44 = vpop.f32.mrf.mxu1  ;;  %v13799_v39 = vpop.f32.mrf.mxu0 }
 0x65f   :  { %17712 = vst [vmem:[#allocation132_spill] sm:$0xff] %v13792_v13  ;;  %v13797_v54 = vadd.f32 %v9326_v44, %v13517_v49  ;;  %17714 = vst [vmem:[#allocation142_spill] sm:$0xff] %v13799_v39 }
 0x660   :  { %v4888_v9 = vpop.f32.mrf.mxu1  ;;  %v13804_v61 = vpop.f32.mrf.mxu0 }
 0x661   :  { %v13802_v7 = vadd.f32 %v4888_v9, %v13524_v43  ;;  %17715 = vst [vmem:[#allocation147_spill] sm:$0xff] %v13804_v61 }
 0x662   :  { %v9329_v8 = vpop.f32.mrf.mxu1  ;;  %9520 = vmatmul.mubr.bf16.gmra.mxu1 %v17716_v31  ;;  %v13811_v35 = vpop.f32.mrf.mxu0 }
 0x663   :  { %v13808_v23 = vadd.f32 %v9329_v8, %v13530_v59  ;;  %9523 = vmatprep.mubr.bf16.mxu1 %v17718_v56  ;;  %17719 = vst [vmem:[#allocation152_spill] sm:$0xff] %v13811_v35  ;;  %v17726_v8 = vld [vmem:[#allocation115_spill] sm:$0xff] }
 0x664   :  { %v13813_v49 = vpop.f32.mrf.mxu1  ;;  %v13815_v44 = vpop.f32.mrf.mxu0  ;;  %v17728_v35 = vld [vmem:[#allocation119_spill] sm:$0xff] }
 0x665   :  { %17717 = vst [vmem:[#allocation149_spill] sm:$0xff] %v13808_v23  ;;  %17720 = vst [vmem:[#allocation157_spill] sm:$0xff] %v13813_v49 }
 0x666   :  { %17721 = vst [vmem:[#allocation140_spill] sm:$0xff] %v13815_v44  ;;  %v9330_v39 = vpop.f32.mrf.mxu1  ;;  %v13820_v9 = vpop.f32.mrf.mxu0 }
 0x667   :  { %v13818_v43 = vadd.f32 %v9330_v39, %v13539_v14  ;;  %17723 = vst [vmem:[#allocation64_spill] sm:$0xff] %v13820_v9 }
 0x668   :  { %v13822_v61 = vpop.f32.mrf.mxu1  ;;  %v13824_v31 = vpop.f32.mrf.mxu0 }
 0x669   :  { %17722 = vst [vmem:[#allocation145_spill] sm:$0xff] %v13818_v43  ;;  %17724 = vst [vmem:[#allocation146_spill] sm:$0xff] %v13822_v61 }
 0x66a   :  { %17725 = vst [vmem:[#allocation154_spill] sm:$0xff] %v13824_v31  ;;  %v9333_v59 = vpop.f32.mrf.mxu1  ;;  %9524 = vmatmul.mubr.bf16.gmra.mxu1 %v17726_v8  ;;  %v13831_v23 = vpop.f32.mrf.mxu0 }
 0x66b   :  { %v13828_v56 = vadd.f32 %v9333_v59, %v13550_v27  ;;  %9527 = vmatprep.mubr.bf16.mxu1 %v17728_v35  ;;  %17729 = vst [vmem:[#allocation151_spill] sm:$0xff] %v13831_v23  ;;  %v17736_v59 = vld [vmem:[#allocation118_spill] sm:$0xff]  ;;  %v17738_v23 = vld [vmem:[#allocation128_spill] sm:$0xff] }
 0x66c   :  { %v13833_v49 = vpop.f32.mrf.mxu1  ;;  %v13835_v14 = vpop.f32.mrf.mxu0 }
 0x66d   :  { %17727 = vst [vmem:[#allocation125_spill] sm:$0xff] %v13828_v56  ;;  %17730 = vst [vmem:[#allocation153_spill] sm:$0xff] %v13833_v49 }
 0x66e   :  { %17731 = vst [vmem:[#allocation120_spill] sm:$0xff] %v13835_v14  ;;  %v9334_v39 = vpop.f32.mrf.mxu1  ;;  %v13840_v61 = vpop.f32.mrf.mxu0 }
 0x66f   :  { %v13838_v43 = vadd.f32 %v9334_v39, %v13557_v20  ;;  %17733 = vst [vmem:[#allocation122_spill] sm:$0xff] %v13840_v61  ;;  %v17744_v61 = vld [vmem:[#allocation175_spill] sm:$0xff] }
 0x670   :  { %v13842_v9 = vpop.f32.mrf.mxu1  ;;  %v13844_v8 = vpop.f32.mrf.mxu0 }
 0x671   :  { %17732 = vst [vmem:[#allocation155_spill] sm:$0xff] %v13838_v43  ;;  %17734 = vst [vmem:[#allocation139_spill] sm:$0xff] %v13842_v9 }
 0x672   :  { %17735 = vst [vmem:[#allocation156_spill] sm:$0xff] %v13844_v8  ;;  %v9337_v27 = vpop.f32.mrf.mxu1  ;;  %9528 = vmatmul.mubr.bf16.gmra.mxu1 %v17736_v59  ;;  %v13851_v44 = vpop.f32.mrf.mxu0  ;;  %v4698_v59 = vadd.f32 %v13562_v12, %v13573_v40 }
 0x673   :  { %v13848_v35 = vadd.f32 %v9337_v27, %v13566_v17  ;;  %9531 = vmatprep.mubr.bf16.mxu1 %v17738_v23  ;;  %17739 = vst [vmem:[#allocation138_spill] sm:$0xff] %v13851_v44 }
 0x674   :  { %v4933_v56 = vpop.f32.mrf.mxu1  ;;  %v13856_v39 = vpop.f32.mrf.mxu0 }
 0x675   :  { %17737 = vst [vmem:[#allocation148_spill] sm:$0xff] %v13848_v35  ;;  %v13854_v20 = vadd.f32 %v4933_v56, %v13570_v4 }
 0x676   :  { %v9338_v49 = vpop.f32.mrf.mxu1  ;;  %v13863_v43 = vpop.f32.mrf.mxu0 }
 0x677   :  { %17740 = vst [vmem:[#allocation150_spill] sm:$0xff] %v13854_v20  ;;  %v13859_v31 = vadd.f32 %v9338_v49, %v13575_v53 }
 0x678   :  { %v4936_v17 = vpop.f32.mrf.mxu1  ;;  %v13867_v23 = vpop.f32.mrf.mxu0 }
 0x679   :  { %17741 = vst [vmem:[#allocation137_spill] sm:$0xff] %v13859_v31  ;;  %v13865_v27 = vadd.f32 %v4936_v17, %v4698_v59  ;;  %v17743_v17 = vld [vmem:[#allocation32_spill] sm:$0xff] }
 0x67a   :  { %v9341_v9 = vpop.f32.mrf.mxu1  ;;  %9532 = vmatmul.mubr.bf16.gmra.mxu1 %v13698_v50  ;;  %v13873_v56 = vpop.f32.mrf.mxu0  ;;  %v4702_v20 = vadd.f32 %v17744_v61, %v17743_v17  ;;  %v17749_v61 = vld [vmem:[#allocation13_spill] sm:$0xff] }
 0x67b   :  { %17742 = vst [vmem:[#allocation57_spill] sm:$0xff] %v13865_v27  ;;  %v13871_v4 = vadd.f32 %v9341_v9, %v13583_v41  ;;  %6162 = vmatprep.mubr.f32.mxu1 %v17632_v10  ;;  %v17745_v27 = vld [vmem:[#allocation59_spill] sm:$0xff]  ;;  %v4706_v17 = vadd.f32 %v17749_v61, %v17748_v19 }
 0x67c   :  { %v4949_v53 = vpop.f32.mrf.mxu1  ;;  %v9425_v40 = vpop.f32.mrf.mxu0 }
 0x67d   :  { %v13877_v12 = vadd.f32 %v4949_v53, %v13586_v2  ;;  %v17746_v2 = vld [vmem:[#allocation90_spill] sm:$0xff] }
 0x67e   :  { %v9342_v49 = vpop.f32.mrf.mxu1  ;;  %v5404_v50 = vpop.f32.mrf.mxu0 }
 0x67f   :  { %v13880_v59 = vadd.f32 %v9342_v49, %v13591_v25  ;;  %v17747_v49 = vld [vmem:[#allocation176_spill] sm:$0xff] }
 0x680   :  { %v4952_v6 = vpop.f32.mrf.mxu1  ;;  %v9426_v9 = vpop.f32.mrf.mxu0 }
 0x681   :  { %v13884_v41 = vadd.f32 %v4952_v6, %v4702_v20 }
 0x682   :  { %v9345_v44 = vpop.f32.mrf.mxu1  ;;  %v5407_v26 = vpop.f32.mrf.mxu0 }
 0x683   :  { %v5126_v10 = vadd.f32 %v9345_v44, %v17745_v27 }
 0x684   :  { %v4965_v5 = vpop.f32.mrf.mxu1  ;;  %v9429_v25 = vpop.f32.mrf.mxu0 }
 0x685   :  { %v5124_v53 = vadd.f32 %v4965_v5, %v17746_v2  ;;  %v13888_v14 = vadd.f32 %v9425_v40, %v5126_v10  ;;  %v17750_v40 = vld [vmem:[#allocation91_spill] sm:$0xff] }
 0x686   :  { %v9346_v35 = vpop.f32.mrf.mxu1  ;;  %v5420_v44 = vpop.f32.mrf.mxu0 }
 0x687   :  { %v5127_v42 = vadd.f32 %v9346_v35, %v17747_v49  ;;  %v13893_v8 = vadd.f32 %v5404_v50, %v5124_v53  ;;  %v17751_v50 = vld [vmem:[#allocation94_spill] sm:$0xff]  ;;  %v17752_v53 = vld [vmem:[#allocation177_spill] sm:$0xff] }
 0x688   :  { %v4968_v6 = vpop.f32.mrf.mxu1  ;;  %v9430_v35 = vpop.f32.mrf.mxu0  ;;  %v4710_v61 = vadd.f32 %v17752_v53, %v17751_v50  ;;  %v17760_v53 = vld [vmem:[#allocation180_spill] sm:$0xff] }
 0x689   :  { %v5125_v20 = vadd.f32 %v4968_v6, %v4706_v17  ;;  %v13895_v31 = vadd.f32 %v9426_v9, %v5127_v42 }
 0x68a   :  { %v9349_v27 = vpop.f32.mrf.mxu1 }
 0x68b   :  { %v5130_v58 = vadd.f32 %v9349_v27, %v13615_v1  ;;  %v13898_v5 = vadd.f32 %v5407_v26, %v5125_v20  ;;  %v5423_v1 = vpop.f32.mrf.mxu0 }
 0x68c   :  { %v4981_v10 = vpop.f32.mrf.mxu1 }
 0x68d   :  { %v5128_v2 = vadd.f32 %v4981_v10, %v17750_v40  ;;  %v13901_v13 = vadd.f32 %v9429_v25, %v5130_v58  ;;  %v17757_v40 = vld [vmem:[#allocation95_spill] sm:$0xff] }
 0x68e   :  { %v9350_v49 = vpop.f32.mrf.mxu1 }
 0x68f   :  { %v5131_v19 = vadd.f32 %v9350_v49, %v13623_v62  ;;  %v13906_v42 = vadd.f32 %v5420_v44, %v5128_v2  ;;  %v17756_v44 = vld [vmem:[#allocation178_spill] sm:$0xff] }
 0x690   :  { %v4984_v9 = vpop.f32.mrf.mxu1  ;;  %v4714_v2 = vadd.f32 %v17757_v40, %v17756_v44 }
 0x691   :  { %v5129_v17 = vadd.f32 %v4984_v9, %v4710_v61  ;;  %v13908_v6 = vadd.f32 %v9430_v35, %v5131_v19  ;;  %v17762_v9 = vld [vmem:[#allocation103_spill] sm:$0xff] }
 0x692   :  { %v9353_v26 = vpop.f32.mrf.mxu1 }
 0x693   :  { %v13911_v20 = vadd.f32 %v9353_v26, %v13631_v48  ;;  %v13913_v58 = vadd.f32 %v5423_v1, %v5129_v17  ;;  %v17764_v1 = vld [vmem:[#allocation179_spill] sm:$0xff] }
 0x694   :  { %v4997_v25 = vpop.f32.mrf.mxu1 }
 0x695   :  { %17753 = vst [vmem:[#allocation133_spill] sm:$0xff] %v13911_v20  ;;  %v13916_v27 = vadd.f32 %v4997_v25, %v13634_v60 }
 0x696   :  { %v9354_v62 = vpop.f32.mrf.mxu1 }
 0x697   :  { %17754 = vst [vmem:[#allocation108_spill] sm:$0xff] %v13916_v27  ;;  %v13919_v10 = vadd.f32 %v9354_v62, %v13639_v55  ;;  %v17763_v55 = vld [vmem:[#allocation97_spill] sm:$0xff] }
 0x698   :  { %v5000_v35 = vpop.f32.mrf.mxu1  ;;  %v4718_v26 = vadd.f32 %v17764_v1, %v17763_v55 }
 0x699   :  { %17755 = vst [vmem:[#allocation158_spill] sm:$0xff] %v13919_v10  ;;  %v13923_v49 = vadd.f32 %v5000_v35, %v4714_v2  ;;  %v17767_v2 = vld [vmem:[#allocation111_spill] sm:$0xff] }
 0x69a   :  { %v9357_v19 = vpop.f32.mrf.mxu1 }
 0x69b   :  { %17758 = vst [vmem:[#allocation127_spill] sm:$0xff] %v13923_v49  ;;  %v13926_v48 = vadd.f32 %v9357_v19, %v13647_v34 }
 0x69c   :  { %v5013_v50 = vpop.f32.mrf.mxu1 }
 0x69d   :  { %17759 = vst [vmem:[#allocation159_spill] sm:$0xff] %v13926_v48  ;;  %v13929_v61 = vadd.f32 %v5013_v50, %v17760_v53  ;;  %v17770_v53 = vld [vmem:[#allocation181_spill] sm:$0xff] }
 0x69e   :  { %v9358_v60 = vpop.f32.mrf.mxu1 }
 0x69f   :  { %17761 = vst [vmem:[#allocation160_spill] sm:$0xff] %v13929_v61  ;;  %v13932_v17 = vadd.f32 %v9358_v60, %v17762_v9  ;;  %v17771_v60 = vld [vmem:[#allocation98_spill] sm:$0xff]  ;;  %v5562_v61 = vadd.f32 %v13867_v23, %v13880_v59  ;;  %v5560_v23 = vadd.f32 %v13873_v56, %v13884_v41  ;;  %v17811_v59 = vld [vmem:[#allocation132_spill] sm:$0xff] }
 0x6a0   :  { %v5016_v25 = vpop.f32.mrf.mxu1  ;;  %v4722_v9 = vadd.f32 %v17771_v60, %v17770_v53  ;;  %v17812_v41 = vld [vmem:[#allocation186_spill] sm:$0xff] }
 0x6a1   :  { %v13936_v62 = vadd.f32 %v5016_v25, %v4718_v26  ;;  %v17774_v25 = vld [vmem:[#allocation107_spill] sm:$0xff] }
 0x6a2   :  { %v9361_v44 = vpop.f32.mrf.mxu1 }
 0x6a3   :  { %17765 = vst [vmem:[#allocation92_spill] sm:$0xff] %v13936_v62  ;;  %v13939_v40 = vadd.f32 %v9361_v44, %v13663_v0  ;;  %v5561_v62 = vadd.f32 %v13856_v39, %v13871_v4 }
 0x6a4   :  { %v5029_v34 = vpop.f32.mrf.mxu1 }
 0x6a5   :  { %17766 = vst [vmem:[#allocation162_spill] sm:$0xff] %v13939_v40  ;;  %v13942_v35 = vadd.f32 %v5029_v34, %v17767_v2  ;;  %v17776_v2 = vld [vmem:[#allocation112_spill] sm:$0xff] }
 0x6a6   :  { %v9362_v19 = vpop.f32.mrf.mxu1 }
 0x6a7   :  { %17768 = vst [vmem:[#allocation165_spill] sm:$0xff] %v13942_v35  ;;  %v13945_v50 = vadd.f32 %v9362_v19, %v13671_v15  ;;  %v17778_v15 = vld [vmem:[#allocation116_spill] sm:$0xff]  ;;  %v17779_v19 = vld [vmem:[#allocation182_spill] sm:$0xff] }
 0x6a8   :  { %v5032_v27 = vpop.f32.mrf.mxu1  ;;  %v4726_v40 = vadd.f32 %v17779_v19, %v17778_v15 }
 0x6a9   :  { %17769 = vst [vmem:[#allocation129_spill] sm:$0xff] %v13945_v50  ;;  %v13949_v55 = vadd.f32 %v5032_v27, %v4722_v9 }
 0x6aa   :  { %v9365_v1 = vpop.f32.mrf.mxu1 }
 0x6ab   :  { %17772 = vst [vmem:[#allocation161_spill] sm:$0xff] %v13949_v55  ;;  %v13952_v26 = vadd.f32 %v9365_v1, %v13679_v47 }
 0x6ac   :  { %v5045_v0 = vpop.f32.mrf.mxu1 }
 0x6ad   :  { %17773 = vst [vmem:[#allocation166_spill] sm:$0xff] %v13952_v26  ;;  %v13955_v44 = vadd.f32 %v5045_v0, %v17774_v25  ;;  %v17784_v25 = vld [vmem:[#allocation121_spill] sm:$0xff] }
 0x6ae   :  { %v9366_v34 = vpop.f32.mrf.mxu1 }
 0x6af   :  { %17775 = vst [vmem:[#allocation164_spill] sm:$0xff] %v13955_v44  ;;  %v13958_v35 = vadd.f32 %v9366_v34, %v17776_v2  ;;  %v4730_v34 = vadd.f32 %v17784_v25, %v13704_v28 }
 0x6b0   :  { %v5048_v50 = vpop.f32.mrf.mxu1 }
 0x6b1   :  { %17777 = vst [vmem:[#allocation167_spill] sm:$0xff] %v13958_v35  ;;  %v13962_v53 = vadd.f32 %v5048_v50, %v4726_v40 }
 0x6b2   :  { %v9369_v27 = vpop.f32.mrf.mxu1 }
 0x6b3   :  { %17780 = vst [vmem:[#allocation168_spill] sm:$0xff] %v13962_v53  ;;  %v13965_v60 = vadd.f32 %v9369_v27, %v13696_v22 }
 0x6b4   :  { %v5061_v47 = vpop.f32.mrf.mxu1 }
 0x6b5   :  { %17781 = vst [vmem:[#allocation169_spill] sm:$0xff] %v13965_v60  ;;  %v13968_v9 = vadd.f32 %v5061_v47, %v13701_v46 }
 0x6b6   :  { %v9370_v1 = vpop.f32.mrf.mxu1 }
 0x6b7   :  { %17782 = vst [vmem:[#allocation163_spill] sm:$0xff] %v13968_v9  ;;  %v13971_v0 = vadd.f32 %v9370_v1, %v13706_v16  ;;  %v17788_v16 = vld [vmem:[#allocation183_spill] sm:$0xff] }
 0x6b8   :  { %v5064_v2 = vpop.f32.mrf.mxu1  ;;  %v4734_v47 = vadd.f32 %v17788_v16, %v13720_v11 }
 0x6b9   :  { %17783 = vst [vmem:[#allocation134_spill] sm:$0xff] %v13971_v0  ;;  %v13975_v15 = vadd.f32 %v5064_v2, %v4730_v34 }
 0x6ba   :  { %v9373_v40 = vpop.f32.mrf.mxu1 }
 0x6bb   :  { %17785 = vst [vmem:[#allocation62_spill] sm:$0xff] %v13975_v15  ;;  %v13978_v50 = vadd.f32 %v9373_v40, %v13714_v52 }
 0x6bc   :  { %v5077_v22 = vpop.f32.mrf.mxu1 }
 0x6bd   :  { %17786 = vst [vmem:[#allocation170_spill] sm:$0xff] %v13978_v50  ;;  %v13981_v19 = vadd.f32 %v5077_v22, %v13717_v45 }
 0x6be   :  { %v9374_v46 = vpop.f32.mrf.mxu1 }
 0x6bf   :  { %17787 = vst [vmem:[#allocation73_spill] sm:$0xff] %v13981_v19  ;;  %v13984_v27 = vadd.f32 %v9374_v46, %v13722_v18  ;;  %v17793_v18 = vld [vmem:[#allocation117_spill] sm:$0xff] }
 0x6c0   :  { %v5080_v1 = vpop.f32.mrf.mxu1  ;;  %v5532_v22 = vadd.f32 %v17793_v18, %v13736_v30 }
 0x6c1   :  { %v13988_v28 = vadd.f32 %v5080_v1, %v4734_v47 }
 0x6c2   :  { %v9473_v25 = vpop.f32.mrf.mxu1 }
 0x6c3   :  { %17789 = vst [vmem:[#allocation141_spill] sm:$0xff] %v13988_v28  ;;  %v13991_v34 = vadd.f32 %v9473_v25, %v13730_v33 }
 0x6c4   :  { %v5709_v52 = vpop.f32.mrf.mxu1 }
 0x6c5   :  { %17790 = vst [vmem:[#allocation3_spill] sm:$0xff] %v13991_v34  ;;  %v13994_v2 = vadd.f32 %v5709_v52, %v13733_v51 }
 0x6c6   :  { %v9474_v45 = vpop.f32.mrf.mxu1 }
 0x6c7   :  { %17791 = vst [vmem:[#allocation25_spill] sm:$0xff] %v13994_v2  ;;  %v13997_v40 = vadd.f32 %v9474_v45, %v13738_v57  ;;  %v5536_v57 = vadd.f32 %v13743_v36, %v13756_v37 }
 0x6c8   :  { %v5712_v46 = vpop.f32.mrf.mxu1 }
 0x6c9   :  { %17792 = vst [vmem:[#allocation126_spill] sm:$0xff] %v13997_v40  ;;  %v14001_v11 = vadd.f32 %v5712_v46, %v5532_v22 }
 0x6ca   :  { %v9477_v16 = vpop.f32.mrf.mxu1 }
 0x6cb   :  { %17794 = vst [vmem:[#allocation85_spill] sm:$0xff] %v14001_v11  ;;  %v14004_v47 = vadd.f32 %v9477_v16, %v13748_v29 }
 0x6cc   :  { %v5725_v33 = vpop.f32.mrf.mxu1 }
 0x6cd   :  { %17795 = vst [vmem:[#allocation83_spill] sm:$0xff] %v14004_v47  ;;  %v14007_v1 = vadd.f32 %v5725_v33, %v13753_v32 }
 0x6ce   :  { %v9478_v51 = vpop.f32.mrf.mxu1 }
 0x6cf   :  { %17796 = vst [vmem:[#allocation110_spill] sm:$0xff] %v14007_v1  ;;  %v14010_v25 = vadd.f32 %v9478_v51, %v13760_v24  ;;  %v14026_v51 = vpop.f32.mrf.mxu0 }
 0x6d0   :  { %v5728_v52 = vpop.f32.mrf.mxu1  ;;  %17799 = vst [vmem:[#allocation17_spill] sm:$0xff] %v14026_v51 }
 0x6d1   :  { %17797 = vst [vmem:[#allocation21_spill] sm:$0xff] %v14010_v25  ;;  %v14014_v30 = vadd.f32 %v5728_v52, %v5536_v57  ;;  %v14032_v57 = vpop.f32.mrf.mxu0 }
 0x6d2   :  { %v14016_v45 = vpop.f32.mrf.mxu1  ;;  %17800 = vst [vmem:[#allocation171_spill] sm:$0xff] %v14032_v57 }
 0x6d3   :  { %17798 = vst [vmem:[#allocation82_spill] sm:$0xff] %v14014_v30  ;;  %v14038_v44 = vpop.f32.mrf.mxu0 }
 0x6d4   :  { %v14018_v18 = vpop.f32.mrf.mxu1  ;;  %17801 = vst [vmem:[#allocation93_spill] sm:$0xff] %v14038_v44 }
 0x6d5   :  { %v14044_v35 = vpop.f32.mrf.mxu0 }
 0x6d6   :  { %v14020_v29 = vpop.f32.mrf.mxu1  ;;  %17802 = vst [vmem:[#allocation67_spill] sm:$0xff] %v14044_v35  ;;  %v5546_v35 = vadd.f32 %v13782_v63, %v13797_v54  ;;  %v5544_v54 = vadd.f32 %v13789_v3, %v13802_v7  ;;  %v17814_v7 = vld [vmem:[#allocation137_spill] sm:$0xff] }
 0x6d7   :  { %v14048_v15 = vpop.f32.mrf.mxu0 }
 0x6d8   :  { %v14022_v22 = vpop.f32.mrf.mxu1  ;;  %17803 = vst [vmem:[#allocation124_spill] sm:$0xff] %v14048_v15 }
 0x6d9   :  { %v14052_v20 = vpop.f32.mrf.mxu0 }
 0x6da   :  { %v9485_v32 = vpop.f32.mrf.mxu1  ;;  %17804 = vst [vmem:[#allocation29_spill] sm:$0xff] %v14052_v20  ;;  %v5545_v20 = vadd.f32 %v13772_v21, %v13786_v38  ;;  %v5559_v21 = vadd.f32 %v13863_v43, %v13877_v12 }
 0x6db   :  { %v14054_v0 = vpop.f32.mrf.mxu0 }
 0x6dc   :  { %v5757_v46 = vpop.f32.mrf.mxu1  ;;  %17805 = vst [vmem:[#allocation89_spill] sm:$0xff] %v14054_v0  ;;  %v14075_v63 = vadd.f32 %v9485_v32, %v5545_v20  ;;  %v5543_v20 = vadd.f32 %v17812_v41, %v17811_v59 }
 0x6dd   :  { %v14064_v15 = vpop.f32.mrf.mxu0 }
 0x6de   :  { %v9486_v16 = vpop.f32.mrf.mxu1  ;;  %17809 = vst [vmem:[#allocation96_spill] sm:$0xff] %v14075_v63 }
 0x6df   :  { %v14068_v48 = vadd.f32 %v9486_v16, %v5546_v35  ;;  %v14088_v56 = vpop.f32.mrf.mxu0  ;;  %v17819_v35 = vld [vmem:[#allocation130_spill] sm:$0xff]  ;;  %v17821_v16 = vld [vmem:[#allocation148_spill] sm:$0xff] }
 0x6e0   :  { %v5760_v33 = vpop.f32.mrf.mxu1 }
 0x6e1   :  { %17807 = vst [vmem:[#allocation84_spill] sm:$0xff] %v14068_v48 }
 0x6e2   :  { %v14024_v24 = vpop.f32.mrf.mxu1 }
 0x6e4   :  { %v14028_v36 = vpop.f32.mrf.mxu1 }
 0x6e6   :  { %v14030_v37 = vpop.f32.mrf.mxu1 }
 0x6e8   :  { %v14034_v52 = vpop.f32.mrf.mxu1 }
 0x6ea   :  { %v14036_v55 = vpop.f32.mrf.mxu1 }
 0x6ec   :  { %v14040_v53 = vpop.f32.mrf.mxu1 }
 0x6ee   :  { %v14042_v26 = vpop.f32.mrf.mxu1 }
 0x6f0   :  { %v14046_v9 = vpop.f32.mrf.mxu1 }
 0x6f2   :  { %v9497_v49 = vpop.f32.mrf.mxu1 }
 0x6f4   :  { %v14050_v51 = vpop.f32.mrf.mxu1 }
 0x6f6   :  { %v9498_v57 = vpop.f32.mrf.mxu1 }
 0x6f8   :  { %v5808_v60 = vpop.f32.mrf.mxu1 }
 0x6fa   :  { %v9501_v10 = vpop.f32.mrf.mxu1 }
 0x6fb   :  { %v14070_v0 = vadd.f32 %v9501_v10, %v5561_v62  ;;  %v14092_v10 = vadd.f32 %v5760_v33, %v5544_v54  ;;  %v17818_v62 = vld [vmem:[#allocation135_spill] sm:$0xff]  ;;  %v17822_v33 = vld [vmem:[#allocation120_spill] sm:$0xff] }
 0x6fc   :  { %v5821_v44 = vpop.f32.mrf.mxu1 }
 0x6fd   :  { %17808 = vst [vmem:[#allocation99_spill] sm:$0xff] %v14070_v0  ;;  %17813 = vst [vmem:[#allocation101_spill] sm:$0xff] %v14092_v10  ;;  %v14097_v12 = vadd.f32 %v5821_v44, %v5559_v21  ;;  %v17825_v21 = vld [vmem:[#allocation123_spill] sm:$0xff] }
 0x6fe   :  { %v9502_v19 = vpop.f32.mrf.mxu1 }
 0x6ff   :  { %v14062_v28 = vadd.f32 %v9502_v19, %v5562_v61  ;;  %v17815_v61 = vld [vmem:[#allocation156_spill] sm:$0xff]  ;;  %17816 = vst [vmem:[#allocation106_spill] sm:$0xff] %v14097_v12  ;;  %v14105_v19 = vadd.f32 %v5757_v46, %v5543_v20 }
 0x700   :  { %v5824_v50 = vpop.f32.mrf.mxu1  ;;  %v5558_v43 = vadd.f32 %v17815_v61, %v17814_v7 }
 0x701   :  { %17806 = vst [vmem:[#allocation100_spill] sm:$0xff] %v14062_v28  ;;  %8495 = vmatprep.subr.mxu0 %v14062_v28  ;;  %v14082_v38 = vadd.f32 %v5824_v50, %v5560_v23  ;;  %v5542_v50 = vadd.f32 %v17819_v35, %v17818_v62  ;;  %17820 = vst [vmem:[#allocation114_spill] sm:$0xff] %v14105_v19  ;;  %v5557_v23 = vadd.f32 %v17822_v33, %v17821_v16  ;;  %v17832_v62 = vld [vmem:[#allocation185_spill] sm:$0xff]  ;;  %v17835_v16 = vld [vmem:[#allocation150_spill] sm:$0xff] }
 0x702   :  { %v9505_v39 = vpop.f32.mrf.mxu1  ;;  %8496 = vmatpush3.msra.mxu0 %v14068_v48  ;;  %v14110_v54 = vadd.f32 %v9498_v57, %v5558_v43  ;;  %v17828_v57 = vld [vmem:[#allocation57_spill] sm:$0xff]  ;;  %v17831_v43 = vld [vmem:[#allocation187_spill] sm:$0xff]  ;;  %v17836_v33 = vld [vmem:[#allocation122_spill] sm:$0xff] }
 0x703   :  { %17810 = vst [vmem:[#allocation105_spill] sm:$0xff] %v14082_v38  ;;  %v14085_v4 = vadd.f32 %v9505_v39, %v13888_v14  ;;  %8497 = vmatprep.subr.mxu0 %v14070_v0  ;;  %v17824_v39 = vld [vmem:[#allocation184_spill] sm:$0xff]  ;;  %v14121_v46 = vadd.f32 %v14020_v29, %v5542_v50  ;;  %v14124_v20 = vadd.f32 %v9497_v49, %v5557_v23  ;;  %v17833_v50 = vld [vmem:[#allocation174_spill] sm:$0xff]  ;;  %v17834_v49 = vld [vmem:[#allocation9_spill] sm:$0xff] }
 0x704   :  { %v5837_v3 = vpop.f32.mrf.mxu1  ;;  %8498 = vmatpush3.msra.mxu0 %v14075_v63  ;;  %17823 = vst [vmem:[#allocation109_spill] sm:$0xff] %v14110_v54  ;;  %v5541_v59 = vadd.f32 %v17825_v21, %v17824_v39  ;;  %v5540_v29 = vadd.f32 %v17832_v62, %v17831_v43  ;;  %v5555_v23 = vadd.f32 %v17836_v33, %v17835_v16  ;;  %v17839_v21 = vld [vmem:[#allocation86_spill] sm:$0xff] }
 0x705   :  { %v14100_v14 = vadd.f32 %v5837_v3, %v13893_v8  ;;  %8499 = vmatprep.subr.mxu0 %v14082_v38  ;;  %v14116_v8 = vpop.f32.mrf.mxu0  ;;  %17826 = vst [vmem:[#allocation113_spill] sm:$0xff] %v14121_v46  ;;  %17827 = vst [vmem:[#allocation115_spill] sm:$0xff] %v14124_v20  ;;  %v17829_v3 = vld [vmem:[#allocation138_spill] sm:$0xff] }
 0x706   :  { %v9506_v32 = vpop.f32.mrf.mxu1  ;;  %8500 = vmatpush3.msra.mxu0 %v14092_v10  ;;  %v5556_v7 = vadd.f32 %v17829_v3, %v17828_v57  ;;  %v14133_v61 = vadd.f32 %v14016_v45, %v5541_v59  ;;  %v17838_v45 = vld [vmem:[#allocation69_spill] sm:$0xff]  ;;  %v17840_v57 = vld [vmem:[#allocation131_spill] sm:$0xff]  ;;  %v17841_v3 = vld [vmem:[#allocation144_spill] sm:$0xff]  ;;  %v14155_v62 = vadd.f32 %v14022_v22, %v5540_v29  ;;  %v14162_v16 = vadd.f32 %v14050_v51, %v5555_v23 }
 0x707   :  { %17817 = vst [vmem:[#allocation104_spill] sm:$0xff] %v14100_v14  ;;  %v14113_v44 = vadd.f32 %v9506_v32, %v13895_v31  ;;  %8501 = vmatprep.subr.mxu0 %v14097_v12  ;;  %v4694_v32 = vadd.f32 %v17834_v49, %v17833_v50  ;;  %v4693_v59 = vadd.f32 %v17839_v21, %v17838_v45  ;;  %v17848_v29 = vld [vmem:[#allocation153_spill] sm:$0xff] }
 0x708   :  { %v5840_v41 = vpop.f32.mrf.mxu1  ;;  %8502 = vmatpush3.msra.mxu0 %v14105_v19  ;;  %17830 = vst [vmem:[#allocation119_spill] sm:$0xff] %v14133_v61  ;;  %v14142_v39 = vadd.f32 %v5808_v60, %v5556_v7  ;;  %v5539_v43 = vadd.f32 %v17841_v3, %v17840_v57  ;;  %17842 = vst [vmem:[#allocation128_spill] sm:$0xff] %v14155_v62  ;;  %v17843_v60 = vld [vmem:[#allocation139_spill] sm:$0xff]  ;;  %v17850_v57 = vld [vmem:[#allocation140_spill] sm:$0xff] }
 0x709   :  { %v14129_v31 = vadd.f32 %v5840_v41, %v13898_v5  ;;  %8503 = vmatprep.subr.mxu0 %v14110_v54  ;;  %v14150_v41 = vpop.f32.mrf.mxu0  ;;  %v5113_v7 = vadd.f32 %v17843_v60, %v4694_v32  ;;  %17846 = vst [vmem:[#allocation32_spill] sm:$0xff] %v14162_v16  ;;  %v5112_v21 = vadd.f32 %v17848_v29, %v4693_v59  ;;  %v17849_v32 = vld [vmem:[#allocation125_spill] sm:$0xff]  ;;  %v17853_v59 = vld [vmem:[#allocation151_spill] sm:$0xff] }
 0x70a   :  { %v9509_v35 = vpop.f32.mrf.mxu1  ;;  %8504 = vmatpush3.msra.mxu0 %v14121_v46  ;;  %17837 = vst [vmem:[#allocation118_spill] sm:$0xff] %v14142_v39  ;;  %v14169_v45 = vadd.f32 %v14018_v18, %v5539_v43  ;;  %v5553_v3 = vadd.f32 %v17850_v57, %v17849_v32  ;;  %v17859_v32 = vld [vmem:[#allocation88_spill] sm:$0xff]  ;;  %v17865_v54 = vld [vmem:[#allocation149_spill] sm:$0xff] }
 0x70b   :  { %v14145_v5 = vadd.f32 %v9509_v35, %v13901_v13  ;;  %8505 = vmatprep.subr.mxu0 %v14124_v20  ;;  %v17844_v13 = vld [vmem:[#allocation155_spill] sm:$0xff]  ;;  %v17845_v35 = vld [vmem:[#allocation154_spill] sm:$0xff]  ;;  %v5552_v43 = vadd.f32 %v17853_v59, %v5113_v7  ;;  %v17858_v7 = vld [vmem:[#allocation173_spill] sm:$0xff] }
 0x70c   :  { %v5853_v50 = vpop.f32.mrf.mxu1  ;;  %8506 = vmatpush3.msra.mxu0 %v14133_v61  ;;  %v5554_v49 = vadd.f32 %v17845_v35, %v17844_v13  ;;  %17847 = vst [vmem:[#allocation175_spill] sm:$0xff] %v14169_v45  ;;  %v14186_v23 = vadd.f32 %v14036_v55, %v5553_v3  ;;  %v17855_v13 = vld [vmem:[#allocation172_spill] sm:$0xff]  ;;  %v4689_v57 = vadd.f32 %v17859_v32, %v17858_v7  ;;  %v17860_v3 = vld [vmem:[#allocation146_spill] sm:$0xff]  ;;  %v17861_v59 = vld [vmem:[#allocation145_spill] sm:$0xff] }
 0x70d   :  { %v14165_v33 = vadd.f32 %v5853_v50, %v13906_v42  ;;  %8507 = vmatprep.subr.mxu0 %v14142_v39  ;;  %v14182_v42 = vpop.f32.mrf.mxu0  ;;  %v14200_v29 = vadd.f32 %v14046_v9, %v5552_v43  ;;  %v17864_v43 = vld [vmem:[#allocation157_spill] sm:$0xff]  ;;  %v17866_v20 = vld [vmem:[#allocation136_spill] sm:$0xff] }
 0x70e   :  { %v9510_v22 = vpop.f32.mrf.mxu1  ;;  %8508 = vmatpush3.msra.mxu0 %v14155_v62  ;;  %v14176_v60 = vadd.f32 %v14042_v26, %v5554_v49  ;;  %17852 = vst [vmem:[#allocation90_spill] sm:$0xff] %v14186_v23  ;;  %v17856_v49 = vld [vmem:[#allocation64_spill] sm:$0xff]  ;;  %v5549_v12 = vadd.f32 %v17866_v20, %v17865_v54  ;;  %v17874_v61 = vld [vmem:[#allocation89_spill] sm:$0xff] }
 0x70f   :  { %v14179_v51 = vadd.f32 %v9510_v22, %v13908_v6  ;;  %8509 = vmatprep.subr.mxu0 %v14162_v16  ;;  %v17854_v6 = vld [vmem:[#allocation87_spill] sm:$0xff]  ;;  %v5551_v22 = vadd.f32 %v17856_v49, %v5112_v21  ;;  %17857 = vst [vmem:[#allocation176_spill] sm:$0xff] %v14200_v29  ;;  %v14203_v55 = vpop.f32.mrf.mxu0  ;;  %v5108_v49 = vadd.f32 %v17864_v43, %v4689_v57  ;;  %v17869_v32 = vld [vmem:[#allocation152_spill] sm:$0xff] }
 0x710   :  { %17851 = vst [vmem:[#allocation59_spill] sm:$0xff] %v14176_v60  ;;  %v5856_v18 = vpop.f32.mrf.mxu1  ;;  %8510 = vmatpush3.msra.mxu0 %v14169_v45  ;;  %v4690_v35 = vadd.f32 %v17855_v13, %v17854_v6  ;;  %v17862_v6 = vld [vmem:[#allocation147_spill] sm:$0xff]  ;;  %v5578_v62 = vadd.f32 %v17874_v61, %v13932_v17  ;;  %v17879_v17 = vld [vmem:[#allocation92_spill] sm:$0xff] }
 0x711   :  { %v14190_v50 = vadd.f32 %v5856_v18, %v13913_v58  ;;  %8511 = vmatprep.subr.mxu0 %v14176_v60  ;;  %v5550_v13 = vadd.f32 %v17862_v6, %v17861_v59  ;;  %v14214_v21 = vadd.f32 %v14040_v53, %v5551_v22  ;;  %v14233_v22 = vadd.f32 %v14024_v24, %v5549_v12 }
 0x712   :  { %v14193_v26 = vpop.f32.mrf.mxu1  ;;  %8512 = vmatpush3.msra.mxu0 %v14010_v25  ;;  %v5109_v18 = vadd.f32 %v17860_v3, %v4690_v35  ;;  %v14227_v35 = vpop.f32.mrf.mxu0  ;;  %v17875_v25 = vld [vmem:[#allocation170_spill] sm:$0xff]  ;;  %v5576_v61 = vadd.f32 %v14064_v15, %v17879_v17 }
 0x713   :  { %8513 = vmatprep.subr.mxu0 %v14186_v23  ;;  %17863 = vst [vmem:[#allocation102_spill] sm:$0xff] %v14214_v21  ;;  %v14224_v7 = vadd.f32 %v14030_v37, %v5550_v13  ;;  %17868 = vst [vmem:[#allocation91_spill] sm:$0xff] %v14233_v22  ;;  %v17870_v37 = vld [vmem:[#allocation142_spill] sm:$0xff]  ;;  %v17873_v13 = vmov 1.0  }
 0x714   :  { %v14205_v58 = vpop.f32.mrf.mxu1  ;;  %8514 = vmatpush3.msra.mxu0 %v14004_v47  ;;  %v5548_v3 = vadd.f32 %v17869_v32, %v5109_v18  ;;  %v5547_v54 = vadd.f32 %v17870_v37, %v5108_v49  ;;  %v14243_v59 = vpop.f32.mrf.mxu0  ;;  %v17884_v15 = vld [vmem:[#allocation158_spill] sm:$0xff] }
 0x715   :  { %8515 = vmatprep.subr.mxu0 %v14200_v29  ;;  %17867 = vst [vmem:[#allocation13_spill] sm:$0xff] %v14224_v7 }
 0x716   :  { %v14217_v9 = vpop.f32.mrf.mxu1  ;;  %8516 = vmatpush3.msra.mxu0 %v14014_v30  ;;  %v14240_v20 = vadd.f32 %v14034_v52, %v5548_v3  ;;  %v14247_v24 = vadd.f32 %v14028_v36, %v5547_v54  ;;  %v14252_v18 = vpop.f32.mrf.mxu0  ;;  %v17876_v30 = vld [vmem:[#allocation159_spill] sm:$0xff] }
 0x717   :  { %8517 = vmatprep.subr.mxu0 %v14214_v21 }
 0x718   :  { %v14229_v53 = vpop.f32.mrf.mxu1  ;;  %8518 = vmatpush3.msra.mxu0 %v14007_v1  ;;  %17871 = vst [vmem:[#allocation94_spill] sm:$0xff] %v14240_v20  ;;  %17872 = vst [vmem:[#allocation177_spill] sm:$0xff] %v14247_v24  ;;  %v9449_v36 = vpop.f32.mrf.mxu0  ;;  %v17877_v1 = vld [vmem:[#allocation124_spill] sm:$0xff] }
 0x719   :  { %8519 = vmatprep.subr.mxu0 %v14224_v7 }
 0x71a   :  { %v9517_v57 = vpop.f32.mrf.mxu1  ;;  %8520 = vmatpush3.msra.mxu0 %v13997_v40  ;;  %v5500_v3 = vpop.f32.mrf.mxu0  ;;  %v5577_v40 = vadd.f32 %v17877_v1, %v17876_v30  ;;  %v17881_v1 = vld [vmem:[#allocation160_spill] sm:$0xff]  ;;  %v17882_v30 = vld [vmem:[#allocation29_spill] sm:$0xff] }
 0x71b   :  { %8521 = vmatprep.subr.mxu0 %v14233_v22 }
 0x71c   :  { %v5885_v6 = vpop.f32.mrf.mxu1  ;;  %8522 = vmatpush3.msra.mxu0 %v13991_v34  ;;  %v9450_v39 = vpop.f32.mrf.mxu0 }
 0x71d   :  { %8523 = vmatprep.subr.mxu0 %v14240_v20 }
 0x71e   :  { %v9518_v12 = vpop.f32.mrf.mxu1  ;;  %8524 = vmatpush3.msra.mxu0 %v14001_v11  ;;  %v5503_v60 = vpop.f32.mrf.mxu0  ;;  %v17878_v11 = vld [vmem:[#allocation141_spill] sm:$0xff] }
 0x71f   :  { %8525 = vmatprep.subr.mxu0 %v14247_v24  ;;  %v14281_v48 = vadd.f32 %v9518_v12, %v5578_v62  ;;  %v17885_v62 = vld [vmem:[#allocation93_spill] sm:$0xff] }
 0x720   :  { %v5888_v52 = vpop.f32.mrf.mxu1  ;;  %8526 = vmatpush3.msra.mxu0 %v13994_v2  ;;  %v9453_v29 = vpop.f32.mrf.mxu0  ;;  %v17888_v12 = vld [vmem:[#allocation17_spill] sm:$0xff] }
 0x721   :  { %6093 = vmatmul.mubr.f32.vlgmr.msra.gmra.mxu0 %v17873_v13  ;;  %v5593_v47 = vadd.f32 %v9453_v29, %v17875_v25  ;;  %v17880_v25 = vld [vmem:[#allocation73_spill] sm:$0xff]  ;;  %v5574_v29 = vadd.f32 %v17885_v62, %v17884_v15 }
 0x722   :  { %v14256_v43 = vpop.f32.mrf.mxu1  ;;  %6365 = vmatprep.mubr.f32.mxu0 %v17873_v13  ;;  %v5516_v22 = vpop.f32.mrf.mxu0 }
 0x724   :  { %v14259_v49 = vpop.f32.mrf.mxu1  ;;  %v9454_v24 = vpop.f32.mrf.mxu0 }
 0x725   :  { %v5594_v19 = vadd.f32 %v9454_v24, %v13984_v27  ;;  %v14287_v27 = vadd.f32 %v9517_v57, %v5577_v40  ;;  %v17883_v40 = vld [vmem:[#allocation134_spill] sm:$0xff]  ;;  %v17887_v24 = vld [vmem:[#allocation133_spill] sm:$0xff] }
 0x726   :  { %v14261_v32 = vpop.f32.mrf.mxu1  ;;  %v5519_v46 = vpop.f32.mrf.mxu0 }
 0x727   :  { %v5592_v2 = vadd.f32 %v5519_v46, %v17878_v11  ;;  %v5575_v11 = vadd.f32 %v17882_v30, %v17881_v1  ;;  %v17894_v30 = vld [vmem:[#allocation171_spill] sm:$0xff] }
 0x728   :  { %v14263_v37 = vpop.f32.mrf.mxu1 }
 0x72a   :  { %v14265_v54 = vpop.f32.mrf.mxu1 }
 0x72c   :  { %v14267_v16 = vpop.f32.mrf.mxu1 }
 0x72e   :  { %v14269_v38 = vpop.f32.mrf.mxu1 }
 0x730   :  { %v14271_v23 = vpop.f32.mrf.mxu1 }
 0x732   :  { %v9529_v21 = vpop.f32.mrf.mxu1 }
 0x734   :  { %v5933_v7 = vpop.f32.mrf.mxu1 }
 0x736   :  { %v9530_v0 = vpop.f32.mrf.mxu1 }
 0x738   :  { %v5936_v20 = vpop.f32.mrf.mxu1 }
 0x73a   :  { %v9533_v63 = vpop.f32.mrf.mxu1 }
 0x73b   :  { %v14284_v13 = vadd.f32 %v9533_v63, %v5593_v47  ;;  %v14298_v47 = vadd.f32 %v5888_v52, %v5576_v61  ;;  %v5590_v63 = vadd.f32 %v9450_v39, %v17883_v40  ;;  %v5573_v39 = vadd.f32 %v17888_v12, %v17887_v24  ;;  %v17891_v61 = vld [vmem:[#allocation67_spill] sm:$0xff]  ;;  %v17902_v24 = vld [vmem:[#allocation165_spill] sm:$0xff] }
 0x73c   :  { %v5949_v10 = vpop.f32.mrf.mxu1 }
 0x73d   :  { %v14311_v57 = vadd.f32 %v9530_v0, %v5590_v63  ;;  %v17890_v0 = vld [vmem:[#allocation127_spill] sm:$0xff] }
 0x73e   :  { %v9534_v45 = vpop.f32.mrf.mxu1 }
 0x73f   :  { %v14277_v28 = vadd.f32 %v9534_v45, %v5594_v19  ;;  %v5591_v19 = vadd.f32 %v5516_v22, %v17880_v25  ;;  %v5572_v25 = vadd.f32 %v17891_v61, %v17890_v0  ;;  %v17904_v61 = vld [vmem:[#allocation81_spill] sm:$0xff] }
 0x740   :  { %v5952_v34 = vpop.f32.mrf.mxu1 }
 0x741   :  { %8530 = vmatprep.subr.mxu1 %v14277_v28  ;;  %v14293_v45 = vadd.f32 %v5952_v34, %v5592_v2  ;;  %v14302_v46 = vadd.f32 %v5949_v10, %v5591_v19  ;;  %v14307_v34 = vadd.f32 %v5885_v6, %v5575_v11  ;;  %v17886_v2 = vld [vmem:[#allocation169_spill] sm:$0xff]  ;;  %v14317_v10 = vadd.f32 %v14217_v9, %v5574_v29  ;;  %v17889_v6 = vld [vmem:[#allocation62_spill] sm:$0xff]  ;;  %v17892_v19 = vld [vmem:[#allocation163_spill] sm:$0xff] }
 0x742   :  { %8531 = vmatpush3.msra.mxu1 %v14281_v48  ;;  %v5589_v22 = vadd.f32 %v9449_v36, %v17886_v2  ;;  %v5588_v17 = vadd.f32 %v5503_v60, %v17889_v6  ;;  %v14325_v36 = vadd.f32 %v14193_v26, %v5573_v39  ;;  %v5587_v1 = vadd.f32 %v5500_v3, %v17892_v19  ;;  %v17895_v26 = vld [vmem:[#allocation167_spill] sm:$0xff]  ;;  %v17896_v3 = vld [vmem:[#allocation166_spill] sm:$0xff]  ;;  %v17899_v29 = vld [vmem:[#allocation129_spill] sm:$0xff] }
 0x743   :  { %8532 = vmatprep.subr.mxu1 %v14284_v13  ;;  %v14337_v60 = vadd.f32 %v14229_v53, %v5572_v25  ;;  %v5586_v40 = vadd.f32 %v14243_v59, %v17895_v26  ;;  %v5585_v15 = vadd.f32 %v14203_v55, %v17896_v3  ;;  %v17897_v59 = vld [vmem:[#allocation168_spill] sm:$0xff]  ;;  %v17905_v19 = vld [vmem:[#allocation25_spill] sm:$0xff] }
 0x744   :  { %8533 = vmatpush3.msra.mxu1 %v14287_v27  ;;  %v14320_v52 = vadd.f32 %v9529_v21, %v5589_v22  ;;  %v14331_v9 = vadd.f32 %v5936_v20, %v5588_v17  ;;  %v17893_v21 = vld [vmem:[#allocation108_spill] sm:$0xff]  ;;  %v14342_v63 = vadd.f32 %v5933_v7, %v5587_v1  ;;  %v5584_v62 = vadd.f32 %v14252_v18, %v17897_v59  ;;  %v17900_v18 = vld [vmem:[#allocation162_spill] sm:$0xff] }
 0x745   :  { %8534 = vmatprep.subr.mxu1 %v14293_v45  ;;  %v5571_v11 = vadd.f32 %v17894_v30, %v17893_v21  ;;  %v14352_v53 = vadd.f32 %v14269_v38, %v5586_v40  ;;  %v14357_v7 = vadd.f32 %v14265_v54, %v5585_v15  ;;  %v5582_v54 = vadd.f32 %v14150_v41, %v17899_v29  ;;  %v17901_v41 = vld [vmem:[#allocation161_spill] sm:$0xff]  ;;  %v17911_v40 = vld [vmem:[#allocation84_spill] sm:$0xff]  ;;  %v17913_v15 = vld [vmem:[#allocation126_spill] sm:$0xff] }
 0x746   :  { %8535 = vmatpush3.msra.mxu1 %v14298_v47  ;;  %v14366_v38 = vadd.f32 %v14271_v23, %v5584_v62  ;;  %v17907_v21 = vld [vmem:[#allocation85_spill] sm:$0xff]  ;;  %v17915_v62 = vld [vmem:[#allocation110_spill] sm:$0xff] }
 0x747   :  { %8536 = vmatprep.subr.mxu1 %v14302_v46  ;;  %v14346_v20 = vadd.f32 %v14205_v58, %v5571_v11  ;;  %v17898_v58 = vld [vmem:[#allocation164_spill] sm:$0xff]  ;;  %v14380_v23 = vadd.f32 %v14261_v32, %v5582_v54  ;;  %v17909_v11 = vld [vmem:[#allocation3_spill] sm:$0xff] }
 0x748   :  { %8537 = vmatpush3.msra.mxu1 %v14307_v34  ;;  %v5583_v55 = vadd.f32 %v14227_v35, %v17898_v58  ;;  %v5581_v35 = vadd.f32 %v14088_v56, %v17900_v18  ;;  %v5579_v56 = vadd.f32 %v14116_v8, %v17902_v24  ;;  %v17919_v54 = vld [vmem:[#allocation100_spill] sm:$0xff] }
 0x749   :  { %8538 = vmatprep.subr.mxu1 %v14311_v57 }
 0x74a   :  { %8539 = vmatpush3.msra.mxu1 %v14317_v10  ;;  %v14373_v2 = vadd.f32 %v14267_v16, %v5583_v55  ;;  %v14385_v22 = vadd.f32 %v14256_v43, %v5581_v35  ;;  %v5580_v16 = vadd.f32 %v14182_v42, %v17901_v41  ;;  %v14399_v43 = vadd.f32 %v14259_v49, %v5579_v56  ;;  %v17917_v55 = vld [vmem:[#allocation82_spill] sm:$0xff]  ;;  %v17921_v35 = vld [vmem:[#allocation83_spill] sm:$0xff] }
 0x74b   :  { %8540 = vmatprep.subr.mxu1 %v14320_v52  ;;  %v17903_v42 = vmov 1.0   ;;  %v17925_v56 = vld [vmem:[#allocation175_spill] sm:$0xff] }
 0x74c   :  { %8541 = vmatpush3.msra.mxu1 %v14325_v36  ;;  %v14394_v32 = vadd.f32 %v14263_v37, %v5580_v16  ;;  %v17923_v16 = vld [vmem:[#allocation21_spill] sm:$0xff] }
 0x74d   :  { %8542 = vmatprep.subr.mxu1 %v14331_v9 }
 0x74e   :  { %8543 = vmatpush3.msra.mxu1 %v14337_v60 }
 0x74f   :  { %8544 = vmatprep.subr.mxu1 %v14342_v63 }
 0x750   :  { %8545 = vmatpush3.msra.mxu1 %v14346_v20 }
 0x751   :  { %8546 = vmatprep.subr.mxu1 %v14352_v53 }
 0x752   :  { %8547 = vmatpush3.msra.mxu1 %v14179_v51 }
 0x753   :  { %8548 = vmatprep.subr.mxu1 %v14357_v7 }
 0x754   :  { %8549 = vmatpush3.msra.mxu1 %v14145_v5 }
 0x755   :  { %8550 = vmatprep.subr.mxu1 %v14366_v38 }
 0x756   :  { %8551 = vmatpush3.msra.mxu1 %v14190_v50 }
 0x757   :  { %8552 = vmatprep.subr.mxu1 %v14373_v2 }
 0x758   :  { %8553 = vmatpush3.msra.mxu1 %v14165_v33 }
 0x759   :  { %8554 = vmatprep.subr.mxu1 %v14380_v23 }
 0x75a   :  { %8555 = vmatpush3.msra.mxu1 %v14113_v44 }
 0x75b   :  { %8556 = vmatprep.subr.mxu1 %v14385_v22 }
 0x75c   :  { %8557 = vmatpush3.msra.mxu1 %v14085_v4 }
 0x75d   :  { %8558 = vmatprep.subr.mxu1 %v14394_v32 }
 0x75e   :  { %8559 = vmatpush3.msra.mxu1 %v14129_v31 }
 0x75f   :  { %8560 = vmatprep.subr.mxu1 %v14399_v43 }
 0x760   :  { %8561 = vmatpush3.msra.mxu1 %v14100_v14 }
 0x761   :  { %6163 = vmatmul.mubr.f32.vlgmr.msra.gmra.mxu1 %v17903_v42 }
 0x762   :  { %6435 = vmatprep.mubr.f32.mxu1 %v17903_v42 }
 0x7e1   :  { %v8527_v37 = vpop.f32.mrf.mxu0 }
 0x7e3   :  { %v8528_v39 = vpop.f32.mrf.mxu0 }
 0x7e4   :  { %v8529_v17 = vadd.f32 %v8528_v39, %v8527_v37  ;;  %v17927_v37 = vld [vmem:[#allocation128_spill] sm:$0xff]  ;;  %v17929_v39 = vld [vmem:[#allocation119_spill] sm:$0xff] }
 0x821   :  { %v8562_v8 = vpop.f32.mrf.mxu1 }
 0x823   :  { %v8563_v12 = vpop.f32.mrf.mxu1 }
 0x824   :  { %v8564_v6 = vadd.f32 %v8563_v12, %v8562_v8 }
 0x826   :  { %v6165_v49 = vadd.f32 %v8564_v6, %v8529_v17  ;;  %v17931_v17 = vld [vmem:[#allocation113_spill] sm:$0xff] }
 0x828   :  { %v6168_v0 = vmul.f32 0.001953125, %v6165_v49 }
 0x82a   :  { %v14408_v25 = vrot.slane %v6168_v0, %v17904_v61  ;;  %v17933_v0 = vld [vmem:[#allocation114_spill] sm:$0xff] }
 0x82c   :  { %v14412_v1 = vsub.f32 %v17905_v19, %v14408_v25  ;;  %v14416_v30 = vsub.f32 %v17907_v21, %v14408_v25  ;;  %v14420_v26 = vsub.f32 %v17909_v11, %v14408_v25  ;;  %v14424_v3 = vsub.f32 %v17911_v40, %v14408_v25  ;;  %v17935_v21 = vld [vmem:[#allocation101_spill] sm:$0xff]  ;;  %v17937_v40 = vld [vmem:[#allocation96_spill] sm:$0xff] }
 0x82d   :  { %v14428_v59 = vsub.f32 %v17913_v15, %v14408_v25  ;;  %v14432_v58 = vsub.f32 %v17915_v62, %v14408_v25  ;;  %v14436_v29 = vsub.f32 %v17917_v55, %v14408_v25  ;;  %v14440_v18 = vsub.f32 %v17919_v54, %v14408_v25  ;;  %v17939_v62 = vld [vmem:[#allocation177_spill] sm:$0xff]  ;;  %v17941_v54 = vld [vmem:[#allocation94_spill] sm:$0xff] }
 0x82e   :  { %17906 = vst [vmem:[#allocation178_spill] sm:$0xff] %v14412_v1  ;;  %17908 = vst [vmem:[#allocation95_spill] sm:$0xff] %v14416_v30  ;;  %v14444_v41 = vsub.f32 %v17921_v35, %v14408_v25  ;;  %v14448_v24 = vsub.f32 %v17923_v16, %v14408_v25  ;;  %v14452_v8 = vsub.f32 %v17925_v56, %v14408_v25  ;;  %v17943_v56 = vld [vmem:[#allocation99_spill] sm:$0xff]  ;;  %v17957_v1 = vld [vmem:[#allocation105_spill] sm:$0xff] }
 0x82f   :  { %17910 = vst [vmem:[#allocation180_spill] sm:$0xff] %v14420_v26  ;;  %17912 = vst [vmem:[#allocation103_spill] sm:$0xff] %v14424_v3  ;;  %v14456_v12 = vsub.f32 %v17927_v37, %v14408_v25  ;;  %v14460_v6 = vsub.f32 %v17929_v39, %v14408_v25  ;;  %v14464_v49 = vsub.f32 %v17931_v17, %v14408_v25 }
 0x830   :  { %17914 = vst [vmem:[#allocation97_spill] sm:$0xff] %v14428_v59  ;;  %17916 = vst [vmem:[#allocation179_spill] sm:$0xff] %v14432_v58  ;;  %v14468_v19 = vsub.f32 %v17933_v0, %v14408_v25  ;;  %v14472_v11 = vsub.f32 %v17935_v21, %v14408_v25  ;;  %v14476_v15 = vsub.f32 %v17937_v40, %v14408_v25  ;;  %v17947_v21 = vld [vmem:[#allocation91_spill] sm:$0xff] }
 0x831   :  { %17918 = vst [vmem:[#allocation111_spill] sm:$0xff] %v14436_v29  ;;  %17920 = vst [vmem:[#allocation181_spill] sm:$0xff] %v14440_v18  ;;  %v14480_v55 = vsub.f32 %v17939_v62, %v14408_v25  ;;  %v14484_v35 = vsub.f32 %v17941_v54, %v14408_v25  ;;  %v6252_v16 = vmul.f32 %v14424_v3, %v14424_v3  ;;  %v17949_v62 = vld [vmem:[#allocation13_spill] sm:$0xff] }
 0x832   :  { %17922 = vst [vmem:[#allocation98_spill] sm:$0xff] %v14444_v41  ;;  %17924 = vst [vmem:[#allocation107_spill] sm:$0xff] %v14448_v24  ;;  %v14490_v37 = vsub.f32 %v17943_v56, %v14408_v25  ;;  %v14494_v39 = vsub.f32 %v14281_v48, %v14408_v25  ;;  %v14498_v17 = vsub.f32 %v14277_v28, %v14408_v25  ;;  %v17951_v56 = vld [vmem:[#allocation102_spill] sm:$0xff]  ;;  %v17953_v48 = vld [vmem:[#allocation176_spill] sm:$0xff] }
 0x833   :  { %17926 = vst [vmem:[#allocation112_spill] sm:$0xff] %v14452_v8  ;;  %17928 = vst [vmem:[#allocation116_spill] sm:$0xff] %v14456_v12  ;;  %v6268_v0 = vmul.f32 %v14440_v18, %v14440_v18  ;;  %v14504_v40 = vsub.f32 %v17947_v21, %v14408_v25  ;;  %v14508_v54 = vsub.f32 %v17949_v62, %v14408_v25  ;;  %v17955_v28 = vld [vmem:[#allocation90_spill] sm:$0xff]  ;;  %v17956_v18 = vld [vmem:[#allocation59_spill] sm:$0xff] }
 0x834   :  { %17930 = vst [vmem:[#allocation182_spill] sm:$0xff] %v14460_v6  ;;  %17932 = vst [vmem:[#allocation121_spill] sm:$0xff] %v14464_v49  ;;  %v14512_v3 = vsub.f32 %v17951_v56, %v14408_v25  ;;  %v14516_v61 = vsub.f32 %v17953_v48, %v14408_v25  ;;  %v14520_v42 = vsub.f32 %v17955_v28, %v14408_v25  ;;  %v17958_v48 = vld [vmem:[#allocation32_spill] sm:$0xff]  ;;  %v17959_v28 = vld [vmem:[#allocation118_spill] sm:$0xff] }
 0x835   :  { %17934 = vst [vmem:[#allocation183_spill] sm:$0xff] %v14468_v19  ;;  %17936 = vst [vmem:[#allocation117_spill] sm:$0xff] %v14472_v11  ;;  %v14524_v21 = vsub.f32 %v17956_v18, %v14408_v25  ;;  %v14528_v62 = vsub.f32 %v17957_v1, %v14408_v25  ;;  %v14532_v56 = vsub.f32 %v14284_v13, %v14408_v25  ;;  %8565 = vmatprep.subr.mxu0 %v6268_v0  ;;  %v17960_v18 = vld [vmem:[#allocation106_spill] sm:$0xff] }
 0x836   :  { %17938 = vst [vmem:[#allocation132_spill] sm:$0xff] %v14476_v15  ;;  %17940 = vst [vmem:[#allocation186_spill] sm:$0xff] %v14480_v55  ;;  %v14536_v55 = vsub.f32 %v17958_v48, %v14408_v25  ;;  %v14540_v30 = vsub.f32 %v17959_v28, %v14408_v25  ;;  %v14544_v14 = vsub.f32 %v17960_v18, %v14408_v25  ;;  %8566 = vmatpush3.msra.mxu0 %v6252_v16  ;;  %v17961_v18 = vld [vmem:[#allocation115_spill] sm:$0xff] }
 0x837   :  { %17942 = vst [vmem:[#allocation137_spill] sm:$0xff] %v14484_v35  ;;  %17944 = vst [vmem:[#allocation156_spill] sm:$0xff] %v14490_v37  ;;  %v14548_v1 = vsub.f32 %v14287_v27, %v14408_v25  ;;  %v14552_v13 = vsub.f32 %v14293_v45, %v14408_v25  ;;  %v6284_v0 = vmul.f32 %v14494_v39, %v14494_v39  ;;  %v17962_v27 = vld [vmem:[#allocation109_spill] sm:$0xff] }
 0x838   :  { %17945 = vst [vmem:[#allocation135_spill] sm:$0xff] %v14494_v39  ;;  %17946 = vst [vmem:[#allocation130_spill] sm:$0xff] %v14498_v17  ;;  %v6300_v48 = vmul.f32 %v14498_v17, %v14498_v17  ;;  %v6267_v28 = vmul.f32 %v14490_v37, %v14490_v37  ;;  %v14562_v35 = vsub.f32 %v17961_v18, %v14408_v25 }
 0x839   :  { %17948 = vst [vmem:[#allocation148_spill] sm:$0xff] %v14504_v40  ;;  %17950 = vst [vmem:[#allocation120_spill] sm:$0xff] %v14508_v54  ;;  %v14566_v16 = vsub.f32 %v17962_v27, %v14408_v25  ;;  %v14570_v45 = vsub.f32 %v14298_v47, %v14408_v25  ;;  %v6251_v39 = vmul.f32 %v14476_v15, %v14476_v15 }
 0x83a   :  { %17952 = vst [vmem:[#allocation184_spill] sm:$0xff] %v14512_v3  ;;  %17954 = vst [vmem:[#allocation123_spill] sm:$0xff] %v14516_v61  ;;  %v14576_v17 = vsub.f32 %v14302_v46, %v14408_v25  ;;  %8600 = vmatprep.subr.mxu1 %v6300_v48  ;;  %8567 = vmatprep.subr.mxu0 %v6267_v28  ;;  %v6299_v18 = vmul.f32 %v14532_v56, %v14532_v56 }
 0x83b   :  { %v6266_v27 = vmul.f32 %v14528_v62, %v14528_v62  ;;  %v14584_v37 = vsub.f32 %v14307_v34, %v14408_v25  ;;  %v6250_v47 = vmul.f32 %v14472_v11, %v14472_v11  ;;  %v6283_v15 = vmul.f32 %v14548_v1, %v14548_v1  ;;  %8601 = vmatpush3.msra.mxu1 %v6284_v0  ;;  %v17980_v11 = vld [vmem:[#allocation143_spill] sm:$0xff] }
 0x83c   :  { %8568 = vmatpush3.msra.mxu0 %v6251_v39  ;;  %v14592_v46 = vsub.f32 %v14311_v57, %v14408_v25  ;;  %8602 = vmatprep.subr.mxu1 %v6299_v18  ;;  %v6298_v48 = vmul.f32 %v14552_v13, %v14552_v13  ;;  %v6265_v34 = vmul.f32 %v14544_v14, %v14544_v14 }
 0x83d   :  { %8569 = vmatprep.subr.mxu0 %v6266_v27  ;;  %v14600_v28 = vsub.f32 %v14317_v10, %v14408_v25  ;;  %v6249_v0 = vmul.f32 %v14468_v19, %v14468_v19  ;;  %v6282_v39 = vmul.f32 %v14570_v45, %v14570_v45  ;;  %8603 = vmatpush3.msra.mxu1 %v6283_v15  ;;  %v17981_v19 = vld [vmem:[#allocation51_spill] sm:$0xff] }
 0x83e   :  { %8570 = vmatpush3.msra.mxu0 %v6250_v47  ;;  %v14608_v57 = vsub.f32 %v14320_v52, %v14408_v25  ;;  %8604 = vmatprep.subr.mxu1 %v6298_v48  ;;  %v6297_v18 = vmul.f32 %v14576_v17, %v14576_v17  ;;  %v6264_v10 = vmul.f32 %v14566_v16, %v14566_v16 }
 0x83f   :  { %8571 = vmatprep.subr.mxu0 %v6265_v34  ;;  %v14616_v27 = vsub.f32 %v14325_v36, %v14408_v25  ;;  %v6248_v15 = vmul.f32 %v14464_v49, %v14464_v49  ;;  %v6281_v47 = vmul.f32 %v14584_v37, %v14584_v37  ;;  %8605 = vmatpush3.msra.mxu1 %v6282_v39  ;;  %v17982_v49 = vld [vmem:[#allocation61_spill] sm:$0xff] }
 0x840   :  { %8572 = vmatpush3.msra.mxu0 %v6249_v0  ;;  %v14624_v52 = vsub.f32 %v14331_v9, %v14408_v25  ;;  %8606 = vmatprep.subr.mxu1 %v6297_v18  ;;  %v6296_v48 = vmul.f32 %v14592_v46, %v14592_v46  ;;  %v6263_v36 = vmul.f32 %v14562_v35, %v14562_v35 }
 0x841   :  { %8573 = vmatprep.subr.mxu0 %v6264_v10  ;;  %v14632_v34 = vsub.f32 %v14337_v60, %v14408_v25  ;;  %v6247_v39 = vmul.f32 %v14460_v6, %v14460_v6  ;;  %v6280_v0 = vmul.f32 %v14600_v28, %v14600_v28  ;;  %8607 = vmatpush3.msra.mxu1 %v6281_v47  ;;  %v17983_v6 = vld [vmem:[#allocation24_spill] sm:$0xff] }
 0x842   :  { %8574 = vmatpush3.msra.mxu0 %v6248_v15  ;;  %v14640_v9 = vsub.f32 %v14342_v63, %v14408_v25  ;;  %8608 = vmatprep.subr.mxu1 %v6296_v48  ;;  %v6295_v18 = vmul.f32 %v14608_v57, %v14608_v57  ;;  %v6262_v60 = vmul.f32 %v14540_v30, %v14540_v30 }
 0x843   :  { %8575 = vmatprep.subr.mxu0 %v6263_v36  ;;  %v14648_v10 = vsub.f32 %v14346_v20, %v14408_v25  ;;  %v6246_v47 = vmul.f32 %v14456_v12, %v14456_v12  ;;  %v6279_v15 = vmul.f32 %v14616_v27, %v14616_v27  ;;  %8609 = vmatpush3.msra.mxu1 %v6280_v0  ;;  %v17984_v12 = vld [vmem:[#allocation79_spill] sm:$0xff] }
 0x844   :  { %8576 = vmatpush3.msra.mxu0 %v6247_v39  ;;  %v14656_v63 = vsub.f32 %v14352_v53, %v14408_v25  ;;  %8610 = vmatprep.subr.mxu1 %v6295_v18  ;;  %v6294_v48 = vmul.f32 %v14624_v52, %v14624_v52  ;;  %v6261_v20 = vmul.f32 %v14536_v55, %v14536_v55 }
 0x845   :  { %8577 = vmatprep.subr.mxu0 %v6262_v60  ;;  %v14664_v36 = vsub.f32 %v14179_v51, %v14408_v25  ;;  %v6245_v0 = vmul.f32 %v14452_v8, %v14452_v8  ;;  %v6278_v39 = vmul.f32 %v14632_v34, %v14632_v34  ;;  %8611 = vmatpush3.msra.mxu1 %v6279_v15  ;;  %v17985_v8 = vld [vmem:[#allocation49_spill] sm:$0xff] }
 0x846   :  { %8578 = vmatpush3.msra.mxu0 %v6246_v47  ;;  %v14672_v53 = vsub.f32 %v14357_v7, %v14408_v25  ;;  %8612 = vmatprep.subr.mxu1 %v6294_v48  ;;  %v6293_v18 = vmul.f32 %v14640_v9, %v14640_v9  ;;  %v6260_v51 = vmul.f32 %v14524_v21, %v14524_v21 }
 0x847   :  { %8579 = vmatprep.subr.mxu0 %v6261_v20  ;;  %v14680_v60 = vsub.f32 %v14145_v5, %v14408_v25  ;;  %v6244_v15 = vmul.f32 %v14448_v24, %v14448_v24  ;;  %v6277_v47 = vmul.f32 %v14648_v10, %v14648_v10  ;;  %8613 = vmatpush3.msra.mxu1 %v6278_v39  ;;  %v17986_v24 = vld [vmem:[#allocation56_spill] sm:$0xff] }
 0x848   :  { %8580 = vmatpush3.msra.mxu0 %v6245_v0  ;;  %v14688_v7 = vsub.f32 %v14366_v38, %v14408_v25  ;;  %8614 = vmatprep.subr.mxu1 %v6293_v18  ;;  %v6292_v48 = vmul.f32 %v14656_v63, %v14656_v63  ;;  %v6259_v5 = vmul.f32 %v14520_v42, %v14520_v42 }
 0x849   :  { %8581 = vmatprep.subr.mxu0 %v6260_v51  ;;  %v14696_v20 = vsub.f32 %v14190_v50, %v14408_v25  ;;  %v6243_v39 = vmul.f32 %v14444_v41, %v14444_v41  ;;  %v6276_v0 = vmul.f32 %v14664_v36, %v14664_v36  ;;  %8615 = vmatpush3.msra.mxu1 %v6277_v47  ;;  %v17987_v41 = vld [vmem:[#allocation22_spill] sm:$0xff] }
 0x84a   :  { %8582 = vmatpush3.msra.mxu0 %v6244_v15  ;;  %v14704_v38 = vsub.f32 %v14373_v2, %v14408_v25  ;;  %8616 = vmatprep.subr.mxu1 %v6292_v48  ;;  %v6291_v18 = vmul.f32 %v14672_v53, %v14672_v53  ;;  %v6258_v50 = vmul.f32 %v14516_v61, %v14516_v61  ;;  %v17964_v61 = vld [vmem:[#allocation104_spill] sm:$0xff] }
 0x84b   :  { %8583 = vmatprep.subr.mxu0 %v6259_v5  ;;  %v14712_v51 = vsub.f32 %v14165_v33, %v14408_v25  ;;  %v6242_v47 = vmul.f32 %v14436_v29, %v14436_v29  ;;  %v6275_v15 = vmul.f32 %v14680_v60, %v14680_v60  ;;  %8617 = vmatpush3.msra.mxu1 %v6276_v0  ;;  %v17988_v29 = vld [vmem:[#allocation78_spill] sm:$0xff] }
 0x84c   :  { %8584 = vmatpush3.msra.mxu0 %v6243_v39  ;;  %v14720_v2 = vsub.f32 %v14380_v23, %v14408_v25  ;;  %8618 = vmatprep.subr.mxu1 %v6291_v18  ;;  %v6290_v48 = vmul.f32 %v14688_v7, %v14688_v7  ;;  %v6257_v33 = vmul.f32 %v14512_v3, %v14512_v3 }
 0x84d   :  { %8585 = vmatprep.subr.mxu0 %v6258_v50  ;;  %v14728_v5 = vsub.f32 %v14113_v44, %v14408_v25  ;;  %v6241_v0 = vmul.f32 %v14432_v58, %v14432_v58  ;;  %v6274_v39 = vmul.f32 %v14696_v20, %v14696_v20  ;;  %8619 = vmatpush3.msra.mxu1 %v6275_v15  ;;  %v17989_v58 = vld [vmem:[#allocation48_spill] sm:$0xff] }
 0x84e   :  { %8586 = vmatpush3.msra.mxu0 %v6242_v47  ;;  %v14736_v23 = vsub.f32 %v14385_v22, %v14408_v25  ;;  %8620 = vmatprep.subr.mxu1 %v6290_v48  ;;  %v6289_v18 = vmul.f32 %v14704_v38, %v14704_v38  ;;  %v6256_v44 = vmul.f32 %v14508_v54, %v14508_v54  ;;  %v17965_v54 = vld [vmem:[#allocation95_spill] sm:$0xff] }
 0x84f   :  { %8587 = vmatprep.subr.mxu0 %v6257_v33  ;;  %v14744_v50 = vsub.f32 %v14085_v4, %v14408_v25  ;;  %v6240_v15 = vmul.f32 %v14428_v59, %v14428_v59  ;;  %v6273_v47 = vmul.f32 %v14712_v51, %v14712_v51  ;;  %8621 = vmatpush3.msra.mxu1 %v6274_v39  ;;  %v17990_v59 = vld [vmem:[#allocation53_spill] sm:$0xff] }
 0x850   :  { %8588 = vmatpush3.msra.mxu0 %v6241_v0  ;;  %v14752_v22 = vsub.f32 %v14394_v32, %v14408_v25  ;;  %8622 = vmatprep.subr.mxu1 %v6289_v18  ;;  %v6288_v48 = vmul.f32 %v14720_v2, %v14720_v2  ;;  %v6255_v4 = vmul.f32 %v14504_v40, %v14504_v40  ;;  %v17967_v40 = vld [vmem:[#allocation178_spill] sm:$0xff] }
 0x851   :  { %8589 = vmatprep.subr.mxu0 %v6256_v44  ;;  %v14760_v33 = vsub.f32 %v14129_v31, %v14408_v25  ;;  %v6239_v39 = vmul.f32 %v14420_v26, %v14420_v26  ;;  %v6272_v0 = vmul.f32 %v14728_v5, %v14728_v5  ;;  %8623 = vmatpush3.msra.mxu1 %v6273_v47  ;;  %v17963_v44 = vld [vmem:[#allocation137_spill] sm:$0xff]  ;;  %v17991_v26 = vld [vmem:[#allocation20_spill] sm:$0xff] }
 0x852   :  { %8590 = vmatpush3.msra.mxu0 %v6240_v15  ;;  %v14768_v32 = vsub.f32 %v14399_v43, %v14408_v25  ;;  %8624 = vmatprep.subr.mxu1 %v6288_v48  ;;  %v6287_v18 = vmul.f32 %v14736_v23, %v14736_v23  ;;  %v6254_v31 = vmul.f32 %v17963_v44, %v17963_v44  ;;  %v17966_v48 = vld [vmem:[#allocation186_spill] sm:$0xff]  ;;  %v17974_v44 = vld [vmem:[#allocation71_spill] sm:$0xff] }
 0x853   :  { %8591 = vmatprep.subr.mxu0 %v6255_v4  ;;  %v14776_v3 = vsub.f32 %v17964_v61, %v14408_v25  ;;  %v6238_v47 = vmul.f32 %v17965_v54, %v17965_v54  ;;  %v6271_v15 = vmul.f32 %v14744_v50, %v14744_v50  ;;  %8625 = vmatpush3.msra.mxu1 %v6272_v0 }
 0x854   :  { %8592 = vmatpush3.msra.mxu0 %v6239_v39  ;;  %8626 = vmatprep.subr.mxu1 %v6287_v18  ;;  %v6286_v43 = vmul.f32 %v14752_v22, %v14752_v22  ;;  %v6253_v4 = vmul.f32 %v17966_v48, %v17966_v48  ;;  %v6237_v61 = vmul.f32 %v17967_v40, %v17967_v40  ;;  %v17968_v18 = vmov 1.0   ;;  %v17979_v48 = vld [vmem:[#allocation26_spill] sm:$0xff] }
 0x855   :  { %8593 = vmatprep.subr.mxu0 %v6254_v31  ;;  %v6270_v25 = vmul.f32 %v14760_v33, %v14760_v33  ;;  %8627 = vmatpush3.msra.mxu1 %v6271_v15  ;;  %v6285_v39 = vmul.f32 %v14768_v32, %v14768_v32  ;;  %v6269_v0 = vmul.f32 %v14776_v3, %v14776_v3  ;;  %v17969_v31 = vld [vmem:[#allocation55_spill] sm:$0xff]  ;;  %v17970_v15 = vld [vmem:[#allocation80_spill] sm:$0xff] }
 0x856   :  { %8594 = vmatpush3.msra.mxu0 %v6238_v47  ;;  %8628 = vmatprep.subr.mxu1 %v6286_v43  ;;  %v17971_v47 = vld [vmem:[#allocation30_spill] sm:$0xff]  ;;  %v17972_v43 = vld [vmem:[#allocation15_spill] sm:$0xff] }
 0x857   :  { %8595 = vmatprep.subr.mxu0 %v6253_v4  ;;  %8629 = vmatpush3.msra.mxu1 %v6270_v25  ;;  %v17973_v4 = vld [vmem:[#allocation54_spill] sm:$0xff]  ;;  %v17975_v25 = vld [vmem:[#allocation28_spill] sm:$0xff] }
 0x858   :  { %8596 = vmatpush3.msra.mxu0 %v6237_v61  ;;  %8630 = vmatprep.subr.mxu1 %v6285_v39  ;;  %v17976_v61 = vld [vmem:[#allocation11_spill] sm:$0xff]  ;;  %v17977_v39 = vld [vmem:[#allocation52_spill] sm:$0xff] }
 0x859   :  { %6366 = vmatmul.mubr.f32.vlgmr.msra.gmra.mxu0 %v17968_v18  ;;  %8631 = vmatpush3.msra.mxu1 %v6269_v0  ;;  %v17978_v0 = vld [vmem:[#allocation66_spill] sm:$0xff] }
 0x85a   :  { %8635 = vmatprep.subr.mxu0 %v17969_v31  ;;  %6436 = vmatmul.mubr.f32.vlgmr.msra.gmra.mxu1 %v17968_v18  ;;  %v18004_v31 = vld [vmem:[#allocation74_spill] sm:$0xff] }
 0x85b   :  { %8670 = vmatprep.subr.mxu1 %v17970_v15  ;;  %8636 = vmatpush3.msra.mxu0 %v17971_v47  ;;  %v17992_v15 = vld [vmem:[#allocation77_spill] sm:$0xff]  ;;  %v18030_v47 = vld [vmem:[#allocation19_spill] sm:$0xff] }
 0x85c   :  { %8671 = vmatpush3.msra.mxu1 %v17972_v43  ;;  %8637 = vmatprep.subr.mxu0 %v17973_v4  ;;  %v17996_v43 = vld [vmem:[#allocation76_spill] sm:$0xff]  ;;  %v18006_v4 = vld [vmem:[#allocation41_spill] sm:$0xff] }
 0x85d   :  { %8672 = vmatprep.subr.mxu1 %v17974_v44  ;;  %8638 = vmatpush3.msra.mxu0 %v17975_v25  ;;  %v17993_v44 = vld [vmem:[#allocation46_spill] sm:$0xff] }
 0x85e   :  { %8673 = vmatpush3.msra.mxu1 %v17976_v61  ;;  %8639 = vmatprep.subr.mxu0 %v17977_v39  ;;  %v17998_v61 = vld [vmem:[#allocation47_spill] sm:$0xff]  ;;  %v18008_v39 = vld [vmem:[#allocation72_spill] sm:$0xff] }
 0x85f   :  { %8674 = vmatprep.subr.mxu1 %v17978_v0  ;;  %8640 = vmatpush3.msra.mxu0 %v17979_v48  ;;  %v17994_v0 = vld [vmem:[#allocation50_spill] sm:$0xff] }
 0x860   :  { %8675 = vmatpush3.msra.mxu1 %v17980_v11  ;;  %8641 = vmatprep.subr.mxu0 %v17981_v19  ;;  %v17999_v11 = vld [vmem:[#allocation16_spill] sm:$0xff]  ;;  %v18010_v19 = vld [vmem:[#allocation38_spill] sm:$0xff] }
 0x861   :  { %8676 = vmatprep.subr.mxu1 %v17982_v49  ;;  %8642 = vmatpush3.msra.mxu0 %v17983_v6  ;;  %v17995_v49 = vld [vmem:[#allocation18_spill] sm:$0xff]  ;;  %v18033_v6 = vld [vmem:[#allocation81_spill] sm:$0xff] }
 0x862   :  { %8677 = vmatpush3.msra.mxu1 %v17984_v12  ;;  %8643 = vmatprep.subr.mxu0 %v17985_v8  ;;  %v18000_v12 = vld [vmem:[#allocation75_spill] sm:$0xff]  ;;  %v18012_v8 = vld [vmem:[#allocation70_spill] sm:$0xff] }
 0x863   :  { %8678 = vmatprep.subr.mxu1 %v17986_v24  ;;  %8644 = vmatpush3.msra.mxu0 %v17987_v41  ;;  %v17997_v24 = vld [vmem:[#allocation45_spill] sm:$0xff] }
 0x864   :  { %8679 = vmatpush3.msra.mxu1 %v17988_v29  ;;  %8645 = vmatprep.subr.mxu0 %v17989_v58  ;;  %v18002_v29 = vld [vmem:[#allocation44_spill] sm:$0xff]  ;;  %v18014_v58 = vld [vmem:[#allocation35_spill] sm:$0xff] }
 0x865   :  { %8680 = vmatprep.subr.mxu1 %v17990_v59  ;;  %8646 = vmatpush3.msra.mxu0 %v17991_v26  ;;  %v18001_v59 = vld [vmem:[#allocation43_spill] sm:$0xff] }
 0x866   :  { %8681 = vmatpush3.msra.mxu1 %v17992_v15  ;;  %8647 = vmatprep.subr.mxu0 %v17993_v44  ;;  %v18003_v15 = vld [vmem:[#allocation14_spill] sm:$0xff]  ;;  %v18016_v44 = vld [vmem:[#allocation68_spill] sm:$0xff] }
 0x867   :  { %8682 = vmatprep.subr.mxu1 %v17994_v0  ;;  %8648 = vmatpush3.msra.mxu0 %v17995_v49  ;;  %v18005_v0 = vld [vmem:[#allocation42_spill] sm:$0xff] }
 0x868   :  { %8683 = vmatpush3.msra.mxu1 %v17996_v43  ;;  %8649 = vmatprep.subr.mxu0 %v17997_v24  ;;  %v18007_v43 = vld [vmem:[#allocation12_spill] sm:$0xff]  ;;  %v18018_v24 = vld [vmem:[#allocation31_spill] sm:$0xff] }
 0x869   :  { %8684 = vmatprep.subr.mxu1 %v17998_v61  ;;  %8650 = vmatpush3.msra.mxu0 %v17999_v11  ;;  %v18009_v61 = vld [vmem:[#allocation40_spill] sm:$0xff] }
 0x86a   :  { %8685 = vmatpush3.msra.mxu1 %v18000_v12  ;;  %8651 = vmatprep.subr.mxu0 %v18001_v59  ;;  %v18011_v12 = vld [vmem:[#allocation10_spill] sm:$0xff]  ;;  %v18020_v59 = vld [vmem:[#allocation65_spill] sm:$0xff] }
 0x86b   :  { %8686 = vmatprep.subr.mxu1 %v18002_v29  ;;  %8652 = vmatpush3.msra.mxu0 %v18003_v15  ;;  %v18013_v29 = vld [vmem:[#allocation39_spill] sm:$0xff] }
 0x86c   :  { %8687 = vmatpush3.msra.mxu1 %v18004_v31  ;;  %8653 = vmatprep.subr.mxu0 %v18005_v0  ;;  %v18015_v31 = vld [vmem:[#allocation8_spill] sm:$0xff]  ;;  %v18022_v0 = vld [vmem:[#allocation27_spill] sm:$0xff] }
 0x86d   :  { %8688 = vmatprep.subr.mxu1 %v18006_v4  ;;  %8654 = vmatpush3.msra.mxu0 %v18007_v43  ;;  %v18017_v4 = vld [vmem:[#allocation37_spill] sm:$0xff] }
 0x86e   :  { %8689 = vmatpush3.msra.mxu1 %v18008_v39  ;;  %8655 = vmatprep.subr.mxu0 %v18009_v61  ;;  %v18019_v39 = vld [vmem:[#allocation7_spill] sm:$0xff] }
 0x86f   :  { %8690 = vmatprep.subr.mxu1 %v18010_v19  ;;  %8656 = vmatpush3.msra.mxu0 %v18011_v12  ;;  %v18021_v19 = vld [vmem:[#allocation36_spill] sm:$0xff]  ;;  %v18024_v61 = vld [vmem:[#allocation63_spill] sm:$0xff] }
 0x870   :  { %8691 = vmatpush3.msra.mxu1 %v18012_v8  ;;  %8657 = vmatprep.subr.mxu0 %v18013_v29  ;;  %v18023_v8 = vld [vmem:[#allocation6_spill] sm:$0xff]  ;;  %v18026_v29 = vld [vmem:[#allocation23_spill] sm:$0xff] }
 0x871   :  { %8692 = vmatprep.subr.mxu1 %v18014_v58  ;;  %8658 = vmatpush3.msra.mxu0 %v18015_v31  ;;  %v18025_v58 = vld [vmem:[#allocation34_spill] sm:$0xff] }
 0x872   :  { %8693 = vmatpush3.msra.mxu1 %v18016_v44  ;;  %8659 = vmatprep.subr.mxu0 %v18017_v4  ;;  %v18027_v44 = vld [vmem:[#allocation5_spill] sm:$0xff]  ;;  %v18028_v4 = vld [vmem:[#allocation60_spill] sm:$0xff] }
 0x873   :  { %8694 = vmatprep.subr.mxu1 %v18018_v24  ;;  %8660 = vmatpush3.msra.mxu0 %v18019_v39  ;;  %v18029_v24 = vld [vmem:[#allocation33_spill] sm:$0xff] }
 0x874   :  { %8695 = vmatpush3.msra.mxu1 %v18020_v59  ;;  %8661 = vmatprep.subr.mxu0 %v18021_v19  ;;  %v18031_v59 = vld [vmem:[#allocation4_spill] sm:$0xff] }
 0x875   :  { %8696 = vmatprep.subr.mxu1 %v18022_v0  ;;  %8662 = vmatpush3.msra.mxu0 %v18023_v8  ;;  %v18032_v0 = vld [vmem:[#allocation58_spill] sm:$0xff] }
 0x876   :  { %8697 = vmatpush3.msra.mxu1 %v18024_v61  ;;  %8663 = vmatprep.subr.mxu0 %v18025_v58 }
 0x877   :  { %8698 = vmatprep.subr.mxu1 %v18026_v29  ;;  %8664 = vmatpush3.msra.mxu0 %v18027_v44 }
 0x878   :  { %8699 = vmatpush3.msra.mxu1 %v18028_v4  ;;  %8665 = vmatprep.subr.mxu0 %v18029_v24 }
 0x879   :  { %8700 = vmatprep.subr.mxu1 %v18030_v47  ;;  %8666 = vmatpush3.msra.mxu0 %v18031_v59 }
 0x87a   :  { %6830 = vmatprep.mubr.f32.mxu0 %v17968_v18  ;;  %8701 = vmatpush3.msra.mxu1 %v18032_v0 }
 0x87b   :  { %6900 = vmatprep.mubr.f32.mxu1 %v17968_v18  ;;  %6831 = vmatmul.mubr.f32.vlgmr.msra.gmra.mxu0 %v17968_v18 }
 0x87c   :  { %6901 = vmatmul.mubr.f32.vlgmr.msra.gmra.mxu1 %v17968_v18  ;;  %7103 = vmatprep.mubr.f32.mxu0 %v17968_v18 }
 0x87d   :  { %7173 = vmatprep.mubr.f32.mxu1 %v17968_v18 }
 0x919   :  { %v8597_v4 = vpop.f32.mrf.mxu0 }
 0x91a   :  { %v8632_v29 = vpop.f32.mrf.mxu1 }
 0x91b   :  { %v8598_v61 = vpop.f32.mrf.mxu0 }
 0x91c   :  { %v8599_v47 = vadd.f32 %v8598_v61, %v8597_v4  ;;  %v8633_v19 = vpop.f32.mrf.mxu1  ;;  %v18037_v61 = vld [vmem:[#allocation135_spill] sm:$0xff] }
 0x91d   :  { %v8634_v58 = vadd.f32 %v8633_v19, %v8632_v29 }
 0x91f   :  { %v6438_v24 = vadd.f32 %v8634_v58, %v8599_v47  ;;  %v18036_v47 = vld [vmem:[#allocation181_spill] sm:$0xff] }
 0x921   :  { %v6441_v25 = vmul.f32 0.001953125, %v6438_v24 }
 0x923   :  { %v6442_v48 = vadd.f32 1e-05, %v6441_v25 }
 0x925   :  { %9772 = vrsqrt.f32 %v6442_v48  ;;  %v18035_v48 = vld [vmem:[#allocation156_spill] sm:$0xff] }
 0x932   :  { %v9773_v0 = vpop.eup %9772 }
 0x933   :  { %v14867_v41 = vrot.slane %v9773_v0, %v18033_v6 }
 0x935   :  { %18034 = vst [vmem:[#allocation57_spill] sm:$0xff] %v14867_v41  ;;  %v6470_v26 = vmul.f32 %v14867_v41, %v14520_v42  ;;  %v6471_v18 = vmul.f32 %v14867_v41, %v14524_v21  ;;  %v6472_v49 = vmul.f32 %v14867_v41, %v14536_v55  ;;  %v6473_v29 = vmul.f32 %v14867_v41, %v14540_v30 }
 0x936   :  { %v6474_v58 = vmul.f32 %v14867_v41, %v14562_v35  ;;  %v6475_v24 = vmul.f32 %v14867_v41, %v14566_v16  ;;  %v6476_v19 = vmul.f32 %v14867_v41, %v14544_v14  ;;  %v6477_v42 = vmul.f32 %v14867_v41, %v14528_v62 }
 0x937   :  { %v6478_v21 = vmul.f32 %v14867_v41, %v18035_v48  ;;  %v6479_v55 = vmul.f32 %v14867_v41, %v18036_v47  ;;  %v6480_v30 = vmul.f32 %v14867_v41, %v14776_v3  ;;  %v6481_v35 = vmul.f32 %v14867_v41, %v14760_v33  ;;  %v18039_v47 = vld [vmem:[#allocation130_spill] sm:$0xff] }
 0x938   :  { %v6482_v16 = vmul.f32 %v14867_v41, %v14744_v50  ;;  %v6483_v14 = vmul.f32 %v14867_v41, %v14728_v5  ;;  %v6484_v62 = vmul.f32 %v14867_v41, %v14712_v51  ;;  %v6485_v4 = vmul.f32 %v14867_v41, %v14696_v20 }
 0x939   :  { %v6486_v25 = vmul.f32 %v14867_v41, %v14680_v60  ;;  %v6487_v3 = vmul.f32 %v14867_v41, %v14664_v36  ;;  %v6488_v33 = vmul.f32 %v14867_v41, %v14648_v10  ;;  %v6489_v50 = vmul.f32 %v14867_v41, %v14632_v34 }
 0x93a   :  { %v6490_v5 = vmul.f32 %v14867_v41, %v14616_v27  ;;  %v6491_v51 = vmul.f32 %v14867_v41, %v14600_v28  ;;  %v6492_v20 = vmul.f32 %v14867_v41, %v14584_v37  ;;  %v6493_v60 = vmul.f32 %v14867_v41, %v14570_v45  ;;  %v14928_v28 = vld [vmem:[%s16462_s5] ss:$0 sm:$0xff] }
 0x93b   :  { %v6494_v36 = vmul.f32 %v14867_v41, %v14548_v1  ;;  %v6495_v10 = vmul.f32 %v14867_v41, %v18037_v61  ;;  %v6496_v34 = vmul.f32 %v14867_v41, %v14768_v32  ;;  %v6497_v27 = vmul.f32 %v14867_v41, %v14752_v22  ;;  %18038 = vst [vmem:[#allocation138_spill] sm:$0xff] %v14928_v28 }
 0x93c   :  { %v6498_v37 = vmul.f32 %v14867_v41, %v14736_v23  ;;  %v6499_v1 = vmul.f32 %v14867_v41, %v14720_v2  ;;  %v6500_v45 = vmul.f32 %v14867_v41, %v14704_v38  ;;  %v6501_v32 = vmul.f32 %v14867_v41, %v14688_v7 }
 0x93d   :  { %v6502_v22 = vmul.f32 %v14867_v41, %v14672_v53  ;;  %v6503_v0 = vmul.f32 %v14867_v41, %v14656_v63  ;;  %v6504_v48 = vmul.f32 %v14867_v41, %v14640_v9  ;;  %v6505_v23 = vmul.f32 %v14867_v41, %v14624_v52 }
 0x93e   :  { %v6506_v2 = vmul.f32 %v14867_v41, %v14608_v57  ;;  %v6507_v38 = vmul.f32 %v14867_v41, %v14592_v46  ;;  %v6508_v7 = vmul.f32 %v14867_v41, %v14576_v17  ;;  %v6509_v53 = vmul.f32 %v14867_v41, %v14552_v13 }
 0x93f   :  { %v6510_v63 = vmul.f32 %v14867_v41, %v14532_v56  ;;  %v6511_v9 = vmul.f32 %v14867_v41, %v18039_v47  ;;  %v6541_v52 = vmul.f32 %v14928_v28, %v6470_v26  ;;  %v6542_v61 = vmul.f32 %v14928_v28, %v6471_v18  ;;  %v8667_v47 = vpop.f32.mrf.mxu0 }
 0x940   :  { %v14961_v57 = vmul.f32 %v14928_v28, %v6472_v49  ;;  %v14964_v46 = vmul.f32 %v14928_v28, %v6473_v29  ;;  %v6545_v17 = vmul.f32 %v14928_v28, %v6474_v58  ;;  %v6546_v13 = vmul.f32 %v14928_v28, %v6475_v24 }
 0x941   :  { %v14969_v11 = vmul.f32 %v14928_v28, %v6476_v19  ;;  %v14972_v56 = vmul.f32 %v14928_v28, %v6477_v42  ;;  %v6549_v26 = vmul.f32 %v14928_v28, %v6478_v21  ;;  %v6550_v18 = vmul.f32 %v14928_v28, %v6479_v55 }
 0x942   :  { %v14977_v49 = vmul.f32 %v14928_v28, %v6480_v30  ;;  %v14980_v29 = vmul.f32 %v14928_v28, %v6481_v35  ;;  %v6553_v58 = vmul.f32 %v14928_v28, %v6482_v16  ;;  %v6554_v24 = vmul.f32 %v14928_v28, %v6483_v14 }
 0x943   :  { %18040 = vst [vmem:[#allocation187_spill] sm:$0xff] %v14969_v11  ;;  %18041 = vst [vmem:[#allocation185_spill] sm:$0xff] %v14972_v56  ;;  %v14985_v19 = vmul.f32 %v14928_v28, %v6484_v62  ;;  %v14988_v42 = vmul.f32 %v14928_v28, %v6485_v4  ;;  %v6557_v21 = vmul.f32 %v14928_v28, %v6486_v25  ;;  %v18174_v56 = vld [vmem:[#allocation71_spill] sm:$0xff]  ;;  %v18176_v11 = vld [vmem:[#allocation80_spill] sm:$0xff] }
 0x944   :  { %18042 = vst [vmem:[#allocation174_spill] sm:$0xff] %v14977_v49  ;;  %18043 = vst [vmem:[#allocation9_spill] sm:$0xff] %v14980_v29  ;;  %v6558_v55 = vmul.f32 %v14928_v28, %v6487_v3  ;;  %v14993_v30 = vmul.f32 %v14928_v28, %v6488_v33  ;;  %v14996_v35 = vmul.f32 %v14928_v28, %v6489_v50  ;;  %v18158_v29 = vld [vmem:[#allocation41_spill] sm:$0xff]  ;;  %v18160_v49 = vld [vmem:[#allocation44_spill] sm:$0xff] }
 0x945   :  { %18044 = vst [vmem:[#allocation150_spill] sm:$0xff] %v14985_v19  ;;  %18045 = vst [vmem:[#allocation122_spill] sm:$0xff] %v14988_v42  ;;  %v6561_v16 = vmul.f32 %v14928_v28, %v6490_v5  ;;  %v6562_v14 = vmul.f32 %v14928_v28, %v6491_v51  ;;  %v15001_v62 = vmul.f32 %v14928_v28, %v6492_v20  ;;  %v18148_v42 = vld [vmem:[#allocation15_spill] sm:$0xff] }
 0x946   :  { %18046 = vst [vmem:[#allocation69_spill] sm:$0xff] %v14993_v30  ;;  %18047 = vst [vmem:[#allocation86_spill] sm:$0xff] %v14996_v35  ;;  %v15004_v4 = vmul.f32 %v14928_v28, %v6493_v60  ;;  %v6565_v25 = vmul.f32 %v14928_v28, %v6494_v36  ;;  %v6566_v3 = vmul.f32 %v14928_v28, %v6495_v10  ;;  %v18132_v35 = vld [vmem:[#allocation74_spill] sm:$0xff]  ;;  %v18142_v30 = vld [vmem:[#allocation79_spill] sm:$0xff] }
 0x947   :  { %18048 = vst [vmem:[#allocation131_spill] sm:$0xff] %v15001_v62  ;;  %v15009_v33 = vmul.f32 %v14928_v28, %v6496_v34  ;;  %v15012_v50 = vmul.f32 %v14928_v28, %v6497_v27  ;;  %v6569_v5 = vmul.f32 %v14928_v28, %v6498_v37  ;;  %v6570_v51 = vmul.f32 %v14928_v28, %v6499_v1  ;;  %v18126_v62 = vld [vmem:[#allocation68_spill] sm:$0xff]  ;;  %v18152_v19 = vld [vmem:[#allocation31_spill] sm:$0xff] }
 0x948   :  { %18049 = vst [vmem:[#allocation144_spill] sm:$0xff] %v15004_v4  ;;  %v15017_v20 = vmul.f32 %v14928_v28, %v6500_v45  ;;  %v15020_v60 = vmul.f32 %v14928_v28, %v6501_v32  ;;  %v6573_v36 = vmul.f32 %v14928_v28, %v6502_v22  ;;  %v6574_v10 = vmul.f32 %v14928_v28, %v6503_v0  ;;  %v18124_v4 = vld [vmem:[#allocation65_spill] sm:$0xff] }
 0x949   :  { %18050 = vst [vmem:[#allocation139_spill] sm:$0xff] %v15009_v33  ;;  %18051 = vst [vmem:[#allocation155_spill] sm:$0xff] %v15012_v50  ;;  %v15025_v34 = vmul.f32 %v14928_v28, %v6504_v48  ;;  %v15028_v27 = vmul.f32 %v14928_v28, %v6505_v23  ;;  %v6577_v37 = vmul.f32 %v14928_v28, %v6506_v2  ;;  %v8702_v48 = vpop.f32.mrf.mxu1  ;;  %v18117_v50 = vld [vmem:[#allocation52_spill] sm:$0xff]  ;;  %v18118_v33 = vld [vmem:[#allocation54_spill] sm:$0xff] }
 0x94a   :  { %18052 = vst [vmem:[#allocation154_spill] sm:$0xff] %v15017_v20  ;;  %18053 = vst [vmem:[#allocation153_spill] sm:$0xff] %v15020_v60  ;;  %v6578_v1 = vmul.f32 %v14928_v28, %v6507_v38  ;;  %v15033_v45 = vmul.f32 %v14928_v28, %v6508_v7  ;;  %v15036_v32 = vmul.f32 %v14928_v28, %v6509_v53  ;;  %v15047_v53 = vld [vmem:[%s16463_s6] ss:$0 sm:$0xff]  ;;  %v18114_v20 = vld [vmem:[#allocation49_spill] sm:$0xff] }
 0x94b   :  { %18054 = vst [vmem:[#allocation125_spill] sm:$0xff] %v15025_v34  ;;  %18055 = vst [vmem:[#allocation140_spill] sm:$0xff] %v15028_v27  ;;  %v6581_v22 = vmul.f32 %v14928_v28, %v6510_v63  ;;  %v6582_v0 = vmul.f32 %v14928_v28, %v6511_v9  ;;  %v8668_v34 = vpop.f32.mrf.mxu0  ;;  %v8703_v60 = vpop.f32.mrf.mxu1  ;;  %v6448_v23 = vmul.f32 %v14867_v41, %v17967_v40  ;;  %v18112_v27 = vld [vmem:[#allocation48_spill] sm:$0xff] }
 0x94c   :  { %18056 = vst [vmem:[#allocation151_spill] sm:$0xff] %v15033_v45  ;;  %18057 = vst [vmem:[#allocation87_spill] sm:$0xff] %v15036_v32  ;;  %v6449_v2 = vmul.f32 %v14867_v41, %v17965_v54  ;;  %v8669_v38 = vadd.f32 %v8668_v34, %v8667_v47  ;;  %v8704_v7 = vadd.f32 %v8703_v60, %v8702_v48  ;;  %v18096_v41 = vld [vmem:[#allocation33_spill] sm:$0xff] }
 0x94d   :  { %v6519_v9 = vmul.f32 %v14928_v28, %v6448_v23  ;;  %v15052_v45 = vadd.f32 %v15047_v53, %v6541_v52  ;;  %v15055_v40 = vadd.f32 %v15047_v53, %v6542_v61  ;;  %v15058_v54 = vadd.f32 %v15047_v53, %v6545_v17 }
 0x94e   :  { %v6903_v63 = vadd.f32 %v8704_v7, %v8669_v38  ;;  %v6520_v32 = vmul.f32 %v14928_v28, %v6449_v2  ;;  %v15061_v60 = vadd.f32 %v15047_v53, %v6546_v13  ;;  %v15064_v34 = vadd.f32 %v15047_v53, %v6549_v26  ;;  %v18085_v2 = vld [vmem:[#allocation20_spill] sm:$0xff]  ;;  %v18087_v7 = vld [vmem:[#allocation22_spill] sm:$0xff] }
 0x94f   :  { %v15067_v47 = vadd.f32 %v15047_v53, %v6550_v18  ;;  %v15070_v48 = vadd.f32 %v15047_v53, %v6553_v58  ;;  %v15073_v52 = vadd.f32 %v15047_v53, %v6554_v24  ;;  %v15076_v61 = vadd.f32 %v15047_v53, %v6557_v21  ;;  %v18094_v28 = vld [vmem:[#allocation30_spill] sm:$0xff] }
 0x950   :  { %18058 = vst [vmem:[#allocation172_spill] sm:$0xff] %v15064_v34  ;;  %v15079_v17 = vadd.f32 %v15047_v53, %v6558_v55  ;;  %v6906_v13 = vmul.f32 0.001953125, %v6903_v63  ;;  %v15082_v23 = vadd.f32 %v15047_v53, %v6561_v16  ;;  %v15085_v26 = vadd.f32 %v15047_v53, %v6562_v14  ;;  %v18172_v34 = vld [vmem:[#allocation66_spill] sm:$0xff] }
 0x951   :  { %18059 = vst [vmem:[#allocation64_spill] sm:$0xff] %v15067_v47  ;;  %18060 = vst [vmem:[#allocation173_spill] sm:$0xff] %v15070_v48  ;;  %v15088_v18 = vadd.f32 %v15047_v53, %v6565_v25  ;;  %v15091_v58 = vadd.f32 %v15047_v53, %v6566_v3  ;;  %v15094_v24 = vadd.f32 %v15047_v53, %v6569_v5  ;;  %v18156_v48 = vld [vmem:[#allocation38_spill] sm:$0xff]  ;;  %v18170_v47 = vld [vmem:[#allocation61_spill] sm:$0xff] }
 0x952   :  { %18061 = vst [vmem:[#allocation88_spill] sm:$0xff] %v15073_v52  ;;  %18062 = vst [vmem:[#allocation146_spill] sm:$0xff] %v15076_v61  ;;  %v15097_v21 = vadd.f32 %v15047_v53, %v6570_v51  ;;  %v15100_v55 = vadd.f32 %v15047_v53, %v6573_v36  ;;  %v15103_v16 = vadd.f32 %v15047_v53, %v6574_v10  ;;  %v18091_v51 = vld [vmem:[#allocation26_spill] sm:$0xff]  ;;  %v18146_v61 = vld [vmem:[#allocation11_spill] sm:$0xff] }
 0x953   :  { %18063 = vst [vmem:[#allocation145_spill] sm:$0xff] %v15079_v17  ;;  %18064 = vst [vmem:[#allocation147_spill] sm:$0xff] %v15082_v23  ;;  %v15106_v14 = vadd.f32 %v15047_v53, %v6577_v37  ;;  %v15109_v25 = vadd.f32 %v15047_v53, %v6578_v1  ;;  %v15112_v3 = vadd.f32 %v15047_v53, %v6581_v22  ;;  %v18083_v37 = vld [vmem:[#allocation18_spill] sm:$0xff]  ;;  %v18089_v22 = vld [vmem:[#allocation24_spill] sm:$0xff] }
 0x954   :  { %18065 = vst [vmem:[#allocation157_spill] sm:$0xff] %v15085_v26  ;;  %18066 = vst [vmem:[#allocation149_spill] sm:$0xff] %v15088_v18  ;;  %v15115_v5 = vadd.f32 %v15047_v53, %v6582_v0  ;;  %v15121_v10 = vrot.slane %v6906_v13, %v18033_v6  ;;  %v15144_v63 = vadd.f32 %v15047_v53, %v6519_v9  ;;  %v18081_v9 = vld [vmem:[#allocation16_spill] sm:$0xff]  ;;  %v18122_v18 = vld [vmem:[#allocation63_spill] sm:$0xff] }
 0x955   :  { %18067 = vst [vmem:[#allocation136_spill] sm:$0xff] %v15091_v58  ;;  %18068 = vst [vmem:[#allocation152_spill] sm:$0xff] %v15094_v24  ;;  %v15147_v36 = vadd.f32 %v15047_v53, %v6520_v32  ;;  %v18093_v6 = vld [vmem:[#allocation28_spill] sm:$0xff]  ;;  %v18115_v24 = vld [vmem:[#allocation51_spill] sm:$0xff] }
 0x956   :  { %18069 = vst [vmem:[#allocation142_spill] sm:$0xff] %v15112_v3  ;;  %18070 = vst [vmem:[#allocation89_spill] sm:$0xff] %v15115_v5  ;;  %v15137_v38 = vsub.f32 %v18031_v59, %v15121_v10  ;;  %v15141_v0 = vsub.f32 %v18027_v44, %v15121_v10  ;;  %v15151_v13 = vsub.f32 %v18023_v8, %v15121_v10  ;;  %v18120_v58 = vld [vmem:[#allocation55_spill] sm:$0xff]  ;;  %v18128_v26 = vld [vmem:[#allocation70_spill] sm:$0xff] }
 0x957   :  { %18073 = vst [vmem:[#allocation124_spill] sm:$0xff] %v15144_v63  ;;  %18074 = vst [vmem:[#allocation141_spill] sm:$0xff] %v15147_v36  ;;  %v15155_v1 = vsub.f32 %v18019_v39, %v15121_v10  ;;  %v15159_v59 = vsub.f32 %v18015_v31, %v15121_v10  ;;  %v15163_v44 = vsub.f32 %v18011_v12, %v15121_v10  ;;  %v18098_v36 = vld [vmem:[#allocation34_spill] sm:$0xff]  ;;  %v18102_v63 = vld [vmem:[#allocation37_spill] sm:$0xff] }
 0x958   :  { %18071 = vst [vmem:[#allocation170_spill] sm:$0xff] %v15137_v38  ;;  %18072 = vst [vmem:[#allocation159_spill] sm:$0xff] %v15141_v0  ;;  %v15167_v32 = vsub.f32 %v18007_v43, %v15121_v10  ;;  %v15171_v8 = vsub.f32 %v18003_v15, %v15121_v10  ;;  %v15175_v39 = vsub.f32 %v18081_v9, %v15121_v10  ;;  %v18100_v38 = vld [vmem:[#allocation36_spill] sm:$0xff]  ;;  %v18104_v0 = vld [vmem:[#allocation39_spill] sm:$0xff] }
 0x959   :  { %18075 = vst [vmem:[#allocation92_spill] sm:$0xff] %v15151_v13  ;;  %18076 = vst [vmem:[#allocation73_spill] sm:$0xff] %v15155_v1  ;;  %v15179_v31 = vsub.f32 %v18083_v37, %v15121_v10  ;;  %v15183_v12 = vsub.f32 %v18085_v2, %v15121_v10  ;;  %v15187_v43 = vsub.f32 %v18087_v7, %v15121_v10  ;;  %v18106_v13 = vld [vmem:[#allocation40_spill] sm:$0xff]  ;;  %v18144_v17 = vld [vmem:[#allocation143_spill] sm:$0xff] }
 0x95a   :  { %18077 = vst [vmem:[#allocation160_spill] sm:$0xff] %v15159_v59  ;;  %18078 = vst [vmem:[#allocation29_spill] sm:$0xff] %v15163_v44  ;;  %v15191_v15 = vsub.f32 %v18089_v22, %v15121_v10  ;;  %v15195_v9 = vsub.f32 %v18091_v51, %v15121_v10  ;;  %v15199_v37 = vsub.f32 %v18093_v6, %v15121_v10  ;;  %v18130_v23 = vld [vmem:[#allocation72_spill] sm:$0xff]  ;;  %v18150_v5 = vld [vmem:[#allocation27_spill] sm:$0xff] }
 0x95b   :  { %18079 = vst [vmem:[#allocation134_spill] sm:$0xff] %v15167_v32  ;;  %18080 = vst [vmem:[#allocation158_spill] sm:$0xff] %v15171_v8  ;;  %v15203_v2 = vsub.f32 %v18094_v28, %v15121_v10  ;;  %v15207_v7 = vsub.f32 %v18096_v41, %v15121_v10  ;;  %v15211_v22 = vsub.f32 %v18098_v36, %v15121_v10  ;;  %v18154_v52 = vld [vmem:[#allocation35_spill] sm:$0xff] }
 0x95c   :  { %18082 = vst [vmem:[#allocation93_spill] sm:$0xff] %v15175_v39  ;;  %18084 = vst [vmem:[#allocation169_spill] sm:$0xff] %v15179_v31  ;;  %v15215_v51 = vsub.f32 %v18100_v38, %v15121_v10  ;;  %v15219_v6 = vsub.f32 %v18102_v63, %v15121_v10  ;;  %v15223_v28 = vsub.f32 %v18104_v0, %v15121_v10 }
 0x95d   :  { %18086 = vst [vmem:[#allocation133_spill] sm:$0xff] %v15183_v12  ;;  %18088 = vst [vmem:[#allocation17_spill] sm:$0xff] %v15187_v43  ;;  %v15227_v41 = vsub.f32 %v18106_v13, %v15121_v10  ;;  %v15247_v13 = vsub.f32 %v18112_v27, %v15121_v10  ;;  %v15267_v27 = vsub.f32 %v18120_v58, %v15121_v10 }
 0x95e   :  { %18090 = vst [vmem:[#allocation62_spill] sm:$0xff] %v15191_v15  ;;  %18092 = vst [vmem:[#allocation127_spill] sm:$0xff] %v15195_v9  ;;  %v15287_v58 = vsub.f32 %v18130_v23, %v15121_v10  ;;  %v15389_v3 = vmul.f32 %v15159_v59, %v15159_v59  ;;  %v15411_v59 = vmul.f32 %v15179_v31, %v15179_v31 }
 0x95f   :  { %18095 = vst [vmem:[#allocation67_spill] sm:$0xff] %v15203_v2  ;;  %18097 = vst [vmem:[#allocation163_spill] sm:$0xff] %v15207_v7  ;;  %v18107_v7 = vld [vmem:[#allocation42_spill] sm:$0xff]  ;;  %v6989_v31 = vmul.f32 %v15199_v37, %v15199_v37 }
 0x960   :  { %18099 = vst [vmem:[#allocation108_spill] sm:$0xff] %v15211_v22  ;;  %18101 = vst [vmem:[#allocation171_spill] sm:$0xff] %v15215_v51  ;;  %v15231_v36 = vsub.f32 %v18107_v7, %v15121_v10  ;;  %v18108_v22 = vld [vmem:[#allocation43_spill] sm:$0xff]  ;;  %v18109_v51 = vld [vmem:[#allocation45_spill] sm:$0xff]  ;;  %v15251_v7 = vsub.f32 %v18114_v20, %v15121_v10  ;;  %v15271_v20 = vsub.f32 %v18122_v18, %v15121_v10 }
 0x961   :  { %18103 = vst [vmem:[#allocation167_spill] sm:$0xff] %v15219_v6  ;;  %18105 = vst [vmem:[#allocation166_spill] sm:$0xff] %v15223_v28  ;;  %v15235_v38 = vsub.f32 %v18108_v22, %v15121_v10  ;;  %v15239_v63 = vsub.f32 %v18109_v51, %v15121_v10  ;;  %v18111_v6 = vld [vmem:[#allocation46_spill] sm:$0xff]  ;;  %v15255_v22 = vsub.f32 %v18115_v24, %v15121_v10 }
 0x962   :  { %v15243_v0 = vsub.f32 %v18111_v6, %v15121_v10  ;;  %18113 = vst [vmem:[#allocation164_spill] sm:$0xff] %v15247_v13  ;;  %v15259_v51 = vsub.f32 %v18117_v50, %v15121_v10  ;;  %v15263_v6 = vsub.f32 %v18118_v33, %v15121_v10  ;;  %18121 = vst [vmem:[#allocation161_spill] sm:$0xff] %v15267_v27 }
 0x963   :  { %18110 = vst [vmem:[#allocation168_spill] sm:$0xff] %v15239_v63  ;;  %18116 = vst [vmem:[#allocation129_spill] sm:$0xff] %v15255_v22  ;;  %v15275_v24 = vsub.f32 %v18124_v4, %v15121_v10  ;;  %v15279_v50 = vsub.f32 %v18126_v62, %v15121_v10  ;;  %v15283_v33 = vsub.f32 %v18128_v26, %v15121_v10 }
 0x964   :  { %18119 = vst [vmem:[#allocation162_spill] sm:$0xff] %v15263_v6  ;;  %18123 = vst [vmem:[#allocation165_spill] sm:$0xff] %v15271_v20  ;;  %v15291_v18 = vsub.f32 %v18132_v35, %v15121_v10  ;;  %v18134_v20 = vld [vmem:[#allocation75_spill] sm:$0xff]  ;;  %v15311_v35 = vsub.f32 %v18142_v30, %v15121_v10  ;;  %v15331_v30 = vsub.f32 %v18152_v19, %v15121_v10 }
 0x965   :  { %18125 = vst [vmem:[#allocation25_spill] sm:$0xff] %v15275_v24  ;;  %18127 = vst [vmem:[#allocation85_spill] sm:$0xff] %v15279_v50  ;;  %v15295_v4 = vsub.f32 %v18134_v20, %v15121_v10  ;;  %v18136_v24 = vld [vmem:[#allocation76_spill] sm:$0xff]  ;;  %v18138_v50 = vld [vmem:[#allocation77_spill] sm:$0xff]  ;;  %v15315_v20 = vsub.f32 %v18144_v17, %v15121_v10  ;;  %v15335_v17 = vsub.f32 %v18154_v52, %v15121_v10 }
 0x966   :  { %18129 = vst [vmem:[#allocation3_spill] sm:$0xff] %v15283_v33  ;;  %18131 = vst [vmem:[#allocation84_spill] sm:$0xff] %v15287_v58  ;;  %v15299_v62 = vsub.f32 %v18136_v24, %v15121_v10  ;;  %v15303_v26 = vsub.f32 %v18138_v50, %v15121_v10  ;;  %v18140_v33 = vld [vmem:[#allocation78_spill] sm:$0xff]  ;;  %v15319_v24 = vsub.f32 %v18146_v61, %v15121_v10 }
 0x967   :  { %18133 = vst [vmem:[#allocation126_spill] sm:$0xff] %v15291_v18  ;;  %18135 = vst [vmem:[#allocation110_spill] sm:$0xff] %v15295_v4  ;;  %v15307_v23 = vsub.f32 %v18140_v33, %v15121_v10  ;;  %v15323_v50 = vsub.f32 %v18148_v42, %v15121_v10  ;;  %v15327_v33 = vsub.f32 %v18150_v5, %v15121_v10 }
 0x968   :  { %18137 = vst [vmem:[#allocation82_spill] sm:$0xff] %v15299_v62  ;;  %18139 = vst [vmem:[#allocation100_spill] sm:$0xff] %v15303_v26  ;;  %v15339_v61 = vsub.f32 %v18156_v48, %v15121_v10  ;;  %v15343_v42 = vsub.f32 %v18158_v29, %v15121_v10  ;;  %v15347_v5 = vsub.f32 %v18160_v49, %v15121_v10 }
 0x969   :  { %18141 = vst [vmem:[#allocation83_spill] sm:$0xff] %v15307_v23  ;;  %18143 = vst [vmem:[#allocation21_spill] sm:$0xff] %v15311_v35  ;;  %v15367_v49 = vsub.f32 %v18170_v47, %v15121_v10  ;;  %v6990_v47 = vmul.f32 %v15203_v2, %v15203_v2  ;;  %v15407_v2 = vmul.f32 %v15175_v39, %v15175_v39 }
 0x96a   :  { %18145 = vst [vmem:[#allocation175_spill] sm:$0xff] %v15315_v20  ;;  %18147 = vst [vmem:[#allocation128_spill] sm:$0xff] %v15319_v24  ;;  %v7005_v39 = vmul.f32 %v15263_v6, %v15263_v6  ;;  %v7001_v6 = vmul.f32 %v15247_v13, %v15247_v13  ;;  %v7021_v13 = vmul.f32 %v15319_v24, %v15319_v24 }
 0x96b   :  { %18149 = vst [vmem:[#allocation119_spill] sm:$0xff] %v15323_v50  ;;  %18151 = vst [vmem:[#allocation113_spill] sm:$0xff] %v15327_v33  ;;  %v18162_v33 = vld [vmem:[#allocation47_spill] sm:$0xff] }
 0x96c   :  { %18153 = vst [vmem:[#allocation114_spill] sm:$0xff] %v15331_v30  ;;  %18155 = vst [vmem:[#allocation101_spill] sm:$0xff] %v15335_v17  ;;  %v15351_v19 = vsub.f32 %v18162_v33, %v15121_v10  ;;  %v18164_v30 = vld [vmem:[#allocation50_spill] sm:$0xff]  ;;  %v18166_v17 = vld [vmem:[#allocation53_spill] sm:$0xff]  ;;  %v15371_v33 = vsub.f32 %v18172_v34, %v15121_v10  ;;  %v15393_v34 = vmul.f32 %v15163_v44, %v15163_v44 }
 0x96d   :  { %18157 = vst [vmem:[#allocation96_spill] sm:$0xff] %v15339_v61  ;;  %18159 = vst [vmem:[#allocation177_spill] sm:$0xff] %v15343_v42  ;;  %v15355_v52 = vsub.f32 %v18164_v30, %v15121_v10  ;;  %v15359_v48 = vsub.f32 %v18166_v17, %v15121_v10  ;;  %v18168_v61 = vld [vmem:[#allocation56_spill] sm:$0xff]  ;;  %v15375_v30 = vsub.f32 %v18174_v56, %v15121_v10 }
 0x96e   :  { %18161 = vst [vmem:[#allocation94_spill] sm:$0xff] %v15347_v5  ;;  %18163 = vst [vmem:[#allocation99_spill] sm:$0xff] %v15351_v19  ;;  %v15363_v29 = vsub.f32 %v18168_v61, %v15121_v10  ;;  %v15379_v17 = vsub.f32 %v18176_v11, %v15121_v10  ;;  %v15383_v61 = vmul.f32 %v15155_v1, %v15155_v1 }
 0x96f   :  { %18165 = vst [vmem:[#allocation91_spill] sm:$0xff] %v15355_v52  ;;  %18167 = vst [vmem:[#allocation13_spill] sm:$0xff] %v15359_v48  ;;  %v15397_v56 = vmul.f32 %v15167_v32, %v15167_v32  ;;  %v7006_v11 = vmul.f32 %v15267_v27, %v15267_v27  ;;  %v15403_v1 = vmul.f32 %v15171_v8, %v15171_v8 }
 0x970   :  { %18169 = vst [vmem:[#allocation102_spill] sm:$0xff] %v15363_v29  ;;  %18171 = vst [vmem:[#allocation176_spill] sm:$0xff] %v15367_v49  ;;  %v15415_v44 = vmul.f32 %v15183_v12, %v15183_v12  ;;  %v6986_v32 = vmul.f32 %v15187_v43, %v15187_v43  ;;  %v6987_v27 = vmul.f32 %v15191_v15, %v15191_v15 }
 0x971   :  { %18173 = vst [vmem:[#allocation90_spill] sm:$0xff] %v15371_v33  ;;  %18175 = vst [vmem:[#allocation59_spill] sm:$0xff] %v15375_v30  ;;  %v6988_v8 = vmul.f32 %v15195_v9, %v15195_v9  ;;  %8705 = vmatprep.subr.mxu0 %v7006_v11  ;;  %v15429_v12 = vmul.f32 %v15223_v28, %v15223_v28  ;;  %v15433_v43 = vmul.f32 %v15231_v36, %v15231_v36 }
 0x972   :  { %18177 = vst [vmem:[#allocation105_spill] sm:$0xff] %v15379_v17  ;;  %v15437_v15 = vmul.f32 %v15239_v63, %v15239_v63  ;;  %8706 = vmatpush3.msra.mxu0 %v6990_v47  ;;  %v7003_v11 = vmul.f32 %v15255_v22, %v15255_v22  ;;  %v15445_v9 = vmul.f32 %v15287_v58, %v15287_v58 }
 0x973   :  { %v15449_v28 = vmul.f32 %v15291_v18, %v15291_v18  ;;  %8707 = vmatprep.subr.mxu0 %v7005_v39  ;;  %v15453_v63 = vmul.f32 %v15295_v4, %v15295_v4  ;;  %v15457_v47 = vmul.f32 %v15299_v62, %v15299_v62  ;;  %v15461_v22 = vmul.f32 %v15303_v26, %v15303_v26 }
 0x974   :  { %v7022_v58 = vmul.f32 %v15323_v50, %v15323_v50  ;;  %8708 = vmatpush3.msra.mxu0 %v6989_v31  ;;  %v7018_v18 = vmul.f32 %v15307_v23, %v15307_v23  ;;  %v7019_v39 = vmul.f32 %v15311_v35, %v15311_v35  ;;  %v7038_v4 = vmul.f32 %v15379_v17, %v15379_v17 }
 0x975   :  { %v7004_v62 = vmul.f32 %v15259_v51, %v15259_v51  ;;  %v7020_v26 = vmul.f32 %v15315_v20, %v15315_v20  ;;  %v15479_v31 = vmul.f32 %v15343_v42, %v15343_v42  ;;  %v15483_v50 = vmul.f32 %v15351_v19, %v15351_v19 }
 0x976   :  { %v7033_v17 = vmul.f32 %v15359_v48, %v15359_v48  ;;  %v7035_v23 = vmul.f32 %v15367_v49, %v15367_v49  ;;  %v7037_v20 = vmul.f32 %v15375_v30, %v15375_v30  ;;  %8740 = vmatprep.subr.mxu1 %v7038_v4  ;;  %v7036_v19 = vmul.f32 %v15371_v33, %v15371_v33 }
 0x977   :  { %8709 = vmatprep.subr.mxu0 %v7004_v62  ;;  %8741 = vmatpush3.msra.mxu1 %v7022_v58  ;;  %v7002_v35 = vmul.f32 %v15251_v7, %v15251_v7  ;;  %v7034_v48 = vmul.f32 %v15363_v29, %v15363_v29  ;;  %v7000_v4 = vmul.f32 %v15243_v0, %v15243_v0  ;;  %v18179_v49 = vmax.f32 %v15055_v40, 0.0  ;;  %v18197_v40 = vld [vmem:[#allocation89_spill] sm:$0xff] }
 0x978   :  { %8710 = vmatpush3.msra.mxu0 %v6988_v8  ;;  %8742 = vmatprep.subr.mxu1 %v7037_v20  ;;  %v7032_v58 = vmul.f32 %v15355_v52, %v15355_v52  ;;  %v6998_v62 = vmul.f32 %v15235_v38, %v15235_v38  ;;  %v15509_v42 = vmul.f32 %v15347_v5, %v15347_v5  ;;  %v18180_v8 = vmax.f32 %v15058_v54, 0.0  ;;  %v18187_v5 = vld [vmem:[#allocation64_spill] sm:$0xff] }
 0x979   :  { %8711 = vmatprep.subr.mxu0 %v7003_v11  ;;  %8743 = vmatpush3.msra.mxu1 %v7021_v13  ;;  %v15513_v20 = vmul.f32 %v15227_v41, %v15227_v41  ;;  %v18178_v11 = vmax.f32 %v15052_v45, 0.0  ;;  %v6614_v13 = vadd.f32 %v15047_v53, %v14961_v57  ;;  %v18181_v52 = vmax.f32 %v15061_v60, 0.0  ;;  %v18182_v45 = vld [vmem:[#allocation142_spill] sm:$0xff]  ;;  %v18185_v57 = vld [vmem:[#allocation172_spill] sm:$0xff] }
 0x97a   :  { %8712 = vmatpush3.msra.mxu0 %v6987_v27  ;;  %8744 = vmatprep.subr.mxu1 %v7036_v19  ;;  %v6615_v27 = vadd.f32 %v15047_v53, %v14964_v46  ;;  %v18186_v30 = vmax.f32 %v18185_v57, 0.0  ;;  %v18188_v46 = vmax.f32 %v18187_v5, 0.0  ;;  %v18192_v57 = vld [vmem:[#allocation173_spill] sm:$0xff] }
 0x97b   :  { %v15519_v33 = vpack.c.bf16 %v18179_v49, %v18178_v11  ;;  %8713 = vmatprep.subr.mxu0 %v7002_v35  ;;  %v15530_v29 = vpack.c.bf16 %v18181_v52, %v18180_v8  ;;  %8745 = vmatpush3.msra.mxu1 %v7020_v26  ;;  %v18183_v49 = vld [vmem:[#allocation187_spill] sm:$0xff]  ;;  %v18184_v35 = vld [vmem:[#allocation185_spill] sm:$0xff]  ;;  %v6678_v54 = vmax.f32 %v6614_v13, 0.0  ;;  %v18189_v52 = vld [vmem:[#allocation174_spill] sm:$0xff] }
 0x97c   :  { %8714 = vmatpush3.msra.mxu0 %v6986_v32  ;;  %v6618_v19 = vadd.f32 %v15047_v53, %v18183_v49  ;;  %v6619_v11 = vadd.f32 %v15047_v53, %v18184_v35  ;;  %v15541_v24 = vpack.c.bf16 %v18188_v46, %v18186_v30  ;;  %8746 = vmatprep.subr.mxu1 %v7035_v23  ;;  %v6679_v60 = vmax.f32 %v6615_v27, 0.0  ;;  %v18190_v32 = vld [vmem:[#allocation9_spill] sm:$0xff]  ;;  %v18191_v49 = vld [vmem:[#allocation96_spill] sm:$0xff] }
 0x97d   :  { %8715 = vmatprep.subr.mxu0 %v7001_v6  ;;  %v6622_v26 = vadd.f32 %v15047_v53, %v18189_v52  ;;  %v6623_v8 = vadd.f32 %v15047_v53, %v18190_v32  ;;  %8747 = vmatpush3.msra.mxu1 %v7019_v39  ;;  %v15550_v35 = vmul.f32 %v18191_v49, %v18191_v49  ;;  %v18193_v23 = vmax.f32 %v18192_v57, 0.0  ;;  %v18194_v6 = vld [vmem:[#allocation88_spill] sm:$0xff]  ;;  %v18196_v32 = vld [vmem:[#allocation150_spill] sm:$0xff] }
 0x97e   :  { %8716 = vmatpush3.msra.mxu0 %v15415_v44  ;;  %v6682_v5 = vmax.f32 %v6618_v19, 0.0  ;;  %v6683_v30 = vmax.f32 %v6619_v11, 0.0  ;;  %v18195_v13 = vmax.f32 %v18194_v6, 0.0  ;;  %8748 = vmatprep.subr.mxu1 %v7034_v48  ;;  %v15558_v46 = vpack.c.bf16 %v6679_v60, %v6678_v54  ;;  %v18198_v11 = vld [vmem:[#allocation122_spill] sm:$0xff]  ;;  %v18205_v6 = vld [vmem:[#allocation147_spill] sm:$0xff] }
 0x97f   :  { %8717 = vmatprep.subr.mxu0 %v7000_v4  ;;  %v6686_v52 = vmax.f32 %v6622_v26, 0.0  ;;  %v6687_v39 = vmax.f32 %v6623_v8, 0.0  ;;  %v6626_v44 = vadd.f32 %v15047_v53, %v18196_v32  ;;  %v6717_v49 = vmax.f32 %v18197_v40, 0.0  ;;  %8749 = vmatpush3.msra.mxu1 %v7018_v18  ;;  %v18201_v4 = vld [vmem:[#allocation145_spill] sm:$0xff]  ;;  %v18204_v8 = vld [vmem:[#allocation86_spill] sm:$0xff] }
 0x980   :  { %v15556_v27 = vpack.c.bf16 %v18195_v13, %v18193_v23  ;;  %8718 = vmatpush3.msra.mxu0 %v15411_v59  ;;  %v15564_v19 = vpack.c.bf16 %v6683_v30, %v6682_v5  ;;  %v6627_v57 = vadd.f32 %v15047_v53, %v18198_v11  ;;  %v18199_v23 = vld [vmem:[#allocation146_spill] sm:$0xff]  ;;  %v18202_v54 = vmax.f32 %v18201_v4, 0.0  ;;  %8750 = vmatprep.subr.mxu1 %v7033_v17  ;;  %v18203_v18 = vld [vmem:[#allocation69_spill] sm:$0xff] }
 0x981   :  { %v18200_v48 = vmax.f32 %v18199_v23, 0.0  ;;  %8719 = vmatprep.subr.mxu0 %v15437_v15  ;;  %v15575_v26 = vpack.c.bf16 %v6687_v39, %v6686_v52  ;;  %v6690_v40 = vmax.f32 %v6626_v44, 0.0  ;;  %v6630_v59 = vadd.f32 %v15047_v53, %v18203_v18  ;;  %8751 = vmatpush3.msra.mxu1 %v15461_v22  ;;  %v18207_v32 = vld [vmem:[#allocation157_spill] sm:$0xff]  ;;  %v18209_v15 = vld [vmem:[#allocation131_spill] sm:$0xff]  ;;  %v18210_v39 = vld [vmem:[#allocation144_spill] sm:$0xff] }
 0x982   :  { %v6631_v5 = vadd.f32 %v15047_v53, %v18204_v8  ;;  %8720 = vmatpush3.msra.mxu0 %v15407_v2  ;;  %v6691_v30 = vmax.f32 %v6627_v57, 0.0  ;;  %v18206_v13 = vmax.f32 %v18205_v6, 0.0  ;;  %v18208_v17 = vmax.f32 %v18207_v32, 0.0  ;;  %8752 = vmatprep.subr.mxu1 %v7032_v58  ;;  %v18211_v22 = vld [vmem:[#allocation149_spill] sm:$0xff]  ;;  %v18213_v2 = vld [vmem:[#allocation136_spill] sm:$0xff]  ;;  %v18215_v18 = vld [vmem:[#allocation139_spill] sm:$0xff] }
 0x983   :  { %v15572_v60 = vpack.c.bf16 %v18202_v54, %v18200_v48  ;;  %v6634_v52 = vadd.f32 %v15047_v53, %v18209_v15  ;;  %v6635_v44 = vadd.f32 %v15047_v53, %v18210_v39  ;;  %8721 = vmatprep.subr.mxu0 %v6998_v62  ;;  %v6694_v23 = vmax.f32 %v6630_v59, 0.0  ;;  %8753 = vmatpush3.msra.mxu1 %v15457_v47  ;;  %v18216_v62 = vld [vmem:[#allocation155_spill] sm:$0xff] }
 0x984   :  { %v15587_v11 = vpack.c.bf16 %v18208_v17, %v18206_v13  ;;  %v6695_v48 = vmax.f32 %v6631_v5, 0.0  ;;  %v18212_v4 = vmax.f32 %v18211_v22, 0.0  ;;  %v18214_v57 = vmax.f32 %v18213_v2, 0.0  ;;  %8722 = vmatpush3.msra.mxu0 %v15403_v1  ;;  %8754 = vmatprep.subr.mxu1 %v15483_v50  ;;  %v18217_v17 = vld [vmem:[#allocation152_spill] sm:$0xff]  ;;  %v18220_v1 = vld [vmem:[#allocation154_spill] sm:$0xff] }
 0x985   :  { %v6638_v8 = vadd.f32 %v15047_v53, %v18215_v18  ;;  %v15603_v6 = vpack.c.bf16 %v6691_v30, %v6690_v40  ;;  %v6698_v13 = vmax.f32 %v6634_v52, 0.0  ;;  %v6699_v58 = vmax.f32 %v6635_v44, 0.0  ;;  %8723 = vmatprep.subr.mxu0 %v15433_v43  ;;  %8755 = vmatpush3.msra.mxu1 %v15453_v63  ;;  %v18221_v43 = vld [vmem:[#allocation153_spill] sm:$0xff]  ;;  %v18225_v22 = vld [vmem:[#allocation140_spill] sm:$0xff] }
 0x986   :  { %v15597_v54 = vpack.c.bf16 %v18214_v57, %v18212_v4  ;;  %v6639_v59 = vadd.f32 %v15047_v53, %v18216_v62  ;;  %v15609_v5 = vpack.c.bf16 %v6695_v48, %v6694_v23  ;;  %v18218_v15 = vmax.f32 %v18217_v17, 0.0  ;;  %8724 = vmatpush3.msra.mxu0 %v15397_v56  ;;  %8756 = vmatprep.subr.mxu1 %v15509_v42  ;;  %v18224_v63 = vld [vmem:[#allocation125_spill] sm:$0xff] }
 0x987   :  { %v6702_v32 = vmax.f32 %v6638_v8, 0.0  ;;  %v18219_v47 = vmax.f32 %v15097_v21, 0.0  ;;  %v6642_v40 = vadd.f32 %v15047_v53, %v18220_v1  ;;  %v15621_v30 = vpack.c.bf16 %v6699_v58, %v6698_v13  ;;  %8725 = vmatprep.subr.mxu0 %v15513_v20  ;;  %8757 = vmatpush3.msra.mxu1 %v15449_v28  ;;  %v18228_v20 = vld [vmem:[#allocation151_spill] sm:$0xff]  ;;  %v18234_v1 = vld [vmem:[#allocation101_spill] sm:$0xff] }
 0x988   :  { %v6703_v50 = vmax.f32 %v6639_v59, 0.0  ;;  %v6643_v52 = vadd.f32 %v15047_v53, %v18221_v43  ;;  %v18222_v44 = vmax.f32 %v15100_v55, 0.0  ;;  %v18223_v23 = vmax.f32 %v15103_v16, 0.0  ;;  %8726 = vmatpush3.msra.mxu0 %v15393_v34  ;;  %v18229_v8 = vld [vmem:[#allocation87_spill] sm:$0xff]  ;;  %8758 = vmatprep.subr.mxu1 %v15479_v31 }
 0x989   :  { %v15615_v39 = vpack.c.bf16 %v18219_v47, %v18218_v15  ;;  %v6706_v48 = vmax.f32 %v6642_v40, 0.0  ;;  %v6646_v56 = vadd.f32 %v15047_v53, %v18224_v63  ;;  %v6647_v4 = vadd.f32 %v15047_v53, %v18225_v22  ;;  %8727 = vmatprep.subr.mxu0 %v15429_v12  ;;  %v18232_v59 = vld [vmem:[#allocation3_spill] sm:$0xff]  ;;  %8759 = vmatpush3.msra.mxu1 %v15445_v9 }
 0x98a   :  { %v15629_v21 = vpack.c.bf16 %v18223_v23, %v18222_v44  ;;  %v18226_v2 = vmax.f32 %v15106_v14, 0.0  ;;  %v18227_v57 = vmax.f32 %v15109_v25, 0.0  ;;  %v15645_v16 = vpack.c.bf16 %v6703_v50, %v6702_v32  ;;  %v18230_v14 = vld [vmem:[#allocation167_spill] sm:$0xff]  ;;  %8728 = vmatpush3.msra.mxu0 %v15389_v3  ;;  %8760 = vmatprep.subr.mxu1 %v15550_v35  ;;  %v18236_v50 = vld [vmem:[#allocation85_spill] sm:$0xff]  ;;  %v18239_v35 = vld [vmem:[#allocation114_spill] sm:$0xff] }
 0x98b   :  { %v6707_v42 = vmax.f32 %v6643_v52, 0.0  ;;  %v6650_v18 = vadd.f32 %v15047_v53, %v18228_v20  ;;  %v6651_v13 = vadd.f32 %v15047_v53, %v18229_v8  ;;  %v6994_v25 = vmul.f32 %v18230_v14, %v18230_v14  ;;  %v18233_v15 = vld [vmem:[#allocation171_spill] sm:$0xff] }
 0x98c   :  { %v15641_v55 = vpack.c.bf16 %v18227_v57, %v18226_v2  ;;  %v6710_v58 = vmax.f32 %v6646_v56, 0.0  ;;  %v6711_v28 = vmax.f32 %v6647_v4, 0.0  ;;  %v18231_v34 = vmax.f32 %v18182_v45, 0.0  ;;  %v18237_v52 = vld [vmem:[#allocation23_spill] sm:$0xff]  ;;  %v18241_v56 = vld [vmem:[#allocation60_spill] sm:$0xff]  ;;  %v18243_v2 = vld [vmem:[#allocation25_spill] sm:$0xff] }
 0x98d   :  { %v7012_v32 = vmul.f32 %v18232_v59, %v18232_v59  ;;  %v15663_v17 = vpack.c.bf16 %v6707_v42, %v6706_v48  ;;  %v6714_v31 = vmax.f32 %v6650_v18, 0.0  ;;  %v6715_v12 = vmax.f32 %v6651_v13, 0.0  ;;  %8729 = vmatprep.subr.mxu0 %v6994_v25  ;;  %v18240_v48 = vld [vmem:[#allocation108_spill] sm:$0xff]  ;;  %v18242_v4 = vld [vmem:[#allocation159_spill] sm:$0xff]  ;;  %v18247_v13 = vld [vmem:[#allocation113_spill] sm:$0xff] }
 0x98e   :  { %v15657_v62 = vpack.c.bf16 %v6717_v49, %v18231_v34  ;;  %v6993_v47 = vmul.f32 %v18233_v15, %v18233_v15  ;;  %v7027_v40 = vmul.f32 %v18234_v1, %v18234_v1  ;;  %v15670_v45 = vpack.c.bf16 %v6711_v28, %v6710_v58  ;;  %v18235_v49 = vld [vmem:[#allocation92_spill] sm:$0xff]  ;;  %8730 = vmatpush3.msra.mxu0 %v15383_v61  ;;  %v18244_v42 = vld [vmem:[#allocation19_spill] sm:$0xff]  ;;  %v18249_v34 = vld [vmem:[#allocation58_spill] sm:$0xff] }
 0x98f   :  { %v6977_v9 = vmul.f32 %v18235_v49, %v18235_v49  ;;  %v7011_v3 = vmul.f32 %v18236_v50, %v18236_v50  ;;  %8761 = vmatpush3.msra.mxu1 %v7012_v32  ;;  %v15677_v43 = vpack.c.bf16 %v6715_v12, %v6714_v31  ;;  %v15681_v44 = vsub.f32 %v18237_v52, %v15121_v10  ;;  %v18246_v18 = vld [vmem:[#allocation163_spill] sm:$0xff]  ;;  %v18248_v58 = vld [vmem:[#allocation124_spill] sm:$0xff]  ;;  %v18251_v31 = vld [vmem:[#allocation170_spill] sm:$0xff] }
 0x990   :  { %8762 = vmatprep.subr.mxu1 %v7027_v40  ;;  %v7026_v23 = vmul.f32 %v18239_v35, %v18239_v35  ;;  %8731 = vmatprep.subr.mxu0 %v6993_v47  ;;  %v6992_v63 = vmul.f32 %v18240_v48, %v18240_v48  ;;  %v15689_v22 = vsub.f32 %v18241_v56, %v15121_v10  ;;  %v6654_v28 = vmax.f32 %v18248_v58, 0.0  ;;  %v18252_v47 = vld [vmem:[#allocation165_spill] sm:$0xff]  ;;  %v9766_v58 = vld [vmem:[%s16461_s7 + $0x18] sm:$0xff]   ;;  %v18263_v1 = vld [vmem:[#allocation112_spill] sm:$0xff] }
 0x991   :  { %18238 = vst [vmem:[#allocation32_spill] sm:$0xff] %v15681_v44  ;;  %v6976_v61 = vmul.f32 %v18242_v4, %v18242_v4  ;;  %v7010_v57 = vmul.f32 %v18243_v2, %v18243_v2  ;;  %8763 = vmatpush3.msra.mxu1 %v7011_v3  ;;  %8732 = vmatpush3.msra.mxu0 %v6977_v9  ;;  %v9762_v9 = vld [vmem:[%s16461_s7 + $0x38] sm:$0xff]   ;;  %v18253_v3 = vld [vmem:[#allocation141_spill] sm:$0xff]  ;;  %v18254_v56 = vmov 1.0  }
 0x992   :  { %v15697_v20 = vsub.f32 %v18244_v42, %v15121_v10  ;;  %v6991_v8 = vmul.f32 %v18246_v18, %v18246_v18  ;;  %v7025_v25 = vmul.f32 %v18247_v13, %v18247_v13  ;;  %8764 = vmatprep.subr.mxu1 %v7026_v23  ;;  %8733 = vmatprep.subr.mxu0 %v6992_v63  ;;  %v6655_v52 = vmax.f32 %v18253_v3, 0.0  ;;  %v9767_v3 = vld [vmem:[%s16461_s7 + $0x10] sm:$0xff]   ;;  %v18265_v50 = vld [vmem:[#allocation182_spill] sm:$0xff] }
 0x993   :  { %v15706_v32 = vsub.f32 %v18249_v34, %v15121_v10  ;;  %v6975_v12 = vmul.f32 %v18251_v31, %v18251_v31  ;;  %v7009_v40 = vmul.f32 %v18252_v47, %v18252_v47  ;;  %8765 = vmatpush3.msra.mxu1 %v7010_v57  ;;  %8734 = vmatpush3.msra.mxu0 %v6976_v61  ;;  %v9763_v61 = vld [vmem:[%s16461_s7 + $0x30] sm:$0xff]  }
 0x994   :  { %18245 = vst [vmem:[#allocation118_spill] sm:$0xff] %v15697_v20  ;;  %8766 = vmatprep.subr.mxu1 %v7025_v25  ;;  %v7024_v23 = vmul.f32 %v15681_v44, %v15681_v44  ;;  %8735 = vmatprep.subr.mxu0 %v6991_v8  ;;  %v7008_v10 = vmul.f32 %v15689_v22, %v15689_v22  ;;  %v9764_v8 = vld [vmem:[%s16461_s7 + $0x28] sm:$0xff]   ;;  %v9765_v25 = vld [vmem:[%s16461_s7 + $0x20] sm:$0xff]   ;;  %v18256_v34 = vld [vmem:[#allocation57_spill] sm:$0xff] }
 0x995   :  { %18250 = vst [vmem:[#allocation106_spill] sm:$0xff] %v15706_v32  ;;  %8767 = vmatpush3.msra.mxu1 %v7009_v40  ;;  %8736 = vmatpush3.msra.mxu0 %v6975_v12  ;;  %v7023_v63 = vmul.f32 %v15697_v20, %v15697_v20  ;;  %v7007_v57 = vmul.f32 %v15706_v32, %v15706_v32  ;;  %v18257_v40 = vld [vmem:[#allocation97_spill] sm:$0xff] }
 0x996   :  { %8768 = vmatprep.subr.mxu1 %v7024_v23  ;;  %7104 = vmatmul.mubr.f32.vlgmr.msra.gmra.mxu0 %v18254_v56  ;;  %v6718_v42 = vpack.c.bf16 %v6655_v52, %v6654_v28  ;;  %v18255_v28 = vld [vmem:[#allocation180_spill] sm:$0xff]  ;;  %v18258_v52 = vld [vmem:[#allocation179_spill] sm:$0xff] }
 0x997   :  { %8769 = vmatpush3.msra.mxu1 %v7008_v10  ;;  %9535 = vmatprep.subr.bf16.mxu0 %v9762_v9  ;;  %v6450_v12 = vmul.f32 %v18256_v34, %v18255_v28  ;;  %v6452_v23 = vmul.f32 %v18256_v34, %v18258_v52  ;;  %v18259_v10 = vld [vmem:[#allocation111_spill] sm:$0xff]  ;;  %v18261_v28 = vld [vmem:[#allocation98_spill] sm:$0xff] }
 0x998   :  { %8770 = vmatprep.subr.mxu1 %v7023_v63  ;;  %9536 = vmatpush3.bf16.msra.mxu0 %v9762_v9  ;;  %v6451_v9 = vmul.f32 %v18256_v34, %v18257_v40  ;;  %v6453_v63 = vmul.f32 %v18256_v34, %v18259_v10  ;;  %v6454_v40 = vmul.f32 %v18256_v34, %v18261_v28  ;;  %v18262_v52 = vld [vmem:[#allocation107_spill] sm:$0xff] }
 0x999   :  { %8771 = vmatpush3.msra.mxu1 %v7007_v57  ;;  %9551 = vmatprep.mubr.bf16.mxu0 %v6718_v42  ;;  %v9768_v42 = vld [vmem:[%s16461_s7 + $0x8] sm:$0xff]   ;;  %v9769_v10 = vld [vmem:[%s16461_s7] sm:$0xff]  }
 0x99a   :  { %7174 = vmatmul.mubr.f32.vlgmr.msra.gmra.mxu1 %v18254_v56  ;;  %9537 = vmatprep.subr.bf16.mxu0 %v9763_v61  ;;  %v18260_v56 = vld [vmem:[#allocation138_spill] sm:$0xff] }
 0x99b   :  { %v6522_v57 = vmul.f32 %v18260_v56, %v6451_v9 }
 0x99c   :  { %9538 = vmatpush3.bf16.msra.mxu0 %v9763_v61  ;;  %v6521_v61 = vmul.f32 %v18260_v56, %v6450_v12 }
 0x99d   :  { %9539 = vmatprep.subr.bf16.mxu0 %v9764_v8  ;;  %v6593_v9 = vadd.f32 %v15047_v53, %v6522_v57 }
 0x99e   :  { %v6592_v12 = vadd.f32 %v15047_v53, %v6521_v61  ;;  %v6525_v61 = vmul.f32 %v18260_v56, %v6454_v40 }
 0x99f   :  { %v6657_v35 = vmax.f32 %v6593_v9, 0.0 }
 0x9a0   :  { %9540 = vmatpush3.bf16.msra.mxu0 %v9764_v8  ;;  %v6523_v8 = vmul.f32 %v18260_v56, %v6452_v23  ;;  %v6456_v23 = vmul.f32 %v18256_v34, %v18263_v1 }
 0x9a1   :  { %9541 = vmatprep.subr.bf16.mxu0 %v9765_v25 }
 0x9a2   :  { %v6594_v28 = vadd.f32 %v15047_v53, %v6523_v8  ;;  %v6527_v20 = vmul.f32 %v18260_v56, %v6456_v23  ;;  %v18266_v8 = vld [vmem:[#allocation121_spill] sm:$0xff] }
 0x9a3   :  { %v18268_v23 = vld [vmem:[#allocation117_spill] sm:$0xff] }
 0x9a4   :  { %9542 = vmatpush3.bf16.msra.mxu0 %v9765_v25  ;;  %v6524_v25 = vmul.f32 %v18260_v56, %v6453_v63  ;;  %v18264_v63 = vld [vmem:[#allocation116_spill] sm:$0xff]  ;;  %v6658_v1 = vmax.f32 %v6594_v28, 0.0 }
 0x9a5   :  { %9543 = vmatprep.subr.bf16.mxu0 %v9766_v58 }
 0x9a6   :  { %v6595_v44 = vadd.f32 %v15047_v53, %v6524_v25  ;;  %v6459_v25 = vmul.f32 %v18256_v34, %v18266_v8 }
 0x9a8   :  { %9544 = vmatpush3.bf16.msra.mxu0 %v9766_v58  ;;  %v6455_v58 = vmul.f32 %v18256_v34, %v18262_v52  ;;  %v6656_v52 = vmax.f32 %v6592_v12, 0.0  ;;  %v6659_v59 = vmax.f32 %v6595_v44, 0.0  ;;  %v6598_v44 = vadd.f32 %v15047_v53, %v6527_v20  ;;  %v18270_v20 = vld [vmem:[#allocation103_spill] sm:$0xff] }
 0x9a9   :  { %9545 = vmatprep.subr.bf16.mxu0 %v9767_v3  ;;  %v6530_v8 = vmul.f32 %v18260_v56, %v6459_v25 }
 0x9aa   :  { %v6526_v57 = vmul.f32 %v18260_v56, %v6455_v58  ;;  %v6596_v58 = vadd.f32 %v15047_v53, %v6525_v61  ;;  %v6719_v9 = vpack.c.bf16 %v6657_v35, %v6656_v52  ;;  %v6720_v28 = vpack.c.bf16 %v6659_v59, %v6658_v1  ;;  %v18271_v1 = vld [vmem:[#allocation186_spill] sm:$0xff] }
 0x9ab   :  { %v6601_v25 = vadd.f32 %v15047_v53, %v6530_v8 }
 0x9ac   :  { %9546 = vmatpush3.bf16.msra.mxu0 %v9767_v3  ;;  %v6457_v3 = vmul.f32 %v18256_v34, %v18264_v63  ;;  %v6458_v63 = vmul.f32 %v18256_v34, %v18265_v50  ;;  %v6597_v12 = vadd.f32 %v15047_v53, %v6526_v57  ;;  %v6662_v57 = vmax.f32 %v6598_v44, 0.0 }
 0x9ad   :  { %9547 = vmatprep.subr.bf16.mxu0 %v9768_v42 }
 0x9ae   :  { %v6528_v13 = vmul.f32 %v18260_v56, %v6457_v3  ;;  %v6461_v3 = vmul.f32 %v18256_v34, %v18268_v23  ;;  %v6661_v32 = vmax.f32 %v6597_v12, 0.0  ;;  %v18269_v23 = vld [vmem:[#allocation132_spill] sm:$0xff]  ;;  %v18272_v12 = vld [vmem:[#allocation137_spill] sm:$0xff] }
 0x9af   :  { %v6462_v59 = vmul.f32 %v18256_v34, %v18269_v23 }
 0x9b0   :  { %9548 = vmatpush3.bf16.msra.mxu0 %v9768_v42  ;;  %v18267_v42 = vld [vmem:[#allocation183_spill] sm:$0xff]  ;;  %v6599_v50 = vadd.f32 %v15047_v53, %v6528_v13  ;;  %v6532_v35 = vmul.f32 %v18260_v56, %v6461_v3  ;;  %v6463_v13 = vmul.f32 %v18256_v34, %v18270_v20 }
 0x9b1   :  { %9549 = vmatprep.subr.bf16.mxu0 %v9769_v10  ;;  %v6460_v40 = vmul.f32 %v18256_v34, %v18267_v42  ;;  %v6660_v42 = vmax.f32 %v6596_v58, 0.0 }
 0x9b2   :  { %v6663_v52 = vmax.f32 %v6599_v50, 0.0  ;;  %v6603_v44 = vadd.f32 %v15047_v53, %v6532_v35  ;;  %v6533_v50 = vmul.f32 %v18260_v56, %v6462_v59  ;;  %v6534_v23 = vmul.f32 %v18260_v56, %v6463_v13 }
 0x9b3   :  { %v6531_v61 = vmul.f32 %v18260_v56, %v6460_v40  ;;  %v6721_v58 = vpack.c.bf16 %v6661_v32, %v6660_v42  ;;  %v6465_v40 = vmul.f32 %v18256_v34, %v18272_v12  ;;  %v18273_v12 = vld [vmem:[#allocation148_spill] sm:$0xff] }
 0x9b4   :  { %9550 = vmatpush3.bf16.msra.mxu0 %v9769_v10  ;;  %v6529_v10 = vmul.f32 %v18260_v56, %v6458_v63  ;;  %v6722_v3 = vpack.c.bf16 %v6663_v52, %v6662_v57  ;;  %v6667_v42 = vmax.f32 %v6603_v44, 0.0  ;;  %v6466_v57 = vmul.f32 %v18256_v34, %v18273_v12  ;;  %v18275_v52 = vld [vmem:[#allocation184_spill] sm:$0xff] }
 0x9b5   :  { %v6536_v32 = vmul.f32 %v18260_v56, %v6465_v40  ;;  %v6604_v59 = vadd.f32 %v15047_v53, %v6533_v50  ;;  %v6605_v13 = vadd.f32 %v15047_v53, %v6534_v23 }
 0x9b6   :  { %v6600_v63 = vadd.f32 %v15047_v53, %v6529_v10  ;;  %v6537_v44 = vmul.f32 %v18260_v56, %v6466_v57 }
 0x9b7   :  { %9552 = vmatmul.mubr.bf16.vlgmr.msra.gmra.mxu0 %v6719_v9  ;;  %v6464_v9 = vmul.f32 %v18256_v34, %v18271_v1  ;;  %v6665_v1 = vmax.f32 %v6601_v25, 0.0  ;;  %v18276_v25 = vld [vmem:[#allocation123_spill] sm:$0xff] }
 0x9b8   :  { %9555 = vmatprep.mubr.bf16.mxu0 %v6720_v28  ;;  %v6602_v28 = vadd.f32 %v15047_v53, %v6531_v61  ;;  %v6664_v20 = vmax.f32 %v6600_v63, 0.0  ;;  %v18274_v61 = vld [vmem:[#allocation120_spill] sm:$0xff] }
 0x9b9   :  { %v6535_v10 = vmul.f32 %v18260_v56, %v6464_v9  ;;  %v6467_v35 = vmul.f32 %v18256_v34, %v18274_v61  ;;  %v6469_v9 = vmul.f32 %v18256_v34, %v18276_v25  ;;  %v6668_v61 = vmax.f32 %v6604_v59, 0.0  ;;  %v18281_v25 = vld [vmem:[#allocation158_spill] sm:$0xff] }
 0x9ba   :  { %v6666_v8 = vmax.f32 %v6602_v28, 0.0  ;;  %v6723_v63 = vpack.c.bf16 %v6665_v1, %v6664_v20  ;;  %v6607_v28 = vadd.f32 %v15047_v53, %v6536_v32 }
 0x9bb   :  { %v6538_v12 = vmul.f32 %v18260_v56, %v6467_v35  ;;  %v6540_v23 = vmul.f32 %v18260_v56, %v6469_v9 }
 0x9bc   :  { %v6724_v40 = vpack.c.bf16 %v6667_v42, %v6666_v8  ;;  %v6671_v1 = vmax.f32 %v6607_v28, 0.0 }
 0x9bd   :  { %v6611_v57 = vadd.f32 %v15047_v53, %v6540_v23 }
 0x9bf   :  { %9556 = vmatmul.mubr.bf16.gmra.mxu0 %v6721_v58  ;;  %v6468_v58 = vmul.f32 %v18256_v34, %v18275_v52  ;;  %v6669_v52 = vmax.f32 %v6605_v13, 0.0  ;;  %v6608_v34 = vadd.f32 %v15047_v53, %v6537_v44 }
 0x9c0   :  { %9559 = vmatprep.mubr.bf16.mxu0 %v6722_v3  ;;  %v6606_v3 = vadd.f32 %v15047_v53, %v6535_v10  ;;  %v6609_v10 = vadd.f32 %v15047_v53, %v6538_v12 }
 0x9c1   :  { %v6539_v50 = vmul.f32 %v18260_v56, %v6468_v58  ;;  %v6725_v8 = vpack.c.bf16 %v6669_v52, %v6668_v61  ;;  %v6672_v35 = vmax.f32 %v6608_v34, 0.0  ;;  %v6675_v58 = vmax.f32 %v6611_v57, 0.0  ;;  %v18282_v52 = vld [vmem:[#allocation29_spill] sm:$0xff] }
 0x9c2   :  { %v6670_v20 = vmax.f32 %v6606_v3, 0.0  ;;  %v6673_v59 = vmax.f32 %v6609_v10, 0.0 }
 0x9c3   :  { %v6610_v42 = vadd.f32 %v15047_v53, %v6539_v50 }
 0x9c4   :  { %v6726_v32 = vpack.c.bf16 %v6671_v1, %v6670_v20 }
 0x9c5   :  { %v6674_v13 = vmax.f32 %v6610_v42, 0.0  ;;  %v18283_v42 = vld [vmem:[#allocation133_spill] sm:$0xff] }
 0x9c7   :  { %9560 = vmatmul.mubr.bf16.gmra.mxu0 %v6723_v63  ;;  %v6727_v63 = vpack.c.bf16 %v6673_v59, %v6672_v35  ;;  %v6728_v56 = vpack.c.bf16 %v6675_v58, %v6674_v13  ;;  %v18284_v35 = vld [vmem:[#allocation93_spill] sm:$0xff] }
 0x9c8   :  { %9563 = vmatprep.mubr.bf16.mxu0 %v6724_v40 }
 0x9cf   :  { %9564 = vmatmul.mubr.bf16.gmra.mxu0 %v6725_v8 }
 0x9d0   :  { %9567 = vmatprep.mubr.bf16.mxu0 %v6726_v32 }
 0x9d7   :  { %9568 = vmatmul.mubr.bf16.gmra.mxu0 %v6727_v63  ;;  %v18285_v63 = vld [vmem:[#allocation17_spill] sm:$0xff] }
 0x9d8   :  { %9571 = vmatprep.mubr.bf16.mxu0 %v6728_v56 }
 0x9df   :  { %9572 = vmatmul.mubr.bf16.gmra.mxu0 %v15519_v33 }
 0x9e0   :  { %9575 = vmatprep.mubr.bf16.mxu0 %v15558_v46 }
 0x9e7   :  { %9576 = vmatmul.mubr.bf16.gmra.mxu0 %v15530_v29 }
 0x9e8   :  { %9579 = vmatprep.mubr.bf16.mxu0 %v15564_v19 }
 0x9ef   :  { %9580 = vmatmul.mubr.bf16.gmra.mxu0 %v15541_v24 }
 0x9f0   :  { %9583 = vmatprep.mubr.bf16.mxu0 %v15575_v26 }
 0x9f7   :  { %9584 = vmatmul.mubr.bf16.gmra.mxu0 %v15556_v27 }
 0x9f8   :  { %9587 = vmatprep.mubr.bf16.mxu0 %v15603_v6 }
 0x9ff   :  { %9588 = vmatmul.mubr.bf16.gmra.mxu0 %v15572_v60 }
 0xa00   :  { %9591 = vmatprep.mubr.bf16.mxu0 %v15609_v5  ;;  %v15854_v5 = vld [vmem:[%s16464_s8] ss:$0 sm:$0xff] }
 0xa07   :  { %9592 = vmatmul.mubr.bf16.gmra.mxu0 %v15587_v11 }
 0xa08   :  { %9595 = vmatprep.mubr.bf16.mxu0 %v15621_v30 }
 0xa0f   :  { %9596 = vmatmul.mubr.bf16.gmra.mxu0 %v15597_v54  ;;  %v18277_v54 = vld [vmem:[#allocation81_spill] sm:$0xff] }
 0xa10   :  { %9599 = vmatprep.mubr.bf16.mxu0 %v15645_v16 }
 0xa17   :  { %9600 = vmatmul.mubr.bf16.gmra.mxu0 %v15615_v39 }
 0xa18   :  { %9603 = vmatprep.mubr.bf16.mxu0 %v15663_v17  ;;  %v18279_v17 = vld [vmem:[#allocation134_spill] sm:$0xff] }
 0xa1f   :  { %9604 = vmatmul.mubr.bf16.gmra.mxu0 %v15629_v21  ;;  %v18278_v21 = vld [vmem:[#allocation73_spill] sm:$0xff] }
 0xa20   :  { %9607 = vmatprep.mubr.bf16.mxu0 %v15670_v45 }
 0xa27   :  { %9608 = vmatmul.mubr.bf16.gmra.mxu0 %v15641_v55 }
 0xa28   :  { %9611 = vmatprep.mubr.bf16.mxu0 %v15677_v43  ;;  %v18280_v43 = vld [vmem:[#allocation160_spill] sm:$0xff] }
 0xa2f   :  { %9612 = vmatmul.mubr.bf16.gmra.mxu0 %v15657_v62  ;;  %v15867_v62 = vld [vmem:[%s16465_s9] ss:$0 sm:$0xff] }
 0xa56   :  { %v8737_v53 = vpop.f32.mrf.mxu0 }
 0xa58   :  { %v8738_v24 = vpop.f32.mrf.mxu0 }
 0xa59   :  { %v8739_v33 = vadd.f32 %v8738_v24, %v8737_v53  ;;  %v18286_v53 = vld [vmem:[#allocation169_spill] sm:$0xff] }
 0xa5a   :  { %v8772_v29 = vpop.f32.mrf.mxu1 }
 0xa5c   :  { %v8773_v27 = vpop.f32.mrf.mxu1 }
 0xa5d   :  { %v8774_v46 = vadd.f32 %v8773_v27, %v8772_v29 }
 0xa5f   :  { %v7176_v19 = vadd.f32 %v8774_v46, %v8739_v33 }
 0xa61   :  { %v7179_v60 = vmul.f32 0.001953125, %v7176_v19 }
 0xa63   :  { %v7180_v26 = vadd.f32 1e-05, %v7179_v60 }
 0xa65   :  { %9774 = vrsqrt.f32 %v7180_v26 }
 0xa72   :  { %v9775_v11 = vpop.eup %9774 }
 0xa73   :  { %v15849_v6 = vrot.slane %v9775_v11, %v18277_v54 }
 0xa75   :  { %v7188_v39 = vmul.f32 %v15849_v6, %v18235_v49  ;;  %v7186_v30 = vmul.f32 %v15849_v6, %v18251_v31  ;;  %v7189_v55 = vmul.f32 %v15849_v6, %v18278_v21  ;;  %v7187_v16 = vmul.f32 %v15849_v6, %v18242_v4 }
 0xa76   :  { %v7192_v45 = vmul.f32 %v15849_v6, %v18279_v17  ;;  %v7190_v49 = vmul.f32 %v15849_v6, %v18280_v43  ;;  %v7193_v31 = vmul.f32 %v15849_v6, %v18281_v25  ;;  %v7191_v50 = vmul.f32 %v15849_v6, %v18282_v52 }
 0xa77   :  { %v7259_v9 = vmul.f32 %v15854_v5, %v7188_v39  ;;  %v9553_v40 = vpop.f32.mrf.mxu0  ;;  %v7257_v3 = vmul.f32 %v15854_v5, %v7186_v30  ;;  %v7260_v4 = vmul.f32 %v15854_v5, %v7189_v55  ;;  %v7258_v28 = vmul.f32 %v15854_v5, %v7187_v16  ;;  %v18287_v55 = vld [vmem:[#allocation62_spill] sm:$0xff] }
 0xa78   :  { %v7263_v20 = vmul.f32 %v15854_v5, %v7192_v45  ;;  %v7261_v1 = vmul.f32 %v15854_v5, %v7190_v49  ;;  %v7264_v34 = vmul.f32 %v15854_v5, %v7193_v31  ;;  %v7196_v57 = vmul.f32 %v15849_v6, %v18283_v42 }
 0xa79   :  { %v7330_v44 = vadd.f32 %v15867_v62, %v7259_v9  ;;  %v7328_v12 = vadd.f32 %v15867_v62, %v7257_v3  ;;  %v7474_v61 = vpop.f32.mrf.mxu0  ;;  %v7331_v23 = vadd.f32 %v15867_v62, %v7260_v4  ;;  %v7194_v59 = vmul.f32 %v15849_v6, %v18284_v35  ;;  %v18289_v4 = vld [vmem:[#allocation127_spill] sm:$0xff] }
 0xa7a   :  { %v7329_v58 = vadd.f32 %v15867_v62, %v7258_v28  ;;  %v7197_v56 = vmul.f32 %v15849_v6, %v18285_v63  ;;  %v7195_v24 = vmul.f32 %v15849_v6, %v18286_v53  ;;  %v7262_v46 = vmul.f32 %v15854_v5, %v7191_v50 }
 0xa7b   :  { %v7483_v10 = vadd.f32 %v9553_v40, %v7330_v44  ;;  %v7475_v8 = vadd.f32 %v7474_v61, %v7328_v12  ;;  %v9554_v32 = vpop.f32.mrf.mxu0  ;;  %v7200_v19 = vmul.f32 %v15849_v6, %v15199_v37  ;;  %v7334_v11 = vadd.f32 %v15867_v62, %v7263_v20  ;;  %v18288_v40 = vld [vmem:[#allocation67_spill] sm:$0xff] }
 0xa7c   :  { %v7486_v13 = vadd.f32 %v9554_v32, %v7331_v23  ;;  %v7332_v54 = vadd.f32 %v15867_v62, %v7261_v1  ;;  %v7335_v30 = vadd.f32 %v15867_v62, %v7264_v34  ;;  %v7267_v21 = vmul.f32 %v15854_v5, %v7196_v57 }
 0xa7d   :  { %v7731_v29 = vmax.f32 %v7483_v10, 0.0  ;;  %v7729_v33 = vmax.f32 %v7475_v8, 0.0  ;;  %v7477_v27 = vpop.f32.mrf.mxu0  ;;  %v7265_v37 = vmul.f32 %v15854_v5, %v7194_v59  ;;  %v7198_v16 = vmul.f32 %v15849_v6, %v18287_v55 }
 0xa7e   :  { %v7732_v60 = vmax.f32 %v7486_v13, 0.0  ;;  %v7478_v26 = vadd.f32 %v7477_v27, %v7329_v58  ;;  %v7268_v43 = vmul.f32 %v15854_v5, %v7197_v56  ;;  %v7266_v49 = vmul.f32 %v15854_v5, %v7195_v24 }
 0xa7f   :  { %7795 = vst [vmem:[%s16466_s10 + $0x10] sm:$0xff] %v7731_v29  ;;  %7793 = vst [vmem:[%s16466_s10] sm:$0xff] %v7729_v33  ;;  %v9557_v39 = vpop.f32.mrf.mxu0  ;;  %v7333_v31 = vadd.f32 %v15867_v62, %v7262_v46  ;;  %v7271_v9 = vmul.f32 %v15854_v5, %v7200_v19  ;;  %v7201_v3 = vmul.f32 %v15849_v6, %v18288_v40  ;;  %v18290_v46 = vld [vmem:[#allocation166_spill] sm:$0xff] }
 0xa80   :  { %7796 = vst [vmem:[%s16466_s10 + $0x18] sm:$0xff] %v7732_v60  ;;  %v7730_v17 = vmax.f32 %v7478_v26, 0.0  ;;  %v7499_v45 = vadd.f32 %v9557_v39, %v7334_v11  ;;  %v7199_v28 = vmul.f32 %v15849_v6, %v18289_v4  ;;  %v7204_v61 = vmul.f32 %v15849_v6, %v18233_v15  ;;  %v18291_v39 = vld [vmem:[#allocation164_spill] sm:$0xff] }
 0xa81   :  { %v7490_v25 = vpop.f32.mrf.mxu0  ;;  %v7202_v52 = vmul.f32 %v15849_v6, %v18246_v18  ;;  %v7338_v23 = vadd.f32 %v15867_v62, %v7267_v21  ;;  %v7336_v20 = vadd.f32 %v15867_v62, %v7265_v37  ;;  %v7269_v1 = vmul.f32 %v15854_v5, %v7198_v16 }
 0xa82   :  { %7794 = vst [vmem:[%s16466_s10 + $0x8] sm:$0xff] %v7730_v17  ;;  %v7735_v44 = vmax.f32 %v7499_v45, 0.0  ;;  %v7491_v12 = vadd.f32 %v7490_v25, %v7332_v54  ;;  %v7205_v34 = vmul.f32 %v15849_v6, %v18230_v14  ;;  %v7339_v15 = vadd.f32 %v15867_v62, %v7268_v43  ;;  %v18292_v43 = vld [vmem:[#allocation168_spill] sm:$0xff] }
 0xa83   :  { %v9558_v50 = vpop.f32.mrf.mxu0  ;;  %v7337_v18 = vadd.f32 %v15867_v62, %v7266_v49  ;;  %v7342_v42 = vadd.f32 %v15867_v62, %v7271_v9  ;;  %v7272_v57 = vmul.f32 %v15854_v5, %v7201_v3  ;;  %v7270_v35 = vmul.f32 %v15854_v5, %v7199_v28 }
 0xa84   :  { %7799 = vst [vmem:[%s16466_s10 + $0x30] sm:$0xff] %v7735_v44  ;;  %v7733_v10 = vmax.f32 %v7491_v12, 0.0  ;;  %v7502_v8 = vadd.f32 %v9558_v50, %v7335_v30  ;;  %v7203_v14 = vmul.f32 %v15849_v6, %v18240_v48  ;;  %v7275_v58 = vmul.f32 %v15854_v5, %v7204_v61  ;;  %v18293_v50 = vld [vmem:[#allocation162_spill] sm:$0xff] }
 0xa85   :  { %v7493_v32 = vpop.f32.mrf.mxu0  ;;  %v7273_v63 = vmul.f32 %v15854_v5, %v7202_v52  ;;  %v7340_v53 = vadd.f32 %v15867_v62, %v7269_v1  ;;  %v7276_v24 = vmul.f32 %v15854_v5, %v7205_v34  ;;  %v7208_v48 = vmul.f32 %v15849_v6, %v15231_v36 }
 0xa86   :  { %7797 = vst [vmem:[%s16466_s10 + $0x20] sm:$0xff] %v7733_v10  ;;  %v7736_v59 = vmax.f32 %v7502_v8, 0.0  ;;  %v7494_v13 = vadd.f32 %v7493_v32, %v7333_v31  ;;  %v7274_v29 = vmul.f32 %v15854_v5, %v7203_v14  ;;  %v7206_v19 = vmul.f32 %v15849_v6, %v18290_v46 }
 0xa87   :  { %v9561_v56 = vpop.f32.mrf.mxu0  ;;  %v7209_v60 = vmul.f32 %v15849_v6, %v15235_v38  ;;  %v7343_v11 = vadd.f32 %v15867_v62, %v7272_v57  ;;  %v15964_v54 = vadd.f32 %v15867_v62, %v7270_v35  ;;  %v7207_v36 = vmul.f32 %v15849_v6, %v15227_v41 }
 0xa88   :  { %7800 = vst [vmem:[%s16466_s10 + $0x38] sm:$0xff] %v7736_v59  ;;  %v7734_v33 = vmax.f32 %v7494_v13, 0.0  ;;  %v7515_v27 = vadd.f32 %v9561_v56, %v7338_v23  ;;  %v7212_v30 = vmul.f32 %v15849_v6, %v18291_v39  ;;  %v15974_v38 = vadd.f32 %v15867_v62, %v7275_v58 }
 0xa89   :  { %v7506_v26 = vpop.f32.mrf.mxu0  ;;  %v15977_v55 = vadd.f32 %v15867_v62, %v7273_v63  ;;  %v15980_v17 = vadd.f32 %v15867_v62, %v7276_v24  ;;  %v15983_v41 = vadd.f32 %v15867_v62, %v7274_v29  ;;  %v7279_v45 = vmul.f32 %v15854_v5, %v7208_v48 }
 0xa8a   :  { %7798 = vst [vmem:[%s16466_s10 + $0x28] sm:$0xff] %v7734_v33  ;;  %v7739_v21 = vmax.f32 %v7515_v27, 0.0  ;;  %v7507_v37 = vadd.f32 %v7506_v26, %v7336_v20  ;;  %v7210_v49 = vmul.f32 %v15849_v6, %v18292_v43  ;;  %v7277_v9 = vmul.f32 %v15854_v5, %v7206_v19  ;;  %v18294_v20 = vld [vmem:[#allocation129_spill] sm:$0xff] }
 0xa8b   :  { %v9562_v16 = vpop.f32.mrf.mxu0  ;;  %v7280_v40 = vmul.f32 %v15854_v5, %v7209_v60  ;;  %v7278_v4 = vmul.f32 %v15854_v5, %v7207_v36  ;;  %v7283_v28 = vmul.f32 %v15854_v5, %v7212_v30  ;;  %v7213_v44 = vmul.f32 %v15849_v6, %v15251_v7 }
 0xa8c   :  { %7803 = vst [vmem:[%s16466_s10 + $0x50] sm:$0xff] %v7739_v21  ;;  %v7737_v25 = vmax.f32 %v7507_v37, 0.0  ;;  %v7518_v31 = vadd.f32 %v9562_v16, %v7339_v15  ;;  %v7211_v12 = vmul.f32 %v15849_v6, %v15243_v0  ;;  %v7216_v23 = vmul.f32 %v15849_v6, %v18293_v50  ;;  %v18295_v0 = vld [vmem:[#allocation161_spill] sm:$0xff]  ;;  %v18296_v37 = vld [vmem:[#allocation84_spill] sm:$0xff] }
 0xa8d   :  { %v7509_v3 = vpop.f32.mrf.mxu0  ;;  %v7214_v1 = vmul.f32 %v15849_v6, %v18294_v20  ;;  %v7281_v10 = vmul.f32 %v15854_v5, %v7210_v49  ;;  %v7284_v7 = vmul.f32 %v15854_v5, %v7213_v44  ;;  %v7217_v15 = vmul.f32 %v15849_v6, %v18295_v0 }
 0xa8e   :  { %7801 = vst [vmem:[%s16466_s10 + $0x40] sm:$0xff] %v7737_v25  ;;  %v7740_v61 = vmax.f32 %v7518_v31, 0.0  ;;  %v7510_v52 = vadd.f32 %v7509_v3, %v7337_v18  ;;  %v7282_v8 = vmul.f32 %v15854_v5, %v7211_v12  ;;  %v16015_v57 = vadd.f32 %v15867_v62, %v7279_v45  ;;  %v18297_v25 = vld [vmem:[#allocation106_spill] sm:$0xff] }
 0xa8f   :  { %v9565_v34 = vpop.f32.mrf.mxu0  ;;  %v16018_v35 = vadd.f32 %v15867_v62, %v7277_v9  ;;  %v16021_v59 = vadd.f32 %v15867_v62, %v7280_v40  ;;  %v7287_v13 = vmul.f32 %v15854_v5, %v7216_v23  ;;  %v7285_v58 = vmul.f32 %v15854_v5, %v7214_v1  ;;  %v18298_v40 = vld [vmem:[#allocation85_spill] sm:$0xff]  ;;  %v18300_v23 = vld [vmem:[#allocation3_spill] sm:$0xff] }
 0xa90   :  { %7804 = vst [vmem:[%s16466_s10 + $0x58] sm:$0xff] %v7740_v61  ;;  %v7738_v18 = vmax.f32 %v7510_v52, 0.0  ;;  %v7531_v32 = vadd.f32 %v9565_v34, %v7342_v42  ;;  %v7215_v63 = vmul.f32 %v15849_v6, %v15259_v51  ;;  %v16031_v24 = vadd.f32 %v15867_v62, %v7278_v4  ;;  %v18299_v52 = vld [vmem:[#allocation126_spill] sm:$0xff]  ;;  %v18301_v34 = vld [vmem:[#allocation100_spill] sm:$0xff] }
 0xa91   :  { %v7522_v14 = vpop.f32.mrf.mxu0  ;;  %v16034_v29 = vadd.f32 %v15867_v62, %v7283_v28  ;;  %v16037_v33 = vadd.f32 %v15867_v62, %v7281_v10  ;;  %v16040_v27 = vadd.f32 %v15867_v62, %v7284_v7  ;;  %v16043_v51 = vadd.f32 %v15867_v62, %v7282_v8  ;;  %v18302_v7 = vld [vmem:[#allocation110_spill] sm:$0xff] }
 0xa92   :  { %7802 = vst [vmem:[%s16466_s10 + $0x48] sm:$0xff] %v7738_v18  ;;  %v7743_v42 = vmax.f32 %v7531_v32, 0.0  ;;  %v7523_v56 = vadd.f32 %v7522_v14, %v7340_v53  ;;  %v16046_v46 = vmul.f32 %v15854_v5, %v7217_v15  ;;  %v7221_v60 = vmul.f32 %v15849_v6, %v18243_v2  ;;  %v18303_v14 = vld [vmem:[#allocation83_spill] sm:$0xff] }
 0xa93   :  { %v9566_v48 = vpop.f32.mrf.mxu0  ;;  %v7219_v26 = vmul.f32 %v15849_v6, %v15689_v22  ;;  %v16056_v39 = vadd.f32 %v15867_v62, %v7287_v13  ;;  %v16059_v30 = vadd.f32 %v15867_v62, %v7285_v58  ;;  %v16062_v21 = vmul.f32 %v15854_v5, %v7215_v63 }
 0xa94   :  { %7807 = vst [vmem:[%s16466_s10 + $0x70] sm:$0xff] %v7743_v42  ;;  %v7741_v53 = vmax.f32 %v7523_v56, 0.0  ;;  %v7534_v19 = vadd.f32 %v9566_v48, %v7343_v11  ;;  %v7224_v16 = vmul.f32 %v15849_v6, %v18296_v37  ;;  %v7292_v11 = vmul.f32 %v15854_v5, %v7221_v60  ;;  %v18304_v60 = vld [vmem:[#allocation82_spill] sm:$0xff] }
 0xa95   :  { %v7525_v36 = vpop.f32.mrf.mxu0  ;;  %v7290_v45 = vmul.f32 %v15854_v5, %v7219_v26  ;;  %v16074_v49 = vmul.f32 %v15849_v6, %v18252_v47  ;;  %v16078_v31 = vmul.f32 %v15849_v6, %v18297_v25  ;;  %v7222_v3 = vmul.f32 %v15849_v6, %v18298_v40  ;;  %v18306_v25 = vld [vmem:[#allocation21_spill] sm:$0xff] }
 0xa96   :  { %7805 = vst [vmem:[%s16466_s10 + $0x60] sm:$0xff] %v7741_v53  ;;  %v7744_v2 = vmax.f32 %v7534_v19, 0.0  ;;  %v7526_v22 = vadd.f32 %v7525_v36, %v15964_v54  ;;  %v7295_v9 = vmul.f32 %v15854_v5, %v7224_v16  ;;  %v16088_v28 = vadd.f32 %v15867_v62, %v7292_v11 }
 0xa97   :  { %v9569_v43 = vpop.f32.mrf.mxu0  ;;  %v16091_v47 = vadd.f32 %v15867_v62, %v7290_v45  ;;  %v7293_v61 = vmul.f32 %v15854_v5, %v7222_v3  ;;  %v7225_v50 = vmul.f32 %v15849_v6, %v18299_v52  ;;  %v7223_v20 = vmul.f32 %v15849_v6, %v18300_v23  ;;  %v18305_v45 = vld [vmem:[#allocation128_spill] sm:$0xff]  ;;  %v18307_v3 = vld [vmem:[#allocation119_spill] sm:$0xff] }
 0xa98   :  { %7808 = vst [vmem:[%s16466_s10 + $0x78] sm:$0xff] %v7744_v2  ;;  %v7742_v54 = vmax.f32 %v7526_v22, 0.0  ;;  %v7547_v4 = vadd.f32 %v9569_v43, %v15974_v38  ;;  %v16094_v12 = vadd.f32 %v15867_v62, %v7295_v9  ;;  %v7228_v10 = vmul.f32 %v15849_v6, %v18301_v34 }
 0xa99   :  { %v7538_v44 = vpop.f32.mrf.mxu0  ;;  %v7226_v8 = vmul.f32 %v15849_v6, %v18302_v7  ;;  %v16110_v15 = vadd.f32 %v15867_v62, %v7293_v61  ;;  %v7296_v18 = vmul.f32 %v15854_v5, %v7225_v50  ;;  %v7294_v32 = vmul.f32 %v15854_v5, %v7223_v20  ;;  %v18309_v20 = vld [vmem:[#allocation113_spill] sm:$0xff] }
 0xa9a   :  { %7806 = vst [vmem:[%s16466_s10 + $0x68] sm:$0xff] %v7742_v54  ;;  %v7747_v38 = vmax.f32 %v7547_v4, 0.0  ;;  %v7539_v1 = vadd.f32 %v7538_v44, %v15977_v55  ;;  %v7229_v13 = vmul.f32 %v15849_v6, %v18303_v14  ;;  %v7299_v63 = vmul.f32 %v15854_v5, %v7228_v10  ;;  %v18308_v4 = vld [vmem:[#allocation175_spill] sm:$0xff] }
 0xa9b   :  { %v9570_v0 = vpop.f32.mrf.mxu0  ;;  %v7297_v42 = vmul.f32 %v15854_v5, %v7226_v8  ;;  %v16123_v48 = vadd.f32 %v15867_v62, %v7296_v18  ;;  %v16126_v53 = vadd.f32 %v15867_v62, %v7294_v32  ;;  %v7227_v26 = vmul.f32 %v15849_v6, %v18304_v60  ;;  %v18310_v32 = vld [vmem:[#allocation118_spill] sm:$0xff] }
 0xa9c   :  { %7811 = vst [vmem:[%s16466_s10 + $0x90] sm:$0xff] %v7747_v38  ;;  %v7745_v55 = vmax.f32 %v7539_v1, 0.0  ;;  %v7550_v58 = vadd.f32 %v9570_v0, %v15980_v17  ;;  %v7300_v19 = vmul.f32 %v15854_v5, %v7229_v13  ;;  %v16136_v37 = vadd.f32 %v15867_v62, %v7299_v63 }
 0xa9d   :  { %v7541_v56 = vpop.f32.mrf.mxu0  ;;  %v16139_v16 = vadd.f32 %v15867_v62, %v7297_v42  ;;  %v7298_v11 = vmul.f32 %v15854_v5, %v7227_v26  ;;  %v7232_v43 = vmul.f32 %v15849_v6, %v18305_v45  ;;  %v7230_v9 = vmul.f32 %v15849_v6, %v18306_v25  ;;  %v18312_v26 = vld [vmem:[#allocation32_spill] sm:$0xff]  ;;  %v18314_v45 = vld [vmem:[#allocation101_spill] sm:$0xff] }
 0xa9e   :  { %7809 = vst [vmem:[%s16466_s10 + $0x80] sm:$0xff] %v7745_v55  ;;  %v7748_v17 = vmax.f32 %v7550_v58, 0.0  ;;  %v7542_v36 = vadd.f32 %v7541_v56, %v15983_v41  ;;  %v16142_v22 = vadd.f32 %v15867_v62, %v7300_v19  ;;  %v7233_v54 = vmul.f32 %v15849_v6, %v18307_v3  ;;  %v18311_v19 = vld [vmem:[#allocation114_spill] sm:$0xff] }
 0xa9f   :  { %v9573_v2 = vpop.f32.mrf.mxu0  ;;  %v7231_v44 = vmul.f32 %v15849_v6, %v18308_v4  ;;  %v16158_v52 = vadd.f32 %v15867_v62, %v7298_v11  ;;  %v7303_v50 = vmul.f32 %v15854_v5, %v7232_v43  ;;  %v7301_v23 = vmul.f32 %v15854_v5, %v7230_v9  ;;  %v18315_v3 = vld [vmem:[#allocation94_spill] sm:$0xff] }
 0xaa0   :  { %7812 = vst [vmem:[%s16466_s10 + $0x98] sm:$0xff] %v7748_v17  ;;  %v7746_v41 = vmax.f32 %v7542_v36, 0.0  ;;  %v7563_v40 = vadd.f32 %v9573_v2, %v16015_v57  ;;  %v7236_v38 = vmul.f32 %v15849_v6, %v18309_v20  ;;  %v7304_v34 = vmul.f32 %v15854_v5, %v7233_v54  ;;  %v18313_v2 = vld [vmem:[#allocation177_spill] sm:$0xff] }
 0xaa1   :  { %v7554_v61 = vpop.f32.mrf.mxu0  ;;  %v7302_v10 = vmul.f32 %v15854_v5, %v7231_v44  ;;  %v16171_v8 = vadd.f32 %v15867_v62, %v7303_v50  ;;  %v16174_v0 = vadd.f32 %v15867_v62, %v7301_v23  ;;  %v7234_v14 = vmul.f32 %v15849_v6, %v18310_v32 }
 0xaa2   :  { %7810 = vst [vmem:[%s16466_s10 + $0x88] sm:$0xff] %v7746_v41  ;;  %v7751_v57 = vmax.f32 %v7563_v40, 0.0  ;;  %v7555_v1 = vadd.f32 %v7554_v61, %v16018_v35  ;;  %v7307_v18 = vmul.f32 %v15854_v5, %v7236_v38  ;;  %v16184_v55 = vadd.f32 %v15867_v62, %v7304_v34 }
 0xaa3   :  { %v9574_v7 = vpop.f32.mrf.mxu0  ;;  %v16187_v58 = vadd.f32 %v15867_v62, %v7302_v10  ;;  %v7305_v56 = vmul.f32 %v15854_v5, %v7234_v14  ;;  %v7237_v60 = vmul.f32 %v15849_v6, %v18311_v19  ;;  %v7235_v17 = vmul.f32 %v15849_v6, %v18312_v26 }
 0xaa4   :  { %7815 = vst [vmem:[%s16466_s10 + $0xb0] sm:$0xff] %v7751_v57  ;;  %v7749_v35 = vmax.f32 %v7555_v1, 0.0  ;;  %v7566_v13 = vadd.f32 %v9574_v7, %v16021_v59  ;;  %v16190_v42 = vadd.f32 %v15867_v62, %v7307_v18  ;;  %v7240_v11 = vmul.f32 %v15849_v6, %v18313_v2  ;;  %v18316_v57 = vld [vmem:[#allocation96_spill] sm:$0xff] }
 0xaa5   :  { %v7557_v63 = vpop.f32.mrf.mxu0  ;;  %v7238_v43 = vmul.f32 %v15849_v6, %v18314_v45  ;;  %v16206_v9 = vadd.f32 %v15867_v62, %v7305_v56  ;;  %v7308_v41 = vmul.f32 %v15854_v5, %v7237_v60  ;;  %v7306_v40 = vmul.f32 %v15854_v5, %v7235_v17  ;;  %v18319_v60 = vld [vmem:[#allocation102_spill] sm:$0xff]  ;;  %v18320_v17 = vld [vmem:[#allocation91_spill] sm:$0xff] }
 0xaa6   :  { %7813 = vst [vmem:[%s16466_s10 + $0xa0] sm:$0xff] %v7749_v35  ;;  %v7752_v59 = vmax.f32 %v7566_v13, 0.0  ;;  %v7558_v36 = vadd.f32 %v7557_v63, %v16031_v24  ;;  %v7241_v54 = vmul.f32 %v15849_v6, %v18315_v3  ;;  %v7311_v44 = vmul.f32 %v15854_v5, %v7240_v11  ;;  %v18317_v35 = vld [vmem:[#allocation13_spill] sm:$0xff]  ;;  %v18318_v63 = vld [vmem:[#allocation99_spill] sm:$0xff] }
 0xaa7   :  { %v9577_v25 = vpop.f32.mrf.mxu0  ;;  %v7309_v61 = vmul.f32 %v15854_v5, %v7238_v43  ;;  %v16219_v23 = vadd.f32 %v15867_v62, %v7308_v41  ;;  %v16222_v20 = vadd.f32 %v15867_v62, %v7306_v40  ;;  %v7239_v1 = vmul.f32 %v15849_v6, %v18316_v57  ;;  %v18321_v43 = vld [vmem:[#allocation59_spill] sm:$0xff] }
 0xaa8   :  { %7816 = vst [vmem:[%s16466_s10 + $0xb8] sm:$0xff] %v7752_v59  ;;  %v7750_v24 = vmax.f32 %v7558_v36, 0.0  ;;  %v7579_v4 = vadd.f32 %v9577_v25, %v16034_v29  ;;  %v7312_v38 = vmul.f32 %v15854_v5, %v7241_v54  ;;  %v16232_v10 = vadd.f32 %v15867_v62, %v7311_v44 }
 0xaa9   :  { %v7570_v50 = vpop.f32.mrf.mxu0  ;;  %v16235_v7 = vadd.f32 %v15867_v62, %v7309_v61  ;;  %v7310_v14 = vmul.f32 %v15854_v5, %v7239_v1  ;;  %v7244_v13 = vmul.f32 %v15849_v6, %v18317_v35  ;;  %v7242_v56 = vmul.f32 %v15849_v6, %v18318_v63  ;;  %v18322_v61 = vld [vmem:[#allocation176_spill] sm:$0xff] }
 0xaaa   :  { %7814 = vst [vmem:[%s16466_s10 + $0xa8] sm:$0xff] %v7750_v24  ;;  %v7755_v29 = vmax.f32 %v7579_v4, 0.0  ;;  %v7571_v34 = vadd.f32 %v7570_v50, %v16037_v33  ;;  %v16238_v32 = vadd.f32 %v15867_v62, %v7312_v38  ;;  %v7245_v26 = vmul.f32 %v15849_v6, %v18319_v60 }
 0xaab   :  { %v9578_v18 = vpop.f32.mrf.mxu0  ;;  %v7243_v59 = vmul.f32 %v15849_v6, %v18320_v17  ;;  %v16254_v2 = vadd.f32 %v15867_v62, %v7310_v14  ;;  %v7315_v11 = vmul.f32 %v15854_v5, %v7244_v13  ;;  %v7313_v45 = vmul.f32 %v15854_v5, %v7242_v56  ;;  %v18323_v14 = vld [vmem:[#allocation105_spill] sm:$0xff]  ;;  %v18324_v13 = vld [vmem:[#allocation90_spill] sm:$0xff] }
 0xaac   :  { %7819 = vst [vmem:[%s16466_s10 + $0xd0] sm:$0xff] %v7755_v29  ;;  %v7753_v33 = vmax.f32 %v7571_v34, 0.0  ;;  %v7582_v19 = vadd.f32 %v9578_v18, %v16040_v27  ;;  %v7248_v25 = vmul.f32 %v15849_v6, %v18321_v43  ;;  %v7316_v40 = vmul.f32 %v15854_v5, %v7245_v26 }
 0xaad   :  { %v7573_v36 = vpop.f32.mrf.mxu0  ;;  %v7314_v3 = vmul.f32 %v15854_v5, %v7243_v59  ;;  %v16267_v24 = vadd.f32 %v15867_v62, %v7315_v11  ;;  %v16270_v4 = vadd.f32 %v15867_v62, %v7313_v45  ;;  %v7246_v50 = vmul.f32 %v15849_v6, %v18322_v61 }
 0xaae   :  { %7817 = vst [vmem:[%s16466_s10 + $0xc0] sm:$0xff] %v7753_v33  ;;  %v7756_v27 = vmax.f32 %v7582_v19, 0.0  ;;  %v7574_v41 = vadd.f32 %v7573_v36, %v16043_v51  ;;  %v7319_v44 = vmul.f32 %v15854_v5, %v7248_v25  ;;  %v16280_v57 = vadd.f32 %v15867_v62, %v7316_v40 }
 0xaaf   :  { %v9581_v54 = vpop.f32.mrf.mxu0  ;;  %v16283_v1 = vadd.f32 %v15867_v62, %v7314_v3  ;;  %v7317_v18 = vmul.f32 %v15854_v5, %v7246_v50  ;;  %v7249_v35 = vmul.f32 %v15849_v6, %v18323_v14  ;;  %v7247_v63 = vmul.f32 %v15849_v6, %v18324_v13 }
 0xab0   :  { %7820 = vst [vmem:[%s16466_s10 + $0xd8] sm:$0xff] %v7756_v27  ;;  %v7754_v51 = vmax.f32 %v7574_v41, 0.0  ;;  %v7595_v38 = vadd.f32 %v9581_v54, %v16056_v39  ;;  %v16286_v34 = vadd.f32 %v15867_v62, %v7319_v44  ;;  %v7359_v33 = vadd.f32 %v15867_v62, %v16046_v46 }
 0xab1   :  { %v7586_v29 = vpop.f32.mrf.mxu0  ;;  %v7291_v19 = vmul.f32 %v15854_v5, %v16074_v49  ;;  %v16302_v26 = vadd.f32 %v15867_v62, %v7317_v18  ;;  %v7320_v17 = vmul.f32 %v15854_v5, %v7249_v35  ;;  %v7318_v6 = vmul.f32 %v15854_v5, %v7247_v63 }
 0xab2   :  { %7818 = vst [vmem:[%s16466_s10 + $0xc8] sm:$0xff] %v7754_v51  ;;  %v7759_v39 = vmax.f32 %v7595_v38, 0.0  ;;  %v7587_v56 = vadd.f32 %v7586_v29, %v16059_v30  ;;  %v7357_v46 = vadd.f32 %v15867_v62, %v16062_v21  ;;  %v7289_v49 = vmul.f32 %v15854_v5, %v16078_v31 }
 0xab3   :  { %v9582_v60 = vpop.f32.mrf.mxu0  ;;  %v16314_v11 = vadd.f32 %v15867_v62, %v7320_v17  ;;  %v16317_v45 = vadd.f32 %v15867_v62, %v7318_v6  ;;  %v7362_v27 = vadd.f32 %v15867_v62, %v7291_v19 }
 0xab4   :  { %7823 = vst [vmem:[%s16466_s10 + $0xf0] sm:$0xff] %v7759_v39  ;;  %v7757_v59 = vmax.f32 %v7587_v56, 0.0  ;;  %v7598_v30 = vadd.f32 %v9582_v60, %v7359_v33  ;;  %v7360_v31 = vadd.f32 %v15867_v62, %v7289_v49 }
 0xab5   :  { %v7589_v36 = vpop.f32.mrf.mxu0 }
 0xab6   :  { %7821 = vst [vmem:[%s16466_s10 + $0xe0] sm:$0xff] %v7757_v59  ;;  %v7760_v43 = vmax.f32 %v7598_v30, 0.0  ;;  %v7590_v25 = vadd.f32 %v7589_v36, %v7357_v46 }
 0xab7   :  { %v9585_v41 = vpop.f32.mrf.mxu0 }
 0xab8   :  { %7824 = vst [vmem:[%s16466_s10 + $0xf8] sm:$0xff] %v7760_v43  ;;  %v7758_v5 = vmax.f32 %v7590_v25, 0.0  ;;  %v7611_v21 = vadd.f32 %v9585_v41, %v7362_v27 }
 0xab9   :  { %v7602_v40 = vpop.f32.mrf.mxu0 }
 0xaba   :  { %7822 = vst [vmem:[%s16466_s10 + $0xe8] sm:$0xff] %v7758_v5  ;;  %v7763_v3 = vmax.f32 %v7611_v21, 0.0  ;;  %v7603_v54 = vadd.f32 %v7602_v40, %v7360_v31 }
 0xabb   :  { %v9586_v44 = vpop.f32.mrf.mxu0 }
 0xabc   :  { %7827 = vst [vmem:[%s16466_s10 + $0x110] sm:$0xff] %v7763_v3  ;;  %v7761_v61 = vmax.f32 %v7603_v54, 0.0  ;;  %v7614_v50 = vadd.f32 %v9586_v44, %v16088_v28 }
 0xabd   :  { %v7605_v51 = vpop.f32.mrf.mxu0 }
 0xabe   :  { %7825 = vst [vmem:[%s16466_s10 + $0x100] sm:$0xff] %v7761_v61  ;;  %v7764_v62 = vmax.f32 %v7614_v50, 0.0  ;;  %v7606_v38 = vadd.f32 %v7605_v51, %v16091_v47 }
 0xabf   :  { %v9589_v29 = vpop.f32.mrf.mxu0 }
 0xac0   :  { %7828 = vst [vmem:[%s16466_s10 + $0x118] sm:$0xff] %v7764_v62  ;;  %v7762_v18 = vmax.f32 %v7606_v38, 0.0  ;;  %v7627_v14 = vadd.f32 %v9589_v29, %v16094_v12 }
 0xac1   :  { %v7618_v35 = vpop.f32.mrf.mxu0 }
 0xac2   :  { %7826 = vst [vmem:[%s16466_s10 + $0x108] sm:$0xff] %v7762_v18  ;;  %v7767_v28 = vmax.f32 %v7627_v14, 0.0  ;;  %v7619_v13 = vadd.f32 %v7618_v35, %v16110_v15 }
 0xac3   :  { %v9590_v63 = vpop.f32.mrf.mxu0 }
 0xac4   :  { %7831 = vst [vmem:[%s16466_s10 + $0x130] sm:$0xff] %v7767_v28  ;;  %v7765_v47 = vmax.f32 %v7619_v13, 0.0  ;;  %v7630_v39 = vadd.f32 %v9590_v63, %v16123_v48 }
 0xac5   :  { %v7621_v56 = vpop.f32.mrf.mxu0 }
 0xac6   :  { %7829 = vst [vmem:[%s16466_s10 + $0x120] sm:$0xff] %v7765_v47  ;;  %v7768_v12 = vmax.f32 %v7630_v39, 0.0  ;;  %v7622_v33 = vadd.f32 %v7621_v56, %v16126_v53 }
 0xac7   :  { %v9593_v19 = vpop.f32.mrf.mxu0 }
 0xac8   :  { %7832 = vst [vmem:[%s16466_s10 + $0x138] sm:$0xff] %v7768_v12  ;;  %v7766_v15 = vmax.f32 %v7622_v33, 0.0  ;;  %v7643_v60 = vadd.f32 %v9593_v19, %v16136_v37 }
 0xac9   :  { %v7634_v17 = vpop.f32.mrf.mxu0 }
 0xaca   :  { %7830 = vst [vmem:[%s16466_s10 + $0x128] sm:$0xff] %v7766_v15  ;;  %v7771_v48 = vmax.f32 %v7643_v60, 0.0  ;;  %v7635_v6 = vadd.f32 %v7634_v17, %v16139_v16 }
 0xacb   :  { %v9594_v59 = vpop.f32.mrf.mxu0 }
 0xacc   :  { %7835 = vst [vmem:[%s16466_s10 + $0x150] sm:$0xff] %v7771_v48  ;;  %v7769_v53 = vmax.f32 %v7635_v6, 0.0  ;;  %v7646_v30 = vadd.f32 %v9594_v59, %v16142_v22 }
 0xacd   :  { %v7637_v46 = vpop.f32.mrf.mxu0 }
 0xace   :  { %7833 = vst [vmem:[%s16466_s10 + $0x140] sm:$0xff] %v7769_v53  ;;  %v7772_v37 = vmax.f32 %v7646_v30, 0.0  ;;  %v7638_v49 = vadd.f32 %v7637_v46, %v16158_v52 }
 0xacf   :  { %v9597_v36 = vpop.f32.mrf.mxu0 }
 0xad0   :  { %7836 = vst [vmem:[%s16466_s10 + $0x158] sm:$0xff] %v7772_v37  ;;  %v7770_v16 = vmax.f32 %v7638_v49, 0.0  ;;  %v7659_v43 = vadd.f32 %v9597_v36, %v16171_v8 }
 0xad1   :  { %v7650_v25 = vpop.f32.mrf.mxu0 }
 0xad2   :  { %7834 = vst [vmem:[%s16466_s10 + $0x148] sm:$0xff] %v7770_v16  ;;  %v7775_v22 = vmax.f32 %v7659_v43, 0.0  ;;  %v7651_v27 = vadd.f32 %v7650_v25, %v16174_v0 }
 0xad3   :  { %v9598_v41 = vpop.f32.mrf.mxu0 }
 0xad4   :  { %7839 = vst [vmem:[%s16466_s10 + $0x170] sm:$0xff] %v7775_v22  ;;  %v7773_v52 = vmax.f32 %v7651_v27, 0.0  ;;  %v7662_v5 = vadd.f32 %v9598_v41, %v16184_v55 }
 0xad5   :  { %v7653_v21 = vpop.f32.mrf.mxu0 }
 0xad6   :  { %7837 = vst [vmem:[%s16466_s10 + $0x160] sm:$0xff] %v7773_v52  ;;  %v7776_v8 = vmax.f32 %v7662_v5, 0.0  ;;  %v7654_v31 = vadd.f32 %v7653_v21, %v16187_v58 }
 0xad7   :  { %v9601_v40 = vpop.f32.mrf.mxu0 }
 0xad8   :  { %7840 = vst [vmem:[%s16466_s10 + $0x178] sm:$0xff] %v7776_v8  ;;  %v7774_v0 = vmax.f32 %v7654_v31, 0.0  ;;  %v7675_v3 = vadd.f32 %v9601_v40, %v16190_v42 }
 0xad9   :  { %v7666_v54 = vpop.f32.mrf.mxu0 }
 0xada   :  { %7838 = vst [vmem:[%s16466_s10 + $0x168] sm:$0xff] %v7774_v0  ;;  %v7779_v55 = vmax.f32 %v7675_v3, 0.0  ;;  %v7667_v44 = vadd.f32 %v7666_v54, %v16206_v9 }
 0xadb   :  { %v9602_v61 = vpop.f32.mrf.mxu0 }
 0xadc   :  { %7843 = vst [vmem:[%s16466_s10 + $0x190] sm:$0xff] %v7779_v55  ;;  %v7777_v58 = vmax.f32 %v7667_v44, 0.0  ;;  %v7678_v50 = vadd.f32 %v9602_v61, %v16219_v23 }
 0xadd   :  { %v7669_v51 = vpop.f32.mrf.mxu0 }
 0xade   :  { %7841 = vst [vmem:[%s16466_s10 + $0x180] sm:$0xff] %v7777_v58  ;;  %v7780_v42 = vmax.f32 %v7678_v50, 0.0  ;;  %v7670_v62 = vadd.f32 %v7669_v51, %v16222_v20 }
 0xadf   :  { %v9605_v38 = vpop.f32.mrf.mxu0 }
 0xae0   :  { %7844 = vst [vmem:[%s16466_s10 + $0x198] sm:$0xff] %v7780_v42  ;;  %v7778_v9 = vmax.f32 %v7670_v62, 0.0  ;;  %v7691_v29 = vadd.f32 %v9605_v38, %v16232_v10 }
 0xae1   :  { %v7682_v18 = vpop.f32.mrf.mxu0 }
 0xae2   :  { %7842 = vst [vmem:[%s16466_s10 + $0x188] sm:$0xff] %v7778_v9  ;;  %v7783_v23 = vmax.f32 %v7691_v29, 0.0  ;;  %v7683_v14 = vadd.f32 %v7682_v18, %v16235_v7 }
 0xae3   :  { %v9606_v35 = vpop.f32.mrf.mxu0 }
 0xae4   :  { %7847 = vst [vmem:[%s16466_s10 + $0x1b0] sm:$0xff] %v7783_v23  ;;  %v7781_v20 = vmax.f32 %v7683_v14, 0.0  ;;  %v7694_v28 = vadd.f32 %v9606_v35, %v16238_v32 }
 0xae5   :  { %v7685_v13 = vpop.f32.mrf.mxu0 }
 0xae6   :  { %7845 = vst [vmem:[%s16466_s10 + $0x1a0] sm:$0xff] %v7781_v20  ;;  %v7784_v10 = vmax.f32 %v7694_v28, 0.0  ;;  %v7686_v63 = vadd.f32 %v7685_v13, %v16254_v2 }
 0xae7   :  { %v9609_v47 = vpop.f32.mrf.mxu0 }
 0xae8   :  { %7848 = vst [vmem:[%s16466_s10 + $0x1b8] sm:$0xff] %v7784_v10  ;;  %v7782_v7 = vmax.f32 %v7686_v63, 0.0  ;;  %v7707_v39 = vadd.f32 %v9609_v47, %v16267_v24 }
 0xae9   :  { %v7698_v56 = vpop.f32.mrf.mxu0 }
 0xaea   :  { %7846 = vst [vmem:[%s16466_s10 + $0x1a8] sm:$0xff] %v7782_v7  ;;  %v7787_v32 = vmax.f32 %v7707_v39, 0.0  ;;  %v7699_v12 = vadd.f32 %v7698_v56, %v16270_v4 }
 0xaeb   :  { %v9610_v33 = vpop.f32.mrf.mxu0 }
 0xaec   :  { %7851 = vst [vmem:[%s16466_s10 + $0x1d0] sm:$0xff] %v7787_v32  ;;  %v7785_v2 = vmax.f32 %v7699_v12, 0.0  ;;  %v7710_v19 = vadd.f32 %v9610_v33, %v16280_v57 }
 0xaed   :  { %v7701_v15 = vpop.f32.mrf.mxu0 }
 0xaee   :  { %7849 = vst [vmem:[%s16466_s10 + $0x1c0] sm:$0xff] %v7785_v2  ;;  %v7788_v24 = vmax.f32 %v7710_v19, 0.0  ;;  %v7702_v60 = vadd.f32 %v7701_v15, %v16283_v1 }
 0xaef   :  { %v9613_v17 = vpop.f32.mrf.mxu0 }
 0xaf0   :  { %7852 = vst [vmem:[%s16466_s10 + $0x1d8] sm:$0xff] %v7788_v24  ;;  %v7786_v4 = vmax.f32 %v7702_v60, 0.0  ;;  %v7723_v48 = vadd.f32 %v9613_v17, %v16286_v34 }
 0xaf1   :  { %v7714_v6 = vpop.f32.mrf.mxu0 }
 0xaf2   :  { %7850 = vst [vmem:[%s16466_s10 + $0x1c8] sm:$0xff] %v7786_v4  ;;  %v7791_v57 = vmax.f32 %v7723_v48, 0.0  ;;  %v7715_v59 = vadd.f32 %v7714_v6, %v16302_v26 }
 0xaf3   :  { %v9614_v53 = vpop.f32.mrf.mxu0 }
 0xaf4   :  { %7855 = vst [vmem:[%s16466_s10 + $0x1f0] sm:$0xff] %v7791_v57  ;;  %v7789_v1 = vmax.f32 %v7715_v59, 0.0  ;;  %v7726_v30 = vadd.f32 %v9614_v53, %v16314_v11 }
 0xaf5   :  { %v7717_v46 = vpop.f32.mrf.mxu0 }
 0xaf6   :  { %7853 = vst [vmem:[%s16466_s10 + $0x1e0] sm:$0xff] %v7789_v1  ;;  %v7792_v34 = vmax.f32 %v7726_v30, 0.0  ;;  %v7718_v37 = vadd.f32 %v7717_v46, %v16317_v45 }
 0xaf8   :  { %7856 = vst [vmem:[%s16466_s10 + $0x1f8] sm:$0xff] %v7792_v34  ;;  %v7790_v26 = vmax.f32 %v7718_v37, 0.0 }
 0xafa   :  { %7854 = vst [vmem:[%s16466_s10 + $0x1e8] sm:$0xff] %v7790_v26 }

</bundles_post_ra>
